<compile_context>
chip_gen: v6e
topology: v6e:2x2x1
jax: 0.10.0
libtpu: 0.0.40
codegen_flags: <defaults>
</compile_context>

<pallas_src>
import math
import functools

import numpy as np
import jax
import jax.numpy as jnp
from jax.experimental import pallas as pl
from jax.experimental.pallas import tpu as pltpu


# ---------------------------------------------------------------------------
# Default config (mirrors AcRKNContextLayer.get_default_config()).
# ---------------------------------------------------------------------------
CONFIG = dict(
    num_basis=15,
    bandwidth=3,
    trans_net_hidden_units=[120],              # coefficient net hidden (Tanh)
    control_net_hidden_units=[120, 120, 120],  # control net hiddens (ReLU)
    process_noise_hidden_units=[30],           # process noise net hidden (ReLU)
    initial_state_covar=10.0,
)


# ---------------------------------------------------------------------------
# Pallas kernel: one grid step == one chunk of `tt` time steps of the recurrence.
# All per-chunk tensors are lane-flattened 2D blocks: (bb, tt*D).
# ---------------------------------------------------------------------------
def _acrkn_context_kernel(
    # per-(batch,time)-chunk inputs
    obs_ref, var_ref, valid_ref, ctrl_ref,
    # per-batch-chunk constants
    init_mean_ref, init_cov_ref, noise_ref,
    # coefficient net + fused basis + fused block-diagonal selector
    cw1_ref, cb1_ref, cw2_ref, cb2_ref, bcat_ref, sel_ref,
    # output slab (bb, tt * 10*lod)
    out_ref,
    # scratch: recurrent belief state carried across time chunks
    pm_s, cov_s,
    *, lod, tt):
    lsd = 2 * lod
    LL = lod * lod
    slab_w = 10 * lod
    t = pl.program_id(1)

    @pl.when(t == 0)
    def _():
        pm_s[...] = init_mean_ref[...]
        cov_s[...] = init_cov_ref[...]

    bf16 = jnp.bfloat16
    f32 = jnp.float32

    # Constants loaded once per grid step, reused by every unrolled time step.
    cw1 = cw1_ref[...]        # (lsd, Ht)   bf16
    cb1 = cb1_ref[...]        # (1, Ht)     f32  (implicit sublane broadcast on add)
    cw2 = cw2_ref[...]        # (Ht, K)     bf16
    cb2 = cb2_ref[...]        # (1, K)      f32
    bcat = bcat_ref[...]      # (K, 4*LL)   bf16  [b11|b12|b21|b22]
    sel = sel_ref[...]        # (5*LL, 5*lod) f32 block-diagonal group-sum selector
    noise = noise_ref[...]    # (bb, 3*lod) f32   [nz_u | nz_l | 0]

    # Recurrent state for this chunk lives in registers across the unrolled loop.
    pm = pm_s[...]            # (bb, lsd)   prior mean [upper|lower]
    cov = cov_s[...]          # (bb, 3*lod) prior cov  [cu|cl|cs]

    for i in range(tt):                              # static unroll (tt kept moderate)
        obs = obs_ref[:, i * lod:(i + 1) * lod]      # (bb, lod)
        ov = var_ref[:, i * lod:(i + 1) * lod]       # (bb, lod)
        vmask = valid_ref[:, i * lod:(i + 1) * lod]  # (bb, lod) 0/1 float
        ctrl = ctrl_ref[:, i * lsd:(i + 1) * lsd]    # (bb, lsd) precomputed control net

        cu = cov[:, 0 * lod:1 * lod]
        cl = cov[:, 1 * lod:2 * lod]
        cs = cov[:, 2 * lod:3 * lod]

        # ---------------- Update (factorized Kalman update) ----------------
        inv = pl.reciprocal(cu + ov, approx=True)
        q_u = cu * inv
        q_l = cs * inv
        res = obs - pm[:, :lod]
        d_mean = jnp.concatenate([q_u * res, q_l * res], axis=-1)       # (bb, lsd)
        d_cov = jnp.concatenate([q_u * cu, q_l * cs, q_u * cs], axis=-1)  # (bb, 3*lod)
        post_mean = pm + jnp.tile(vmask, (1, 2)) * d_mean
        post_cov = cov - jnp.tile(vmask, (1, 3)) * d_cov

        # ---------------- Predict (locally-linear transition model) --------
        # coefficient net -> softmax mixture weights over basis matrices
        h = jnp.tanh(jnp.dot(post_mean.astype(bf16), cw1,
                             preferred_element_type=f32) + cb1)
        logits = jnp.dot(h.astype(bf16), cw2, preferred_element_type=f32) + cb2
        logits = logits - jnp.max(logits, axis=-1, keepdims=True)
        e = jnp.exp(logits)
        coeff = e * pl.reciprocal(jnp.sum(e, axis=-1, keepdims=True), approx=True)

        # one MXU issue for all four mixed transition blocks (row-major flattened)
        tm = jnp.dot(coeff.astype(bf16), bcat, preferred_element_type=f32)  # (bb, 4*LL)
        tm11 = tm[:, 0 * LL:1 * LL]
        tm12 = tm[:, 1 * LL:2 * LL]
        tm21 = tm[:, 2 * LL:3 * LL]
        tm22 = tm[:, 3 * LL:4 * LL]

        # lane replication (column i*lod + j holds v[j]) — VPU/XLU, no MXU
        mu_rep = jnp.tile(post_mean[:, :lod], (1, lod))
        ml_rep = jnp.tile(post_mean[:, lod:], (1, lod))
        cu_rep = jnp.tile(post_cov[:, 0 * lod:1 * lod], (1, lod))
        cl_rep = jnp.tile(post_cov[:, 1 * lod:2 * lod], (1, lod))
        cs_rep = jnp.tile(post_cov[:, 2 * lod:3 * lod], (1, lod))

        # all five group-sum reductions (mean mat-vec + diag(A Sigma A^T)) fused
        # into one matmul against the block-diagonal selector (f32 for cov safety)
        pre = jnp.concatenate([
            tm11 * mu_rep + tm12 * ml_rep,
            tm21 * mu_rep + tm22 * ml_rep,
            tm11 * tm11 * cu_rep + 2.0 * (tm11 * tm12) * cs_rep + tm12 * tm12 * cl_rep,
            tm21 * tm21 * cu_rep + 2.0 * (tm21 * tm22) * cs_rep + tm22 * tm22 * cl_rep,
            tm21 * tm11 * cu_rep + (tm22 * tm11 + tm21 * tm12) * cs_rep
            + tm22 * tm12 * cl_rep,
        ], axis=-1)                                               # (bb, 5*LL)
        red = jnp.dot(pre, sel, preferred_element_type=f32)       # (bb, 5*lod)

        next_mean = red[:, :lsd] + ctrl                           # (bb, lsd)
        next_cov = red[:, lsd:] + noise                           # (bb, 3*lod)

        # one wide lane-dense store per time step
        out_ref[:, i * slab_w:(i + 1) * slab_w] = jnp.concatenate(
            [post_mean, post_cov, next_mean, next_cov], axis=-1)

        pm, cov = next_mean, next_cov

    # carry belief state to the next time chunk
    pm_s[...] = pm
    cov_s[...] = cov


# ---------------------------------------------------------------------------
# Wrapper (PyTorch-equivalent signature, batch-major I/O, no transposes)
# ---------------------------------------------------------------------------
def acrkn_context_forward(params, latent_obs, obs_vars, action, latent_task,
                          initial_mean, initial_cov, obs_valid=None,
                          time_chunk=8, batch_chunks=1):
    p = params
    f32 = jnp.float32
    bf16 = jnp.bfloat16
    B, T, lod = latent_obs.shape
    lsd = 2 * lod
    LL = lod * lod

    # ---- time chunking: round tt to a lane-aligned granule, pad T up ------
    tt = max(1, int(time_chunk))
    if tt < T:
        step = 128 // math.gcd(lod, 128)   # smallest granule with tt*lod % 128 == 0
        tt = ((tt + step - 1) // step) * step
    if tt >= T:
        tt, Tp = T, T
    else:
        Tp = ((T + tt - 1) // tt) * tt
    tc = Tp // tt

    # ---- batch chunking (v7x megacore: use a multiple of 2; v5e/v6e: 1) ----
    nb = max(1, int(batch_chunks))
    if nb > 1:
        assert B % nb == 0, "batch_chunks must divide B"
        bb = B // nb
        assert bb % 8 == 0, "per-chunk batch must be a multiple of 8 (sublane align)"
    else:
        bb = B

    obs = latent_obs.astype(f32)
    var = obs_vars.astype(f32)
    act = action.astype(f32)
    task = latent_task.astype(f32)
    if obs_valid is None:
        valid = jnp.ones((B, T, lod), f32)
    else:
        valid = jnp.broadcast_to(obs_valid.astype(f32)[..., None], (B, T, lod))

    # ---- hoisted state-independent sub-networks (big batched matmuls) ------
    with jax.default_matmul_precision("highest"):
        u = jax.nn.relu(act @ p['uw1a'] + (task @ p['uw1b'])[:, None, :] + p['ub1'])
        u = jax.nn.relu(u @ p['uw2'] + p['ub2'])
        u = jax.nn.relu(u @ p['uw3'] + p['ub3'])
        ctrl = (u @ p['uw4'] + p['ub4']).astype(f32)                # (B, T, lsd)
        pn = jax.nn.relu(task @ p['pw1'] + p['pb1']) @ p['pw2'] + p['pb2']
    noise = jnp.where(pn < 0.0, jnp.exp(pn), pn + 1.0).astype(f32)  # elu+1, (B, lsd)
    noise_pad = jnp.concatenate([noise, jnp.zeros((B, lod), f32)], axis=-1)  # (B, 3*lod)

    # ---- pad along T, then flatten to lane-dense (B, T*D) (free reshapes) --
    def pad_t(x, fill):
        if Tp == T:
            return x
        pad = jnp.full((B, Tp - T) + x.shape[2:], fill, x.dtype)
        return jnp.concatenate([x, pad], axis=1)

    obs_f = pad_t(obs, 0.0).reshape(B, Tp * lod)
    var_f = pad_t(var, 1.0).reshape(B, Tp * lod)
    valid_f = pad_t(valid, 0.0).reshape(B, Tp * lod)
    ctrl_f = pad_t(ctrl, 0.0).reshape(B, Tp * lsd)

    init_mean = initial_mean.astype(f32)                                      # (B, lsd)
    init_cov = jnp.concatenate([c.astype(f32) for c in initial_cov], axis=-1)  # (B, 3*lod)

    # ---- constants: bf16 matmul weights, fused basis, fused selector -------
    cw1 = p['cw1'].astype(bf16)
    cb1 = p['cb1'].astype(f32)
    cw2 = p['cw2'].astype(bf16)
    cb2 = p['cb2'].astype(f32)
    bcat = jnp.concatenate([p['b11'], p['b12'], p['b21'], p['b22']],
                           axis=-1).astype(bf16)                    # (K, 4*LL)
    sel_base = np.repeat(np.eye(lod, dtype=np.float32), lod, axis=0)          # (LL, lod)
    sel5 = jnp.asarray(np.kron(np.eye(5, dtype=np.float32), sel_base))        # (5*LL, 5*lod)
    consts = [cw1, cb1, cw2, cb2, bcat, sel5]

    def tmap(b, t):
        return (b, t)

    def bmap(b, t):
        return (b, 0)

    def cmap(b, t):
        return (0, 0)

    in_specs = [
        pl.BlockSpec((bb, tt * lod), tmap),       # latent obs
        pl.BlockSpec((bb, tt * lod), tmap),       # obs vars
        pl.BlockSpec((bb, tt * lod), tmap),       # obs_valid (lane-broadcast mask)
        pl.BlockSpec((bb, tt * lsd), tmap),       # precomputed control
        pl.BlockSpec((bb, lsd), bmap),            # initial mean
        pl.BlockSpec((bb, 3 * lod), bmap),        # initial covariance (cat)
        pl.BlockSpec((bb, 3 * lod), bmap),        # process noise (+ zero cs slots)
    ] + [pl.BlockSpec(tuple(int(d) for d in c.shape), cmap) for c in consts]

    slab_w = 10 * lod
    kernel = functools.partial(_acrkn_context_kernel, lod=lod, tt=tt)
    out = pl.pallas_call(
        kernel,
        out_shape=jax.ShapeDtypeStruct((B, Tp * slab_w), f32),
        grid_spec=pltpu.PrefetchScalarGridSpec(
            num_scalar_prefetch=0,
            grid=(nb, tc),                    # batch outer (parallel), time inner (serial)
            in_specs=in_specs,
            out_specs=pl.BlockSpec((bb, tt * slab_w), tmap),
            scratch_shapes=[pltpu.VMEM((bb, lsd), f32),
                            pltpu.VMEM((bb, 3 * lod), f32)]),
        compiler_params=pltpu.CompilerParams(
            dimension_semantics=("parallel", "arbitrary")),
    )(obs_f, var_f, valid_f, ctrl_f, init_mean, init_cov, noise_pad, *consts)

    # split the lane-dense output slab back into the module's outputs
    out = out.reshape(B, Tp, slab_w)[:, :T]
    post_means = out[..., 0:lsd]
    post_covs = [out[..., lsd + j * lod: lsd + (j + 1) * lod] for j in range(3)]
    prior_means = out[..., 5 * lod:7 * lod]
    prior_covs = [out[..., 7 * lod + j * lod: 7 * lod + (j + 1) * lod] for j in range(3)]
    return post_means, post_covs, prior_means, prior_covs


# ---------------------------------------------------------------------------
# Deterministic parameter construction (synthetic init, no checkpoint load).
# ---------------------------------------------------------------------------
def init_params(key, lod, lad, ltd, cfg):
    lsd = 2 * lod
    K = cfg['num_basis']
    bw = cfg['bandwidth']
    Ht = cfg['trans_net_hidden_units'][0]
    Hc = cfg['control_net_hidden_units']
    Hp = cfg['process_noise_hidden_units'][0]

    keys = iter(jax.random.split(key, 24))

    def dense_init(fan_in, fan_out):
        w = jax.random.normal(next(keys), (fan_in, fan_out), jnp.float32) / np.sqrt(fan_in)
        b = 0.01 * jax.random.normal(next(keys), (1, fan_out), jnp.float32)
        return w, b

    params = {}
    # coefficient net
    params['cw1'], params['cb1'] = dense_init(lsd, Ht)
    params['cw2'], params['cb2'] = dense_init(Ht, K)
    # control net (first weight split between action and latent_task inputs)
    uw1, params['ub1'] = dense_init(lad + ltd, Hc[0])
    params['uw1a'], params['uw1b'] = uw1[:lad], uw1[lad:]
    params['uw2'], params['ub2'] = dense_init(Hc[0], Hc[1])
    params['uw3'], params['ub3'] = dense_init(Hc[1], Hc[2])
    params['uw4'], params['ub4'] = dense_init(Hc[2], lsd)
    # process noise net
    params['pw1'], params['pb1'] = dense_init(ltd, Hp)
    params['pw2'], params['pb2'] = dense_init(Hp, lsd)

    # banded basis matrices for the locally-linear transition model
    band = np.triu(np.ones((lod, lod), np.float32), -bw) * \
        np.tril(np.ones((lod, lod), np.float32), bw)
    band = jnp.asarray(band)
    eye = jnp.eye(lod, dtype=jnp.float32)

    def basis(scale=0.05):
        return scale * jax.random.normal(next(keys), (K, lod, lod), jnp.float32) * band[None]

    # softmax coefficients sum to one -> identity / sign folded into the basis
    b11 = basis() + eye[None]
    b12 = basis()
    b21 = -basis()
    b22 = basis() + eye[None]
    params['b11'] = b11.reshape(K, lod * lod)
    params['b12'] = b12.reshape(K, lod * lod)
    params['b21'] = b21.reshape(K, lod * lod)
    params['b22'] = b22.reshape(K, lod * lod)
    return params


# ---------------------------------------------------------------------------
# Pure-JAX reference (mirrors the PyTorch AcRKNContextLayer.forward semantics).
# ---------------------------------------------------------------------------
def acrkn_context_reference(params, latent_obs, obs_vars, action, latent_task,
                            initial_mean, initial_cov, obs_valid=None):
    p = params
    B, T, lod = latent_obs.shape

    def dense(x, w, b):
        return x @ w + b

    def mix(basis_flat, coeff):
        return (coeff @ basis_flat).reshape(B, lod, lod)

    bmv = lambda A, v: jnp.einsum('bij,bj->bi', A, v)
    dadat = lambda A, d: jnp.einsum('bij,bj->bi', A * A, d)
    dadbt = lambda A, d, Bm: jnp.einsum('bij,bj->bi', A * Bm, d)

    prior_mean = initial_mean
    cu, cl, cs = initial_cov
    post_mean_list, prior_mean_list = [], []
    post_cov_list = [[], [], []]
    prior_cov_list = [[], [], []]

    with jax.default_matmul_precision("highest"):
        for i in range(T):
            obs, ov, act = latent_obs[:, i], obs_vars[:, i], action[:, i]
            # Update
            denom = cu + ov
            q_u, q_l = cu / denom, cs / denom
            res = obs - prior_mean[:, :lod]
            post_mean = prior_mean + jnp.concatenate([q_u * res, q_l * res], -1)
            pcu, pcl, pcs = (1.0 - q_u) * cu, cl - q_l * cs, (1.0 - q_u) * cs
            if obs_valid is not None:
                v = obs_valid[:, i][:, None]
                post_mean = jnp.where(v, post_mean, prior_mean)
                pcu = jnp.where(v, pcu, cu)
                pcl = jnp.where(v, pcl, cl)
                pcs = jnp.where(v, pcs, cs)
            post_mean_list.append(post_mean)
            for j, val in enumerate((pcu, pcl, pcs)):
                post_cov_list[j].append(val)
            # Predict
            h = jnp.tanh(dense(post_mean, p['cw1'], p['cb1']))
            coeff = jax.nn.softmax(dense(h, p['cw2'], p['cb2']), axis=-1)
            tm11, tm12 = mix(p['b11'], coeff), mix(p['b12'], coeff)
            tm21, tm22 = mix(p['b21'], coeff), mix(p['b22'], coeff)
            mu, ml = post_mean[:, :lod], post_mean[:, lod:]
            nmu = bmv(tm11, mu) + bmv(tm12, ml)
            nml = bmv(tm21, mu) + bmv(tm22, ml)
            u = jax.nn.relu(act @ p['uw1a'] + latent_task @ p['uw1b'] + p['ub1'])
            u = jax.nn.relu(dense(u, p['uw2'], p['ub2']))
            u = jax.nn.relu(dense(u, p['uw3'], p['ub3']))
            control = dense(u, p['uw4'], p['ub4'])
            next_mean = jnp.concatenate([nmu, nml], -1) + control
            pn = dense(jax.nn.relu(dense(latent_task, p['pw1'], p['pb1'])),
                       p['pw2'], p['pb2'])
            pn = jnp.where(pn < 0.0, jnp.exp(pn), pn + 1.0)
            nu_, nl_ = pn[:, :lod], pn[:, lod:]
            new_cu = dadat(tm11, pcu) + 2 * dadbt(tm11, pcs, tm12) + dadat(tm12, pcl) + nu_
            new_cl = dadat(tm21, pcu) + 2 * dadbt(tm21, pcs, tm22) + dadat(tm22, pcl) + nl_
            new_cs = (dadbt(tm21, pcu, tm11) + dadbt(tm22, pcs, tm11)
                      + dadbt(tm21, pcs, tm12) + dadbt(tm22, pcl, tm12))
            prior_mean_list.append(next_mean)
            for j, val in enumerate((new_cu, new_cl, new_cs)):
                prior_cov_list[j].append(val)
            prior_mean, cu, cl, cs = next_mean, new_cu, new_cl, new_cs

    post_means = jnp.stack(post_mean_list, 1)
    prior_means = jnp.stack(prior_mean_list, 1)
    post_covs = [jnp.stack(x, 1) for x in post_cov_list]
    prior_covs = [jnp.stack(x, 1) for x in prior_cov_list]
    return post_means, post_covs, prior_means, prior_covs


if __name__ == "__main__":
    def flatten(o):
        pm, pc, qm, qc = o
        return [pm] + list(pc) + [qm] + list(qc)

    def close(out, ref):
        good = True
        for a, b in zip(flatten(out), flatten(ref)):
            a = np.asarray(a)
            b = np.asarray(b)
            if not (np.all(np.isfinite(a)) and np.allclose(a, b, rtol=1e-1, atol=1e-1)):
                good = False
        return good

    lod, lad, ltd = 16, 4, 8          # latent_obs_dim, act_dim, latent task dim
    lsd = 2 * lod
    icv = CONFIG['initial_state_covar']

    ok = True
    # config 1: single time chunk; config 2: multi-chunk carry + time padding
    for (B, T, time_chunk) in [(2, 8, 8), (4, 20, 8)]:
        key = jax.random.PRNGKey(0)
        k_par, k1, k2, k3, k4, k5, k6 = jax.random.split(key, 7)
        params = init_params(k_par, lod, lad, ltd, CONFIG)

        latent_obs = jax.random.normal(k1, (B, T, lod), jnp.float32)
        obs_vars = 0.1 + jax.nn.softplus(jax.random.normal(k2, (B, T, lod), jnp.float32))
        action = jax.random.normal(k3, (B, T, lad), jnp.float32)
        latent_task = jax.random.normal(k4, (B, ltd), jnp.float32)
        initial_mean = jax.random.normal(k5, (B, lsd), jnp.float32)
        initial_cov = [jnp.full((B, lod), icv, jnp.float32),
                       jnp.full((B, lod), icv, jnp.float32),
                       jnp.zeros((B, lod), jnp.float32)]
        obs_valid = jax.random.bernoulli(k6, 0.7, (B, T))

        for mask in (None, obs_valid):
            out = acrkn_context_forward(params, latent_obs, obs_vars, action,
                                        latent_task, initial_mean, initial_cov,
                                        obs_valid=mask, time_chunk=time_chunk,
                                        batch_chunks=1)
            out = jax.block_until_ready(out)
            ref = acrkn_context_reference(params, latent_obs, obs_vars, action,
                                          latent_task, initial_mean, initial_cov,
                                          obs_valid=mask)
            ok = ok and close(out, ref)

    assert ok, "Pallas kernel output does not match the reference"
    print("KERNEL_OK")
</pallas_src>

<mosaic_0001>
module attributes {stable_mosaic.version = 11 : i64} {
  func.func @_acrkn_context_kernel(%arg0: i32, %arg1: i32, %arg2: memref<2x128xf32, #tpu.memory_space<vmem>>, %arg3: memref<2x128xf32, #tpu.memory_space<vmem>>, %arg4: memref<2x128xf32, #tpu.memory_space<vmem>>, %arg5: memref<2x256xf32, #tpu.memory_space<vmem>>, %arg6: memref<2x32xf32, #tpu.memory_space<vmem>>, %arg7: memref<2x48xf32, #tpu.memory_space<vmem>>, %arg8: memref<2x48xf32, #tpu.memory_space<vmem>>, %arg9: memref<32x120xbf16, #tpu.memory_space<vmem>>, %arg10: memref<1x120xf32, #tpu.memory_space<vmem>>, %arg11: memref<120x15xbf16, #tpu.memory_space<vmem>>, %arg12: memref<1x15xf32, #tpu.memory_space<vmem>>, %arg13: memref<15x1024xbf16, #tpu.memory_space<vmem>>, %arg14: memref<1280x80xf32, #tpu.memory_space<vmem>>, %arg15: memref<2x1280xf32, #tpu.memory_space<vmem>>, %arg16: memref<2x32xf32, #tpu.memory_space<vmem>>, %arg17: memref<2x48xf32, #tpu.memory_space<vmem>>) attributes {dimension_semantics = [#tpu.dimension_semantics<parallel>, #tpu.dimension_semantics<arbitrary>], iteration_bounds = array<i64: 1, 1>, scalar_prefetch = 0 : i64, scratch_operands = 2 : i64, tpu.core_type = #tpu.core_type<tc>, window_params = [{transform_indices = @transform_0, window_bounds = array<i64: 2, 128>}, {transform_indices = @transform_1, window_bounds = array<i64: 2, 128>}, {transform_indices = @transform_2, window_bounds = array<i64: 2, 128>}, {transform_indices = @transform_3, window_bounds = array<i64: 2, 256>}, {transform_indices = @transform_4, window_bounds = array<i64: 2, 32>}, {transform_indices = @transform_5, window_bounds = array<i64: 2, 48>}, {transform_indices = @transform_6, window_bounds = array<i64: 2, 48>}, {pipeline_mode = #tpu.pipeline_mode<synchronous>, transform_indices = @transform_7, window_bounds = array<i64: 32, 120>}, {pipeline_mode = #tpu.pipeline_mode<synchronous>, transform_indices = @transform_8, window_bounds = array<i64: 1, 120>}, {pipeline_mode = #tpu.pipeline_mode<synchronous>, transform_indices = @transform_9, window_bounds = array<i64: 120, 15>}, {pipeline_mode = #tpu.pipeline_mode<synchronous>, transform_indices = @transform_10, window_bounds = array<i64: 1, 15>}, {pipeline_mode = #tpu.pipeline_mode<synchronous>, transform_indices = @transform_11, window_bounds = array<i64: 15, 1024>}, {pipeline_mode = #tpu.pipeline_mode<synchronous>, transform_indices = @transform_12, window_bounds = array<i64: 1280, 80>}, {transform_indices = @transform_13, window_bounds = array<i64: 2, 1280>}]} {
    %c0_i32 = arith.constant 0 : i32
    %0 = arith.cmpi eq, %arg1, %c0_i32 : i32
    %1 = arith.extui %0 : i1 to i32
    %c0_i32_0 = arith.constant 0 : i32
    %2 = arith.cmpi ne, %1, %c0_i32_0 : i32
    scf.if %2 {
      %c0_148 = arith.constant 0 : index
      %c0_149 = arith.constant 0 : index
      %846 = vector.load %arg6[%c0_148, %c0_149] : memref<2x32xf32, #tpu.memory_space<vmem>>, vector<2x32xf32>
      %c0_150 = arith.constant 0 : index
      %c0_151 = arith.constant 0 : index
      %847 = vector.load %arg16[%c0_150, %c0_151] : memref<2x32xf32, #tpu.memory_space<vmem>>, vector<2x32xf32>
      tpu.vector_store %arg16[%c0_150, %c0_151], %846 {strides = array<i32>} : memref<2x32xf32, #tpu.memory_space<vmem>>, vector<2x32xf32>,
      %c0_152 = arith.constant 0 : index
      %c0_153 = arith.constant 0 : index
      %848 = vector.load %arg7[%c0_152, %c0_153] : memref<2x48xf32, #tpu.memory_space<vmem>>, vector<2x48xf32>
      %c0_154 = arith.constant 0 : index
      %c0_155 = arith.constant 0 : index
      %849 = vector.load %arg17[%c0_154, %c0_155] : memref<2x48xf32, #tpu.memory_space<vmem>>, vector<2x48xf32>
      tpu.vector_store %arg17[%c0_154, %c0_155], %848 {strides = array<i32>} : memref<2x48xf32, #tpu.memory_space<vmem>>, vector<2x48xf32>,
    } else {
    }
    %c0 = arith.constant 0 : index
    %c0_1 = arith.constant 0 : index
    %3 = vector.load %arg9[%c0, %c0_1] : memref<32x120xbf16, #tpu.memory_space<vmem>>, vector<32x120xbf16>
    %c0_2 = arith.constant 0 : index
    %c0_3 = arith.constant 0 : index
    %4 = vector.load %arg10[%c0_2, %c0_3] : memref<1x120xf32, #tpu.memory_space<vmem>>, vector<1x120xf32>
    %c0_4 = arith.constant 0 : index
    %c0_5 = arith.constant 0 : index
    %5 = vector.load %arg11[%c0_4, %c0_5] : memref<120x15xbf16, #tpu.memory_space<vmem>>, vector<120x15xbf16>
    %c0_6 = arith.constant 0 : index
    %c0_7 = arith.constant 0 : index
    %6 = vector.load %arg12[%c0_6, %c0_7] : memref<1x15xf32, #tpu.memory_space<vmem>>, vector<1x15xf32>
    %c0_8 = arith.constant 0 : index
    %c0_9 = arith.constant 0 : index
    %7 = vector.load %arg13[%c0_8, %c0_9] : memref<15x1024xbf16, #tpu.memory_space<vmem>>, vector<15x1024xbf16>
    %c0_10 = arith.constant 0 : index
    %c0_11 = arith.constant 0 : index
    %8 = vector.load %arg14[%c0_10, %c0_11] : memref<1280x80xf32, #tpu.memory_space<vmem>>, vector<1280x80xf32>
    %c0_12 = arith.constant 0 : index
    %c0_13 = arith.constant 0 : index
    %9 = vector.load %arg8[%c0_12, %c0_13] : memref<2x48xf32, #tpu.memory_space<vmem>>, vector<2x48xf32>
    %c0_14 = arith.constant 0 : index
    %c0_15 = arith.constant 0 : index
    %10 = vector.load %arg16[%c0_14, %c0_15] : memref<2x32xf32, #tpu.memory_space<vmem>>, vector<2x32xf32>
    %c0_16 = arith.constant 0 : index
    %c0_17 = arith.constant 0 : index
    %11 = vector.load %arg17[%c0_16, %c0_17] : memref<2x48xf32, #tpu.memory_space<vmem>>, vector<2x48xf32>
    %c0_18 = arith.constant 0 : index
    %c0_19 = arith.constant 0 : index
    %12 = vector.load %arg2[%c0_18, %c0_19] : memref<2x128xf32, #tpu.memory_space<vmem>>, vector<2x16xf32>
    %c0_20 = arith.constant 0 : index
    %c0_21 = arith.constant 0 : index
    %13 = vector.load %arg3[%c0_20, %c0_21] : memref<2x128xf32, #tpu.memory_space<vmem>>, vector<2x16xf32>
    %c0_22 = arith.constant 0 : index
    %c0_23 = arith.constant 0 : index
    %14 = vector.load %arg4[%c0_22, %c0_23] : memref<2x128xf32, #tpu.memory_space<vmem>>, vector<2x16xf32>
    %c0_24 = arith.constant 0 : index
    %c0_25 = arith.constant 0 : index
    %15 = vector.load %arg5[%c0_24, %c0_25] : memref<2x256xf32, #tpu.memory_space<vmem>>, vector<2x32xf32>
    %16 = vector.extract_strided_slice %11 {offsets = [0, 0], sizes = [2, 16], strides = [1, 1]} : vector<2x48xf32> to vector<2x16xf32>
    %17 = vector.extract_strided_slice %11 {offsets = [0, 32], sizes = [2, 16], strides = [1, 1]} : vector<2x48xf32> to vector<2x16xf32>
    %18 = arith.addf %16, %13 : vector<2x16xf32>
    %19 = tpu.reciprocal %18 {approx = true} : vector<2x16xf32> -> vector<2x16xf32>
    %20 = arith.mulf %16, %19 : vector<2x16xf32>
    %21 = arith.mulf %17, %19 : vector<2x16xf32>
    %22 = vector.extract_strided_slice %10 {offsets = [0, 0], sizes = [2, 16], strides = [1, 1]} : vector<2x32xf32> to vector<2x16xf32>
    %23 = arith.subf %12, %22 : vector<2x16xf32>
    %24 = arith.mulf %20, %23 : vector<2x16xf32>
    %25 = arith.mulf %21, %23 : vector<2x16xf32>
    %26 = tpu.concatenate %24, %25 in 1 : vector<2x16xf32>, vector<2x16xf32> -> vector<2x32xf32>
    %27 = arith.mulf %20, %16 : vector<2x16xf32>
    %28 = arith.mulf %21, %17 : vector<2x16xf32>
    %29 = arith.mulf %20, %17 : vector<2x16xf32>
    %30 = tpu.concatenate %27, %28, %29 in 1 : vector<2x16xf32>, vector<2x16xf32>, vector<2x16xf32> -> vector<2x48xf32>
    %31 = tpu.concatenate %14, %14 in 1 : vector<2x16xf32>, vector<2x16xf32> -> vector<2x32xf32>
    %32 = arith.mulf %31, %26 : vector<2x32xf32>
    %33 = arith.addf %10, %32 : vector<2x32xf32>
    %34 = tpu.concatenate %14, %14, %14 in 1 : vector<2x16xf32>, vector<2x16xf32>, vector<2x16xf32> -> vector<2x48xf32>
    %35 = arith.mulf %34, %30 : vector<2x48xf32>
    %36 = arith.subf %11, %35 : vector<2x48xf32>
    %37 = arith.truncf %33 : vector<2x32xf32> to vector<2x32xbf16>
    %cst = arith.constant dense<0.000000e+00> : vector<2x120xf32>
    %38 = tpu.matmul %37, %3, %cst {dimension_numbers = #tpu.dot_dimension_numbers<[1], [0], [0], [1], [0, 0, 1, 1], [], []>} : vector<2x32xbf16>, vector<32x120xbf16>, vector<2x120xf32> -> vector<2x120xf32>
    %39 = vector.broadcast %4 : vector<1x120xf32> to vector<2x120xf32>
    %40 = arith.addf %38, %39 : vector<2x120xf32>
    %41 = math.tanh %40 : vector<2x120xf32>
    %42 = arith.truncf %41 : vector<2x120xf32> to vector<2x120xbf16>
    %cst_26 = arith.constant dense<0.000000e+00> : vector<2x15xf32>
    %43 = tpu.matmul %42, %5, %cst_26 {dimension_numbers = #tpu.dot_dimension_numbers<[1], [0], [0], [1], [0, 0, 1, 1], [], []>} : vector<2x120xbf16>, vector<120x15xbf16>, vector<2x15xf32> -> vector<2x15xf32>
    %44 = vector.broadcast %6 : vector<1x15xf32> to vector<2x15xf32>
    %45 = arith.addf %43, %44 : vector<2x15xf32>
    %cst_27 = arith.constant dense<0xFF800000> : vector<2xf32>
    %46 = vector.multi_reduction <maximumf>, %45, %cst_27 [1] : vector<2x15xf32> to vector<2xf32>
    %47 = vector.shape_cast %46 : vector<2xf32> to vector<2x1xf32>
    %48 = vector.broadcast %47 : vector<2x1xf32> to vector<2x15xf32>
    %49 = arith.subf %45, %48 : vector<2x15xf32>
    %50 = math.exp %49 : vector<2x15xf32>
    %cst_28 = arith.constant dense<0.000000e+00> : vector<2xf32>
    %51 = vector.multi_reduction <add>, %50, %cst_28 [1] : vector<2x15xf32> to vector<2xf32>
    %52 = vector.shape_cast %51 : vector<2xf32> to vector<2x1xf32>
    %53 = tpu.reciprocal %52 {approx = true} : vector<2x1xf32> -> vector<2x1xf32>
    %54 = vector.broadcast %53 : vector<2x1xf32> to vector<2x15xf32>
    %55 = arith.mulf %50, %54 : vector<2x15xf32>
    %56 = arith.truncf %55 : vector<2x15xf32> to vector<2x15xbf16>
    %cst_29 = arith.constant dense<0.000000e+00> : vector<2x1024xf32>
    %57 = tpu.matmul %56, %7, %cst_29 {dimension_numbers = #tpu.dot_dimension_numbers<[1], [0], [0], [1], [0, 0, 1, 1], [], []>} : vector<2x15xbf16>, vector<15x1024xbf16>, vector<2x1024xf32> -> vector<2x1024xf32>
    %58 = vector.extract_strided_slice %57 {offsets = [0, 0], sizes = [2, 256], strides = [1, 1]} : vector<2x1024xf32> to vector<2x256xf32>
    %59 = vector.extract_strided_slice %57 {offsets = [0, 256], sizes = [2, 256], strides = [1, 1]} : vector<2x1024xf32> to vector<2x256xf32>
    %60 = vector.extract_strided_slice %57 {offsets = [0, 512], sizes = [2, 256], strides = [1, 1]} : vector<2x1024xf32> to vector<2x256xf32>
    %61 = vector.extract_strided_slice %57 {offsets = [0, 768], sizes = [2, 256], strides = [1, 1]} : vector<2x1024xf32> to vector<2x256xf32>
    %62 = vector.extract_strided_slice %33 {offsets = [0, 0], sizes = [2, 16], strides = [1, 1]} : vector<2x32xf32> to vector<2x16xf32>
    %63 = tpu.concatenate %62, %62, %62, %62, %62, %62, %62, %62, %62, %62, %62, %62, %62, %62, %62, %62 in 1 : vector<2x16xf32>, vector<2x16xf32>, vector<2x16xf32>, vector<2x16xf32>, vector<2x16xf32>, vector<2x16xf32>, vector<2x16xf32>, vector<2x16xf32>, vector<2x16xf32>, vector<2x16xf32>, vector<2x16xf32>, vector<2x16xf32>, vector<2x16xf32>, vector<2x16xf32>, vector<2x16xf32>, vector<2x16xf32> -> vector<2x256xf32>
    %64 = vector.extract_strided_slice %33 {offsets = [0, 16], sizes = [2, 16], strides = [1, 1]} : vector<2x32xf32> to vector<2x16xf32>
    %65 = tpu.concatenate %64, %64, %64, %64, %64, %64, %64, %64, %64, %64, %64, %64, %64, %64, %64, %64 in 1 : vector<2x16xf32>, vector<2x16xf32>, vector<2x16xf32>, vector<2x16xf32>, vector<2x16xf32>, vector<2x16xf32>, vector<2x16xf32>, vector<2x16xf32>, vector<2x16xf32>, vector<2x16xf32>, vector<2x16xf32>, vector<2x16xf32>, vector<2x16xf32>, vector<2x16xf32>, vector<2x16xf32>, vector<2x16xf32> -> vector<2x256xf32>
    %66 = vector.extract_strided_slice %36 {offsets = [0, 0], sizes = [2, 16], strides = [1, 1]} : vector<2x48xf32> to vector<2x16xf32>
    %67 = tpu.concatenate %66, %66, %66, %66, %66, %66, %66, %66, %66, %66, %66, %66, %66, %66, %66, %66 in 1 : vector<2x16xf32>, vector<2x16xf32>, vector<2x16xf32>, vector<2x16xf32>, vector<2x16xf32>, vector<2x16xf32>, vector<2x16xf32>, vector<2x16xf32>, vector<2x16xf32>, vector<2x16xf32>, vector<2x16xf32>, vector<2x16xf32>, vector<2x16xf32>, vector<2x16xf32>, vector<2x16xf32>, vector<2x16xf32> -> vector<2x256xf32>
    %68 = vector.extract_strided_slice %36 {offsets = [0, 16], sizes = [2, 16], strides = [1, 1]} : vector<2x48xf32> to vector<2x16xf32>
    %69 = tpu.concatenate %68, %68, %68, %68, %68, %68, %68, %68, %68, %68, %68, %68, %68, %68, %68, %68 in 1 : vector<2x16xf32>, vector<2x16xf32>, vector<2x16xf32>, vector<2x16xf32>, vector<2x16xf32>, vector<2x16xf32>, vector<2x16xf32>, vector<2x16xf32>, vector<2x16xf32>, vector<2x16xf32>, vector<2x16xf32>, vector<2x16xf32>, vector<2x16xf32>, vector<2x16xf32>, vector<2x16xf32>, vector<2x16xf32> -> vector<2x256xf32>
    %70 = vector.extract_strided_slice %36 {offsets = [0, 32], sizes = [2, 16], strides = [1, 1]} : vector<2x48xf32> to vector<2x16xf32>
    %71 = tpu.concatenate %70, %70, %70, %70, %70, %70, %70, %70, %70, %70, %70, %70, %70, %70, %70, %70 in 1 : vector<2x16xf32>, vector<2x16xf32>, vector<2x16xf32>, vector<2x16xf32>, vector<2x16xf32>, vector<2x16xf32>, vector<2x16xf32>, vector<2x16xf32>, vector<2x16xf32>, vector<2x16xf32>, vector<2x16xf32>, vector<2x16xf32>, vector<2x16xf32>, vector<2x16xf32>, vector<2x16xf32>, vector<2x16xf32> -> vector<2x256xf32>
    %72 = arith.mulf %58, %63 : vector<2x256xf32>
    %73 = arith.mulf %59, %65 : vector<2x256xf32>
    %74 = arith.addf %72, %73 : vector<2x256xf32>
    %75 = arith.mulf %60, %63 : vector<2x256xf32>
    %76 = arith.mulf %61, %65 : vector<2x256xf32>
    %77 = arith.addf %75, %76 : vector<2x256xf32>
    %78 = arith.mulf %58, %58 : vector<2x256xf32>
    %79 = arith.mulf %78, %67 : vector<2x256xf32>
    %80 = arith.mulf %58, %59 : vector<2x256xf32>
    %cst_30 = arith.constant 2.000000e+00 : f32
    %81 = vector.broadcast %cst_30 : f32 to vector<2x256xf32>
    %82 = arith.mulf %81, %80 : vector<2x256xf32>
    %83 = arith.mulf %82, %71 : vector<2x256xf32>
    %84 = arith.addf %79, %83 : vector<2x256xf32>
    %85 = arith.mulf %59, %59 : vector<2x256xf32>
    %86 = arith.mulf %85, %69 : vector<2x256xf32>
    %87 = arith.addf %84, %86 : vector<2x256xf32>
    %88 = arith.mulf %60, %60 : vector<2x256xf32>
    %89 = arith.mulf %88, %67 : vector<2x256xf32>
    %90 = arith.mulf %60, %61 : vector<2x256xf32>
    %cst_31 = arith.constant 2.000000e+00 : f32
    %91 = vector.broadcast %cst_31 : f32 to vector<2x256xf32>
    %92 = arith.mulf %91, %90 : vector<2x256xf32>
    %93 = arith.mulf %92, %71 : vector<2x256xf32>
    %94 = arith.addf %89, %93 : vector<2x256xf32>
    %95 = arith.mulf %61, %61 : vector<2x256xf32>
    %96 = arith.mulf %95, %69 : vector<2x256xf32>
    %97 = arith.addf %94, %96 : vector<2x256xf32>
    %98 = arith.mulf %60, %58 : vector<2x256xf32>
    %99 = arith.mulf %98, %67 : vector<2x256xf32>
    %100 = arith.mulf %61, %58 : vector<2x256xf32>
    %101 = arith.mulf %60, %59 : vector<2x256xf32>
    %102 = arith.addf %100, %101 : vector<2x256xf32>
    %103 = arith.mulf %102, %71 : vector<2x256xf32>
    %104 = arith.addf %99, %103 : vector<2x256xf32>
    %105 = arith.mulf %61, %59 : vector<2x256xf32>
    %106 = arith.mulf %105, %69 : vector<2x256xf32>
    %107 = arith.addf %104, %106 : vector<2x256xf32>
    %108 = tpu.concatenate %74, %77, %87, %97, %107 in 1 : vector<2x256xf32>, vector<2x256xf32>, vector<2x256xf32>, vector<2x256xf32>, vector<2x256xf32> -> vector<2x1280xf32>
    %cst_32 = arith.constant dense<0.000000e+00> : vector<2x80xf32>
    %109 = tpu.matmul %108, %8, %cst_32 {dimension_numbers = #tpu.dot_dimension_numbers<[1], [0], [0], [1], [0, 0, 1, 1], [], []>} : vector<2x1280xf32>, vector<1280x80xf32>, vector<2x80xf32> -> vector<2x80xf32>
    %110 = vector.extract_strided_slice %109 {offsets = [0, 0], sizes = [2, 32], strides = [1, 1]} : vector<2x80xf32> to vector<2x32xf32>
    %111 = arith.addf %110, %15 : vector<2x32xf32>
    %112 = vector.extract_strided_slice %109 {offsets = [0, 32], sizes = [2, 48], strides = [1, 1]} : vector<2x80xf32> to vector<2x48xf32>
    %113 = arith.addf %112, %9 : vector<2x48xf32>
    %114 = tpu.concatenate %33, %36, %111, %113 in 1 : vector<2x32xf32>, vector<2x48xf32>, vector<2x32xf32>, vector<2x48xf32> -> vector<2x160xf32>
    %c0_33 = arith.constant 0 : index
    %c0_34 = arith.constant 0 : index
    %115 = vector.load %arg15[%c0_33, %c0_34] : memref<2x1280xf32, #tpu.memory_space<vmem>>, vector<2x160xf32>
    tpu.vector_store %arg15[%c0_33, %c0_34], %114 {strides = array<i32>} : memref<2x1280xf32, #tpu.memory_space<vmem>>, vector<2x160xf32>,
    %c0_35 = arith.constant 0 : index
    %c16 = arith.constant 16 : index
    %116 = vector.load %arg2[%c0_35, %c16] : memref<2x128xf32, #tpu.memory_space<vmem>>, vector<2x16xf32>
    %c0_36 = arith.constant 0 : index
    %c16_37 = arith.constant 16 : index
    %117 = vector.load %arg3[%c0_36, %c16_37] : memref<2x128xf32, #tpu.memory_space<vmem>>, vector<2x16xf32>
    %c0_38 = arith.constant 0 : index
    %c16_39 = arith.constant 16 : index
    %118 = vector.load %arg4[%c0_38, %c16_39] : memref<2x128xf32, #tpu.memory_space<vmem>>, vector<2x16xf32>
    %c0_40 = arith.constant 0 : index
    %c32 = arith.constant 32 : index
    %119 = vector.load %arg5[%c0_40, %c32] : memref<2x256xf32, #tpu.memory_space<vmem>>, vector<2x32xf32>
    %120 = vector.extract_strided_slice %113 {offsets = [0, 0], sizes = [2, 16], strides = [1, 1]} : vector<2x48xf32> to vector<2x16xf32>
    %121 = vector.extract_strided_slice %113 {offsets = [0, 32], sizes = [2, 16], strides = [1, 1]} : vector<2x48xf32> to vector<2x16xf32>
    %122 = arith.addf %120, %117 : vector<2x16xf32>
    %123 = tpu.reciprocal %122 {approx = true} : vector<2x16xf32> -> vector<2x16xf32>
    %124 = arith.mulf %120, %123 : vector<2x16xf32>
    %125 = arith.mulf %121, %123 : vector<2x16xf32>
    %126 = vector.extract_strided_slice %111 {offsets = [0, 0], sizes = [2, 16], strides = [1, 1]} : vector<2x32xf32> to vector<2x16xf32>
    %127 = arith.subf %116, %126 : vector<2x16xf32>
    %128 = arith.mulf %124, %127 : vector<2x16xf32>
    %129 = arith.mulf %125, %127 : vector<2x16xf32>
    %130 = tpu.concatenate %128, %129 in 1 : vector<2x16xf32>, vector<2x16xf32> -> vector<2x32xf32>
    %131 = arith.mulf %124, %120 : vector<2x16xf32>
    %132 = arith.mulf %125, %121 : vector<2x16xf32>
    %133 = arith.mulf %124, %121 : vector<2x16xf32>
    %134 = tpu.concatenate %131, %132, %133 in 1 : vector<2x16xf32>, vector<2x16xf32>, vector<2x16xf32> -> vector<2x48xf32>
    %135 = tpu.concatenate %118, %118 in 1 : vector<2x16xf32>, vector<2x16xf32> -> vector<2x32xf32>
    %136 = arith.mulf %135, %130 : vector<2x32xf32>
    %137 = arith.addf %111, %136 : vector<2x32xf32>
    %138 = tpu.concatenate %118, %118, %118 in 1 : vector<2x16xf32>, vector<2x16xf32>, vector<2x16xf32> -> vector<2x48xf32>
    %139 = arith.mulf %138, %134 : vector<2x48xf32>
    %140 = arith.subf %113, %139 : vector<2x48xf32>
    %141 = arith.truncf %137 : vector<2x32xf32> to vector<2x32xbf16>
    %cst_41 = arith.constant dense<0.000000e+00> : vector<2x120xf32>
    %142 = tpu.matmul %141, %3, %cst_41 {dimension_numbers = #tpu.dot_dimension_numbers<[1], [0], [0], [1], [0, 0, 1, 1], [], []>} : vector<2x32xbf16>, vector<32x120xbf16>, vector<2x120xf32> -> vector<2x120xf32>
    %143 = vector.broadcast %4 : vector<1x120xf32> to vector<2x120xf32>
    %144 = arith.addf %142, %143 : vector<2x120xf32>
    %145 = math.tanh %144 : vector<2x120xf32>
    %146 = arith.truncf %145 : vector<2x120xf32> to vector<2x120xbf16>
    %cst_42 = arith.constant dense<0.000000e+00> : vector<2x15xf32>
    %147 = tpu.matmul %146, %5, %cst_42 {dimension_numbers = #tpu.dot_dimension_numbers<[1], [0], [0], [1], [0, 0, 1, 1], [], []>} : vector<2x120xbf16>, vector<120x15xbf16>, vector<2x15xf32> -> vector<2x15xf32>
    %148 = vector.broadcast %6 : vector<1x15xf32> to vector<2x15xf32>
    %149 = arith.addf %147, %148 : vector<2x15xf32>
    %cst_43 = arith.constant dense<0xFF800000> : vector<2xf32>
    %150 = vector.multi_reduction <maximumf>, %149, %cst_43 [1] : vector<2x15xf32> to vector<2xf32>
    %151 = vector.shape_cast %150 : vector<2xf32> to vector<2x1xf32>
    %152 = vector.broadcast %151 : vector<2x1xf32> to vector<2x15xf32>
    %153 = arith.subf %149, %152 : vector<2x15xf32>
    %154 = math.exp %153 : vector<2x15xf32>
    %cst_44 = arith.constant dense<0.000000e+00> : vector<2xf32>
    %155 = vector.multi_reduction <add>, %154, %cst_44 [1] : vector<2x15xf32> to vector<2xf32>
    %156 = vector.shape_cast %155 : vector<2xf32> to vector<2x1xf32>
    %157 = tpu.reciprocal %156 {approx = true} : vector<2x1xf32> -> vector<2x1xf32>
    %158 = vector.broadcast %157 : vector<2x1xf32> to vector<2x15xf32>
    %159 = arith.mulf %154, %158 : vector<2x15xf32>
    %160 = arith.truncf %159 : vector<2x15xf32> to vector<2x15xbf16>
    %cst_45 = arith.constant dense<0.000000e+00> : vector<2x1024xf32>
    %161 = tpu.matmul %160, %7, %cst_45 {dimension_numbers = #tpu.dot_dimension_numbers<[1], [0], [0], [1], [0, 0, 1, 1], [], []>} : vector<2x15xbf16>, vector<15x1024xbf16>, vector<2x1024xf32> -> vector<2x1024xf32>
    %162 = vector.extract_strided_slice %161 {offsets = [0, 0], sizes = [2, 256], strides = [1, 1]} : vector<2x1024xf32> to vector<2x256xf32>
    %163 = vector.extract_strided_slice %161 {offsets = [0, 256], sizes = [2, 256], strides = [1, 1]} : vector<2x1024xf32> to vector<2x256xf32>
    %164 = vector.extract_strided_slice %161 {offsets = [0, 512], sizes = [2, 256], strides = [1, 1]} : vector<2x1024xf32> to vector<2x256xf32>
    %165 = vector.extract_strided_slice %161 {offsets = [0, 768], sizes = [2, 256], strides = [1, 1]} : vector<2x1024xf32> to vector<2x256xf32>
    %166 = vector.extract_strided_slice %137 {offsets = [0, 0], sizes = [2, 16], strides = [1, 1]} : vector<2x32xf32> to vector<2x16xf32>
    %167 = tpu.concatenate %166, %166, %166, %166, %166, %166, %166, %166, %166, %166, %166, %166, %166, %166, %166, %166 in 1 : vector<2x16xf32>, vector<2x16xf32>, vector<2x16xf32>, vector<2x16xf32>, vector<2x16xf32>, vector<2x16xf32>, vector<2x16xf32>, vector<2x16xf32>, vector<2x16xf32>, vector<2x16xf32>, vector<2x16xf32>, vector<2x16xf32>, vector<2x16xf32>, vector<2x16xf32>, vector<2x16xf32>, vector<2x16xf32> -> vector<2x256xf32>
    %168 = vector.extract_strided_slice %137 {offsets = [0, 16], sizes = [2, 16], strides = [1, 1]} : vector<2x32xf32> to vector<2x16xf32>
    %169 = tpu.concatenate %168, %168, %168, %168, %168, %168, %168, %168, %168, %168, %168, %168, %168, %168, %168, %168 in 1 : vector<2x16xf32>, vector<2x16xf32>, vector<2x16xf32>, vector<2x16xf32>, vector<2x16xf32>, vector<2x16xf32>, vector<2x16xf32>, vector<2x16xf32>, vector<2x16xf32>, vector<2x16xf32>, vector<2x16xf32>, vector<2x16xf32>, vector<2x16xf32>, vector<2x16xf32>, vector<2x16xf32>, vector<2x16xf32> -> vector<2x256xf32>
    %170 = vector.extract_strided_slice %140 {offsets = [0, 0], sizes = [2, 16], strides = [1, 1]} : vector<2x48xf32> to vector<2x16xf32>
    %171 = tpu.concatenate %170, %170, %170, %170, %170, %170, %170, %170, %170, %170, %170, %170, %170, %170, %170, %170 in 1 : vector<2x16xf32>, vector<2x16xf32>, vector<2x16xf32>, vector<2x16xf32>, vector<2x16xf32>, vector<2x16xf32>, vector<2x16xf32>, vector<2x16xf32>, vector<2x16xf32>, vector<2x16xf32>, vector<2x16xf32>, vector<2x16xf32>, vector<2x16xf32>, vector<2x16xf32>, vector<2x16xf32>, vector<2x16xf32> -> vector<2x256xf32>
    %172 = vector.extract_strided_slice %140 {offsets = [0, 16], sizes = [2, 16], strides = [1, 1]} : vector<2x48xf32> to vector<2x16xf32>
    %173 = tpu.concatenate %172, %172, %172, %172, %172, %172, %172, %172, %172, %172, %172, %172, %172, %172, %172, %172 in 1 : vector<2x16xf32>, vector<2x16xf32>, vector<2x16xf32>, vector<2x16xf32>, vector<2x16xf32>, vector<2x16xf32>, vector<2x16xf32>, vector<2x16xf32>, vector<2x16xf32>, vector<2x16xf32>, vector<2x16xf32>, vector<2x16xf32>, vector<2x16xf32>, vector<2x16xf32>, vector<2x16xf32>, vector<2x16xf32> -> vector<2x256xf32>
    %174 = vector.extract_strided_slice %140 {offsets = [0, 32], sizes = [2, 16], strides = [1, 1]} : vector<2x48xf32> to vector<2x16xf32>
    %175 = tpu.concatenate %174, %174, %174, %174, %174, %174, %174, %174, %174, %174, %174, %174, %174, %174, %174, %174 in 1 : vector<2x16xf32>, vector<2x16xf32>, vector<2x16xf32>, vector<2x16xf32>, vector<2x16xf32>, vector<2x16xf32>, vector<2x16xf32>, vector<2x16xf32>, vector<2x16xf32>, vector<2x16xf32>, vector<2x16xf32>, vector<2x16xf32>, vector<2x16xf32>, vector<2x16xf32>, vector<2x16xf32>, vector<2x16xf32> -> vector<2x256xf32>
    %176 = arith.mulf %162, %167 : vector<2x256xf32>
    %177 = arith.mulf %163, %169 : vector<2x256xf32>
    %178 = arith.addf %176, %177 : vector<2x256xf32>
    %179 = arith.mulf %164, %167 : vector<2x256xf32>
    %180 = arith.mulf %165, %169 : vector<2x256xf32>
    %181 = arith.addf %179, %180 : vector<2x256xf32>
    %182 = arith.mulf %162, %162 : vector<2x256xf32>
    %183 = arith.mulf %182, %171 : vector<2x256xf32>
    %184 = arith.mulf %162, %163 : vector<2x256xf32>
    %cst_46 = arith.constant 2.000000e+00 : f32
    %185 = vector.broadcast %cst_46 : f32 to vector<2x256xf32>
    %186 = arith.mulf %185, %184 : vector<2x256xf32>
    %187 = arith.mulf %186, %175 : vector<2x256xf32>
    %188 = arith.addf %183, %187 : vector<2x256xf32>
    %189 = arith.mulf %163, %163 : vector<2x256xf32>
    %190 = arith.mulf %189, %173 : vector<2x256xf32>
    %191 = arith.addf %188, %190 : vector<2x256xf32>
    %192 = arith.mulf %164, %164 : vector<2x256xf32>
    %193 = arith.mulf %192, %171 : vector<2x256xf32>
    %194 = arith.mulf %164, %165 : vector<2x256xf32>
    %cst_47 = arith.constant 2.000000e+00 : f32
    %195 = vector.broadcast %cst_47 : f32 to vector<2x256xf32>
    %196 = arith.mulf %195, %194 : vector<2x256xf32>
    %197 = arith.mulf %196, %175 : vector<2x256xf32>
    %198 = arith.addf %193, %197 : vector<2x256xf32>
    %199 = arith.mulf %165, %165 : vector<2x256xf32>
    %200 = arith.mulf %199, %173 : vector<2x256xf32>
    %201 = arith.addf %198, %200 : vector<2x256xf32>
    %202 = arith.mulf %164, %162 : vector<2x256xf32>
    %203 = arith.mulf %202, %171 : vector<2x256xf32>
    %204 = arith.mulf %165, %162 : vector<2x256xf32>
    %205 = arith.mulf %164, %163 : vector<2x256xf32>
    %206 = arith.addf %204, %205 : vector<2x256xf32>
    %207 = arith.mulf %206, %175 : vector<2x256xf32>
    %208 = arith.addf %203, %207 : vector<2x256xf32>
    %209 = arith.mulf %165, %163 : vector<2x256xf32>
    %210 = arith.mulf %209, %173 : vector<2x256xf32>
    %211 = arith.addf %208, %210 : vector<2x256xf32>
    %212 = tpu.concatenate %178, %181, %191, %201, %211 in 1 : vector<2x256xf32>, vector<2x256xf32>, vector<2x256xf32>, vector<2x256xf32>, vector<2x256xf32> -> vector<2x1280xf32>
    %cst_48 = arith.constant dense<0.000000e+00> : vector<2x80xf32>
    %213 = tpu.matmul %212, %8, %cst_48 {dimension_numbers = #tpu.dot_dimension_numbers<[1], [0], [0], [1], [0, 0, 1, 1], [], []>} : vector<2x1280xf32>, vector<1280x80xf32>, vector<2x80xf32> -> vector<2x80xf32>
    %214 = vector.extract_strided_slice %213 {offsets = [0, 0], sizes = [2, 32], strides = [1, 1]} : vector<2x80xf32> to vector<2x32xf32>
    %215 = arith.addf %214, %119 : vector<2x32xf32>
    %216 = vector.extract_strided_slice %213 {offsets = [0, 32], sizes = [2, 48], strides = [1, 1]} : vector<2x80xf32> to vector<2x48xf32>
    %217 = arith.addf %216, %9 : vector<2x48xf32>
    %218 = tpu.concatenate %137, %140, %215, %217 in 1 : vector<2x32xf32>, vector<2x48xf32>, vector<2x32xf32>, vector<2x48xf32> -> vector<2x160xf32>
    %c0_49 = arith.constant 0 : index
    %c160 = arith.constant 160 : index
    %219 = vector.load %arg15[%c0_49, %c160] : memref<2x1280xf32, #tpu.memory_space<vmem>>, vector<2x160xf32>
    tpu.vector_store %arg15[%c0_49, %c160], %218 {strides = array<i32>} : memref<2x1280xf32, #tpu.memory_space<vmem>>, vector<2x160xf32>,
    %c0_50 = arith.constant 0 : index
    %c32_51 = arith.constant 32 : index
    %220 = vector.load %arg2[%c0_50, %c32_51] : memref<2x128xf32, #tpu.memory_space<vmem>>, vector<2x16xf32>
    %c0_52 = arith.constant 0 : index
    %c32_53 = arith.constant 32 : index
    %221 = vector.load %arg3[%c0_52, %c32_53] : memref<2x128xf32, #tpu.memory_space<vmem>>, vector<2x16xf32>
    %c0_54 = arith.constant 0 : index
    %c32_55 = arith.constant 32 : index
    %222 = vector.load %arg4[%c0_54, %c32_55] : memref<2x128xf32, #tpu.memory_space<vmem>>, vector<2x16xf32>
    %c0_56 = arith.constant 0 : index
    %c64 = arith.constant 64 : index
    %223 = vector.load %arg5[%c0_56, %c64] : memref<2x256xf32, #tpu.memory_space<vmem>>, vector<2x32xf32>
    %224 = vector.extract_strided_slice %217 {offsets = [0, 0], sizes = [2, 16], strides = [1, 1]} : vector<2x48xf32> to vector<2x16xf32>
    %225 = vector.extract_strided_slice %217 {offsets = [0, 32], sizes = [2, 16], strides = [1, 1]} : vector<2x48xf32> to vector<2x16xf32>
    %226 = arith.addf %224, %221 : vector<2x16xf32>
    %227 = tpu.reciprocal %226 {approx = true} : vector<2x16xf32> -> vector<2x16xf32>
    %228 = arith.mulf %224, %227 : vector<2x16xf32>
    %229 = arith.mulf %225, %227 : vector<2x16xf32>
    %230 = vector.extract_strided_slice %215 {offsets = [0, 0], sizes = [2, 16], strides = [1, 1]} : vector<2x32xf32> to vector<2x16xf32>
    %231 = arith.subf %220, %230 : vector<2x16xf32>
    %232 = arith.mulf %228, %231 : vector<2x16xf32>
    %233 = arith.mulf %229, %231 : vector<2x16xf32>
    %234 = tpu.concatenate %232, %233 in 1 : vector<2x16xf32>, vector<2x16xf32> -> vector<2x32xf32>
    %235 = arith.mulf %228, %224 : vector<2x16xf32>
    %236 = arith.mulf %229, %225 : vector<2x16xf32>
    %237 = arith.mulf %228, %225 : vector<2x16xf32>
    %238 = tpu.concatenate %235, %236, %237 in 1 : vector<2x16xf32>, vector<2x16xf32>, vector<2x16xf32> -> vector<2x48xf32>
    %239 = tpu.concatenate %222, %222 in 1 : vector<2x16xf32>, vector<2x16xf32> -> vector<2x32xf32>
    %240 = arith.mulf %239, %234 : vector<2x32xf32>
    %241 = arith.addf %215, %240 : vector<2x32xf32>
    %242 = tpu.concatenate %222, %222, %222 in 1 : vector<2x16xf32>, vector<2x16xf32>, vector<2x16xf32> -> vector<2x48xf32>
    %243 = arith.mulf %242, %238 : vector<2x48xf32>
    %244 = arith.subf %217, %243 : vector<2x48xf32>
    %245 = arith.truncf %241 : vector<2x32xf32> to vector<2x32xbf16>
    %cst_57 = arith.constant dense<0.000000e+00> : vector<2x120xf32>
    %246 = tpu.matmul %245, %3, %cst_57 {dimension_numbers = #tpu.dot_dimension_numbers<[1], [0], [0], [1], [0, 0, 1, 1], [], []>} : vector<2x32xbf16>, vector<32x120xbf16>, vector<2x120xf32> -> vector<2x120xf32>
    %247 = vector.broadcast %4 : vector<1x120xf32> to vector<2x120xf32>
    %248 = arith.addf %246, %247 : vector<2x120xf32>
    %249 = math.tanh %248 : vector<2x120xf32>
    %250 = arith.truncf %249 : vector<2x120xf32> to vector<2x120xbf16>
    %cst_58 = arith.constant dense<0.000000e+00> : vector<2x15xf32>
    %251 = tpu.matmul %250, %5, %cst_58 {dimension_numbers = #tpu.dot_dimension_numbers<[1], [0], [0], [1], [0, 0, 1, 1], [], []>} : vector<2x120xbf16>, vector<120x15xbf16>, vector<2x15xf32> -> vector<2x15xf32>
    %252 = vector.broadcast %6 : vector<1x15xf32> to vector<2x15xf32>
    %253 = arith.addf %251, %252 : vector<2x15xf32>
    %cst_59 = arith.constant dense<0xFF800000> : vector<2xf32>
    %254 = vector.multi_reduction <maximumf>, %253, %cst_59 [1] : vector<2x15xf32> to vector<2xf32>
    %255 = vector.shape_cast %254 : vector<2xf32> to vector<2x1xf32>
    %256 = vector.broadcast %255 : vector<2x1xf32> to vector<2x15xf32>
    %257 = arith.subf %253, %256 : vector<2x15xf32>
    %258 = math.exp %257 : vector<2x15xf32>
    %cst_60 = arith.constant dense<0.000000e+00> : vector<2xf32>
    %259 = vector.multi_reduction <add>, %258, %cst_60 [1] : vector<2x15xf32> to vector<2xf32>
    %260 = vector.shape_cast %259 : vector<2xf32> to vector<2x1xf32>
    %261 = tpu.reciprocal %260 {approx = true} : vector<2x1xf32> -> vector<2x1xf32>
    %262 = vector.broadcast %261 : vector<2x1xf32> to vector<2x15xf32>
    %263 = arith.mulf %258, %262 : vector<2x15xf32>
    %264 = arith.truncf %263 : vector<2x15xf32> to vector<2x15xbf16>
    %cst_61 = arith.constant dense<0.000000e+00> : vector<2x1024xf32>
    %265 = tpu.matmul %264, %7, %cst_61 {dimension_numbers = #tpu.dot_dimension_numbers<[1], [0], [0], [1], [0, 0, 1, 1], [], []>} : vector<2x15xbf16>, vector<15x1024xbf16>, vector<2x1024xf32> -> vector<2x1024xf32>
    %266 = vector.extract_strided_slice %265 {offsets = [0, 0], sizes = [2, 256], strides = [1, 1]} : vector<2x1024xf32> to vector<2x256xf32>
    %267 = vector.extract_strided_slice %265 {offsets = [0, 256], sizes = [2, 256], strides = [1, 1]} : vector<2x1024xf32> to vector<2x256xf32>
    %268 = vector.extract_strided_slice %265 {offsets = [0, 512], sizes = [2, 256], strides = [1, 1]} : vector<2x1024xf32> to vector<2x256xf32>
    %269 = vector.extract_strided_slice %265 {offsets = [0, 768], sizes = [2, 256], strides = [1, 1]} : vector<2x1024xf32> to vector<2x256xf32>
    %270 = vector.extract_strided_slice %241 {offsets = [0, 0], sizes = [2, 16], strides = [1, 1]} : vector<2x32xf32> to vector<2x16xf32>
    %271 = tpu.concatenate %270, %270, %270, %270, %270, %270, %270, %270, %270, %270, %270, %270, %270, %270, %270, %270 in 1 : vector<2x16xf32>, vector<2x16xf32>, vector<2x16xf32>, vector<2x16xf32>, vector<2x16xf32>, vector<2x16xf32>, vector<2x16xf32>, vector<2x16xf32>, vector<2x16xf32>, vector<2x16xf32>, vector<2x16xf32>, vector<2x16xf32>, vector<2x16xf32>, vector<2x16xf32>, vector<2x16xf32>, vector<2x16xf32> -> vector<2x256xf32>
    %272 = vector.extract_strided_slice %241 {offsets = [0, 16], sizes = [2, 16], strides = [1, 1]} : vector<2x32xf32> to vector<2x16xf32>
    %273 = tpu.concatenate %272, %272, %272, %272, %272, %272, %272, %272, %272, %272, %272, %272, %272, %272, %272, %272 in 1 : vector<2x16xf32>, vector<2x16xf32>, vector<2x16xf32>, vector<2x16xf32>, vector<2x16xf32>, vector<2x16xf32>, vector<2x16xf32>, vector<2x16xf32>, vector<2x16xf32>, vector<2x16xf32>, vector<2x16xf32>, vector<2x16xf32>, vector<2x16xf32>, vector<2x16xf32>, vector<2x16xf32>, vector<2x16xf32> -> vector<2x256xf32>
    %274 = vector.extract_strided_slice %244 {offsets = [0, 0], sizes = [2, 16], strides = [1, 1]} : vector<2x48xf32> to vector<2x16xf32>
    %275 = tpu.concatenate %274, %274, %274, %274, %274, %274, %274, %274, %274, %274, %274, %274, %274, %274, %274, %274 in 1 : vector<2x16xf32>, vector<2x16xf32>, vector<2x16xf32>, vector<2x16xf32>, vector<2x16xf32>, vector<2x16xf32>, vector<2x16xf32>, vector<2x16xf32>, vector<2x16xf32>, vector<2x16xf32>, vector<2x16xf32>, vector<2x16xf32>, vector<2x16xf32>, vector<2x16xf32>, vector<2x16xf32>, vector<2x16xf32> -> vector<2x256xf32>
    %276 = vector.extract_strided_slice %244 {offsets = [0, 16], sizes = [2, 16], strides = [1, 1]} : vector<2x48xf32> to vector<2x16xf32>
    %277 = tpu.concatenate %276, %276, %276, %276, %276, %276, %276, %276, %276, %276, %276, %276, %276, %276, %276, %276 in 1 : vector<2x16xf32>, vector<2x16xf32>, vector<2x16xf32>, vector<2x16xf32>, vector<2x16xf32>, vector<2x16xf32>, vector<2x16xf32>, vector<2x16xf32>, vector<2x16xf32>, vector<2x16xf32>, vector<2x16xf32>, vector<2x16xf32>, vector<2x16xf32>, vector<2x16xf32>, vector<2x16xf32>, vector<2x16xf32> -> vector<2x256xf32>
    %278 = vector.extract_strided_slice %244 {offsets = [0, 32], sizes = [2, 16], strides = [1, 1]} : vector<2x48xf32> to vector<2x16xf32>
    %279 = tpu.concatenate %278, %278, %278, %278, %278, %278, %278, %278, %278, %278, %278, %278, %278, %278, %278, %278 in 1 : vector<2x16xf32>, vector<2x16xf32>, vector<2x16xf32>, vector<2x16xf32>, vector<2x16xf32>, vector<2x16xf32>, vector<2x16xf32>, vector<2x16xf32>, vector<2x16xf32>, vector<2x16xf32>, vector<2x16xf32>, vector<2x16xf32>, vector<2x16xf32>, vector<2x16xf32>, vector<2x16xf32>, vector<2x16xf32> -> vector<2x256xf32>
    %280 = arith.mulf %266, %271 : vector<2x256xf32>
    %281 = arith.mulf %267, %273 : vector<2x256xf32>
    %282 = arith.addf %280, %281 : vector<2x256xf32>
    %283 = arith.mulf %268, %271 : vector<2x256xf32>
    %284 = arith.mulf %269, %273 : vector<2x256xf32>
    %285 = arith.addf %283, %284 : vector<2x256xf32>
    %286 = arith.mulf %266, %266 : vector<2x256xf32>
    %287 = arith.mulf %286, %275 : vector<2x256xf32>
    %288 = arith.mulf %266, %267 : vector<2x256xf32>
    %cst_62 = arith.constant 2.000000e+00 : f32
    %289 = vector.broadcast %cst_62 : f32 to vector<2x256xf32>
    %290 = arith.mulf %289, %288 : vector<2x256xf32>
    %291 = arith.mulf %290, %279 : vector<2x256xf32>
    %292 = arith.addf %287, %291 : vector<2x256xf32>
    %293 = arith.mulf %267, %267 : vector<2x256xf32>
    %294 = arith.mulf %293, %277 : vector<2x256xf32>
    %295 = arith.addf %292, %294 : vector<2x256xf32>
    %296 = arith.mulf %268, %268 : vector<2x256xf32>
    %297 = arith.mulf %296, %275 : vector<2x256xf32>
    %298 = arith.mulf %268, %269 : vector<2x256xf32>
    %cst_63 = arith.constant 2.000000e+00 : f32
    %299 = vector.broadcast %cst_63 : f32 to vector<2x256xf32>
    %300 = arith.mulf %299, %298 : vector<2x256xf32>
    %301 = arith.mulf %300, %279 : vector<2x256xf32>
    %302 = arith.addf %297, %301 : vector<2x256xf32>
    %303 = arith.mulf %269, %269 : vector<2x256xf32>
    %304 = arith.mulf %303, %277 : vector<2x256xf32>
    %305 = arith.addf %302, %304 : vector<2x256xf32>
    %306 = arith.mulf %268, %266 : vector<2x256xf32>
    %307 = arith.mulf %306, %275 : vector<2x256xf32>
    %308 = arith.mulf %269, %266 : vector<2x256xf32>
    %309 = arith.mulf %268, %267 : vector<2x256xf32>
    %310 = arith.addf %308, %309 : vector<2x256xf32>
    %311 = arith.mulf %310, %279 : vector<2x256xf32>
    %312 = arith.addf %307, %311 : vector<2x256xf32>
    %313 = arith.mulf %269, %267 : vector<2x256xf32>
    %314 = arith.mulf %313, %277 : vector<2x256xf32>
    %315 = arith.addf %312, %314 : vector<2x256xf32>
    %316 = tpu.concatenate %282, %285, %295, %305, %315 in 1 : vector<2x256xf32>, vector<2x256xf32>, vector<2x256xf32>, vector<2x256xf32>, vector<2x256xf32> -> vector<2x1280xf32>
    %cst_64 = arith.constant dense<0.000000e+00> : vector<2x80xf32>
    %317 = tpu.matmul %316, %8, %cst_64 {dimension_numbers = #tpu.dot_dimension_numbers<[1], [0], [0], [1], [0, 0, 1, 1], [], []>} : vector<2x1280xf32>, vector<1280x80xf32>, vector<2x80xf32> -> vector<2x80xf32>
    %318 = vector.extract_strided_slice %317 {offsets = [0, 0], sizes = [2, 32], strides = [1, 1]} : vector<2x80xf32> to vector<2x32xf32>
    %319 = arith.addf %318, %223 : vector<2x32xf32>
    %320 = vector.extract_strided_slice %317 {offsets = [0, 32], sizes = [2, 48], strides = [1, 1]} : vector<2x80xf32> to vector<2x48xf32>
    %321 = arith.addf %320, %9 : vector<2x48xf32>
    %322 = tpu.concatenate %241, %244, %319, %321 in 1 : vector<2x32xf32>, vector<2x48xf32>, vector<2x32xf32>, vector<2x48xf32> -> vector<2x160xf32>
    %c0_65 = arith.constant 0 : index
    %c320 = arith.constant 320 : index
    %323 = vector.load %arg15[%c0_65, %c320] : memref<2x1280xf32, #tpu.memory_space<vmem>>, vector<2x160xf32>
    tpu.vector_store %arg15[%c0_65, %c320], %322 {strides = array<i32>} : memref<2x1280xf32, #tpu.memory_space<vmem>>, vector<2x160xf32>,
    %c0_66 = arith.constant 0 : index
    %c48 = arith.constant 48 : index
    %324 = vector.load %arg2[%c0_66, %c48] : memref<2x128xf32, #tpu.memory_space<vmem>>, vector<2x16xf32>
    %c0_67 = arith.constant 0 : index
    %c48_68 = arith.constant 48 : index
    %325 = vector.load %arg3[%c0_67, %c48_68] : memref<2x128xf32, #tpu.memory_space<vmem>>, vector<2x16xf32>
    %c0_69 = arith.constant 0 : index
    %c48_70 = arith.constant 48 : index
    %326 = vector.load %arg4[%c0_69, %c48_70] : memref<2x128xf32, #tpu.memory_space<vmem>>, vector<2x16xf32>
    %c0_71 = arith.constant 0 : index
    %c96 = arith.constant 96 : index
    %327 = vector.load %arg5[%c0_71, %c96] : memref<2x256xf32, #tpu.memory_space<vmem>>, vector<2x32xf32>
    %328 = vector.extract_strided_slice %321 {offsets = [0, 0], sizes = [2, 16], strides = [1, 1]} : vector<2x48xf32> to vector<2x16xf32>
    %329 = vector.extract_strided_slice %321 {offsets = [0, 32], sizes = [2, 16], strides = [1, 1]} : vector<2x48xf32> to vector<2x16xf32>
    %330 = arith.addf %328, %325 : vector<2x16xf32>
    %331 = tpu.reciprocal %330 {approx = true} : vector<2x16xf32> -> vector<2x16xf32>
    %332 = arith.mulf %328, %331 : vector<2x16xf32>
    %333 = arith.mulf %329, %331 : vector<2x16xf32>
    %334 = vector.extract_strided_slice %319 {offsets = [0, 0], sizes = [2, 16], strides = [1, 1]} : vector<2x32xf32> to vector<2x16xf32>
    %335 = arith.subf %324, %334 : vector<2x16xf32>
    %336 = arith.mulf %332, %335 : vector<2x16xf32>
    %337 = arith.mulf %333, %335 : vector<2x16xf32>
    %338 = tpu.concatenate %336, %337 in 1 : vector<2x16xf32>, vector<2x16xf32> -> vector<2x32xf32>
    %339 = arith.mulf %332, %328 : vector<2x16xf32>
    %340 = arith.mulf %333, %329 : vector<2x16xf32>
    %341 = arith.mulf %332, %329 : vector<2x16xf32>
    %342 = tpu.concatenate %339, %340, %341 in 1 : vector<2x16xf32>, vector<2x16xf32>, vector<2x16xf32> -> vector<2x48xf32>
    %343 = tpu.concatenate %326, %326 in 1 : vector<2x16xf32>, vector<2x16xf32> -> vector<2x32xf32>
    %344 = arith.mulf %343, %338 : vector<2x32xf32>
    %345 = arith.addf %319, %344 : vector<2x32xf32>
    %346 = tpu.concatenate %326, %326, %326 in 1 : vector<2x16xf32>, vector<2x16xf32>, vector<2x16xf32> -> vector<2x48xf32>
    %347 = arith.mulf %346, %342 : vector<2x48xf32>
    %348 = arith.subf %321, %347 : vector<2x48xf32>
    %349 = arith.truncf %345 : vector<2x32xf32> to vector<2x32xbf16>
    %cst_72 = arith.constant dense<0.000000e+00> : vector<2x120xf32>
    %350 = tpu.matmul %349, %3, %cst_72 {dimension_numbers = #tpu.dot_dimension_numbers<[1], [0], [0], [1], [0, 0, 1, 1], [], []>} : vector<2x32xbf16>, vector<32x120xbf16>, vector<2x120xf32> -> vector<2x120xf32>
    %351 = vector.broadcast %4 : vector<1x120xf32> to vector<2x120xf32>
    %352 = arith.addf %350, %351 : vector<2x120xf32>
    %353 = math.tanh %352 : vector<2x120xf32>
    %354 = arith.truncf %353 : vector<2x120xf32> to vector<2x120xbf16>
    %cst_73 = arith.constant dense<0.000000e+00> : vector<2x15xf32>
    %355 = tpu.matmul %354, %5, %cst_73 {dimension_numbers = #tpu.dot_dimension_numbers<[1], [0], [0], [1], [0, 0, 1, 1], [], []>} : vector<2x120xbf16>, vector<120x15xbf16>, vector<2x15xf32> -> vector<2x15xf32>
    %356 = vector.broadcast %6 : vector<1x15xf32> to vector<2x15xf32>
    %357 = arith.addf %355, %356 : vector<2x15xf32>
    %cst_74 = arith.constant dense<0xFF800000> : vector<2xf32>
    %358 = vector.multi_reduction <maximumf>, %357, %cst_74 [1] : vector<2x15xf32> to vector<2xf32>
    %359 = vector.shape_cast %358 : vector<2xf32> to vector<2x1xf32>
    %360 = vector.broadcast %359 : vector<2x1xf32> to vector<2x15xf32>
    %361 = arith.subf %357, %360 : vector<2x15xf32>
    %362 = math.exp %361 : vector<2x15xf32>
    %cst_75 = arith.constant dense<0.000000e+00> : vector<2xf32>
    %363 = vector.multi_reduction <add>, %362, %cst_75 [1] : vector<2x15xf32> to vector<2xf32>
    %364 = vector.shape_cast %363 : vector<2xf32> to vector<2x1xf32>
    %365 = tpu.reciprocal %364 {approx = true} : vector<2x1xf32> -> vector<2x1xf32>
    %366 = vector.broadcast %365 : vector<2x1xf32> to vector<2x15xf32>
    %367 = arith.mulf %362, %366 : vector<2x15xf32>
    %368 = arith.truncf %367 : vector<2x15xf32> to vector<2x15xbf16>
    %cst_76 = arith.constant dense<0.000000e+00> : vector<2x1024xf32>
    %369 = tpu.matmul %368, %7, %cst_76 {dimension_numbers = #tpu.dot_dimension_numbers<[1], [0], [0], [1], [0, 0, 1, 1], [], []>} : vector<2x15xbf16>, vector<15x1024xbf16>, vector<2x1024xf32> -> vector<2x1024xf32>
    %370 = vector.extract_strided_slice %369 {offsets = [0, 0], sizes = [2, 256], strides = [1, 1]} : vector<2x1024xf32> to vector<2x256xf32>
    %371 = vector.extract_strided_slice %369 {offsets = [0, 256], sizes = [2, 256], strides = [1, 1]} : vector<2x1024xf32> to vector<2x256xf32>
    %372 = vector.extract_strided_slice %369 {offsets = [0, 512], sizes = [2, 256], strides = [1, 1]} : vector<2x1024xf32> to vector<2x256xf32>
    %373 = vector.extract_strided_slice %369 {offsets = [0, 768], sizes = [2, 256], strides = [1, 1]} : vector<2x1024xf32> to vector<2x256xf32>
    %374 = vector.extract_strided_slice %345 {offsets = [0, 0], sizes = [2, 16], strides = [1, 1]} : vector<2x32xf32> to vector<2x16xf32>
    %375 = tpu.concatenate %374, %374, %374, %374, %374, %374, %374, %374, %374, %374, %374, %374, %374, %374, %374, %374 in 1 : vector<2x16xf32>, vector<2x16xf32>, vector<2x16xf32>, vector<2x16xf32>, vector<2x16xf32>, vector<2x16xf32>, vector<2x16xf32>, vector<2x16xf32>, vector<2x16xf32>, vector<2x16xf32>, vector<2x16xf32>, vector<2x16xf32>, vector<2x16xf32>, vector<2x16xf32>, vector<2x16xf32>, vector<2x16xf32> -> vector<2x256xf32>
    %376 = vector.extract_strided_slice %345 {offsets = [0, 16], sizes = [2, 16], strides = [1, 1]} : vector<2x32xf32> to vector<2x16xf32>
    %377 = tpu.concatenate %376, %376, %376, %376, %376, %376, %376, %376, %376, %376, %376, %376, %376, %376, %376, %376 in 1 : vector<2x16xf32>, vector<2x16xf32>, vector<2x16xf32>, vector<2x16xf32>, vector<2x16xf32>, vector<2x16xf32>, vector<2x16xf32>, vector<2x16xf32>, vector<2x16xf32>, vector<2x16xf32>, vector<2x16xf32>, vector<2x16xf32>, vector<2x16xf32>, vector<2x16xf32>, vector<2x16xf32>, vector<2x16xf32> -> vector<2x256xf32>
    %378 = vector.extract_strided_slice %348 {offsets = [0, 0], sizes = [2, 16], strides = [1, 1]} : vector<2x48xf32> to vector<2x16xf32>
    %379 = tpu.concatenate %378, %378, %378, %378, %378, %378, %378, %378, %378, %378, %378, %378, %378, %378, %378, %378 in 1 : vector<2x16xf32>, vector<2x16xf32>, vector<2x16xf32>, vector<2x16xf32>, vector<2x16xf32>, vector<2x16xf32>, vector<2x16xf32>, vector<2x16xf32>, vector<2x16xf32>, vector<2x16xf32>, vector<2x16xf32>, vector<2x16xf32>, vector<2x16xf32>, vector<2x16xf32>, vector<2x16xf32>, vector<2x16xf32> -> vector<2x256xf32>
    %380 = vector.extract_strided_slice %348 {offsets = [0, 16], sizes = [2, 16], strides = [1, 1]} : vector<2x48xf32> to vector<2x16xf32>
    %381 = tpu.concatenate %380, %380, %380, %380, %380, %380, %380, %380, %380, %380, %380, %380, %380, %380, %380, %380 in 1 : vector<2x16xf32>, vector<2x16xf32>, vector<2x16xf32>, vector<2x16xf32>, vector<2x16xf32>, vector<2x16xf32>, vector<2x16xf32>, vector<2x16xf32>, vector<2x16xf32>, vector<2x16xf32>, vector<2x16xf32>, vector<2x16xf32>, vector<2x16xf32>, vector<2x16xf32>, vector<2x16xf32>, vector<2x16xf32> -> vector<2x256xf32>
    %382 = vector.extract_strided_slice %348 {offsets = [0, 32], sizes = [2, 16], strides = [1, 1]} : vector<2x48xf32> to vector<2x16xf32>
    %383 = tpu.concatenate %382, %382, %382, %382, %382, %382, %382, %382, %382, %382, %382, %382, %382, %382, %382, %382 in 1 : vector<2x16xf32>, vector<2x16xf32>, vector<2x16xf32>, vector<2x16xf32>, vector<2x16xf32>, vector<2x16xf32>, vector<2x16xf32>, vector<2x16xf32>, vector<2x16xf32>, vector<2x16xf32>, vector<2x16xf32>, vector<2x16xf32>, vector<2x16xf32>, vector<2x16xf32>, vector<2x16xf32>, vector<2x16xf32> -> vector<2x256xf32>
    %384 = arith.mulf %370, %375 : vector<2x256xf32>
    %385 = arith.mulf %371, %377 : vector<2x256xf32>
    %386 = arith.addf %384, %385 : vector<2x256xf32>
    %387 = arith.mulf %372, %375 : vector<2x256xf32>
    %388 = arith.mulf %373, %377 : vector<2x256xf32>
    %389 = arith.addf %387, %388 : vector<2x256xf32>
    %390 = arith.mulf %370, %370 : vector<2x256xf32>
    %391 = arith.mulf %390, %379 : vector<2x256xf32>
    %392 = arith.mulf %370, %371 : vector<2x256xf32>
    %cst_77 = arith.constant 2.000000e+00 : f32
    %393 = vector.broadcast %cst_77 : f32 to vector<2x256xf32>
    %394 = arith.mulf %393, %392 : vector<2x256xf32>
    %395 = arith.mulf %394, %383 : vector<2x256xf32>
    %396 = arith.addf %391, %395 : vector<2x256xf32>
    %397 = arith.mulf %371, %371 : vector<2x256xf32>
    %398 = arith.mulf %397, %381 : vector<2x256xf32>
    %399 = arith.addf %396, %398 : vector<2x256xf32>
    %400 = arith.mulf %372, %372 : vector<2x256xf32>
    %401 = arith.mulf %400, %379 : vector<2x256xf32>
    %402 = arith.mulf %372, %373 : vector<2x256xf32>
    %cst_78 = arith.constant 2.000000e+00 : f32
    %403 = vector.broadcast %cst_78 : f32 to vector<2x256xf32>
    %404 = arith.mulf %403, %402 : vector<2x256xf32>
    %405 = arith.mulf %404, %383 : vector<2x256xf32>
    %406 = arith.addf %401, %405 : vector<2x256xf32>
    %407 = arith.mulf %373, %373 : vector<2x256xf32>
    %408 = arith.mulf %407, %381 : vector<2x256xf32>
    %409 = arith.addf %406, %408 : vector<2x256xf32>
    %410 = arith.mulf %372, %370 : vector<2x256xf32>
    %411 = arith.mulf %410, %379 : vector<2x256xf32>
    %412 = arith.mulf %373, %370 : vector<2x256xf32>
    %413 = arith.mulf %372, %371 : vector<2x256xf32>
    %414 = arith.addf %412, %413 : vector<2x256xf32>
    %415 = arith.mulf %414, %383 : vector<2x256xf32>
    %416 = arith.addf %411, %415 : vector<2x256xf32>
    %417 = arith.mulf %373, %371 : vector<2x256xf32>
    %418 = arith.mulf %417, %381 : vector<2x256xf32>
    %419 = arith.addf %416, %418 : vector<2x256xf32>
    %420 = tpu.concatenate %386, %389, %399, %409, %419 in 1 : vector<2x256xf32>, vector<2x256xf32>, vector<2x256xf32>, vector<2x256xf32>, vector<2x256xf32> -> vector<2x1280xf32>
    %cst_79 = arith.constant dense<0.000000e+00> : vector<2x80xf32>
    %421 = tpu.matmul %420, %8, %cst_79 {dimension_numbers = #tpu.dot_dimension_numbers<[1], [0], [0], [1], [0, 0, 1, 1], [], []>} : vector<2x1280xf32>, vector<1280x80xf32>, vector<2x80xf32> -> vector<2x80xf32>
    %422 = vector.extract_strided_slice %421 {offsets = [0, 0], sizes = [2, 32], strides = [1, 1]} : vector<2x80xf32> to vector<2x32xf32>
    %423 = arith.addf %422, %327 : vector<2x32xf32>
    %424 = vector.extract_strided_slice %421 {offsets = [0, 32], sizes = [2, 48], strides = [1, 1]} : vector<2x80xf32> to vector<2x48xf32>
    %425 = arith.addf %424, %9 : vector<2x48xf32>
    %426 = tpu.concatenate %345, %348, %423, %425 in 1 : vector<2x32xf32>, vector<2x48xf32>, vector<2x32xf32>, vector<2x48xf32> -> vector<2x160xf32>
    %c0_80 = arith.constant 0 : index
    %c480 = arith.constant 480 : index
    %427 = vector.load %arg15[%c0_80, %c480] : memref<2x1280xf32, #tpu.memory_space<vmem>>, vector<2x160xf32>
    tpu.vector_store %arg15[%c0_80, %c480], %426 {strides = array<i32>} : memref<2x1280xf32, #tpu.memory_space<vmem>>, vector<2x160xf32>,
    %c0_81 = arith.constant 0 : index
    %c64_82 = arith.constant 64 : index
    %428 = vector.load %arg2[%c0_81, %c64_82] : memref<2x128xf32, #tpu.memory_space<vmem>>, vector<2x16xf32>
    %c0_83 = arith.constant 0 : index
    %c64_84 = arith.constant 64 : index
    %429 = vector.load %arg3[%c0_83, %c64_84] : memref<2x128xf32, #tpu.memory_space<vmem>>, vector<2x16xf32>
    %c0_85 = arith.constant 0 : index
    %c64_86 = arith.constant 64 : index
    %430 = vector.load %arg4[%c0_85, %c64_86] : memref<2x128xf32, #tpu.memory_space<vmem>>, vector<2x16xf32>
    %c0_87 = arith.constant 0 : index
    %c128 = arith.constant 128 : index
    %431 = vector.load %arg5[%c0_87, %c128] : memref<2x256xf32, #tpu.memory_space<vmem>>, vector<2x32xf32>
    %432 = vector.extract_strided_slice %425 {offsets = [0, 0], sizes = [2, 16], strides = [1, 1]} : vector<2x48xf32> to vector<2x16xf32>
    %433 = vector.extract_strided_slice %425 {offsets = [0, 32], sizes = [2, 16], strides = [1, 1]} : vector<2x48xf32> to vector<2x16xf32>
    %434 = arith.addf %432, %429 : vector<2x16xf32>
    %435 = tpu.reciprocal %434 {approx = true} : vector<2x16xf32> -> vector<2x16xf32>
    %436 = arith.mulf %432, %435 : vector<2x16xf32>
    %437 = arith.mulf %433, %435 : vector<2x16xf32>
    %438 = vector.extract_strided_slice %423 {offsets = [0, 0], sizes = [2, 16], strides = [1, 1]} : vector<2x32xf32> to vector<2x16xf32>
    %439 = arith.subf %428, %438 : vector<2x16xf32>
    %440 = arith.mulf %436, %439 : vector<2x16xf32>
    %441 = arith.mulf %437, %439 : vector<2x16xf32>
    %442 = tpu.concatenate %440, %441 in 1 : vector<2x16xf32>, vector<2x16xf32> -> vector<2x32xf32>
    %443 = arith.mulf %436, %432 : vector<2x16xf32>
    %444 = arith.mulf %437, %433 : vector<2x16xf32>
    %445 = arith.mulf %436, %433 : vector<2x16xf32>
    %446 = tpu.concatenate %443, %444, %445 in 1 : vector<2x16xf32>, vector<2x16xf32>, vector<2x16xf32> -> vector<2x48xf32>
    %447 = tpu.concatenate %430, %430 in 1 : vector<2x16xf32>, vector<2x16xf32> -> vector<2x32xf32>
    %448 = arith.mulf %447, %442 : vector<2x32xf32>
    %449 = arith.addf %423, %448 : vector<2x32xf32>
    %450 = tpu.concatenate %430, %430, %430 in 1 : vector<2x16xf32>, vector<2x16xf32>, vector<2x16xf32> -> vector<2x48xf32>
    %451 = arith.mulf %450, %446 : vector<2x48xf32>
    %452 = arith.subf %425, %451 : vector<2x48xf32>
    %453 = arith.truncf %449 : vector<2x32xf32> to vector<2x32xbf16>
    %cst_88 = arith.constant dense<0.000000e+00> : vector<2x120xf32>
    %454 = tpu.matmul %453, %3, %cst_88 {dimension_numbers = #tpu.dot_dimension_numbers<[1], [0], [0], [1], [0, 0, 1, 1], [], []>} : vector<2x32xbf16>, vector<32x120xbf16>, vector<2x120xf32> -> vector<2x120xf32>
    %455 = vector.broadcast %4 : vector<1x120xf32> to vector<2x120xf32>
    %456 = arith.addf %454, %455 : vector<2x120xf32>
    %457 = math.tanh %456 : vector<2x120xf32>
    %458 = arith.truncf %457 : vector<2x120xf32> to vector<2x120xbf16>
    %cst_89 = arith.constant dense<0.000000e+00> : vector<2x15xf32>
    %459 = tpu.matmul %458, %5, %cst_89 {dimension_numbers = #tpu.dot_dimension_numbers<[1], [0], [0], [1], [0, 0, 1, 1], [], []>} : vector<2x120xbf16>, vector<120x15xbf16>, vector<2x15xf32> -> vector<2x15xf32>
    %460 = vector.broadcast %6 : vector<1x15xf32> to vector<2x15xf32>
    %461 = arith.addf %459, %460 : vector<2x15xf32>
    %cst_90 = arith.constant dense<0xFF800000> : vector<2xf32>
    %462 = vector.multi_reduction <maximumf>, %461, %cst_90 [1] : vector<2x15xf32> to vector<2xf32>
    %463 = vector.shape_cast %462 : vector<2xf32> to vector<2x1xf32>
    %464 = vector.broadcast %463 : vector<2x1xf32> to vector<2x15xf32>
    %465 = arith.subf %461, %464 : vector<2x15xf32>
    %466 = math.exp %465 : vector<2x15xf32>
    %cst_91 = arith.constant dense<0.000000e+00> : vector<2xf32>
    %467 = vector.multi_reduction <add>, %466, %cst_91 [1] : vector<2x15xf32> to vector<2xf32>
    %468 = vector.shape_cast %467 : vector<2xf32> to vector<2x1xf32>
    %469 = tpu.reciprocal %468 {approx = true} : vector<2x1xf32> -> vector<2x1xf32>
    %470 = vector.broadcast %469 : vector<2x1xf32> to vector<2x15xf32>
    %471 = arith.mulf %466, %470 : vector<2x15xf32>
    %472 = arith.truncf %471 : vector<2x15xf32> to vector<2x15xbf16>
    %cst_92 = arith.constant dense<0.000000e+00> : vector<2x1024xf32>
    %473 = tpu.matmul %472, %7, %cst_92 {dimension_numbers = #tpu.dot_dimension_numbers<[1], [0], [0], [1], [0, 0, 1, 1], [], []>} : vector<2x15xbf16>, vector<15x1024xbf16>, vector<2x1024xf32> -> vector<2x1024xf32>
    %474 = vector.extract_strided_slice %473 {offsets = [0, 0], sizes = [2, 256], strides = [1, 1]} : vector<2x1024xf32> to vector<2x256xf32>
    %475 = vector.extract_strided_slice %473 {offsets = [0, 256], sizes = [2, 256], strides = [1, 1]} : vector<2x1024xf32> to vector<2x256xf32>
    %476 = vector.extract_strided_slice %473 {offsets = [0, 512], sizes = [2, 256], strides = [1, 1]} : vector<2x1024xf32> to vector<2x256xf32>
    %477 = vector.extract_strided_slice %473 {offsets = [0, 768], sizes = [2, 256], strides = [1, 1]} : vector<2x1024xf32> to vector<2x256xf32>
    %478 = vector.extract_strided_slice %449 {offsets = [0, 0], sizes = [2, 16], strides = [1, 1]} : vector<2x32xf32> to vector<2x16xf32>
    %479 = tpu.concatenate %478, %478, %478, %478, %478, %478, %478, %478, %478, %478, %478, %478, %478, %478, %478, %478 in 1 : vector<2x16xf32>, vector<2x16xf32>, vector<2x16xf32>, vector<2x16xf32>, vector<2x16xf32>, vector<2x16xf32>, vector<2x16xf32>, vector<2x16xf32>, vector<2x16xf32>, vector<2x16xf32>, vector<2x16xf32>, vector<2x16xf32>, vector<2x16xf32>, vector<2x16xf32>, vector<2x16xf32>, vector<2x16xf32> -> vector<2x256xf32>
    %480 = vector.extract_strided_slice %449 {offsets = [0, 16], sizes = [2, 16], strides = [1, 1]} : vector<2x32xf32> to vector<2x16xf32>
    %481 = tpu.concatenate %480, %480, %480, %480, %480, %480, %480, %480, %480, %480, %480, %480, %480, %480, %480, %480 in 1 : vector<2x16xf32>, vector<2x16xf32>, vector<2x16xf32>, vector<2x16xf32>, vector<2x16xf32>, vector<2x16xf32>, vector<2x16xf32>, vector<2x16xf32>, vector<2x16xf32>, vector<2x16xf32>, vector<2x16xf32>, vector<2x16xf32>, vector<2x16xf32>, vector<2x16xf32>, vector<2x16xf32>, vector<2x16xf32> -> vector<2x256xf32>
    %482 = vector.extract_strided_slice %452 {offsets = [0, 0], sizes = [2, 16], strides = [1, 1]} : vector<2x48xf32> to vector<2x16xf32>
    %483 = tpu.concatenate %482, %482, %482, %482, %482, %482, %482, %482, %482, %482, %482, %482, %482, %482, %482, %482 in 1 : vector<2x16xf32>, vector<2x16xf32>, vector<2x16xf32>, vector<2x16xf32>, vector<2x16xf32>, vector<2x16xf32>, vector<2x16xf32>, vector<2x16xf32>, vector<2x16xf32>, vector<2x16xf32>, vector<2x16xf32>, vector<2x16xf32>, vector<2x16xf32>, vector<2x16xf32>, vector<2x16xf32>, vector<2x16xf32> -> vector<2x256xf32>
    %484 = vector.extract_strided_slice %452 {offsets = [0, 16], sizes = [2, 16], strides = [1, 1]} : vector<2x48xf32> to vector<2x16xf32>
    %485 = tpu.concatenate %484, %484, %484, %484, %484, %484, %484, %484, %484, %484, %484, %484, %484, %484, %484, %484 in 1 : vector<2x16xf32>, vector<2x16xf32>, vector<2x16xf32>, vector<2x16xf32>, vector<2x16xf32>, vector<2x16xf32>, vector<2x16xf32>, vector<2x16xf32>, vector<2x16xf32>, vector<2x16xf32>, vector<2x16xf32>, vector<2x16xf32>, vector<2x16xf32>, vector<2x16xf32>, vector<2x16xf32>, vector<2x16xf32> -> vector<2x256xf32>
    %486 = vector.extract_strided_slice %452 {offsets = [0, 32], sizes = [2, 16], strides = [1, 1]} : vector<2x48xf32> to vector<2x16xf32>
    %487 = tpu.concatenate %486, %486, %486, %486, %486, %486, %486, %486, %486, %486, %486, %486, %486, %486, %486, %486 in 1 : vector<2x16xf32>, vector<2x16xf32>, vector<2x16xf32>, vector<2x16xf32>, vector<2x16xf32>, vector<2x16xf32>, vector<2x16xf32>, vector<2x16xf32>, vector<2x16xf32>, vector<2x16xf32>, vector<2x16xf32>, vector<2x16xf32>, vector<2x16xf32>, vector<2x16xf32>, vector<2x16xf32>, vector<2x16xf32> -> vector<2x256xf32>
    %488 = arith.mulf %474, %479 : vector<2x256xf32>
    %489 = arith.mulf %475, %481 : vector<2x256xf32>
    %490 = arith.addf %488, %489 : vector<2x256xf32>
    %491 = arith.mulf %476, %479 : vector<2x256xf32>
    %492 = arith.mulf %477, %481 : vector<2x256xf32>
    %493 = arith.addf %491, %492 : vector<2x256xf32>
    %494 = arith.mulf %474, %474 : vector<2x256xf32>
    %495 = arith.mulf %494, %483 : vector<2x256xf32>
    %496 = arith.mulf %474, %475 : vector<2x256xf32>
    %cst_93 = arith.constant 2.000000e+00 : f32
    %497 = vector.broadcast %cst_93 : f32 to vector<2x256xf32>
    %498 = arith.mulf %497, %496 : vector<2x256xf32>
    %499 = arith.mulf %498, %487 : vector<2x256xf32>
    %500 = arith.addf %495, %499 : vector<2x256xf32>
    %501 = arith.mulf %475, %475 : vector<2x256xf32>
    %502 = arith.mulf %501, %485 : vector<2x256xf32>
    %503 = arith.addf %500, %502 : vector<2x256xf32>
    %504 = arith.mulf %476, %476 : vector<2x256xf32>
    %505 = arith.mulf %504, %483 : vector<2x256xf32>
    %506 = arith.mulf %476, %477 : vector<2x256xf32>
    %cst_94 = arith.constant 2.000000e+00 : f32
    %507 = vector.broadcast %cst_94 : f32 to vector<2x256xf32>
    %508 = arith.mulf %507, %506 : vector<2x256xf32>
    %509 = arith.mulf %508, %487 : vector<2x256xf32>
    %510 = arith.addf %505, %509 : vector<2x256xf32>
    %511 = arith.mulf %477, %477 : vector<2x256xf32>
    %512 = arith.mulf %511, %485 : vector<2x256xf32>
    %513 = arith.addf %510, %512 : vector<2x256xf32>
    %514 = arith.mulf %476, %474 : vector<2x256xf32>
    %515 = arith.mulf %514, %483 : vector<2x256xf32>
    %516 = arith.mulf %477, %474 : vector<2x256xf32>
    %517 = arith.mulf %476, %475 : vector<2x256xf32>
    %518 = arith.addf %516, %517 : vector<2x256xf32>
    %519 = arith.mulf %518, %487 : vector<2x256xf32>
    %520 = arith.addf %515, %519 : vector<2x256xf32>
    %521 = arith.mulf %477, %475 : vector<2x256xf32>
    %522 = arith.mulf %521, %485 : vector<2x256xf32>
    %523 = arith.addf %520, %522 : vector<2x256xf32>
    %524 = tpu.concatenate %490, %493, %503, %513, %523 in 1 : vector<2x256xf32>, vector<2x256xf32>, vector<2x256xf32>, vector<2x256xf32>, vector<2x256xf32> -> vector<2x1280xf32>
    %cst_95 = arith.constant dense<0.000000e+00> : vector<2x80xf32>
    %525 = tpu.matmul %524, %8, %cst_95 {dimension_numbers = #tpu.dot_dimension_numbers<[1], [0], [0], [1], [0, 0, 1, 1], [], []>} : vector<2x1280xf32>, vector<1280x80xf32>, vector<2x80xf32> -> vector<2x80xf32>
    %526 = vector.extract_strided_slice %525 {offsets = [0, 0], sizes = [2, 32], strides = [1, 1]} : vector<2x80xf32> to vector<2x32xf32>
    %527 = arith.addf %526, %431 : vector<2x32xf32>
    %528 = vector.extract_strided_slice %525 {offsets = [0, 32], sizes = [2, 48], strides = [1, 1]} : vector<2x80xf32> to vector<2x48xf32>
    %529 = arith.addf %528, %9 : vector<2x48xf32>
    %530 = tpu.concatenate %449, %452, %527, %529 in 1 : vector<2x32xf32>, vector<2x48xf32>, vector<2x32xf32>, vector<2x48xf32> -> vector<2x160xf32>
    %c0_96 = arith.constant 0 : index
    %c640 = arith.constant 640 : index
    %531 = vector.load %arg15[%c0_96, %c640] : memref<2x1280xf32, #tpu.memory_space<vmem>>, vector<2x160xf32>
    tpu.vector_store %arg15[%c0_96, %c640], %530 {strides = array<i32>} : memref<2x1280xf32, #tpu.memory_space<vmem>>, vector<2x160xf32>,
    %c0_97 = arith.constant 0 : index
    %c80 = arith.constant 80 : index
    %532 = vector.load %arg2[%c0_97, %c80] : memref<2x128xf32, #tpu.memory_space<vmem>>, vector<2x16xf32>
    %c0_98 = arith.constant 0 : index
    %c80_99 = arith.constant 80 : index
    %533 = vector.load %arg3[%c0_98, %c80_99] : memref<2x128xf32, #tpu.memory_space<vmem>>, vector<2x16xf32>
    %c0_100 = arith.constant 0 : index
    %c80_101 = arith.constant 80 : index
    %534 = vector.load %arg4[%c0_100, %c80_101] : memref<2x128xf32, #tpu.memory_space<vmem>>, vector<2x16xf32>
    %c0_102 = arith.constant 0 : index
    %c160_103 = arith.constant 160 : index
    %535 = vector.load %arg5[%c0_102, %c160_103] : memref<2x256xf32, #tpu.memory_space<vmem>>, vector<2x32xf32>
    %536 = vector.extract_strided_slice %529 {offsets = [0, 0], sizes = [2, 16], strides = [1, 1]} : vector<2x48xf32> to vector<2x16xf32>
    %537 = vector.extract_strided_slice %529 {offsets = [0, 32], sizes = [2, 16], strides = [1, 1]} : vector<2x48xf32> to vector<2x16xf32>
    %538 = arith.addf %536, %533 : vector<2x16xf32>
    %539 = tpu.reciprocal %538 {approx = true} : vector<2x16xf32> -> vector<2x16xf32>
    %540 = arith.mulf %536, %539 : vector<2x16xf32>
    %541 = arith.mulf %537, %539 : vector<2x16xf32>
    %542 = vector.extract_strided_slice %527 {offsets = [0, 0], sizes = [2, 16], strides = [1, 1]} : vector<2x32xf32> to vector<2x16xf32>
    %543 = arith.subf %532, %542 : vector<2x16xf32>
    %544 = arith.mulf %540, %543 : vector<2x16xf32>
    %545 = arith.mulf %541, %543 : vector<2x16xf32>
    %546 = tpu.concatenate %544, %545 in 1 : vector<2x16xf32>, vector<2x16xf32> -> vector<2x32xf32>
    %547 = arith.mulf %540, %536 : vector<2x16xf32>
    %548 = arith.mulf %541, %537 : vector<2x16xf32>
    %549 = arith.mulf %540, %537 : vector<2x16xf32>
    %550 = tpu.concatenate %547, %548, %549 in 1 : vector<2x16xf32>, vector<2x16xf32>, vector<2x16xf32> -> vector<2x48xf32>
    %551 = tpu.concatenate %534, %534 in 1 : vector<2x16xf32>, vector<2x16xf32> -> vector<2x32xf32>
    %552 = arith.mulf %551, %546 : vector<2x32xf32>
    %553 = arith.addf %527, %552 : vector<2x32xf32>
    %554 = tpu.concatenate %534, %534, %534 in 1 : vector<2x16xf32>, vector<2x16xf32>, vector<2x16xf32> -> vector<2x48xf32>
    %555 = arith.mulf %554, %550 : vector<2x48xf32>
    %556 = arith.subf %529, %555 : vector<2x48xf32>
    %557 = arith.truncf %553 : vector<2x32xf32> to vector<2x32xbf16>
    %cst_104 = arith.constant dense<0.000000e+00> : vector<2x120xf32>
    %558 = tpu.matmul %557, %3, %cst_104 {dimension_numbers = #tpu.dot_dimension_numbers<[1], [0], [0], [1], [0, 0, 1, 1], [], []>} : vector<2x32xbf16>, vector<32x120xbf16>, vector<2x120xf32> -> vector<2x120xf32>
    %559 = vector.broadcast %4 : vector<1x120xf32> to vector<2x120xf32>
    %560 = arith.addf %558, %559 : vector<2x120xf32>
    %561 = math.tanh %560 : vector<2x120xf32>
    %562 = arith.truncf %561 : vector<2x120xf32> to vector<2x120xbf16>
    %cst_105 = arith.constant dense<0.000000e+00> : vector<2x15xf32>
    %563 = tpu.matmul %562, %5, %cst_105 {dimension_numbers = #tpu.dot_dimension_numbers<[1], [0], [0], [1], [0, 0, 1, 1], [], []>} : vector<2x120xbf16>, vector<120x15xbf16>, vector<2x15xf32> -> vector<2x15xf32>
    %564 = vector.broadcast %6 : vector<1x15xf32> to vector<2x15xf32>
    %565 = arith.addf %563, %564 : vector<2x15xf32>
    %cst_106 = arith.constant dense<0xFF800000> : vector<2xf32>
    %566 = vector.multi_reduction <maximumf>, %565, %cst_106 [1] : vector<2x15xf32> to vector<2xf32>
    %567 = vector.shape_cast %566 : vector<2xf32> to vector<2x1xf32>
    %568 = vector.broadcast %567 : vector<2x1xf32> to vector<2x15xf32>
    %569 = arith.subf %565, %568 : vector<2x15xf32>
    %570 = math.exp %569 : vector<2x15xf32>
    %cst_107 = arith.constant dense<0.000000e+00> : vector<2xf32>
    %571 = vector.multi_reduction <add>, %570, %cst_107 [1] : vector<2x15xf32> to vector<2xf32>
    %572 = vector.shape_cast %571 : vector<2xf32> to vector<2x1xf32>
    %573 = tpu.reciprocal %572 {approx = true} : vector<2x1xf32> -> vector<2x1xf32>
    %574 = vector.broadcast %573 : vector<2x1xf32> to vector<2x15xf32>
    %575 = arith.mulf %570, %574 : vector<2x15xf32>
    %576 = arith.truncf %575 : vector<2x15xf32> to vector<2x15xbf16>
    %cst_108 = arith.constant dense<0.000000e+00> : vector<2x1024xf32>
    %577 = tpu.matmul %576, %7, %cst_108 {dimension_numbers = #tpu.dot_dimension_numbers<[1], [0], [0], [1], [0, 0, 1, 1], [], []>} : vector<2x15xbf16>, vector<15x1024xbf16>, vector<2x1024xf32> -> vector<2x1024xf32>
    %578 = vector.extract_strided_slice %577 {offsets = [0, 0], sizes = [2, 256], strides = [1, 1]} : vector<2x1024xf32> to vector<2x256xf32>
    %579 = vector.extract_strided_slice %577 {offsets = [0, 256], sizes = [2, 256], strides = [1, 1]} : vector<2x1024xf32> to vector<2x256xf32>
    %580 = vector.extract_strided_slice %577 {offsets = [0, 512], sizes = [2, 256], strides = [1, 1]} : vector<2x1024xf32> to vector<2x256xf32>
    %581 = vector.extract_strided_slice %577 {offsets = [0, 768], sizes = [2, 256], strides = [1, 1]} : vector<2x1024xf32> to vector<2x256xf32>
    %582 = vector.extract_strided_slice %553 {offsets = [0, 0], sizes = [2, 16], strides = [1, 1]} : vector<2x32xf32> to vector<2x16xf32>
    %583 = tpu.concatenate %582, %582, %582, %582, %582, %582, %582, %582, %582, %582, %582, %582, %582, %582, %582, %582 in 1 : vector<2x16xf32>, vector<2x16xf32>, vector<2x16xf32>, vector<2x16xf32>, vector<2x16xf32>, vector<2x16xf32>, vector<2x16xf32>, vector<2x16xf32>, vector<2x16xf32>, vector<2x16xf32>, vector<2x16xf32>, vector<2x16xf32>, vector<2x16xf32>, vector<2x16xf32>, vector<2x16xf32>, vector<2x16xf32> -> vector<2x256xf32>
    %584 = vector.extract_strided_slice %553 {offsets = [0, 16], sizes = [2, 16], strides = [1, 1]} : vector<2x32xf32> to vector<2x16xf32>
    %585 = tpu.concatenate %584, %584, %584, %584, %584, %584, %584, %584, %584, %584, %584, %584, %584, %584, %584, %584 in 1 : vector<2x16xf32>, vector<2x16xf32>, vector<2x16xf32>, vector<2x16xf32>, vector<2x16xf32>, vector<2x16xf32>, vector<2x16xf32>, vector<2x16xf32>, vector<2x16xf32>, vector<2x16xf32>, vector<2x16xf32>, vector<2x16xf32>, vector<2x16xf32>, vector<2x16xf32>, vector<2x16xf32>, vector<2x16xf32> -> vector<2x256xf32>
    %586 = vector.extract_strided_slice %556 {offsets = [0, 0], sizes = [2, 16], strides = [1, 1]} : vector<2x48xf32> to vector<2x16xf32>
    %587 = tpu.concatenate %586, %586, %586, %586, %586, %586, %586, %586, %586, %586, %586, %586, %586, %586, %586, %586 in 1 : vector<2x16xf32>, vector<2x16xf32>, vector<2x16xf32>, vector<2x16xf32>, vector<2x16xf32>, vector<2x16xf32>, vector<2x16xf32>, vector<2x16xf32>, vector<2x16xf32>, vector<2x16xf32>, vector<2x16xf32>, vector<2x16xf32>, vector<2x16xf32>, vector<2x16xf32>, vector<2x16xf32>, vector<2x16xf32> -> vector<2x256xf32>
    %588 = vector.extract_strided_slice %556 {offsets = [0, 16], sizes = [2, 16], strides = [1, 1]} : vector<2x48xf32> to vector<2x16xf32>
    %589 = tpu.concatenate %588, %588, %588, %588, %588, %588, %588, %588, %588, %588, %588, %588, %588, %588, %588, %588 in 1 : vector<2x16xf32>, vector<2x16xf32>, vector<2x16xf32>, vector<2x16xf32>, vector<2x16xf32>, vector<2x16xf32>, vector<2x16xf32>, vector<2x16xf32>, vector<2x16xf32>, vector<2x16xf32>, vector<2x16xf32>, vector<2x16xf32>, vector<2x16xf32>, vector<2x16xf32>, vector<2x16xf32>, vector<2x16xf32> -> vector<2x256xf32>
    %590 = vector.extract_strided_slice %556 {offsets = [0, 32], sizes = [2, 16], strides = [1, 1]} : vector<2x48xf32> to vector<2x16xf32>
    %591 = tpu.concatenate %590, %590, %590, %590, %590, %590, %590, %590, %590, %590, %590, %590, %590, %590, %590, %590 in 1 : vector<2x16xf32>, vector<2x16xf32>, vector<2x16xf32>, vector<2x16xf32>, vector<2x16xf32>, vector<2x16xf32>, vector<2x16xf32>, vector<2x16xf32>, vector<2x16xf32>, vector<2x16xf32>, vector<2x16xf32>, vector<2x16xf32>, vector<2x16xf32>, vector<2x16xf32>, vector<2x16xf32>, vector<2x16xf32> -> vector<2x256xf32>
    %592 = arith.mulf %578, %583 : vector<2x256xf32>
    %593 = arith.mulf %579, %585 : vector<2x256xf32>
    %594 = arith.addf %592, %593 : vector<2x256xf32>
    %595 = arith.mulf %580, %583 : vector<2x256xf32>
    %596 = arith.mulf %581, %585 : vector<2x256xf32>
    %597 = arith.addf %595, %596 : vector<2x256xf32>
    %598 = arith.mulf %578, %578 : vector<2x256xf32>
    %599 = arith.mulf %598, %587 : vector<2x256xf32>
    %600 = arith.mulf %578, %579 : vector<2x256xf32>
    %cst_109 = arith.constant 2.000000e+00 : f32
    %601 = vector.broadcast %cst_109 : f32 to vector<2x256xf32>
    %602 = arith.mulf %601, %600 : vector<2x256xf32>
    %603 = arith.mulf %602, %591 : vector<2x256xf32>
    %604 = arith.addf %599, %603 : vector<2x256xf32>
    %605 = arith.mulf %579, %579 : vector<2x256xf32>
    %606 = arith.mulf %605, %589 : vector<2x256xf32>
    %607 = arith.addf %604, %606 : vector<2x256xf32>
    %608 = arith.mulf %580, %580 : vector<2x256xf32>
    %609 = arith.mulf %608, %587 : vector<2x256xf32>
    %610 = arith.mulf %580, %581 : vector<2x256xf32>
    %cst_110 = arith.constant 2.000000e+00 : f32
    %611 = vector.broadcast %cst_110 : f32 to vector<2x256xf32>
    %612 = arith.mulf %611, %610 : vector<2x256xf32>
    %613 = arith.mulf %612, %591 : vector<2x256xf32>
    %614 = arith.addf %609, %613 : vector<2x256xf32>
    %615 = arith.mulf %581, %581 : vector<2x256xf32>
    %616 = arith.mulf %615, %589 : vector<2x256xf32>
    %617 = arith.addf %614, %616 : vector<2x256xf32>
    %618 = arith.mulf %580, %578 : vector<2x256xf32>
    %619 = arith.mulf %618, %587 : vector<2x256xf32>
    %620 = arith.mulf %581, %578 : vector<2x256xf32>
    %621 = arith.mulf %580, %579 : vector<2x256xf32>
    %622 = arith.addf %620, %621 : vector<2x256xf32>
    %623 = arith.mulf %622, %591 : vector<2x256xf32>
    %624 = arith.addf %619, %623 : vector<2x256xf32>
    %625 = arith.mulf %581, %579 : vector<2x256xf32>
    %626 = arith.mulf %625, %589 : vector<2x256xf32>
    %627 = arith.addf %624, %626 : vector<2x256xf32>
    %628 = tpu.concatenate %594, %597, %607, %617, %627 in 1 : vector<2x256xf32>, vector<2x256xf32>, vector<2x256xf32>, vector<2x256xf32>, vector<2x256xf32> -> vector<2x1280xf32>
    %cst_111 = arith.constant dense<0.000000e+00> : vector<2x80xf32>
    %629 = tpu.matmul %628, %8, %cst_111 {dimension_numbers = #tpu.dot_dimension_numbers<[1], [0], [0], [1], [0, 0, 1, 1], [], []>} : vector<2x1280xf32>, vector<1280x80xf32>, vector<2x80xf32> -> vector<2x80xf32>
    %630 = vector.extract_strided_slice %629 {offsets = [0, 0], sizes = [2, 32], strides = [1, 1]} : vector<2x80xf32> to vector<2x32xf32>
    %631 = arith.addf %630, %535 : vector<2x32xf32>
    %632 = vector.extract_strided_slice %629 {offsets = [0, 32], sizes = [2, 48], strides = [1, 1]} : vector<2x80xf32> to vector<2x48xf32>
    %633 = arith.addf %632, %9 : vector<2x48xf32>
    %634 = tpu.concatenate %553, %556, %631, %633 in 1 : vector<2x32xf32>, vector<2x48xf32>, vector<2x32xf32>, vector<2x48xf32> -> vector<2x160xf32>
    %c0_112 = arith.constant 0 : index
    %c800 = arith.constant 800 : index
    %635 = vector.load %arg15[%c0_112, %c800] : memref<2x1280xf32, #tpu.memory_space<vmem>>, vector<2x160xf32>
    tpu.vector_store %arg15[%c0_112, %c800], %634 {strides = array<i32>} : memref<2x1280xf32, #tpu.memory_space<vmem>>, vector<2x160xf32>,
    %c0_113 = arith.constant 0 : index
    %c96_114 = arith.constant 96 : index
    %636 = vector.load %arg2[%c0_113, %c96_114] : memref<2x128xf32, #tpu.memory_space<vmem>>, vector<2x16xf32>
    %c0_115 = arith.constant 0 : index
    %c96_116 = arith.constant 96 : index
    %637 = vector.load %arg3[%c0_115, %c96_116] : memref<2x128xf32, #tpu.memory_space<vmem>>, vector<2x16xf32>
    %c0_117 = arith.constant 0 : index
    %c96_118 = arith.constant 96 : index
    %638 = vector.load %arg4[%c0_117, %c96_118] : memref<2x128xf32, #tpu.memory_space<vmem>>, vector<2x16xf32>
    %c0_119 = arith.constant 0 : index
    %c192 = arith.constant 192 : index
    %639 = vector.load %arg5[%c0_119, %c192] : memref<2x256xf32, #tpu.memory_space<vmem>>, vector<2x32xf32>
    %640 = vector.extract_strided_slice %633 {offsets = [0, 0], sizes = [2, 16], strides = [1, 1]} : vector<2x48xf32> to vector<2x16xf32>
    %641 = vector.extract_strided_slice %633 {offsets = [0, 32], sizes = [2, 16], strides = [1, 1]} : vector<2x48xf32> to vector<2x16xf32>
    %642 = arith.addf %640, %637 : vector<2x16xf32>
    %643 = tpu.reciprocal %642 {approx = true} : vector<2x16xf32> -> vector<2x16xf32>
    %644 = arith.mulf %640, %643 : vector<2x16xf32>
    %645 = arith.mulf %641, %643 : vector<2x16xf32>
    %646 = vector.extract_strided_slice %631 {offsets = [0, 0], sizes = [2, 16], strides = [1, 1]} : vector<2x32xf32> to vector<2x16xf32>
    %647 = arith.subf %636, %646 : vector<2x16xf32>
    %648 = arith.mulf %644, %647 : vector<2x16xf32>
    %649 = arith.mulf %645, %647 : vector<2x16xf32>
    %650 = tpu.concatenate %648, %649 in 1 : vector<2x16xf32>, vector<2x16xf32> -> vector<2x32xf32>
    %651 = arith.mulf %644, %640 : vector<2x16xf32>
    %652 = arith.mulf %645, %641 : vector<2x16xf32>
    %653 = arith.mulf %644, %641 : vector<2x16xf32>
    %654 = tpu.concatenate %651, %652, %653 in 1 : vector<2x16xf32>, vector<2x16xf32>, vector<2x16xf32> -> vector<2x48xf32>
    %655 = tpu.concatenate %638, %638 in 1 : vector<2x16xf32>, vector<2x16xf32> -> vector<2x32xf32>
    %656 = arith.mulf %655, %650 : vector<2x32xf32>
    %657 = arith.addf %631, %656 : vector<2x32xf32>
    %658 = tpu.concatenate %638, %638, %638 in 1 : vector<2x16xf32>, vector<2x16xf32>, vector<2x16xf32> -> vector<2x48xf32>
    %659 = arith.mulf %658, %654 : vector<2x48xf32>
    %660 = arith.subf %633, %659 : vector<2x48xf32>
    %661 = arith.truncf %657 : vector<2x32xf32> to vector<2x32xbf16>
    %cst_120 = arith.constant dense<0.000000e+00> : vector<2x120xf32>
    %662 = tpu.matmul %661, %3, %cst_120 {dimension_numbers = #tpu.dot_dimension_numbers<[1], [0], [0], [1], [0, 0, 1, 1], [], []>} : vector<2x32xbf16>, vector<32x120xbf16>, vector<2x120xf32> -> vector<2x120xf32>
    %663 = vector.broadcast %4 : vector<1x120xf32> to vector<2x120xf32>
    %664 = arith.addf %662, %663 : vector<2x120xf32>
    %665 = math.tanh %664 : vector<2x120xf32>
    %666 = arith.truncf %665 : vector<2x120xf32> to vector<2x120xbf16>
    %cst_121 = arith.constant dense<0.000000e+00> : vector<2x15xf32>
    %667 = tpu.matmul %666, %5, %cst_121 {dimension_numbers = #tpu.dot_dimension_numbers<[1], [0], [0], [1], [0, 0, 1, 1], [], []>} : vector<2x120xbf16>, vector<120x15xbf16>, vector<2x15xf32> -> vector<2x15xf32>
    %668 = vector.broadcast %6 : vector<1x15xf32> to vector<2x15xf32>
    %669 = arith.addf %667, %668 : vector<2x15xf32>
    %cst_122 = arith.constant dense<0xFF800000> : vector<2xf32>
    %670 = vector.multi_reduction <maximumf>, %669, %cst_122 [1] : vector<2x15xf32> to vector<2xf32>
    %671 = vector.shape_cast %670 : vector<2xf32> to vector<2x1xf32>
    %672 = vector.broadcast %671 : vector<2x1xf32> to vector<2x15xf32>
    %673 = arith.subf %669, %672 : vector<2x15xf32>
    %674 = math.exp %673 : vector<2x15xf32>
    %cst_123 = arith.constant dense<0.000000e+00> : vector<2xf32>
    %675 = vector.multi_reduction <add>, %674, %cst_123 [1] : vector<2x15xf32> to vector<2xf32>
    %676 = vector.shape_cast %675 : vector<2xf32> to vector<2x1xf32>
    %677 = tpu.reciprocal %676 {approx = true} : vector<2x1xf32> -> vector<2x1xf32>
    %678 = vector.broadcast %677 : vector<2x1xf32> to vector<2x15xf32>
    %679 = arith.mulf %674, %678 : vector<2x15xf32>
    %680 = arith.truncf %679 : vector<2x15xf32> to vector<2x15xbf16>
    %cst_124 = arith.constant dense<0.000000e+00> : vector<2x1024xf32>
    %681 = tpu.matmul %680, %7, %cst_124 {dimension_numbers = #tpu.dot_dimension_numbers<[1], [0], [0], [1], [0, 0, 1, 1], [], []>} : vector<2x15xbf16>, vector<15x1024xbf16>, vector<2x1024xf32> -> vector<2x1024xf32>
    %682 = vector.extract_strided_slice %681 {offsets = [0, 0], sizes = [2, 256], strides = [1, 1]} : vector<2x1024xf32> to vector<2x256xf32>
    %683 = vector.extract_strided_slice %681 {offsets = [0, 256], sizes = [2, 256], strides = [1, 1]} : vector<2x1024xf32> to vector<2x256xf32>
    %684 = vector.extract_strided_slice %681 {offsets = [0, 512], sizes = [2, 256], strides = [1, 1]} : vector<2x1024xf32> to vector<2x256xf32>
    %685 = vector.extract_strided_slice %681 {offsets = [0, 768], sizes = [2, 256], strides = [1, 1]} : vector<2x1024xf32> to vector<2x256xf32>
    %686 = vector.extract_strided_slice %657 {offsets = [0, 0], sizes = [2, 16], strides = [1, 1]} : vector<2x32xf32> to vector<2x16xf32>
    %687 = tpu.concatenate %686, %686, %686, %686, %686, %686, %686, %686, %686, %686, %686, %686, %686, %686, %686, %686 in 1 : vector<2x16xf32>, vector<2x16xf32>, vector<2x16xf32>, vector<2x16xf32>, vector<2x16xf32>, vector<2x16xf32>, vector<2x16xf32>, vector<2x16xf32>, vector<2x16xf32>, vector<2x16xf32>, vector<2x16xf32>, vector<2x16xf32>, vector<2x16xf32>, vector<2x16xf32>, vector<2x16xf32>, vector<2x16xf32> -> vector<2x256xf32>
    %688 = vector.extract_strided_slice %657 {offsets = [0, 16], sizes = [2, 16], strides = [1, 1]} : vector<2x32xf32> to vector<2x16xf32>
    %689 = tpu.concatenate %688, %688, %688, %688, %688, %688, %688, %688, %688, %688, %688, %688, %688, %688, %688, %688 in 1 : vector<2x16xf32>, vector<2x16xf32>, vector<2x16xf32>, vector<2x16xf32>, vector<2x16xf32>, vector<2x16xf32>, vector<2x16xf32>, vector<2x16xf32>, vector<2x16xf32>, vector<2x16xf32>, vector<2x16xf32>, vector<2x16xf32>, vector<2x16xf32>, vector<2x16xf32>, vector<2x16xf32>, vector<2x16xf32> -> vector<2x256xf32>
    %690 = vector.extract_strided_slice %660 {offsets = [0, 0], sizes = [2, 16], strides = [1, 1]} : vector<2x48xf32> to vector<2x16xf32>
    %691 = tpu.concatenate %690, %690, %690, %690, %690, %690, %690, %690, %690, %690, %690, %690, %690, %690, %690, %690 in 1 : vector<2x16xf32>, vector<2x16xf32>, vector<2x16xf32>, vector<2x16xf32>, vector<2x16xf32>, vector<2x16xf32>, vector<2x16xf32>, vector<2x16xf32>, vector<2x16xf32>, vector<2x16xf32>, vector<2x16xf32>, vector<2x16xf32>, vector<2x16xf32>, vector<2x16xf32>, vector<2x16xf32>, vector<2x16xf32> -> vector<2x256xf32>
    %692 = vector.extract_strided_slice %660 {offsets = [0, 16], sizes = [2, 16], strides = [1, 1]} : vector<2x48xf32> to vector<2x16xf32>
    %693 = tpu.concatenate %692, %692, %692, %692, %692, %692, %692, %692, %692, %692, %692, %692, %692, %692, %692, %692 in 1 : vector<2x16xf32>, vector<2x16xf32>, vector<2x16xf32>, vector<2x16xf32>, vector<2x16xf32>, vector<2x16xf32>, vector<2x16xf32>, vector<2x16xf32>, vector<2x16xf32>, vector<2x16xf32>, vector<2x16xf32>, vector<2x16xf32>, vector<2x16xf32>, vector<2x16xf32>, vector<2x16xf32>, vector<2x16xf32> -> vector<2x256xf32>
    %694 = vector.extract_strided_slice %660 {offsets = [0, 32], sizes = [2, 16], strides = [1, 1]} : vector<2x48xf32> to vector<2x16xf32>
    %695 = tpu.concatenate %694, %694, %694, %694, %694, %694, %694, %694, %694, %694, %694, %694, %694, %694, %694, %694 in 1 : vector<2x16xf32>, vector<2x16xf32>, vector<2x16xf32>, vector<2x16xf32>, vector<2x16xf32>, vector<2x16xf32>, vector<2x16xf32>, vector<2x16xf32>, vector<2x16xf32>, vector<2x16xf32>, vector<2x16xf32>, vector<2x16xf32>, vector<2x16xf32>, vector<2x16xf32>, vector<2x16xf32>, vector<2x16xf32> -> vector<2x256xf32>
    %696 = arith.mulf %682, %687 : vector<2x256xf32>
    %697 = arith.mulf %683, %689 : vector<2x256xf32>
    %698 = arith.addf %696, %697 : vector<2x256xf32>
    %699 = arith.mulf %684, %687 : vector<2x256xf32>
    %700 = arith.mulf %685, %689 : vector<2x256xf32>
    %701 = arith.addf %699, %700 : vector<2x256xf32>
    %702 = arith.mulf %682, %682 : vector<2x256xf32>
    %703 = arith.mulf %702, %691 : vector<2x256xf32>
    %704 = arith.mulf %682, %683 : vector<2x256xf32>
    %cst_125 = arith.constant 2.000000e+00 : f32
    %705 = vector.broadcast %cst_125 : f32 to vector<2x256xf32>
    %706 = arith.mulf %705, %704 : vector<2x256xf32>
    %707 = arith.mulf %706, %695 : vector<2x256xf32>
    %708 = arith.addf %703, %707 : vector<2x256xf32>
    %709 = arith.mulf %683, %683 : vector<2x256xf32>
    %710 = arith.mulf %709, %693 : vector<2x256xf32>
    %711 = arith.addf %708, %710 : vector<2x256xf32>
    %712 = arith.mulf %684, %684 : vector<2x256xf32>
    %713 = arith.mulf %712, %691 : vector<2x256xf32>
    %714 = arith.mulf %684, %685 : vector<2x256xf32>
    %cst_126 = arith.constant 2.000000e+00 : f32
    %715 = vector.broadcast %cst_126 : f32 to vector<2x256xf32>
    %716 = arith.mulf %715, %714 : vector<2x256xf32>
    %717 = arith.mulf %716, %695 : vector<2x256xf32>
    %718 = arith.addf %713, %717 : vector<2x256xf32>
    %719 = arith.mulf %685, %685 : vector<2x256xf32>
    %720 = arith.mulf %719, %693 : vector<2x256xf32>
    %721 = arith.addf %718, %720 : vector<2x256xf32>
    %722 = arith.mulf %684, %682 : vector<2x256xf32>
    %723 = arith.mulf %722, %691 : vector<2x256xf32>
    %724 = arith.mulf %685, %682 : vector<2x256xf32>
    %725 = arith.mulf %684, %683 : vector<2x256xf32>
    %726 = arith.addf %724, %725 : vector<2x256xf32>
    %727 = arith.mulf %726, %695 : vector<2x256xf32>
    %728 = arith.addf %723, %727 : vector<2x256xf32>
    %729 = arith.mulf %685, %683 : vector<2x256xf32>
    %730 = arith.mulf %729, %693 : vector<2x256xf32>
    %731 = arith.addf %728, %730 : vector<2x256xf32>
    %732 = tpu.concatenate %698, %701, %711, %721, %731 in 1 : vector<2x256xf32>, vector<2x256xf32>, vector<2x256xf32>, vector<2x256xf32>, vector<2x256xf32> -> vector<2x1280xf32>
    %cst_127 = arith.constant dense<0.000000e+00> : vector<2x80xf32>
    %733 = tpu.matmul %732, %8, %cst_127 {dimension_numbers = #tpu.dot_dimension_numbers<[1], [0], [0], [1], [0, 0, 1, 1], [], []>} : vector<2x1280xf32>, vector<1280x80xf32>, vector<2x80xf32> -> vector<2x80xf32>
    %734 = vector.extract_strided_slice %733 {offsets = [0, 0], sizes = [2, 32], strides = [1, 1]} : vector<2x80xf32> to vector<2x32xf32>
    %735 = arith.addf %734, %639 : vector<2x32xf32>
    %736 = vector.extract_strided_slice %733 {offsets = [0, 32], sizes = [2, 48], strides = [1, 1]} : vector<2x80xf32> to vector<2x48xf32>
    %737 = arith.addf %736, %9 : vector<2x48xf32>
    %738 = tpu.concatenate %657, %660, %735, %737 in 1 : vector<2x32xf32>, vector<2x48xf32>, vector<2x32xf32>, vector<2x48xf32> -> vector<2x160xf32>
    %c0_128 = arith.constant 0 : index
    %c960 = arith.constant 960 : index
    %739 = vector.load %arg15[%c0_128, %c960] : memref<2x1280xf32, #tpu.memory_space<vmem>>, vector<2x160xf32>
    tpu.vector_store %arg15[%c0_128, %c960], %738 {strides = array<i32>} : memref<2x1280xf32, #tpu.memory_space<vmem>>, vector<2x160xf32>,
    %c0_129 = arith.constant 0 : index
    %c112 = arith.constant 112 : index
    %740 = vector.load %arg2[%c0_129, %c112] : memref<2x128xf32, #tpu.memory_space<vmem>>, vector<2x16xf32>
    %c0_130 = arith.constant 0 : index
    %c112_131 = arith.constant 112 : index
    %741 = vector.load %arg3[%c0_130, %c112_131] : memref<2x128xf32, #tpu.memory_space<vmem>>, vector<2x16xf32>
    %c0_132 = arith.constant 0 : index
    %c112_133 = arith.constant 112 : index
    %742 = vector.load %arg4[%c0_132, %c112_133] : memref<2x128xf32, #tpu.memory_space<vmem>>, vector<2x16xf32>
    %c0_134 = arith.constant 0 : index
    %c224 = arith.constant 224 : index
    %743 = vector.load %arg5[%c0_134, %c224] : memref<2x256xf32, #tpu.memory_space<vmem>>, vector<2x32xf32>
    %744 = vector.extract_strided_slice %737 {offsets = [0, 0], sizes = [2, 16], strides = [1, 1]} : vector<2x48xf32> to vector<2x16xf32>
    %745 = vector.extract_strided_slice %737 {offsets = [0, 32], sizes = [2, 16], strides = [1, 1]} : vector<2x48xf32> to vector<2x16xf32>
    %746 = arith.addf %744, %741 : vector<2x16xf32>
    %747 = tpu.reciprocal %746 {approx = true} : vector<2x16xf32> -> vector<2x16xf32>
    %748 = arith.mulf %744, %747 : vector<2x16xf32>
    %749 = arith.mulf %745, %747 : vector<2x16xf32>
    %750 = vector.extract_strided_slice %735 {offsets = [0, 0], sizes = [2, 16], strides = [1, 1]} : vector<2x32xf32> to vector<2x16xf32>
    %751 = arith.subf %740, %750 : vector<2x16xf32>
    %752 = arith.mulf %748, %751 : vector<2x16xf32>
    %753 = arith.mulf %749, %751 : vector<2x16xf32>
    %754 = tpu.concatenate %752, %753 in 1 : vector<2x16xf32>, vector<2x16xf32> -> vector<2x32xf32>
    %755 = arith.mulf %748, %744 : vector<2x16xf32>
    %756 = arith.mulf %749, %745 : vector<2x16xf32>
    %757 = arith.mulf %748, %745 : vector<2x16xf32>
    %758 = tpu.concatenate %755, %756, %757 in 1 : vector<2x16xf32>, vector<2x16xf32>, vector<2x16xf32> -> vector<2x48xf32>
    %759 = tpu.concatenate %742, %742 in 1 : vector<2x16xf32>, vector<2x16xf32> -> vector<2x32xf32>
    %760 = arith.mulf %759, %754 : vector<2x32xf32>
    %761 = arith.addf %735, %760 : vector<2x32xf32>
    %762 = tpu.concatenate %742, %742, %742 in 1 : vector<2x16xf32>, vector<2x16xf32>, vector<2x16xf32> -> vector<2x48xf32>
    %763 = arith.mulf %762, %758 : vector<2x48xf32>
    %764 = arith.subf %737, %763 : vector<2x48xf32>
    %765 = arith.truncf %761 : vector<2x32xf32> to vector<2x32xbf16>
    %cst_135 = arith.constant dense<0.000000e+00> : vector<2x120xf32>
    %766 = tpu.matmul %765, %3, %cst_135 {dimension_numbers = #tpu.dot_dimension_numbers<[1], [0], [0], [1], [0, 0, 1, 1], [], []>} : vector<2x32xbf16>, vector<32x120xbf16>, vector<2x120xf32> -> vector<2x120xf32>
    %767 = vector.broadcast %4 : vector<1x120xf32> to vector<2x120xf32>
    %768 = arith.addf %766, %767 : vector<2x120xf32>
    %769 = math.tanh %768 : vector<2x120xf32>
    %770 = arith.truncf %769 : vector<2x120xf32> to vector<2x120xbf16>
    %cst_136 = arith.constant dense<0.000000e+00> : vector<2x15xf32>
    %771 = tpu.matmul %770, %5, %cst_136 {dimension_numbers = #tpu.dot_dimension_numbers<[1], [0], [0], [1], [0, 0, 1, 1], [], []>} : vector<2x120xbf16>, vector<120x15xbf16>, vector<2x15xf32> -> vector<2x15xf32>
    %772 = vector.broadcast %6 : vector<1x15xf32> to vector<2x15xf32>
    %773 = arith.addf %771, %772 : vector<2x15xf32>
    %cst_137 = arith.constant dense<0xFF800000> : vector<2xf32>
    %774 = vector.multi_reduction <maximumf>, %773, %cst_137 [1] : vector<2x15xf32> to vector<2xf32>
    %775 = vector.shape_cast %774 : vector<2xf32> to vector<2x1xf32>
    %776 = vector.broadcast %775 : vector<2x1xf32> to vector<2x15xf32>
    %777 = arith.subf %773, %776 : vector<2x15xf32>
    %778 = math.exp %777 : vector<2x15xf32>
    %cst_138 = arith.constant dense<0.000000e+00> : vector<2xf32>
    %779 = vector.multi_reduction <add>, %778, %cst_138 [1] : vector<2x15xf32> to vector<2xf32>
    %780 = vector.shape_cast %779 : vector<2xf32> to vector<2x1xf32>
    %781 = tpu.reciprocal %780 {approx = true} : vector<2x1xf32> -> vector<2x1xf32>
    %782 = vector.broadcast %781 : vector<2x1xf32> to vector<2x15xf32>
    %783 = arith.mulf %778, %782 : vector<2x15xf32>
    %784 = arith.truncf %783 : vector<2x15xf32> to vector<2x15xbf16>
    %cst_139 = arith.constant dense<0.000000e+00> : vector<2x1024xf32>
    %785 = tpu.matmul %784, %7, %cst_139 {dimension_numbers = #tpu.dot_dimension_numbers<[1], [0], [0], [1], [0, 0, 1, 1], [], []>} : vector<2x15xbf16>, vector<15x1024xbf16>, vector<2x1024xf32> -> vector<2x1024xf32>
    %786 = vector.extract_strided_slice %785 {offsets = [0, 0], sizes = [2, 256], strides = [1, 1]} : vector<2x1024xf32> to vector<2x256xf32>
    %787 = vector.extract_strided_slice %785 {offsets = [0, 256], sizes = [2, 256], strides = [1, 1]} : vector<2x1024xf32> to vector<2x256xf32>
    %788 = vector.extract_strided_slice %785 {offsets = [0, 512], sizes = [2, 256], strides = [1, 1]} : vector<2x1024xf32> to vector<2x256xf32>
    %789 = vector.extract_strided_slice %785 {offsets = [0, 768], sizes = [2, 256], strides = [1, 1]} : vector<2x1024xf32> to vector<2x256xf32>
    %790 = vector.extract_strided_slice %761 {offsets = [0, 0], sizes = [2, 16], strides = [1, 1]} : vector<2x32xf32> to vector<2x16xf32>
    %791 = tpu.concatenate %790, %790, %790, %790, %790, %790, %790, %790, %790, %790, %790, %790, %790, %790, %790, %790 in 1 : vector<2x16xf32>, vector<2x16xf32>, vector<2x16xf32>, vector<2x16xf32>, vector<2x16xf32>, vector<2x16xf32>, vector<2x16xf32>, vector<2x16xf32>, vector<2x16xf32>, vector<2x16xf32>, vector<2x16xf32>, vector<2x16xf32>, vector<2x16xf32>, vector<2x16xf32>, vector<2x16xf32>, vector<2x16xf32> -> vector<2x256xf32>
    %792 = vector.extract_strided_slice %761 {offsets = [0, 16], sizes = [2, 16], strides = [1, 1]} : vector<2x32xf32> to vector<2x16xf32>
    %793 = tpu.concatenate %792, %792, %792, %792, %792, %792, %792, %792, %792, %792, %792, %792, %792, %792, %792, %792 in 1 : vector<2x16xf32>, vector<2x16xf32>, vector<2x16xf32>, vector<2x16xf32>, vector<2x16xf32>, vector<2x16xf32>, vector<2x16xf32>, vector<2x16xf32>, vector<2x16xf32>, vector<2x16xf32>, vector<2x16xf32>, vector<2x16xf32>, vector<2x16xf32>, vector<2x16xf32>, vector<2x16xf32>, vector<2x16xf32> -> vector<2x256xf32>
    %794 = vector.extract_strided_slice %764 {offsets = [0, 0], sizes = [2, 16], strides = [1, 1]} : vector<2x48xf32> to vector<2x16xf32>
    %795 = tpu.concatenate %794, %794, %794, %794, %794, %794, %794, %794, %794, %794, %794, %794, %794, %794, %794, %794 in 1 : vector<2x16xf32>, vector<2x16xf32>, vector<2x16xf32>, vector<2x16xf32>, vector<2x16xf32>, vector<2x16xf32>, vector<2x16xf32>, vector<2x16xf32>, vector<2x16xf32>, vector<2x16xf32>, vector<2x16xf32>, vector<2x16xf32>, vector<2x16xf32>, vector<2x16xf32>, vector<2x16xf32>, vector<2x16xf32> -> vector<2x256xf32>
    %796 = vector.extract_strided_slice %764 {offsets = [0, 16], sizes = [2, 16], strides = [1, 1]} : vector<2x48xf32> to vector<2x16xf32>
    %797 = tpu.concatenate %796, %796, %796, %796, %796, %796, %796, %796, %796, %796, %796, %796, %796, %796, %796, %796 in 1 : vector<2x16xf32>, vector<2x16xf32>, vector<2x16xf32>, vector<2x16xf32>, vector<2x16xf32>, vector<2x16xf32>, vector<2x16xf32>, vector<2x16xf32>, vector<2x16xf32>, vector<2x16xf32>, vector<2x16xf32>, vector<2x16xf32>, vector<2x16xf32>, vector<2x16xf32>, vector<2x16xf32>, vector<2x16xf32> -> vector<2x256xf32>
    %798 = vector.extract_strided_slice %764 {offsets = [0, 32], sizes = [2, 16], strides = [1, 1]} : vector<2x48xf32> to vector<2x16xf32>
    %799 = tpu.concatenate %798, %798, %798, %798, %798, %798, %798, %798, %798, %798, %798, %798, %798, %798, %798, %798 in 1 : vector<2x16xf32>, vector<2x16xf32>, vector<2x16xf32>, vector<2x16xf32>, vector<2x16xf32>, vector<2x16xf32>, vector<2x16xf32>, vector<2x16xf32>, vector<2x16xf32>, vector<2x16xf32>, vector<2x16xf32>, vector<2x16xf32>, vector<2x16xf32>, vector<2x16xf32>, vector<2x16xf32>, vector<2x16xf32> -> vector<2x256xf32>
    %800 = arith.mulf %786, %791 : vector<2x256xf32>
    %801 = arith.mulf %787, %793 : vector<2x256xf32>
    %802 = arith.addf %800, %801 : vector<2x256xf32>
    %803 = arith.mulf %788, %791 : vector<2x256xf32>
    %804 = arith.mulf %789, %793 : vector<2x256xf32>
    %805 = arith.addf %803, %804 : vector<2x256xf32>
    %806 = arith.mulf %786, %786 : vector<2x256xf32>
    %807 = arith.mulf %806, %795 : vector<2x256xf32>
    %808 = arith.mulf %786, %787 : vector<2x256xf32>
    %cst_140 = arith.constant 2.000000e+00 : f32
    %809 = vector.broadcast %cst_140 : f32 to vector<2x256xf32>
    %810 = arith.mulf %809, %808 : vector<2x256xf32>
    %811 = arith.mulf %810, %799 : vector<2x256xf32>
    %812 = arith.addf %807, %811 : vector<2x256xf32>
    %813 = arith.mulf %787, %787 : vector<2x256xf32>
    %814 = arith.mulf %813, %797 : vector<2x256xf32>
    %815 = arith.addf %812, %814 : vector<2x256xf32>
    %816 = arith.mulf %788, %788 : vector<2x256xf32>
    %817 = arith.mulf %816, %795 : vector<2x256xf32>
    %818 = arith.mulf %788, %789 : vector<2x256xf32>
    %cst_141 = arith.constant 2.000000e+00 : f32
    %819 = vector.broadcast %cst_141 : f32 to vector<2x256xf32>
    %820 = arith.mulf %819, %818 : vector<2x256xf32>
    %821 = arith.mulf %820, %799 : vector<2x256xf32>
    %822 = arith.addf %817, %821 : vector<2x256xf32>
    %823 = arith.mulf %789, %789 : vector<2x256xf32>
    %824 = arith.mulf %823, %797 : vector<2x256xf32>
    %825 = arith.addf %822, %824 : vector<2x256xf32>
    %826 = arith.mulf %788, %786 : vector<2x256xf32>
    %827 = arith.mulf %826, %795 : vector<2x256xf32>
    %828 = arith.mulf %789, %786 : vector<2x256xf32>
    %829 = arith.mulf %788, %787 : vector<2x256xf32>
    %830 = arith.addf %828, %829 : vector<2x256xf32>
    %831 = arith.mulf %830, %799 : vector<2x256xf32>
    %832 = arith.addf %827, %831 : vector<2x256xf32>
    %833 = arith.mulf %789, %787 : vector<2x256xf32>
    %834 = arith.mulf %833, %797 : vector<2x256xf32>
    %835 = arith.addf %832, %834 : vector<2x256xf32>
    %836 = tpu.concatenate %802, %805, %815, %825, %835 in 1 : vector<2x256xf32>, vector<2x256xf32>, vector<2x256xf32>, vector<2x256xf32>, vector<2x256xf32> -> vector<2x1280xf32>
    %cst_142 = arith.constant dense<0.000000e+00> : vector<2x80xf32>
    %837 = tpu.matmul %836, %8, %cst_142 {dimension_numbers = #tpu.dot_dimension_numbers<[1], [0], [0], [1], [0, 0, 1, 1], [], []>} : vector<2x1280xf32>, vector<1280x80xf32>, vector<2x80xf32> -> vector<2x80xf32>
    %838 = vector.extract_strided_slice %837 {offsets = [0, 0], sizes = [2, 32], strides = [1, 1]} : vector<2x80xf32> to vector<2x32xf32>
    %839 = arith.addf %838, %743 : vector<2x32xf32>
    %840 = vector.extract_strided_slice %837 {offsets = [0, 32], sizes = [2, 48], strides = [1, 1]} : vector<2x80xf32> to vector<2x48xf32>
    %841 = arith.addf %840, %9 : vector<2x48xf32>
    %842 = tpu.concatenate %761, %764, %839, %841 in 1 : vector<2x32xf32>, vector<2x48xf32>, vector<2x32xf32>, vector<2x48xf32> -> vector<2x160xf32>
    %c0_143 = arith.constant 0 : index
    %c1120 = arith.constant 1120 : index
    %843 = vector.load %arg15[%c0_143, %c1120] : memref<2x1280xf32, #tpu.memory_space<vmem>>, vector<2x160xf32>
    tpu.vector_store %arg15[%c0_143, %c1120], %842 {strides = array<i32>} : memref<2x1280xf32, #tpu.memory_space<vmem>>, vector<2x160xf32>,
    %c0_144 = arith.constant 0 : index
    %c0_145 = arith.constant 0 : index
    %844 = vector.load %arg16[%c0_144, %c0_145] : memref<2x32xf32, #tpu.memory_space<vmem>>, vector<2x32xf32>
    tpu.vector_store %arg16[%c0_144, %c0_145], %839 {strides = array<i32>} : memref<2x32xf32, #tpu.memory_space<vmem>>, vector<2x32xf32>,
    %c0_146 = arith.constant 0 : index
    %c0_147 = arith.constant 0 : index
    %845 = vector.load %arg17[%c0_146, %c0_147] : memref<2x48xf32, #tpu.memory_space<vmem>>, vector<2x48xf32>
    tpu.vector_store %arg17[%c0_146, %c0_147], %841 {strides = array<i32>} : memref<2x48xf32, #tpu.memory_space<vmem>>, vector<2x48xf32>,
    return
  }
  func.func @transform_0(%arg0: i32, %arg1: i32) -> (i32, i32) {
    %c0_i32 = arith.constant 0 : i32
    return %arg0, %arg1 : i32, i32
  }
  func.func @transform_1(%arg0: i32, %arg1: i32) -> (i32, i32) {
    %c0_i32 = arith.constant 0 : i32
    return %arg0, %arg1 : i32, i32
  }
  func.func @transform_2(%arg0: i32, %arg1: i32) -> (i32, i32) {
    %c0_i32 = arith.constant 0 : i32
    return %arg0, %arg1 : i32, i32
  }
  func.func @transform_3(%arg0: i32, %arg1: i32) -> (i32, i32) {
    %c0_i32 = arith.constant 0 : i32
    return %arg0, %arg1 : i32, i32
  }
  func.func @transform_4(%arg0: i32, %arg1: i32) -> (i32, i32) {
    %c0_i32 = arith.constant 0 : i32
    %c0_i32_0 = arith.constant 0 : i32
    return %arg0, %c0_i32 : i32, i32
  }
  func.func @transform_5(%arg0: i32, %arg1: i32) -> (i32, i32) {
    %c0_i32 = arith.constant 0 : i32
    %c0_i32_0 = arith.constant 0 : i32
    return %arg0, %c0_i32 : i32, i32
  }
  func.func @transform_6(%arg0: i32, %arg1: i32) -> (i32, i32) {
    %c0_i32 = arith.constant 0 : i32
    %c0_i32_0 = arith.constant 0 : i32
    return %arg0, %c0_i32 : i32, i32
  }
  func.func @transform_7(%arg0: i32, %arg1: i32) -> (i32, i32) {
    %c0_i32 = arith.constant 0 : i32
    %c0_i32_0 = arith.constant 0 : i32
    %c0_i32_1 = arith.constant 0 : i32
    return %c0_i32, %c0_i32_0 : i32, i32
  }
  func.func @transform_8(%arg0: i32, %arg1: i32) -> (i32, i32) {
    %c0_i32 = arith.constant 0 : i32
    %c0_i32_0 = arith.constant 0 : i32
    %c0_i32_1 = arith.constant 0 : i32
    return %c0_i32, %c0_i32_0 : i32, i32
  }
  func.func @transform_9(%arg0: i32, %arg1: i32) -> (i32, i32) {
    %c0_i32 = arith.constant 0 : i32
    %c0_i32_0 = arith.constant 0 : i32
    %c0_i32_1 = arith.constant 0 : i32
    return %c0_i32, %c0_i32_0 : i32, i32
  }
  func.func @transform_10(%arg0: i32, %arg1: i32) -> (i32, i32) {
    %c0_i32 = arith.constant 0 : i32
    %c0_i32_0 = arith.constant 0 : i32
    %c0_i32_1 = arith.constant 0 : i32
    return %c0_i32, %c0_i32_0 : i32, i32
  }
  func.func @transform_11(%arg0: i32, %arg1: i32) -> (i32, i32) {
    %c0_i32 = arith.constant 0 : i32
    %c0_i32_0 = arith.constant 0 : i32
    %c0_i32_1 = arith.constant 0 : i32
    return %c0_i32, %c0_i32_0 : i32, i32
  }
  func.func @transform_12(%arg0: i32, %arg1: i32) -> (i32, i32) {
    %c0_i32 = arith.constant 0 : i32
    %c0_i32_0 = arith.constant 0 : i32
    %c0_i32_1 = arith.constant 0 : i32
    return %c0_i32, %c0_i32_0 : i32, i32
  }
  func.func @transform_13(%arg0: i32, %arg1: i32) -> (i32, i32) {
    %c0_i32 = arith.constant 0 : i32
    return %arg0, %arg1 : i32, i32
  }
}

</mosaic_0001>

<bundles_post_ra>
// kernel: tpu_custom_call.1
= control target key start
LH: loop header
LB: loop body
LE: loop exit
PB: predicated region body
PF: predicated region fallthrough
CT: control target
= control target key end

     0   :  { %vm54_vm0 = vcmask 386048   ;;  %vm51_vm1 = vcmask 254976   ;;  %s17083_s0 = inlined_call_operand.vmem [shape: f32[2,128], index: 0, kind: input, shape index: {}]   ;;  %s17084_s1 = inlined_call_operand.vmem [shape: f32[2,128], index: 1, kind: input, shape index: {}]   ;;  %s17085_s2 = inlined_call_operand.vmem [shape: f32[2,128], index: 2, kind: input, shape index: {}]   ;;  %s17086_s3 = inlined_call_operand.vmem [shape: f32[2,256], index: 3, kind: input, shape index: {}]   ;;  %s17087_s4 = inlined_call_operand.vmem [shape: f32[2,32], index: 4, kind: input, shape index: {}]   ;;  %s17088_s5 = inlined_call_operand.vmem [shape: f32[2,48], index: 5, kind: input, shape index: {}]   ;;  %s17089_s6 = inlined_call_operand.vmem [shape: f32[2,48], index: 6, kind: input, shape index: {}]   ;;  %s17090_s7 = inlined_call_operand.vmem [shape: bf16[32,120], index: 7, kind: input, shape index: {}]   ;;  %s17091_s8 = inlined_call_operand.vmem [shape: f32[1,120], index: 8, kind: input, shape index: {}]   ;;  %s17092_s9 = inlined_call_operand.vmem [shape: bf16[120,15], index: 9, kind: input, shape index: {}]   ;;  %s17093_s10 = inlined_call_operand.vmem [shape: f32[1,15], index: 10, kind: input, shape index: {}]   ;;  %s17094_s11 = inlined_call_operand.vmem [shape: bf16[15,1024], index: 11, kind: input, shape index: {}]   ;;  %s17095_s12 = inlined_call_operand.vmem [shape: f32[1280,80], index: 12, kind: input, shape index: {}]   ;;  %s17096_s13 = inlined_call_operand.hbm [shape: f32[2,1280], index: 13, kind: output, shape index: {}]  }
   0x1   :  { %v53_v0 = vld [vmem:[%s17088_s5] sm:$0x3] }
   0x2   :  { %55 = vst.msk [vmem:[#allocation3] sm:$0x3] %vm54_vm0, %v53_v0  ;;  %v50_v1 = vld [vmem:[%s17087_s4] sm:$0x3] }
   0x3   :  { %52 = vst.msk [vmem:[#allocation2] sm:$0x3] %vm51_vm1, %v50_v1  ;;  %v249_v2 = vld [vmem:[%s17084_s1] sm:$0x3] }
   0x9   :  { %v9990_v3 = vld [vmem:[#allocation3] sm:$0x3] }
   0xa   :  { %18 = vsyncpa [#allocation5], 0  ;;  %v252_v4 = vadd.f32 %v249_v2, %v9990_v3  ;;  %v246_v5 = vld [vmem:[#allocation2] sm:$0x3]  ;;  %s9896_s4 = smov 32   ;;  %v17099_v9 = vmov 0.0  }
   0xb   :  { %v248_v6 = vld [vmem:[%s17083_s0] sm:$0x3]  ;;  %8953 = vmatprep.subr.bf16.mxu0 %v17099_v9  ;;  %8961 = vmatprep.subr.bf16.mxu1 %v17099_v9  ;;  %v9190_v10 = vld [vmem:[%s17090_s7 + $0x8] sm:$0xff]   ;;  %vm9898_vm2 = vmmov 0   ;;  %v9192_v16 = vld [vmem:[%s17092_s9 + $0x38] ss:$0 sps:$4 sm:$0xff]  }
   0xc   :  { %9200 = vrcp.f32 %v252_v4  ;;  %v260_v8 = vsub.f32 %v248_v6, %v246_v5  ;;  %8954 = vmatpush3.bf16.msra.mxu0 %v9190_v10  ;;  %v9191_v12 = vld [vmem:[%s17090_s7] sm:$0xff]   ;;  %8957 = vmatprep.mubr.msk.bf16.mxu0 %vm9898_vm2, %v17099_v9  ;;  %vm423_vm3 = vcmask 1043456   ;;  %s9899_s21 = smov 112   ;;  %v9193_v19 = vld [vmem:[%s17092_s9 + $0x30] sm:$0xff]   ;;  %s9900_s26 = smov 16   ;;  %v9194_v20 = vld [vmem:[%s17092_s9 + $0x28] sm:$0xff]  }
   0xd   :  { %8955 = vmatprep.subr.bf16.mxu0 %v17099_v9  ;;  %8977 = vmatprep.mubr.msk.bf16.mxu1 %vm9898_vm2, %v17099_v9  ;;  %v10019_v17 = vsel %vm423_vm3, %v9192_v16, 0  ;;  %v10024_v18 = vld [vmem:[%s17085_s2] sm:$0x3]  ;;  %vm271_vm4 = vcmask 130048   ;;  %vm289_vm5 = vcmask 261120   ;;  %v9196_v31 = vld [vmem:[%s17092_s9 + $0x18] sm:$0xff]  }
   0xe   :  { %8962 = vmatpush3.bf16.msra.mxu1 %v10019_v17  ;;  %v9195_v30 = vld [vmem:[%s17092_s9 + $0x20] sm:$0xff]   ;;  %v9197_v32 = vld [vmem:[%s17092_s9 + $0x10] sm:$0xff]   ;;  %v9198_v33 = vld [vmem:[%s17092_s9 + $0x8] sm:$0xff]   ;;  %vm419_vm6 = vcmask 982016   ;;  %vm467_vm7 = vcmask 115712   ;;  %s9901_s27 = smov 96  }
   0xf   :  { %8963 = vmatprep.subr.bf16.mxu1 %v17099_v9  ;;  %v9199_v34 = vld [vmem:[%s17092_s9] sm:$0xff]   ;;  %s9902_s28 = smov 64   ;;  %vm516_vm8 = vcmask 1046528   ;;  %vm517_vm9 = vcmask 1047552   ;;  %v9903_v61 = vmov 65535   ;;  %v78_v4 = vld [vmem:[%s17094_s11 + $0x8] sm:$0xff] }
  0x10   :  { %8956 = vmatpush3.bf16.msra.mxu0 %v9191_v12  ;;  %v7383_v35 = vld [vmem:[%s17091_s8] ss:$0 sm:$0xff]  ;;  %v518_v62 = vsel %vm516_vm8, 4294967295, %v9903_v61  ;;  %v17097_v6 = vmov 0   ;;  %s9905_s19 = smov 48   ;;  %s9906_s20 = smov 80  }
  0x11   :  { %v7387_v43 = vld [vmem:[%s17093_s10] ss:$0 sm:$0xff]  ;;  %v10104_v63 = vsel %vm517_vm9, %v518_v62, 0  ;;  %vm512_vm10 = vcmask 121856   ;;  %v131_v61 = vld [vmem:[%s17095_s12 + $0x170] sm:$0xff]  ;;  %v106_v62 = vld [vmem:[%s17095_s12 + $0xa8] sm:$0xff] }
  0x12   :  { %8964 = vmatpush3.bf16.msra.mxu1 %v9193_v19  ;;  %v77_v58 = vld [vmem:[%s17094_s11] sm:$0xff]  ;;  %vm732_vm11 = vcmask 392192   ;;  %vm734_vm12 = vcmask 523264   ;;  %vm736_vm13 = vcmask 654336   ;;  %vm738_vm14 = vcmask 785408  }
  0x13   :  { %8965 = vmatprep.subr.bf16.mxu1 %v17099_v9  ;;  %v81_v59 = vld [vmem:[%s17094_s11 + $0x20] sm:$0xff]  ;;  %vm740_vm15 = vcmask 916480   ;;  %vm1238_vm3 = vcmask 257026   ;;  %vm2986_vm9 = vcmask 1041920  }
  0x14   :  { %v7398_v60 = vcombine.high %v77_v58, %v81_v59  ;;  %v7397_v0 = vcombine.low %v77_v58, %v81_v59  ;;  %v107_v58 = vld [vmem:[%s17095_s12 + $0xb0] sm:$0xff] }
  0x15   :  { %v147_v59 = vld [vmem:[%s17095_s12 + $0x1f0] sm:$0xff] }
  0x16   :  { %8966 = vmatpush3.bf16.msra.mxu1 %v9194_v20  ;;  %v10107_v1 = vand.u32 %v7398_v60, %v10104_v63  ;;  %v10110_v2 = vand.u32 %v7397_v0, %v10104_v63  ;;  %v91_v60 = vld [vmem:[%s17095_s12 + $0x30] sm:$0xff]  ;;  %v90_v0 = vld [vmem:[%s17095_s12 + $0x28] sm:$0xff] }
  0x17   :  { %8967 = vmatprep.subr.bf16.mxu1 %v17099_v9 }
  0x18   :  { %17576 = vst [vmem:[#allocation8_spill] sm:$0xff] %v10107_v1  ;;  %17577 = vst [vmem:[#allocation9_spill] sm:$0xff] %v10110_v2  ;;  %558 = vmatprep.subr.bf16.mxu0 %v10107_v1 }
  0x19   :  { %v9201_v7 = vpop.eup %9200 }
  0x1a   :  { %256 = vrot.lane.b32.xlu0 %v9201_v7, %s9896_s4  ;;  %v10039_v21 = vmul.f32 %v9201_v7, %v9990_v3  ;;  %8968 = vmatpush3.bf16.msra.mxu1 %v9195_v30  ;;  %v100_v30 = vld [vmem:[%s17095_s12 + $0x78] sm:$0xff] }
  0x1b   :  { %8969 = vmatprep.subr.bf16.mxu1 %v17099_v9 }
  0x1c   :  { %v261_v23 = vmul.f32 %v260_v8, %v10039_v21 }
  0x1e   :  { %263 = vrot.lane.b32.xlu0 %v260_v8, %s9896_s4  ;;  %8970 = vmatpush3.bf16.msra.mxu1 %v9196_v31 }
  0x1f   :  { %8971 = vmatprep.subr.bf16.mxu1 %v17099_v9 }
  0x22   :  { %8972 = vmatpush3.bf16.msra.mxu1 %v9197_v32 }
  0x23   :  { %8973 = vmatprep.subr.bf16.mxu1 %v17099_v9 }
  0x26   :  { %8974 = vmatpush3.bf16.msra.mxu1 %v9198_v33  ;;  %v80_v33 = vld [vmem:[%s17094_s11 + $0x18] sm:$0xff] }
  0x27   :  { %8975 = vmatprep.subr.bf16.mxu1 %v17099_v9  ;;  %v226_v9 = vld [vmem:[%s17095_s12 + $0x468] sm:$0xff] }
  0x2a   :  { %8976 = vmatpush3.bf16.msra.mxu1 %v9199_v34  ;;  %v84_v34 = vld [vmem:[%s17094_s11 + $0x38] sm:$0xff] }
  0x8c   :  { %v257_v11 = vpop.permute.xlu0 %256 }
  0x8d   :  { %v10010_v13 = vmul.f32 %v257_v11, %v9990_v3 }
  0x8f   :  { %v274_v57 = vmul.f32 %v10010_v13, %v9990_v3 }
  0x90   :  { %v264_v14 = vpop.permute.xlu0 %263 }
  0x91   :  { %v266_v15 = vmul.f32 %v264_v14, %v10010_v13  ;;  %v273_v13 = vmul.f32 %v10039_v21, %v9990_v3 }
  0x93   :  { %268 = vrot.lane.b32.xlu1 %v266_v15, %s9899_s21 }
  0x97   :  { %292 = vrot.lane.b32.xlu1 %v10024_v18, %s9900_s26 }
 0x105   :  { %v269_v22 = vpop.permute.xlu1 %268 }
 0x106   :  { %v272_v25 = vsel %vm271_vm4, %v261_v23, %v269_v22  ;;  %v79_v23 = vld [vmem:[%s17094_s11 + $0x10] sm:$0xff] }
 0x109   :  { %v293_v24 = vpop.permute.xlu1 %292 }
 0x10a   :  { %v10045_v26 = vsel %vm271_vm4, %v10024_v18, %v293_v24  ;;  %v83_v24 = vld [vmem:[%s17094_s11 + $0x30] sm:$0xff] }
 0x10b   :  { %v296_v27 = vmul.f32 %v10045_v26, %v272_v25  ;;  %v7402_v25 = vcombine.high %v79_v23, %v83_v24 }
 0x10d   :  { %v10048_v28 = vadd.f32 %v296_v27, %v246_v5  ;;  %v82_v5 = vld [vmem:[%s17094_s11 + $0x28] sm:$0xff]  ;;  %v10166_v32 = vand.u32 %v7402_v25, %v10104_v63 }
 0x10e   :  { %v7400_v7 = vcombine.high %v78_v4, %v82_v5  ;;  %v7399_v8 = vcombine.low %v78_v4, %v82_v5  ;;  %v130_v4 = vld [vmem:[%s17095_s12 + $0x168] sm:$0xff]  ;;  %v105_v5 = vld [vmem:[%s17095_s12 + $0xa0] sm:$0xff] }
 0x10f   :  { %17575 = vst [vmem:[#allocation7_spill] sm:$0xff] %v10048_v28  ;;  %v304_v29 = vpack.c.bf16 %v10048_v28, %v10048_v28  ;;  %17580 = vst [vmem:[#allocation12_spill] sm:$0xff] %v10166_v32  ;;  %v86_v25 = vld [vmem:[%s17095_s12 + $0x8] sm:$0xff] }
 0x110   :  { %v10126_v10 = vand.u32 %v7400_v7, %v10104_v63  ;;  %v10129_v11 = vand.u32 %v7399_v8, %v10104_v63  ;;  %v145_v7 = vld [vmem:[%s17095_s12 + $0x1e0] sm:$0xff] }
 0x111   :  { %8958 = vmatmul.mubr.msk.bf16.vlgmr.msra.gmra.mxu0 %vm289_vm5, %v304_v29  ;;  %v10156_v29 = vld [vmem:[%s17095_s12 + $0xf8] sm:$0xff]  ;;  %v89_v8 = vld [vmem:[%s17095_s12 + $0x20] sm:$0xff] }
 0x112   :  { %559 = vmatpush1.bf16.msra.mxu0 %v10110_v2  ;;  %576 = vmatprep.mubr.bf16.mxu0 %v17097_v6  ;;  %17578 = vst [vmem:[#allocation10_spill] sm:$0xff] %v10126_v10  ;;  %17579 = vst [vmem:[#allocation11_spill] sm:$0xff] %v10129_v11 }
 0x113   :  { %599 = vmatprep.subr.bf16.mxu0 %v10126_v10  ;;  %7469 = vmatprep.subr.mxu1 %v10156_v29 }
 0x1d1   :  { %v360_v36 = vpop.f32.mrf.mxu0 }
 0x1d2   :  { %v361_v37 = vadd.f32 %v7383_v35, %v360_v36  ;;  %v99_v35 = vld [vmem:[%s17095_s12 + $0x70] sm:$0xff]  ;;  %v7401_v36 = vcombine.low %v79_v23, %v83_v24  ;;  %v102_v23 = vld [vmem:[%s17095_s12 + $0x88] sm:$0xff] }
 0x1d3   :  { %v8959_v38 = vpop.f32.mrf.mxu0  ;;  %v142_v24 = vld [vmem:[%s17095_s12 + $0x1c8] sm:$0xff] }
 0x1d4   :  { %9202 = vtanh.f32 %v361_v37  ;;  %v114_v37 = vld [vmem:[%s17095_s12 + $0xe8] sm:$0xff]  ;;  %v7404_v38 = vcombine.high %v80_v33, %v84_v34 }
 0x1d5   :  { %v363_v39 = vpop.f32.mrf.mxu0 }
 0x1d6   :  { %v98_v39 = vld [vmem:[%s17095_s12 + $0x68] sm:$0xff] }
 0x1d7   :  { %v8960_v40 = vpop.f32.mrf.mxu0 }
 0x1d8   :  { %v113_v40 = vld [vmem:[%s17095_s12 + $0xe0] sm:$0xff] }
 0x1e1   :  { %v9203_v41 = vpop.eup %9202 }
 0x1e2   :  { %v367_v42 = vpack.c.bf16 %v9203_v41, %v9203_v41  ;;  %v97_v41 = vld [vmem:[%s17095_s12 + $0x60] sm:$0xff] }
 0x1e4   :  { %8978 = vmatmul.mubr.msk.bf16.vlgmr.msra.gmra.mxu1 %vm419_vm6, %v367_v42  ;;  %v10202_v42 = vand.u32 %v7401_v36, %v10104_v63  ;;  %v139_v36 = vld [vmem:[%s17095_s12 + $0x1b0] sm:$0xff] }
 0x1e5   :  { %7470 = vmatpush3.msra.mxu1 %v100_v30  ;;  %v141_v30 = vld [vmem:[%s17095_s12 + $0x1c0] sm:$0xff] }
 0x1e6   :  { %17581 = vst [vmem:[#allocation13_spill] sm:$0xff] %v10202_v42 }
 0x2a4   :  { %v461_v44 = vpop.f32.mrf.mxu1 }
 0x2a5   :  { %v462_v45 = vadd.f32 %v7387_v43, %v461_v44  ;;  %v112_v43 = vld [vmem:[%s17095_s12 + $0xd8] sm:$0xff]  ;;  %v10208_v44 = vand.u32 %v7404_v38, %v10104_v63  ;;  %v138_v38 = vld [vmem:[%s17095_s12 + $0x1a8] sm:$0xff] }
 0x2a6   :  { %v8979_v46 = vpop.f32.mrf.mxu1 }
 0x2a7   :  { %v468_v47 = vsel %vm467_vm7, %v462_v45, -inf  ;;  %17582 = vst [vmem:[#allocation14_spill] sm:$0xff] %v10208_v44  ;;  %v111_v46 = vld [vmem:[%s17095_s12 + $0xd0] sm:$0xff] }
 0x2a8   :  { %469 = vmax.xlane.f32.xlu0 %v468_v47  ;;  %v464_v48 = vpop.f32.mrf.mxu1  ;;  %v7403_v47 = vcombine.low %v80_v33, %v84_v34  ;;  %v140_v33 = vld [vmem:[%s17095_s12 + $0x1b8] sm:$0xff] }
 0x2a9   :  { %v95_v48 = vld [vmem:[%s17095_s12 + $0x50] sm:$0xff]  ;;  %v180_v34 = vld [vmem:[%s17095_s12 + $0x2f8] sm:$0xff] }
 0x2aa   :  { %v8980_v49 = vpop.f32.mrf.mxu1 }
 0x2ab   :  { %v110_v49 = vld [vmem:[%s17095_s12 + $0xc8] sm:$0xff] }
 0x2be   :  { %276 = vrot.lane.b32.xlu0 %v9990_v3, %s9901_s27 }
 0x331   :  { %v470_v50 = vpop.xlane.xlu0 %469 }
 0x332   :  { %v471_v51 = vsub.f32 %v462_v45, %v470_v50  ;;  %v96_v45 = vld [vmem:[%s17095_s12 + $0x58] sm:$0xff]  ;;  %v94_v50 = vld [vmem:[%s17095_s12 + $0x48] sm:$0xff] }
 0x334   :  { %v472_v52 = vmul.f32 1.442695, %v471_v51  ;;  %v109_v51 = vld [vmem:[%s17095_s12 + $0xc0] sm:$0xff] }
 0x335   :  { %v277_v53 = vpop.permute.xlu0 %276 }
 0x336   :  { %9204 = vpow2.f32 %v472_v52  ;;  %v279_v54 = vmul.f32 %v277_v53, %v10039_v21  ;;  %v10235_v52 = vand.u32 %v7403_v47, %v10104_v63  ;;  %v93_v53 = vld [vmem:[%s17095_s12 + $0x40] sm:$0xff]  ;;  %v146_v63 = vld [vmem:[%s17095_s12 + $0x1e8] sm:$0xff]  ;;  %v119_v47 = vld [vmem:[%s17095_s12 + $0x110] sm:$0xff] }
 0x338   :  { %285 = vrot.lane.b32.xlu0 %v279_v54, %s9896_s4  ;;  %17583 = vst [vmem:[#allocation15_spill] sm:$0xff] %v10235_v52  ;;  %v108_v54 = vld [vmem:[%s17095_s12 + $0xb8] sm:$0xff] }
 0x33c   :  { %709 = vrot.lane.b32.xlu0 %v10048_v28, %s9900_s26 }
 0x340   :  { %712 = vrot.lane.b32.xlu0 %v10048_v28, %s9896_s4 }
 0x343   :  { %v9205_v55 = vpop.eup %9204 }
 0x344   :  { %718 = vrot.lane.b32.xlu0 %v10048_v28, %s9902_s28  ;;  %v474_v56 = vsel %vm467_vm7, %v9205_v55, 0.0 }
 0x345   :  { %475 = vadd.xlane.f32.xlu1 %v474_v56  ;;  %v92_v56 = vld [vmem:[%s17095_s12 + $0x38] sm:$0xff] }
 0x348   :  { %724 = vrot.lane.b32.xlu0 %v10048_v28, %s9901_s27 }
 0x356   :  { %281 = vrot.lane.b32.xlu1 %v274_v57, %s9899_s21  ;;  %v132_v57 = vld [vmem:[%s17095_s12 + $0x178] sm:$0xff] }
 0x35a   :  { %298 = vrot.lane.b32.xlu1 %v10024_v18, %s9896_s4 }
 0x35e   :  { %727 = vrot.lane.b32.xlu1 %v10048_v28, %s9899_s21 }
 0x362   :  { %715 = vrot.lane.b32.xlu1 %v10048_v28, %s9905_s19 }
 0x366   :  { %721 = vrot.lane.b32.xlu1 %v10048_v28, %s9906_s20 }
 0x3aa   :  { %v286_v16 = vpop.permute.xlu0 %285 }
 0x3ce   :  { %v476_v12 = vpop.xlane.xlu1 %475 }
 0x3cf   :  { %9206 = vrcp.f32 %v476_v12  ;;  %v129_v12 = vld [vmem:[%s17095_s12 + $0x160] sm:$0xff] }
 0x3d2   :  { %v282_v14 = vpop.permute.xlu1 %281 }
 0x3d3   :  { %v288_v15 = vsel %vm271_vm4, %v273_v13, %v282_v14  ;;  %v104_v13 = vld [vmem:[%s17095_s12 + $0x98] sm:$0xff] }
 0x3d4   :  { %v290_v19 = vsel %vm289_vm5, %v288_v15, %v286_v16  ;;  %v144_v14 = vld [vmem:[%s17095_s12 + $0x1d8] sm:$0xff] }
 0x3d5   :  { %v88_v15 = vld [vmem:[%s17095_s12 + $0x18] sm:$0xff] }
 0x3d6   :  { %v299_v18 = vpop.permute.xlu1 %298  ;;  %v128_v16 = vld [vmem:[%s17095_s12 + $0x158] sm:$0xff] }
 0x3d7   :  { %v301_v20 = vsel %vm289_vm5, %v10045_v26, %v299_v18  ;;  %v103_v18 = vld [vmem:[%s17095_s12 + $0x90] sm:$0xff] }
 0x3d8   :  { %v302_v22 = vmul.f32 %v301_v20, %v290_v19  ;;  %v143_v19 = vld [vmem:[%s17095_s12 + $0x1d0] sm:$0xff] }
 0x3d9   :  { %v87_v20 = vld [vmem:[%s17095_s12 + $0x10] sm:$0xff] }
 0x3da   :  { %v10147_v21 = vsub.f32 %v9990_v3, %v302_v22  ;;  %v115_v3 = vld [vmem:[%s17095_s12 + $0xf0] sm:$0xff] }
 0x3db   :  { %7471 = vmatprep.subr.mxu1 %v115_v3  ;;  %v127_v22 = vld [vmem:[%s17095_s12 + $0x150] sm:$0xff]  ;;  %v85_v3 = vld [vmem:[%s17095_s12] sm:$0xff] }
 0x3dc   :  { %v9207_v27 = vpop.eup %9206  ;;  %765 = vrot.lane.b32.xlu0 %v10147_v21, %s9901_s27  ;;  %750 = vrot.lane.b32.xlu1 %v10147_v21, %s9900_s26 }
 0x3dd   :  { %v478_v26 = vmul.f32 %v9207_v27, %v9205_v55  ;;  %7472 = vmatpush3.msra.mxu1 %v99_v35  ;;  %v148_v55 = vld [vmem:[%s17095_s12 + $0x1f8] sm:$0xff]  ;;  %v126_v27 = vld [vmem:[%s17095_s12 + $0x148] sm:$0xff] }
 0x3de   :  { %7473 = vmatprep.subr.mxu1 %v114_v37  ;;  %v124_v35 = vld [vmem:[%s17095_s12 + $0x138] sm:$0xff]  ;;  %v123_v37 = vld [vmem:[%s17095_s12 + $0x130] sm:$0xff] }
 0x3df   :  { %v479_v31 = vpack.c.bf16 %v478_v26, %v478_v26  ;;  %7474 = vmatpush3.msra.mxu1 %v98_v39  ;;  %v101_v26 = vld [vmem:[%s17095_s12 + $0x80] sm:$0xff]  ;;  %v122_v39 = vld [vmem:[%s17095_s12 + $0x128] sm:$0xff] }
 0x3e0   :  { %753 = vrot.lane.b32.xlu0 %v10147_v21, %s9896_s4  ;;  %768 = vrot.lane.b32.xlu1 %v10147_v21, %s9899_s21 }
 0x3e1   :  { %7405 = vmatmul.mubr.msk.bf16.vlgmr.msra.gmra.mxu0 %vm512_vm10, %v479_v31  ;;  %7475 = vmatprep.subr.mxu1 %v113_v40  ;;  %v137_v40 = vld [vmem:[%s17095_s12 + $0x1a0] sm:$0xff] }
 0x3e2   :  { %600 = vmatpush1.bf16.msra.mxu0 %v10129_v11  ;;  %617 = vmatprep.mubr.bf16.mxu0 %v17097_v6 }
 0x3e3   :  { %640 = vmatprep.subr.bf16.mxu0 %v10166_v32  ;;  %7476 = vmatpush3.msra.mxu1 %v97_v41  ;;  %v121_v41 = vld [vmem:[%s17095_s12 + $0x120] sm:$0xff] }
 0x3e4   :  { %759 = vrot.lane.b32.xlu0 %v10147_v21, %s9902_s28  ;;  %756 = vrot.lane.b32.xlu1 %v10147_v21, %s9905_s19 }
 0x3e5   :  { %7477 = vmatprep.subr.mxu1 %v112_v43  ;;  %v136_v43 = vld [vmem:[%s17095_s12 + $0x198] sm:$0xff] }
 0x3e6   :  { %7478 = vmatpush3.msra.mxu1 %v96_v45  ;;  %v120_v45 = vld [vmem:[%s17095_s12 + $0x118] sm:$0xff] }
 0x3e7   :  { %7479 = vmatprep.subr.mxu1 %v111_v46  ;;  %v135_v46 = vld [vmem:[%s17095_s12 + $0x190] sm:$0xff] }
 0x3e8   :  { %762 = vrot.lane.b32.xlu1 %v10147_v21, %s9906_s20  ;;  %7480 = vmatpush3.msra.mxu1 %v95_v48  ;;  %v134_v48 = vld [vmem:[%s17095_s12 + $0x188] sm:$0xff] }
 0x3e9   :  { %7406 = vmatmul.mubr.msk.bf16.vlgmr.msra.gmra.mxu0 %vm512_vm10, %v479_v31  ;;  %7481 = vmatprep.subr.mxu1 %v110_v49  ;;  %v118_v49 = vld [vmem:[%s17095_s12 + $0x108] sm:$0xff] }
 0x3ea   :  { %641 = vmatpush1.bf16.msra.mxu0 %v10202_v42  ;;  %658 = vmatprep.mubr.bf16.mxu0 %v17097_v6 }
 0x3eb   :  { %681 = vmatprep.subr.bf16.mxu0 %v10208_v44  ;;  %7482 = vmatpush3.msra.mxu1 %v94_v50  ;;  %v133_v50 = vld [vmem:[%s17095_s12 + $0x180] sm:$0xff] }
 0x3ec   :  { %7483 = vmatprep.subr.mxu1 %v109_v51  ;;  %v117_v51 = vld [vmem:[%s17095_s12 + $0x100] sm:$0xff] }
 0x3ed   :  { %7484 = vmatpush3.msra.mxu1 %v93_v53  ;;  %v212_v53 = vld [vmem:[%s17095_s12 + $0x3f8] sm:$0xff] }
 0x3ee   :  { %7485 = vmatprep.subr.mxu1 %v108_v54  ;;  %v245_v54 = vld [vmem:[%s17089_s6] sm:$0x3] }
 0x3ef   :  { %7486 = vmatpush3.msra.mxu1 %v92_v56  ;;  %1212 = vrot.lane.b32.xlu0 %v245_v54, %s9896_s4  ;;  %v710_v56 = vpop.permute.xlu0 %709 }
 0x3f0   :  { %7487 = vmatprep.subr.mxu1 %v107_v58 }
 0x3f1   :  { %7407 = vmatmul.mubr.msk.bf16.vlgmr.msra.gmra.mxu0 %vm512_vm10, %v479_v31  ;;  %7488 = vmatpush3.msra.mxu1 %v91_v60 }
 0x3f2   :  { %682 = vmatpush1.bf16.msra.mxu0 %v10235_v52  ;;  %699 = vmatprep.mubr.bf16.mxu0 %v17097_v6  ;;  %v242_v6 = vld [vmem:[%s17095_s12 + $0x4e8] sm:$0xff] }
 0x3f3   :  { %7504 = vmatprep.subr.mxu0 %v148_v55  ;;  %7489 = vmatprep.subr.mxu1 %v106_v62  ;;  %v1242_v55 = vld [vmem:[%s17084_s1] sm:$0x3]  ;;  %v713_v58 = vpop.permute.xlu0 %712 }
 0x3f4   :  { %7490 = vmatpush3.msra.mxu1 %v90_v0  ;;  %1246 = vrot.lane.b32.xlu1 %v1242_v55, %s9900_s26 }
 0x3f5   :  { %7491 = vmatprep.subr.mxu1 %v105_v5 }
 0x3f6   :  { %7492 = vmatpush3.msra.mxu1 %v89_v8  ;;  %v730_v8 = vsel %vm271_vm4, %v10048_v28, %v710_v56 }
 0x3f7   :  { %7493 = vmatprep.subr.mxu1 %v104_v13  ;;  %v719_v60 = vpop.permute.xlu0 %718  ;;  %v731_v13 = vsel %vm289_vm5, %v730_v8, %v713_v58 }
 0x3f8   :  { %7494 = vmatpush3.msra.mxu1 %v88_v15 }
 0x3f9   :  { %7408 = vmatmul.mubr.msk.bf16.vlgmr.msra.gmra.mxu0 %vm512_vm10, %v479_v31  ;;  %7495 = vmatprep.subr.mxu1 %v103_v18  ;;  %v125_v31 = vld [vmem:[%s17095_s12 + $0x140] sm:$0xff] }
 0x3fa   :  { %7505 = vmatpush3.msra.mxu0 %v132_v57  ;;  %7496 = vmatpush3.msra.mxu1 %v87_v20  ;;  %v728_v57 = vpop.permute.xlu1 %727 }
 0x3fb   :  { %7506 = vmatprep.subr.mxu0 %v147_v59  ;;  %7497 = vmatprep.subr.mxu1 %v102_v23  ;;  %v742_v0 = vsel %vm271_vm4, %v728_v57, %v10048_v28  ;;  %v10850_v28 = vld [vmem:[%s17095_s12 + $0x320] sm:$0xff] }
 0x3fc   :  { %7507 = vmatpush3.msra.mxu0 %v131_v61  ;;  %7498 = vmatpush3.msra.mxu1 %v86_v25  ;;  %17592 = vst [vmem:[#allocation24_spill] sm:$0xff] %v10850_v28 }
 0x3fd   :  { %7508 = vmatprep.subr.mxu0 %v146_v63  ;;  %7499 = vmatprep.subr.mxu1 %v101_v26  ;;  %v725_v63 = vpop.permute.xlu0 %724 }
 0x3fe   :  { %7509 = vmatpush3.msra.mxu0 %v130_v4  ;;  %7500 = vmatpush3.msra.mxu1 %v85_v3  ;;  %v716_v59 = vpop.permute.xlu1 %715 }
 0x3ff   :  { %7510 = vmatprep.subr.mxu0 %v145_v7  ;;  %7539 = vmatprep.subr.mxu1 %v180_v34  ;;  %v743_v7 = vsel %vm289_vm5, %v742_v0, %v710_v56 }
 0x400   :  { %7511 = vmatpush3.msra.mxu0 %v129_v12 }
 0x401   :  { %7512 = vmatprep.subr.mxu0 %v144_v14  ;;  %v744_v14 = vsel %vm732_vm11, %v743_v7, %v713_v58 }
 0x402   :  { %7513 = vmatpush3.msra.mxu0 %v128_v16  ;;  %v722_v61 = vpop.permute.xlu1 %721  ;;  %v733_v16 = vsel %vm732_vm11, %v731_v13, %v716_v59  ;;  %v745_v23 = vsel %vm734_vm12, %v744_v14, %v716_v59  ;;  %v164_v14 = vld [vmem:[%s17095_s12 + $0x278] sm:$0xff] }
 0x403   :  { %7514 = vmatprep.subr.mxu0 %v143_v19  ;;  %v735_v25 = vsel %vm734_vm12, %v733_v16, %v719_v60  ;;  %v746_v34 = vsel %vm736_vm13, %v745_v23, %v719_v60 }
 0x404   :  { %7515 = vmatpush3.msra.mxu0 %v127_v22  ;;  %v737_v26 = vsel %vm736_vm13, %v735_v25, %v722_v61  ;;  %v163_v25 = vld [vmem:[%s17095_s12 + $0x270] sm:$0xff] }
 0x405   :  { %7516 = vmatprep.subr.mxu0 %v142_v24 }
 0x406   :  { %7517 = vmatpush3.msra.mxu0 %v126_v27 }
 0x407   :  { %7518 = vmatprep.subr.mxu0 %v141_v30 }
 0x408   :  { %7519 = vmatpush3.msra.mxu0 %v125_v31 }
 0x409   :  { %7520 = vmatprep.subr.mxu0 %v140_v33 }
 0x40a   :  { %7521 = vmatpush3.msra.mxu0 %v124_v35 }
 0x40b   :  { %7522 = vmatprep.subr.mxu0 %v139_v36 }
 0x40c   :  { %7523 = vmatpush3.msra.mxu0 %v123_v37  ;;  %v747_v37 = vsel %vm738_vm14, %v746_v34, %v722_v61 }
 0x40d   :  { %7524 = vmatprep.subr.mxu0 %v138_v38 }
 0x40e   :  { %7525 = vmatpush3.msra.mxu0 %v122_v39  ;;  %v739_v39 = vsel %vm738_vm14, %v737_v26, %v725_v63  ;;  %v178_v26 = vld [vmem:[%s17095_s12 + $0x2e8] sm:$0xff] }
 0x40f   :  { %7526 = vmatprep.subr.mxu0 %v137_v40 }
 0x410   :  { %7527 = vmatpush3.msra.mxu0 %v121_v41 }
 0x411   :  { %7528 = vmatprep.subr.mxu0 %v136_v43 }
 0x412   :  { %7529 = vmatpush3.msra.mxu0 %v120_v45 }
 0x413   :  { %7530 = vmatprep.subr.mxu0 %v135_v46  ;;  %v10445_v46 = vsel %vm740_vm15, %v747_v37, %v725_v63  ;;  %v176_v37 = vld [vmem:[%s17095_s12 + $0x2d8] sm:$0xff] }
 0x414   :  { %7531 = vmatpush3.msra.mxu0 %v119_v47 }
 0x415   :  { %7532 = vmatprep.subr.mxu0 %v134_v48  ;;  %v10449_v48 = vsel %vm740_vm15, %v739_v39, %v728_v57  ;;  %v175_v39 = vld [vmem:[%s17095_s12 + $0x2d0] sm:$0xff] }
 0x416   :  { %7533 = vmatpush3.msra.mxu0 %v118_v49 }
 0x417   :  { %7534 = vmatprep.subr.mxu0 %v133_v50 }
 0x418   :  { %7535 = vmatpush3.msra.mxu0 %v117_v51 }
 0x419   :  { %7574 = vmatprep.subr.mxu0 %v212_v53 }
 0x44e   :  { %v751_v62 = vpop.permute.xlu1 %750  ;;  %v10404_v4 = vpop.permute.xlu0 %765 }
 0x44f   :  { %v771_v27 = vsel %vm271_vm4, %v10147_v21, %v751_v62 }
 0x452   :  { %v769_v5 = vpop.permute.xlu1 %768  ;;  %v10413_v15 = vpop.permute.xlu0 %753 }
 0x453   :  { %v785_v12 = vsel %vm271_vm4, %v10404_v4, %v769_v5  ;;  %17584 = vst [vmem:[#allocation16_spill] sm:$0xff] %v10413_v15  ;;  %v778_v20 = vsel %vm271_vm4, %v769_v5, %v10147_v21  ;;  %v772_v3 = vsel %vm289_vm5, %v771_v27, %v10413_v15 }
 0x454   :  { %v786_v22 = vsel %vm289_vm5, %v785_v12, %v10147_v21  ;;  %v779_v30 = vsel %vm289_vm5, %v778_v20, %v751_v62  ;;  %v179_v20 = vld [vmem:[%s17095_s12 + $0x2f0] sm:$0xff] }
 0x455   :  { %v787_v31 = vsel %vm732_vm11, %v786_v22, %v751_v62  ;;  %v780_v40 = vsel %vm732_vm11, %v779_v30, %v10413_v15 }
 0x456   :  { %v757_v18 = vpop.permute.xlu1 %756  ;;  %v760_v36 = vpop.permute.xlu0 %759  ;;  %v788_v41 = vsel %vm734_vm12, %v787_v31, %v10413_v15  ;;  %v225_v15 = vld [vmem:[%s17095_s12 + $0x460] sm:$0xff] }
 0x457   :  { %v773_v35 = vsel %vm732_vm11, %v772_v3, %v757_v18  ;;  %v781_v49 = vsel %vm734_vm12, %v780_v40, %v757_v18  ;;  %v789_v50 = vsel %vm736_vm13, %v788_v41, %v757_v18  ;;  %v162_v3 = vld [vmem:[%s17095_s12 + $0x268] sm:$0xff]  ;;  %v159_v41 = vld [vmem:[%s17095_s12 + $0x250] sm:$0xff] }
 0x458   :  { %v774_v43 = vsel %vm734_vm12, %v773_v35, %v760_v36  ;;  %v782_v61 = vsel %vm736_vm13, %v781_v49, %v760_v36  ;;  %v790_v62 = vsel %vm738_vm14, %v789_v50, %v760_v36  ;;  %v161_v36 = vld [vmem:[%s17095_s12 + $0x260] sm:$0xff]  ;;  %v174_v50 = vld [vmem:[%s17095_s12 + $0x2c8] sm:$0xff] }
 0x45a   :  { %v763_v38 = vpop.permute.xlu1 %762 }
 0x45b   :  { %v775_v47 = vsel %vm736_vm13, %v774_v43, %v763_v38  ;;  %v783_v7 = vsel %vm738_vm14, %v782_v61, %v763_v38  ;;  %v10473_v8 = vsel %vm740_vm15, %v790_v62, %v763_v38 }
 0x45c   :  { %v776_v57 = vsel %vm738_vm14, %v775_v47, %v10404_v4 }
 0x45d   :  { %v10481_v18 = vsel %vm740_vm15, %v776_v57, %v769_v5  ;;  %v10495_v5 = vsel %vm740_vm15, %v783_v7, %v10404_v4  ;;  %v177_v4 = vld [vmem:[%s17095_s12 + $0x2e0] sm:$0xff] }
 0x4a1   :  { %v10416_v19 = vpop.f32.mrf.mxu0 }
 0x4a2   :  { %v792_v58 = vmul.f32 %v10449_v48, %v10416_v19 }
 0x4a3   :  { %v10423_v24 = vpop.f32.mrf.mxu0 }
 0x4a4   :  { %v793_v55 = vmul.f32 %v10449_v48, %v10423_v24  ;;  %v805_v59 = vmul.f32 %v10423_v24, %v10423_v24 }
 0x4a5   :  { %v582_v33 = vpop.f32.mrf.mxu0 }
 0x4a6   :  { %v807_v27 = vmul.f32 %v805_v59, %v10481_v18 }
 0x4a7   :  { %v583_v21 = vpop.f32.mrf.mxu0 }
 0x4a8   :  { %v160_v21 = vld [vmem:[%s17095_s12 + $0x258] sm:$0xff] }
 0x4a9   :  { %v10442_v45 = vpop.f32.mrf.mxu0 }
 0x4aa   :  { %v794_v51 = vmul.f32 %v10445_v46, %v10442_v45 }
 0x4ab   :  { %v10455_v53 = vpop.f32.mrf.mxu0 }
 0x4ac   :  { %v809_v54 = vmul.f32 %v10455_v53, %v10423_v24  ;;  %v795_v56 = vmul.f32 %v10445_v46, %v10455_v53  ;;  %v796_v13 = vadd.f32 %v794_v51, %v792_v58  ;;  %v817_v16 = vmul.f32 %v10455_v53, %v10455_v53  ;;  %v173_v58 = vld [vmem:[%s17095_s12 + $0x2c0] sm:$0xff] }
 0x4ad   :  { %v623_v60 = vpop.f32.mrf.mxu0 }
 0x4ae   :  { %v811_v63 = vmul.f32 2.0, %v809_v54  ;;  %v797_v0 = vadd.f32 %v795_v56, %v793_v55  ;;  %v819_v33 = vmul.f32 %v817_v16, %v10495_v5  ;;  %v158_v55 = vld [vmem:[%s17095_s12 + $0x248] sm:$0xff] }
 0x4af   :  { %v624_v12 = vpop.f32.mrf.mxu0 }
 0x4b0   :  { %924 = vmatprep.mubr.f32.mxu1 %v797_v0  ;;  %v813_v22 = vmul.f32 %v811_v63, %v10473_v8  ;;  %v10558_v0 = vld [vmem:[%s17095_s12 + $0x240] sm:$0xff]  ;;  %v808_v12 = vmul.f32 %v10442_v45, %v10416_v19 }
 0x4b1   :  { %v10487_v23 = vpop.f32.mrf.mxu0  ;;  %925 = vmatmul.mubr.f32.vlgmr.msra.gmra.mxu1 %v796_v13  ;;  %v10568_v13 = vld [vmem:[%s17095_s12 + $0x2b8] sm:$0xff] }
 0x4b2   :  { %7540 = vmatpush3.msra.mxu1 %v164_v14  ;;  %v815_v31 = vadd.f32 %v813_v22, %v807_v27  ;;  %v840_v43 = vmul.f32 %v10487_v23, %v10416_v19  ;;  %v846_v47 = vmul.f32 %v10487_v23, %v10442_v45  ;;  %v798_v61 = vmul.f32 %v10449_v48, %v10487_v23  ;;  %v10578_v22 = vld [vmem:[%s17095_s12 + $0x378] sm:$0xff] }
 0x4b3   :  { %7541 = vmatprep.subr.mxu1 %v179_v20  ;;  %v10500_v30 = vpop.f32.mrf.mxu0  ;;  %v10573_v20 = vld [vmem:[%s17095_s12 + $0x238] sm:$0xff] }
 0x4b4   :  { %7542 = vmatpush3.msra.mxu1 %v163_v25  ;;  %v821_v35 = vadd.f32 %v819_v33, %v815_v31  ;;  %v823_v56 = vmul.f32 %v10500_v30, %v10500_v30  ;;  %v799_v59 = vmul.f32 %v10449_v48, %v10500_v30  ;;  %v10592_v31 = vld [vmem:[%s17095_s12 + $0x3f0] sm:$0xff] }
 0x4b5   :  { %7543 = vmatprep.subr.mxu1 %v178_v26  ;;  %v664_v34 = vpop.f32.mrf.mxu0 }
 0x4b6   :  { %7544 = vmatpush3.msra.mxu1 %v162_v3  ;;  %1064 = vmatprep.mubr.f32.mxu1 %v821_v35  ;;  %v10587_v3 = vld [vmem:[%s17095_s12 + $0x2b0] sm:$0xff]  ;;  %v825_v33 = vmul.f32 %v823_v56, %v10481_v18  ;;  %v10644_v56 = vld [vmem:[%s17095_s12 + $0x2a0] sm:$0xff] }
 0x4b7   :  { %7545 = vmatprep.subr.mxu1 %v177_v4  ;;  %v665_v38 = vpop.f32.mrf.mxu0  ;;  %v10599_v4 = vld [vmem:[%s17095_s12 + $0x230] sm:$0xff] }
 0x4b8   :  { %7546 = vmatpush3.msra.mxu1 %v161_v36  ;;  %v10604_v34 = vld [vmem:[%s17095_s12 + $0x370] sm:$0xff] }
 0x4b9   :  { %7547 = vmatprep.subr.mxu1 %v176_v37  ;;  %v10521_v40 = vpop.f32.mrf.mxu0 }
 0x4ba   :  { %v844_v49 = vmul.f32 %v10521_v40, %v10416_v19  ;;  %7548 = vmatpush3.msra.mxu1 %v160_v21  ;;  %v800_v51 = vmul.f32 %v10445_v46, %v10521_v40  ;;  %v854_v62 = vmul.f32 %v10521_v40, %v10442_v45  ;;  %v10615_v21 = vld [vmem:[%s17095_s12 + $0x2a8] sm:$0xff] }
 0x4bb   :  { %7549 = vmatprep.subr.mxu1 %v175_v39  ;;  %v10537_v54 = vpop.f32.mrf.mxu0  ;;  %v10620_v39 = vld [vmem:[%s17095_s12 + $0x3e8] sm:$0xff] }
 0x4bc   :  { %v848_v57 = vadd.f32 %v846_v47, %v844_v49  ;;  %7550 = vmatpush3.msra.mxu1 %v159_v41  ;;  %v801_v60 = vmul.f32 %v10445_v46, %v10537_v54  ;;  %v827_v7 = vmul.f32 %v10537_v54, %v10500_v30  ;;  %v842_v46 = vmul.f32 %v840_v43, %v10481_v18  ;;  %v10627_v43 = vld [vmem:[%s17095_s12 + $0x228] sm:$0xff] }
 0x4bd   :  { %7551 = vmatprep.subr.mxu1 %v174_v50  ;;  %v705_v63 = vpop.f32.mrf.mxu0  ;;  %v802_v16 = vadd.f32 %v800_v51, %v798_v61  ;;  %v835_v27 = vmul.f32 %v10537_v54, %v10537_v54  ;;  %v856_v37 = vmul.f32 %v854_v62, %v10495_v5  ;;  %v845_v38 = vmul.f32 %v10537_v54, %v10423_v24  ;;  %v10632_v47 = vld [vmem:[%s17095_s12 + $0x368] sm:$0xff]  ;;  %v10665_v61 = vld [vmem:[%s17095_s12 + $0x360] sm:$0xff] }
 0x4be   :  { %7552 = vmatpush3.msra.mxu1 %v158_v55  ;;  %v803_v48 = vadd.f32 %v801_v60, %v799_v59  ;;  %v829_v25 = vmul.f32 2.0, %v827_v7  ;;  %v850_v26 = vmul.f32 %v848_v57, %v10473_v8  ;;  %v810_v41 = vmul.f32 2.0, %v808_v12  ;;  %v10649_v57 = vld [vmem:[%s17095_s12 + $0x3e0] sm:$0xff]  ;;  %v10678_v7 = vld [vmem:[%s17095_s12 + $0x3d8] sm:$0xff] }
 0x4bf   :  { %7553 = vmatprep.subr.mxu1 %v173_v58  ;;  %v706_v14 = vpop.f32.mrf.mxu0  ;;  %v837_v50 = vmul.f32 %v835_v27, %v10495_v5  ;;  %v847_v55 = vmul.f32 %v10500_v30, %v10455_v53  ;;  %v804_v58 = vmul.f32 %v10416_v19, %v10416_v19  ;;  %v10658_v60 = vld [vmem:[%s17095_s12 + $0x220] sm:$0xff]  ;;  %v10670_v19 = vld [vmem:[%s17095_s12 + $0x298] sm:$0xff]  ;;  %v10723_v27 = vld [vmem:[%s17095_s12 + $0x288] sm:$0xff] }
 0x4c0   :  { %7554 = vmatpush3.msra.mxu1 %v10558_v0  ;;  %994 = vmatprep.mubr.f32.mxu0 %v803_v48  ;;  %v831_v35 = vmul.f32 %v829_v25, %v10473_v8  ;;  %v852_v36 = vadd.f32 %v850_v26, %v842_v46  ;;  %v812_v63 = vmul.f32 %v810_v41, %v10473_v8  ;;  %v10683_v12 = vld [vmem:[%s17095_s12 + $0x218] sm:$0xff]  ;;  %v10696_v14 = vld [vmem:[%s17095_s12 + $0x290] sm:$0xff] }
 0x4c1   :  { %7555 = vmatprep.subr.mxu1 %v10568_v13  ;;  %995 = vmatmul.mubr.f32.vlgmr.msra.gmra.mxu0 %v802_v16  ;;  %v849_v62 = vadd.f32 %v847_v55, %v845_v38  ;;  %v841_v46 = vmul.f32 %v10500_v30, %v10423_v24  ;;  %v10691_v48 = vld [vmem:[%s17095_s12 + $0x358] sm:$0xff]  ;;  %v806_v16 = vmul.f32 %v804_v58, %v10481_v18  ;;  %v10706_v24 = vld [vmem:[%s17095_s12 + $0x3d0] sm:$0xff]  ;;  %v10748_v38 = vld [vmem:[%s17095_s12 + $0x280] sm:$0xff] }
 0x4c2   :  { %7556 = vmatpush3.msra.mxu1 %v10573_v20  ;;  %7575 = vmatpush3.msra.mxu0 %v10578_v22  ;;  %v833_v49 = vadd.f32 %v831_v35, %v825_v33  ;;  %v10635_v51 = vadd.f32 %v856_v37, %v852_v36  ;;  %v816_v25 = vmul.f32 %v10442_v45, %v10442_v45  ;;  %v10711_v30 = vld [vmem:[%s17095_s12 + $0x210] sm:$0xff]  ;;  %v10731_v33 = vld [vmem:[%s17095_s12 + $0x3c8] sm:$0xff]  ;;  %v10763_v55 = vld [vmem:[%s17095_s12 + $0x200] sm:$0xff] }
 0x4c3   :  { %7557 = vmatprep.subr.mxu1 %v10587_v3  ;;  %7576 = vmatprep.subr.mxu0 %v10592_v31  ;;  %v10718_v45 = vld [vmem:[%s17095_s12 + $0x350] sm:$0xff]  ;;  %v851_v26 = vmul.f32 %v849_v62, %v10473_v8  ;;  %v10736_v35 = vld [vmem:[%s17095_s12 + $0x208] sm:$0xff]  ;;  %v814_v36 = vadd.f32 %v812_v63, %v806_v16  ;;  %17586 = vst [vmem:[#allocation18_spill] sm:$0xff] %v10748_v38  ;;  %17587 = vst [vmem:[#allocation19_spill] sm:$0xff] %v10763_v55 }
 0x4c4   :  { %7558 = vmatpush3.msra.mxu1 %v10599_v4  ;;  %7577 = vmatpush3.msra.mxu0 %v10604_v34  ;;  %v839_v59 = vadd.f32 %v837_v50, %v833_v49  ;;  %17585 = vst [vmem:[#allocation17_spill] sm:$0xff] %v10736_v35  ;;  %v10743_v37 = vld [vmem:[%s17095_s12 + $0x348] sm:$0xff]  ;;  %v843_v41 = vmul.f32 %v841_v46, %v10481_v18  ;;  %v10758_v50 = vld [vmem:[%s17095_s12 + $0x3c0] sm:$0xff]  ;;  %v10778_v62 = vld [vmem:[%s17095_s12 + $0x3b8] sm:$0xff] }
 0x4c5   :  { %7559 = vmatprep.subr.mxu1 %v10615_v21  ;;  %7578 = vmatprep.subr.mxu0 %v10620_v39  ;;  %v855_v49 = vmul.f32 %v10537_v54, %v10455_v53  ;;  %v818_v58 = vmul.f32 %v816_v25, %v10495_v5  ;;  %v10771_v53 = vld [vmem:[%s17095_s12 + $0x340] sm:$0xff]  ;;  %v10783_v63 = vld [vmem:[%s17095_s12 + $0x4f8] sm:$0xff]  ;;  %v826_v46 = vmul.f32 %v10521_v40, %v10487_v23 }
 0x4c6   :  { %7560 = vmatpush3.msra.mxu1 %v10627_v43  ;;  %7579 = vmatpush3.msra.mxu0 %v10632_v47  ;;  %v853_v54 = vadd.f32 %v851_v26, %v843_v41  ;;  %17588 = vst [vmem:[#allocation20_spill] sm:$0xff] %v10783_v63  ;;  %v10792_v16 = vld [vmem:[%s17095_s12 + $0x338] sm:$0xff] }
 0x4c7   :  { %7561 = vmatprep.subr.mxu1 %v10644_v56  ;;  %7580 = vmatprep.subr.mxu0 %v10649_v57  ;;  %v228_v25 = vld [vmem:[%s17095_s12 + $0x478] sm:$0xff]  ;;  %v857_v26 = vmul.f32 %v855_v49, %v10495_v5  ;;  %v10812_v49 = vld [vmem:[%s17095_s12 + $0x330] sm:$0xff] }
 0x4c8   :  { %1134 = vmatprep.mubr.f32.mxu0 %v839_v59  ;;  %7562 = vmatpush3.msra.mxu1 %v10658_v60  ;;  %v820_v59 = vadd.f32 %v818_v58, %v814_v36  ;;  %v10802_v36 = vld [vmem:[%s17095_s12 + $0x3b0] sm:$0xff] }
 0x4c9   :  { %7581 = vmatpush3.msra.mxu0 %v10665_v61  ;;  %7563 = vmatprep.subr.mxu1 %v10670_v19  ;;  %v859_v41 = vadd.f32 %v857_v26, %v853_v54  ;;  %v243_v58 = vld [vmem:[%s17095_s12 + $0x4f0] sm:$0xff]  ;;  %v10821_v54 = vld [vmem:[%s17095_s12 + $0x3a8] sm:$0xff]  ;;  %v828_v26 = vmul.f32 2.0, %v826_v46  ;;  %v10839_v46 = vld [vmem:[%s17095_s12 + $0x3a0] sm:$0xff] }
 0x4ca   :  { %7582 = vmatprep.subr.mxu0 %v10678_v7  ;;  %7564 = vmatpush3.msra.mxu1 %v10683_v12  ;;  %17589 = vst [vmem:[#allocation21_spill] sm:$0xff] %v10821_v54  ;;  %17591 = vst [vmem:[#allocation23_spill] sm:$0xff] %v10839_v46 }
 0x4cb   :  { %7583 = vmatpush3.msra.mxu0 %v10691_v48  ;;  %7565 = vmatprep.subr.mxu1 %v10696_v14 }
 0x4cc   :  { %7584 = vmatprep.subr.mxu0 %v10706_v24  ;;  %7566 = vmatpush3.msra.mxu1 %v10711_v30 }
 0x4cd   :  { %7585 = vmatpush3.msra.mxu0 %v10718_v45  ;;  %7567 = vmatprep.subr.mxu1 %v10723_v27 }
 0x4ce   :  { %7586 = vmatprep.subr.mxu0 %v10731_v33  ;;  %7568 = vmatpush3.msra.mxu1 %v10736_v35 }
 0x4cf   :  { %7587 = vmatpush3.msra.mxu0 %v10743_v37  ;;  %7569 = vmatprep.subr.mxu1 %v10748_v38 }
 0x4d0   :  { %7588 = vmatprep.subr.mxu0 %v10758_v50  ;;  %7570 = vmatpush3.msra.mxu1 %v10763_v55  ;;  %v834_v55 = vmul.f32 %v10521_v40, %v10521_v40  ;;  %v10915_v40 = vld [vmem:[%s17095_s12 + $0x4c8] sm:$0xff] }
 0x4d1   :  { %7589 = vmatpush3.msra.mxu0 %v10771_v53  ;;  %1065 = vmatmul.mubr.f32.vlgmr.msra.gmra.mxu1 %v820_v59  ;;  %v227_v59 = vld [vmem:[%s17095_s12 + $0x470] sm:$0xff]  ;;  %17602 = vst [vmem:[#allocation34_spill] sm:$0xff] %v10915_v40 }
 0x4d2   :  { %7590 = vmatprep.subr.mxu0 %v10778_v62  ;;  %7609 = vmatprep.subr.mxu1 %v10783_v63  ;;  %v10871_v63 = vld [vmem:[%s17095_s12 + $0x318] sm:$0xff] }
 0x4d3   :  { %7591 = vmatpush3.msra.mxu0 %v10792_v16  ;;  %7610 = vmatpush3.msra.mxu1 %v228_v25  ;;  %v10830_v25 = vld [vmem:[%s17095_s12 + $0x328] sm:$0xff]  ;;  %17595 = vst [vmem:[#allocation27_spill] sm:$0xff] %v10871_v63 }
 0x4d4   :  { %1204 = vmatprep.mubr.f32.mxu1 %v859_v41  ;;  %7592 = vmatprep.subr.mxu0 %v10802_v36  ;;  %17590 = vst [vmem:[#allocation22_spill] sm:$0xff] %v10830_v25  ;;  %v822_v41 = vmul.f32 %v10487_v23, %v10487_v23  ;;  %v10859_v23 = vld [vmem:[%s17095_s12 + $0x398] sm:$0xff] }
 0x4d5   :  { %7611 = vmatprep.subr.mxu1 %v243_v58  ;;  %7593 = vmatpush3.msra.mxu0 %v10812_v49  ;;  %v241_v58 = vld [vmem:[%s17095_s12 + $0x4e0] sm:$0xff]  ;;  %17593 = vst [vmem:[#allocation25_spill] sm:$0xff] %v10859_v23 }
 0x4d6   :  { %7612 = vmatpush3.msra.mxu1 %v227_v59  ;;  %7594 = vmatprep.subr.mxu0 %v10821_v54  ;;  %v830_v59 = vmul.f32 %v828_v26, %v10473_v8  ;;  %v10877_v8 = vld [vmem:[%s17095_s12 + $0x458] sm:$0xff]  ;;  %v824_v26 = vmul.f32 %v822_v41, %v10481_v18  ;;  %v10908_v18 = vld [vmem:[%s17095_s12 + $0x388] sm:$0xff]  ;;  %v1247_v54 = vpop.permute.xlu1 %1246 }
 0x4d7   :  { %7613 = vmatprep.subr.mxu1 %v242_v6  ;;  %7595 = vmatpush3.msra.mxu0 %v10830_v25  ;;  %v10866_v6 = vld [vmem:[%s17095_s12 + $0x4d8] sm:$0xff]  ;;  %17596 = vst [vmem:[#allocation28_spill] sm:$0xff] %v10877_v8  ;;  %17601 = vst [vmem:[#allocation33_spill] sm:$0xff] %v10908_v18  ;;  %v10920_v41 = vld [vmem:[%s17095_s12 + $0x308] sm:$0xff]  ;;  %v11077_v25 = vpop.permute.xlu0 %1212 }
 0x4d8   :  { %7614 = vmatpush3.msra.mxu1 %v226_v9  ;;  %7596 = vmatprep.subr.mxu0 %v10839_v46  ;;  %17594 = vst [vmem:[#allocation26_spill] sm:$0xff] %v10866_v6  ;;  %v10882_v9 = vld [vmem:[%s17095_s12 + $0x390] sm:$0xff]  ;;  %17603 = vst [vmem:[#allocation35_spill] sm:$0xff] %v10920_v41 }
 0x4d9   :  { %7615 = vmatprep.subr.mxu1 %v241_v58  ;;  %7597 = vmatpush3.msra.mxu0 %v10850_v28  ;;  %17597 = vst [vmem:[#allocation29_spill] sm:$0xff] %v10882_v9  ;;  %v10891_v58 = vld [vmem:[%s17095_s12 + $0x4d0] sm:$0xff] }
 0x4da   :  { %7616 = vmatpush3.msra.mxu1 %v225_v15  ;;  %7598 = vmatprep.subr.mxu0 %v10859_v23  ;;  %17598 = vst [vmem:[#allocation30_spill] sm:$0xff] %v10891_v58  ;;  %v10896_v28 = vld [vmem:[%s17095_s12 + $0x310] sm:$0xff] }
 0x4db   :  { %17599 = vst [vmem:[#allocation31_spill] sm:$0xff] %v10896_v28  ;;  %7617 = vmatprep.subr.mxu1 %v10866_v6  ;;  %7599 = vmatpush3.msra.mxu0 %v10871_v63  ;;  %v10903_v15 = vld [vmem:[%s17095_s12 + $0x450] sm:$0xff]  ;;  %v832_v6 = vadd.f32 %v830_v59, %v824_v26  ;;  %v10939_v59 = vld [vmem:[%s17095_s12 + $0x4c0] sm:$0xff] }
 0x4dc   :  { %17600 = vst [vmem:[#allocation32_spill] sm:$0xff] %v10903_v15  ;;  %7618 = vmatpush3.msra.mxu1 %v10877_v8  ;;  %7600 = vmatprep.subr.mxu0 %v10882_v9  ;;  %v10927_v8 = vld [vmem:[%s17095_s12 + $0x448] sm:$0xff]  ;;  %v10932_v9 = vld [vmem:[%s17095_s12 + $0x380] sm:$0xff]  ;;  %17606 = vst [vmem:[#allocation38_spill] sm:$0xff] %v10939_v59 }
 0x4dd   :  { %7619 = vmatprep.subr.mxu1 %v10891_v58  ;;  %7601 = vmatpush3.msra.mxu0 %v10896_v28  ;;  %17604 = vst [vmem:[#allocation36_spill] sm:$0xff] %v10927_v8  ;;  %17605 = vst [vmem:[#allocation37_spill] sm:$0xff] %v10932_v9  ;;  %v10944_v26 = vld [vmem:[%s17095_s12 + $0x300] sm:$0xff]  ;;  %v836_v58 = vmul.f32 %v834_v55, %v10495_v5  ;;  %v10959_v28 = vld [vmem:[%s17095_s12 + $0x4b8] sm:$0xff] }
 0x4de   :  { %7620 = vmatpush3.msra.mxu1 %v10903_v15  ;;  %7602 = vmatprep.subr.mxu0 %v10908_v18  ;;  %17607 = vst [vmem:[#allocation39_spill] sm:$0xff] %v10944_v26  ;;  %v10952_v15 = vld [vmem:[%s17095_s12 + $0x440] sm:$0xff]  ;;  %17609 = vst [vmem:[#allocation41_spill] sm:$0xff] %v10959_v28  ;;  %v10966_v5 = vld [vmem:[%s17095_s12 + $0x438] sm:$0xff] }
 0x4df   :  { %7621 = vmatprep.subr.mxu1 %v10915_v40  ;;  %7603 = vmatpush3.msra.mxu0 %v10920_v41  ;;  %17608 = vst [vmem:[#allocation40_spill] sm:$0xff] %v10952_v15  ;;  %v838_v18 = vadd.f32 %v836_v58, %v832_v6  ;;  %17610 = vst [vmem:[#allocation42_spill] sm:$0xff] %v10966_v5  ;;  %v10972_v55 = vld [vmem:[%s17095_s12 + $0x4b0] sm:$0xff]  ;;  %v17613_v58 = vmov 0.0  }
 0x4e0   :  { %7622 = vmatpush3.msra.mxu1 %v10927_v8  ;;  %7604 = vmatprep.subr.mxu0 %v10932_v9  ;;  %17611 = vst [vmem:[#allocation43_spill] sm:$0xff] %v10972_v55  ;;  %v10978_v6 = vld [vmem:[%s17095_s12 + $0x430] sm:$0xff]  ;;  %v11049_v8 = vld [vmem:[%s17095_s12 + $0x488] sm:$0xff] }
 0x4e1   :  { %7623 = vmatprep.subr.mxu1 %v10939_v59  ;;  %7605 = vmatpush3.msra.mxu0 %v10944_v26  ;;  %17612 = vst [vmem:[#allocation44_spill] sm:$0xff] %v10978_v6  ;;  %v11023_v59 = vld [vmem:[%s17090_s7] sm:$0xff]   ;;  %17624 = vst [vmem:[#allocation55_spill] sm:$0xff] %v11049_v8 }
 0x4e2   :  { %7624 = vmatpush3.msra.mxu1 %v10952_v15  ;;  %1135 = vmatmul.mubr.f32.vlgmr.msra.gmra.mxu0 %v838_v18  ;;  %v10985_v18 = vld [vmem:[%s17095_s12 + $0x4a8] sm:$0xff]  ;;  %17620 = vst [vmem:[#allocation51_spill] sm:$0xff] %v11023_v59 }
 0x4e3   :  { %7625 = vmatprep.subr.mxu1 %v10959_v28  ;;  %8981 = vmatprep.subr.bf16.mxu0 %v17613_v58  ;;  %17614 = vst [vmem:[#allocation45_spill] sm:$0xff] %v10985_v18  ;;  %v10990_v15 = vld [vmem:[%s17090_s7 + $0x8] sm:$0xff]  }
 0x4e4   :  { %7626 = vmatpush3.msra.mxu1 %v10966_v5  ;;  %17615 = vst [vmem:[#allocation46_spill] sm:$0xff] %v10990_v15  ;;  %8982 = vmatpush3.bf16.msra.mxu0 %v10990_v15  ;;  %v10997_v28 = vld [vmem:[%s17095_s12 + $0x428] sm:$0xff]  ;;  %v11004_v5 = vld [vmem:[%s17095_s12 + $0x4a0] sm:$0xff] }
 0x4e5   :  { %7627 = vmatprep.subr.mxu1 %v10972_v55  ;;  %17616 = vst [vmem:[#allocation47_spill] sm:$0xff] %v10997_v28  ;;  %8983 = vmatprep.subr.bf16.mxu0 %v17613_v58  ;;  %17617 = vst [vmem:[#allocation48_spill] sm:$0xff] %v11004_v5  ;;  %v11012_v55 = vld [vmem:[%s17095_s12 + $0x420] sm:$0xff] }
 0x4e6   :  { %7628 = vmatpush3.msra.mxu1 %v10978_v6  ;;  %8985 = vmatprep.mubr.msk.bf16.mxu0 %vm9898_vm2, %v17613_v58  ;;  %17618 = vst [vmem:[#allocation49_spill] sm:$0xff] %v11012_v55  ;;  %v11018_v6 = vld [vmem:[%s17095_s12 + $0x498] sm:$0xff] }
 0x4e7   :  { %7629 = vmatprep.subr.mxu1 %v10985_v18  ;;  %17619 = vst [vmem:[#allocation50_spill] sm:$0xff] %v11018_v6  ;;  %v11030_v18 = vld [vmem:[%s17095_s12 + $0x418] sm:$0xff] }
 0x4e8   :  { %7630 = vmatpush3.msra.mxu1 %v10997_v28  ;;  %8984 = vmatpush3.bf16.msra.mxu0 %v11023_v59  ;;  %17621 = vst [vmem:[#allocation52_spill] sm:$0xff] %v11030_v18  ;;  %v11037_v28 = vld [vmem:[%s17095_s12 + $0x490] sm:$0xff] }
 0x4e9   :  { %7631 = vmatprep.subr.mxu1 %v11004_v5  ;;  %8989 = vmatprep.subr.bf16.mxu0 %v17613_v58  ;;  %17622 = vst [vmem:[#allocation53_spill] sm:$0xff] %v11037_v28  ;;  %v11043_v5 = vld [vmem:[%s17095_s12 + $0x410] sm:$0xff] }
 0x4ea   :  { %7632 = vmatpush3.msra.mxu1 %v11012_v55  ;;  %17623 = vst [vmem:[#allocation54_spill] sm:$0xff] %v11043_v5  ;;  %v11055_v55 = vld [vmem:[%s17095_s12 + $0x408] sm:$0xff] }
 0x4eb   :  { %7633 = vmatprep.subr.mxu1 %v11018_v6  ;;  %17625 = vst [vmem:[#allocation56_spill] sm:$0xff] %v11055_v55  ;;  %v11061_v6 = vld [vmem:[%s17095_s12 + $0x480] sm:$0xff] }
 0x4ec   :  { %7634 = vmatpush3.msra.mxu1 %v11030_v18  ;;  %17626 = vst [vmem:[#allocation57_spill] sm:$0xff] %v11061_v6  ;;  %v11067_v18 = vld [vmem:[%s17095_s12 + $0x400] sm:$0xff] }
 0x4ed   :  { %7635 = vmatprep.subr.mxu1 %v11037_v28  ;;  %17627 = vst [vmem:[#allocation58_spill] sm:$0xff] %v11067_v18 }
 0x4ee   :  { %7636 = vmatpush3.msra.mxu1 %v11043_v5  ;;  %v17628_v5 = vmov 0  }
 0x4ef   :  { %7637 = vmatprep.subr.mxu1 %v11049_v8 }
 0x4f0   :  { %7638 = vmatpush3.msra.mxu1 %v11055_v55 }
 0x4f1   :  { %7639 = vmatprep.subr.mxu1 %v11061_v6 }
 0x4f2   :  { %7640 = vmatpush3.msra.mxu1 %v11067_v18 }
 0x4f3   :  { %1205 = vmatmul.mubr.f32.vlgmr.msra.gmra.mxu1 %v10635_v51  ;;  %1512 = vmatprep.subr.bf16.mxu1 %v10166_v32 }
 0x4f4   :  { %1513 = vmatpush1.bf16.msra.mxu1 %v10202_v42  ;;  %1530 = vmatprep.mubr.bf16.mxu1 %v17628_v5 }
 0x4f5   :  { %7656 = vmatprep.subr.mxu1 %v10156_v29  ;;  %v251_v29 = vld [vmem:[%s17086_s3] sm:$0x3] }
 0x571   :  { %v7501_v8 = vpop.f32.mrf.mxu1 }
 0x573   :  { %v7502_v40 = vpop.f32.mrf.mxu1 }
 0x574   :  { %v7503_v18 = vadd.f32 %v7502_v40, %v7501_v8 }
 0x581   :  { %v7536_v28 = vpop.f32.mrf.mxu0 }
 0x583   :  { %v7537_v59 = vpop.f32.mrf.mxu0 }
 0x584   :  { %v7538_v6 = vadd.f32 %v7537_v59, %v7536_v28  ;;  %v11109_v59 = vld [vmem:[%s17085_s2] sm:$0x3] }
 0x586   :  { %v997_v51 = vadd.f32 %v7538_v6, %v7503_v18 }
 0x591   :  { %v7571_v15 = vpop.f32.mrf.mxu1 }
 0x593   :  { %v7572_v26 = vpop.f32.mrf.mxu1 }
 0x594   :  { %v7573_v41 = vadd.f32 %v7572_v26, %v7571_v15 }
 0x596   :  { %v1067_v23 = vadd.f32 %v7573_v41, %v997_v51 }
 0x5a2   :  { %v7606_v55 = vpop.f32.mrf.mxu0 }
 0x5a4   :  { %v7607_v9 = vpop.f32.mrf.mxu0 }
 0x5a5   :  { %v7608_v63 = vadd.f32 %v7607_v9, %v7606_v55 }
 0x5a7   :  { %v1137_v46 = vadd.f32 %v7608_v63, %v1067_v23 }
 0x5b3   :  { %v7641_v32 = vpop.f32.mrf.mxu1 }
 0x5b5   :  { %v7642_v42 = vpop.f32.mrf.mxu1 }
 0x5b6   :  { %v7643_v38 = vadd.f32 %v7642_v42, %v7641_v32  ;;  %v1241_v42 = vld [vmem:[%s17083_s0] sm:$0x3] }
 0x5b8   :  { %v1207_v35 = vadd.f32 %v7643_v38, %v1137_v46 }
 0x5ba   :  { %v11083_v28 = vadd.f32 %v11077_v25, %v1207_v35  ;;  %v11085_v8 = vadd.f32 %v1207_v35, %v251_v29 }
 0x5bc   :  { %17629 = vst [vmem:[#allocation59_spill] sm:$0xff] %v11083_v28  ;;  %17630 = vst [vmem:[#allocation60_spill] sm:$0xff] %v11085_v8  ;;  %v1249_v9 = vadd.f32 %v1247_v54, %v11083_v28  ;;  %1257 = vrot.lane.b32.xlu0 %v11085_v8, %s9900_s26 }
 0x5be   :  { %9208 = vrcp.f32 %v1249_v9 }
 0x5cb   :  { %v9209_v32 = vpop.eup %9208 }
 0x5cc   :  { %1253 = vrot.lane.b32.xlu1 %v9209_v32, %s9896_s4  ;;  %v11100_v46 = vmul.f32 %v9209_v32, %v11083_v28 }
 0x62e   :  { %v1258_v38 = vpop.permute.xlu0 %1257 }
 0x62f   :  { %v1260_v63 = vsub.f32 %v1241_v42, %v1258_v38  ;;  %v11132_v42 = vld [vmem:[%s17092_s9 + $0x30] sm:$0xff]   ;;  %v11139_v38 = vld [vmem:[%s17092_s9 + $0x28] sm:$0xff]  }
 0x630   :  { %17632 = vst [vmem:[#allocation62_spill] sm:$0xff] %v11139_v38 }
 0x631   :  { %1266 = vrot.lane.b32.xlu1 %v1260_v63, %s9905_s19  ;;  %1262 = vrot.lane.b32.xlu0 %v1260_v63, %s9900_s26  ;;  %v11146_v63 = vld [vmem:[%s17092_s9 + $0x20] sm:$0xff]  }
 0x632   :  { %17633 = vst [vmem:[#allocation63_spill] sm:$0xff] %v11146_v63 }
 0x63e   :  { %v1254_v35 = vpop.permute.xlu1 %1253 }
 0x63f   :  { %v11097_v54 = vmul.f32 %v1254_v35, %v11083_v28  ;;  %v11153_v35 = vld [vmem:[%s17092_s9 + $0x18] sm:$0xff]  }
 0x640   :  { %17634 = vst [vmem:[#allocation64_spill] sm:$0xff] %v11153_v35 }
 0x6a3   :  { %v1267_v23 = vpop.permute.xlu1 %1266  ;;  %v1263_v15 = vpop.permute.xlu0 %1262 }
 0x6a4   :  { %v1269_v40 = vmul.f32 %v1267_v23, %v11097_v54  ;;  %v1265_v41 = vmul.f32 %v1263_v15, %v11100_v46  ;;  %v11160_v23 = vld [vmem:[%s17092_s9 + $0x10] sm:$0xff]   ;;  %v11167_v15 = vld [vmem:[%s17092_s9 + $0x8] sm:$0xff]  }
 0x6a5   :  { %17635 = vst [vmem:[#allocation65_spill] sm:$0xff] %v11160_v23  ;;  %17636 = vst [vmem:[#allocation66_spill] sm:$0xff] %v11167_v15 }
 0x6a6   :  { %1275 = vrot.lane.b32.xlu1 %v1269_v40, %s9906_s20  ;;  %1271 = vrot.lane.b32.xlu0 %v1265_v41, %s9901_s27  ;;  %v11174_v40 = vld [vmem:[%s17092_s9] sm:$0xff]  }
 0x6a7   :  { %17637 = vst [vmem:[#allocation67_spill] sm:$0xff] %v11174_v40 }
 0x6aa   :  { %1296 = vrot.lane.b32.xlu0 %v11109_v59, %s9899_s21 }
 0x718   :  { %v1272_v26 = vpop.permute.xlu0 %1271  ;;  %v1276_v55 = vpop.permute.xlu1 %1275 }
 0x719   :  { %v1278_v18 = vsel %vm271_vm4, %v1272_v26, %v1276_v55  ;;  %v11181_v26 = vld [vmem:[%s17091_s8] ss:$0 sm:$0xff] }
 0x71a   :  { %17638 = vst [vmem:[#allocation68_spill] sm:$0xff] %v11181_v26 }
 0x71c   :  { %v1297_v6 = vpop.permute.xlu0 %1296 }
 0x71d   :  { %v11116_v51 = vsel %vm271_vm4, %v1297_v6, %v11109_v59 }
 0x71e   :  { %v1300_v29 = vmul.f32 %v11116_v51, %v1278_v18 }
 0x720   :  { %v11120_v9 = vadd.f32 %v1300_v29, %v11085_v8 }
 0x722   :  { %17631 = vst [vmem:[#allocation61_spill] sm:$0xff] %v11120_v9  ;;  %v1312_v32 = vpack.c.bf16 %v11120_v9, %v11120_v9 }
 0x724   :  { %8986 = vmatmul.mubr.msk.bf16.vlgmr.msra.gmra.mxu0 %vm289_vm5, %v1312_v32 }
 0x725   :  { %8990 = vmatpush3.bf16.msra.mxu0 %v10019_v17  ;;  %9005 = vmatprep.mubr.msk.bf16.mxu0 %vm9898_vm2, %v17613_v58 }
 0x726   :  { %8991 = vmatprep.subr.bf16.mxu0 %v17613_v58 }
 0x729   :  { %8992 = vmatpush3.bf16.msra.mxu0 %v11132_v42 }
 0x72a   :  { %8993 = vmatprep.subr.bf16.mxu0 %v17613_v58 }
 0x72d   :  { %8994 = vmatpush3.bf16.msra.mxu0 %v11139_v38 }
 0x72e   :  { %8995 = vmatprep.subr.bf16.mxu0 %v17613_v58 }
 0x731   :  { %8996 = vmatpush3.bf16.msra.mxu0 %v11146_v63 }
 0x732   :  { %8997 = vmatprep.subr.bf16.mxu0 %v17613_v58 }
 0x735   :  { %8998 = vmatpush3.bf16.msra.mxu0 %v11153_v35 }
 0x736   :  { %8999 = vmatprep.subr.bf16.mxu0 %v17613_v58 }
 0x739   :  { %9000 = vmatpush3.bf16.msra.mxu0 %v11160_v23 }
 0x73a   :  { %9001 = vmatprep.subr.bf16.mxu0 %v17613_v58 }
 0x73d   :  { %9002 = vmatpush3.bf16.msra.mxu0 %v11167_v15  ;;  %v11191_v15 = vld [vmem:[%s17093_s10] ss:$0 sm:$0xff] }
 0x73e   :  { %9003 = vmatprep.subr.bf16.mxu0 %v17613_v58  ;;  %17639 = vst [vmem:[#allocation69_spill] sm:$0xff] %v11191_v15 }
 0x741   :  { %9004 = vmatpush3.bf16.msra.mxu0 %v11174_v40 }
 0x742   :  { %1430 = vmatprep.subr.bf16.mxu0 %v10107_v1 }
 0x7e4   :  { %v1350_v41 = vpop.f32.mrf.mxu0 }
 0x7e5   :  { %v1351_v55 = vadd.f32 %v11181_v26, %v1350_v41 }
 0x7e6   :  { %v8987_v6 = vpop.f32.mrf.mxu0 }
 0x7e7   :  { %9210 = vtanh.f32 %v1351_v55 }
 0x7e8   :  { %v1353_v18 = vpop.f32.mrf.mxu0 }
 0x7ea   :  { %v8988_v29 = vpop.f32.mrf.mxu0 }
 0x7eb   :  { %v1279_v29 = vmul.f32 %v11100_v46, %v11083_v28 }
 0x7f4   :  { %v9211_v32 = vpop.eup %9210 }
 0x7f5   :  { %v1357_v8 = vpack.c.bf16 %v9211_v32, %v9211_v32  ;;  %v1280_v32 = vmul.f32 %v11097_v54, %v11083_v28 }
 0x7f7   :  { %9006 = vmatmul.mubr.msk.bf16.vlgmr.msra.gmra.mxu0 %vm419_vm6, %v1357_v8 }
 0x7f8   :  { %1431 = vmatpush1.bf16.msra.mxu0 %v10110_v2  ;;  %1448 = vmatprep.mubr.bf16.mxu0 %v17628_v5 }
 0x7f9   :  { %1471 = vmatprep.subr.bf16.mxu0 %v10126_v10 }
 0x8b7   :  { %v1395_v40 = vpop.f32.mrf.mxu0 }
 0x8b8   :  { %v1396_v41 = vadd.f32 %v11191_v15, %v1395_v40 }
 0x8b9   :  { %v9007_v55 = vpop.f32.mrf.mxu0 }
 0x8ba   :  { %v1401_v6 = vsel %vm467_vm7, %v1396_v41, -inf }
 0x8bb   :  { %1402 = vmax.xlane.f32.xlu1 %v1401_v6  ;;  %v1398_v18 = vpop.f32.mrf.mxu0 }
 0x8bd   :  { %v9008_v8 = vpop.f32.mrf.mxu0 }
 0x8cc   :  { %1286 = vrot.lane.b32.xlu1 %v1279_v29, %s9901_s27 }
 0x8d0   :  { %1290 = vrot.lane.b32.xlu1 %v1280_v32, %s9906_s20 }
 0x944   :  { %v1403_v26 = vpop.xlane.xlu1 %1402 }
 0x945   :  { %v1404_v23 = vsub.f32 %v1396_v41, %v1403_v26 }
 0x947   :  { %v1405_v35 = vmul.f32 1.442695, %v1404_v23 }
 0x948   :  { %v1287_v54 = vpop.permute.xlu1 %1286 }
 0x949   :  { %9212 = vpow2.f32 %v1405_v35 }
 0x94c   :  { %v1291_v26 = vpop.permute.xlu1 %1290 }
 0x956   :  { %v9213_v40 = vpop.eup %9212 }
 0x957   :  { %v1407_v55 = vsel %vm467_vm7, %v9213_v40, 0.0 }
 0x958   :  { %1408 = vadd.xlane.f32.xlu0 %v1407_v55 }
 0x96e   :  { %1281 = vrot.lane.b32.xlu0 %v11083_v28, %s9901_s27 }
 0x972   :  { %1302 = vrot.lane.b32.xlu0 %v11109_v59, %s9900_s26  ;;  %v1293_v59 = vsel %vm271_vm4, %v1287_v54, %v1291_v26  ;;  %v11252_v54 = vld [vmem:[%s17095_s12 + $0xe8] sm:$0xff]  ;;  %v11265_v26 = vld [vmem:[%s17095_s12 + $0xe0] sm:$0xff] }
 0x973   :  { %17643 = vst [vmem:[#allocation73_spill] sm:$0xff] %v11252_v54  ;;  %17645 = vst [vmem:[#allocation75_spill] sm:$0xff] %v11265_v26 }
 0x976   :  { %1581 = vrot.lane.b32.xlu0 %v11120_v9, %s9900_s26 }
 0x97a   :  { %1584 = vrot.lane.b32.xlu0 %v11120_v9, %s9896_s4 }
 0x97e   :  { %1590 = vrot.lane.b32.xlu0 %v11120_v9, %s9902_s28 }
 0x982   :  { %1596 = vrot.lane.b32.xlu0 %v11120_v9, %s9901_s27 }
 0x9e1   :  { %v1409_v35 = vpop.xlane.xlu0 %1408 }
 0x9e2   :  { %9214 = vrcp.f32 %v1409_v35 }
 0x9e5   :  { %v1282_v23 = vpop.permute.xlu0 %1281 }
 0x9e6   :  { %v1284_v41 = vmul.f32 %v1282_v23, %v11100_v46  ;;  %v11232_v46 = vld [vmem:[%s17095_s12 + $0x78] sm:$0xff]  ;;  %v11258_v23 = vld [vmem:[%s17095_s12 + $0x68] sm:$0xff] }
 0x9e7   :  { %17640 = vst [vmem:[#allocation70_spill] sm:$0xff] %v11232_v46  ;;  %17644 = vst [vmem:[#allocation74_spill] sm:$0xff] %v11258_v23 }
 0x9e8   :  { %v1294_v18 = vsel %vm289_vm5, %v1293_v59, %v1284_v41  ;;  %v11273_v41 = vld [vmem:[%s17095_s12 + $0x60] sm:$0xff]  ;;  %v11279_v59 = vld [vmem:[%s17095_s12 + $0x1f8] sm:$0xff] }
 0x9e9   :  { %v1303_v6 = vpop.permute.xlu0 %1302  ;;  %17646 = vst [vmem:[#allocation76_spill] sm:$0xff] %v11273_v41  ;;  %17647 = vst [vmem:[#allocation77_spill] sm:$0xff] %v11279_v59 }
 0x9ea   :  { %v1305_v8 = vsel %vm289_vm5, %v11116_v51, %v1303_v6  ;;  %v11238_v51 = vld [vmem:[%s17095_s12 + $0xf0] sm:$0xff]  ;;  %v11285_v6 = vld [vmem:[%s17095_s12 + $0xd8] sm:$0xff] }
 0x9eb   :  { %v1306_v29 = vmul.f32 %v1305_v8, %v1294_v18  ;;  %17641 = vst [vmem:[#allocation71_spill] sm:$0xff] %v11238_v51  ;;  %17648 = vst [vmem:[#allocation78_spill] sm:$0xff] %v11285_v6  ;;  %v11291_v18 = vld [vmem:[%s17095_s12 + $0x58] sm:$0xff]  ;;  %v11297_v8 = vld [vmem:[%s17095_s12 + $0xd0] sm:$0xff] }
 0x9ec   :  { %17649 = vst [vmem:[#allocation79_spill] sm:$0xff] %v11291_v18  ;;  %17650 = vst [vmem:[#allocation80_spill] sm:$0xff] %v11297_v8 }
 0x9ed   :  { %1308 = vrot.lane.b32.xlu1 %v1306_v29, %s9896_s4  ;;  %v11303_v29 = vld [vmem:[%s17095_s12 + $0x50] sm:$0xff] }
 0x9ee   :  { %17651 = vst [vmem:[#allocation81_spill] sm:$0xff] %v11303_v29 }
 0x9ef   :  { %v9215_v32 = vpop.eup %9214 }
 0x9f0   :  { %v1411_v55 = vmul.f32 %v9215_v32, %v9213_v40  ;;  %v11246_v40 = vld [vmem:[%s17095_s12 + $0x70] sm:$0xff]  ;;  %v11309_v32 = vld [vmem:[%s17095_s12 + $0xc8] sm:$0xff] }
 0x9f1   :  { %1599 = vrot.lane.b32.xlu1 %v11120_v9, %s9899_s21  ;;  %17642 = vst [vmem:[#allocation72_spill] sm:$0xff] %v11246_v40  ;;  %17652 = vst [vmem:[#allocation82_spill] sm:$0xff] %v11309_v32 }
 0x9f2   :  { %v1412_v35 = vpack.c.bf16 %v1411_v55, %v1411_v55  ;;  %v11316_v55 = vld [vmem:[%s17095_s12 + $0x48] sm:$0xff] }
 0x9f3   :  { %17653 = vst [vmem:[#allocation83_spill] sm:$0xff] %v11316_v55 }
 0x9f4   :  { %7411 = vmatmul.mubr.msk.bf16.vlgmr.msra.gmra.mxu0 %vm512_vm10, %v1412_v35  ;;  %7413 = vmatmul.mubr.msk.bf16.vlgmr.msra.gmra.mxu1 %vm512_vm10, %v1412_v35 }
 0x9f5   :  { %1587 = vrot.lane.b32.xlu1 %v11120_v9, %s9905_s19  ;;  %1472 = vmatpush1.bf16.msra.mxu0 %v10129_v11 }
 0x9f6   :  { %1489 = vmatprep.mubr.bf16.mxu0 %v17628_v5  ;;  %1553 = vmatprep.subr.bf16.mxu0 %v10208_v44 }
 0x9f7   :  { %7657 = vmatpush3.msra.mxu1 %v11232_v46 }
 0x9f8   :  { %7658 = vmatprep.subr.mxu1 %v11238_v51 }
 0x9f9   :  { %1593 = vrot.lane.b32.xlu1 %v11120_v9, %s9906_s20  ;;  %7659 = vmatpush3.msra.mxu1 %v11246_v40 }
 0x9fa   :  { %7660 = vmatprep.subr.mxu1 %v11252_v54 }
 0x9fb   :  { %7661 = vmatpush3.msra.mxu1 %v11258_v23 }
 0x9fc   :  { %7412 = vmatmul.mubr.msk.bf16.vlgmr.msra.gmra.mxu0 %vm512_vm10, %v1412_v35  ;;  %7662 = vmatprep.subr.mxu1 %v11265_v26 }
 0x9fd   :  { %1554 = vmatpush1.bf16.msra.mxu0 %v10235_v52  ;;  %1571 = vmatprep.mubr.bf16.mxu0 %v17628_v5 }
 0x9fe   :  { %7663 = vmatpush3.msra.mxu1 %v11273_v41  ;;  %7691 = vmatprep.subr.mxu0 %v11279_v59 }
 0x9ff   :  { %7664 = vmatprep.subr.mxu1 %v11285_v6 }
 0xa00   :  { %7665 = vmatpush3.msra.mxu1 %v11291_v18 }
 0xa01   :  { %7666 = vmatprep.subr.mxu1 %v11297_v8 }
 0xa02   :  { %7667 = vmatpush3.msra.mxu1 %v11303_v29  ;;  %v11322_v29 = vld [vmem:[%s17095_s12 + $0x178] sm:$0xff] }
 0xa03   :  { %7668 = vmatprep.subr.mxu1 %v11309_v32  ;;  %17654 = vst [vmem:[#allocation84_spill] sm:$0xff] %v11322_v29  ;;  %v11328_v32 = vld [vmem:[%s17095_s12 + $0xc0] sm:$0xff] }
 0xa04   :  { %7414 = vmatmul.mubr.msk.bf16.vlgmr.msra.gmra.mxu0 %vm512_vm10, %v1412_v35  ;;  %7669 = vmatpush3.msra.mxu1 %v11316_v55  ;;  %17655 = vst [vmem:[#allocation85_spill] sm:$0xff] %v11328_v32  ;;  %v11334_v35 = vld [vmem:[%s17095_s12 + $0x1f0] sm:$0xff]  ;;  %v11340_v55 = vld [vmem:[%s17095_s12 + $0x40] sm:$0xff] }
 0xa05   :  { %7692 = vmatpush3.msra.mxu0 %v11322_v29  ;;  %7670 = vmatprep.subr.mxu1 %v11328_v32  ;;  %17656 = vst [vmem:[#allocation86_spill] sm:$0xff] %v11334_v35  ;;  %17657 = vst [vmem:[#allocation87_spill] sm:$0xff] %v11340_v55  ;;  %v11346_v29 = vld [vmem:[%s17095_s12 + $0x170] sm:$0xff]  ;;  %v11352_v32 = vld [vmem:[%s17095_s12 + $0xb8] sm:$0xff] }
 0xa06   :  { %7693 = vmatprep.subr.mxu0 %v11334_v35  ;;  %7671 = vmatpush3.msra.mxu1 %v11340_v55  ;;  %17658 = vst [vmem:[#allocation88_spill] sm:$0xff] %v11346_v29  ;;  %17659 = vst [vmem:[#allocation89_spill] sm:$0xff] %v11352_v32  ;;  %v11358_v35 = vld [vmem:[%s17095_s12 + $0x1e8] sm:$0xff]  ;;  %v11364_v55 = vld [vmem:[%s17095_s12 + $0x38] sm:$0xff] }
 0xa07   :  { %7694 = vmatpush3.msra.mxu0 %v11346_v29  ;;  %7672 = vmatprep.subr.mxu1 %v11352_v32  ;;  %17660 = vst [vmem:[#allocation90_spill] sm:$0xff] %v11358_v35  ;;  %17661 = vst [vmem:[#allocation91_spill] sm:$0xff] %v11364_v55  ;;  %v11370_v29 = vld [vmem:[%s17095_s12 + $0x168] sm:$0xff]  ;;  %v11376_v32 = vld [vmem:[%s17095_s12 + $0xb0] sm:$0xff] }
 0xa08   :  { %7695 = vmatprep.subr.mxu0 %v11358_v35  ;;  %7673 = vmatpush3.msra.mxu1 %v11364_v55  ;;  %17662 = vst [vmem:[#allocation92_spill] sm:$0xff] %v11370_v29  ;;  %17663 = vst [vmem:[#allocation93_spill] sm:$0xff] %v11376_v32  ;;  %v11382_v35 = vld [vmem:[%s17095_s12 + $0x1e0] sm:$0xff]  ;;  %v11388_v55 = vld [vmem:[%s17095_s12 + $0x30] sm:$0xff] }
 0xa09   :  { %7696 = vmatpush3.msra.mxu0 %v11370_v29  ;;  %7674 = vmatprep.subr.mxu1 %v11376_v32  ;;  %17664 = vst [vmem:[#allocation94_spill] sm:$0xff] %v11382_v35  ;;  %17665 = vst [vmem:[#allocation95_spill] sm:$0xff] %v11388_v55  ;;  %v11394_v29 = vld [vmem:[%s17095_s12 + $0x160] sm:$0xff]  ;;  %v11400_v32 = vld [vmem:[%s17095_s12 + $0xa8] sm:$0xff] }
 0xa0a   :  { %7697 = vmatprep.subr.mxu0 %v11382_v35  ;;  %7675 = vmatpush3.msra.mxu1 %v11388_v55  ;;  %17666 = vst [vmem:[#allocation96_spill] sm:$0xff] %v11394_v29  ;;  %17667 = vst [vmem:[#allocation97_spill] sm:$0xff] %v11400_v32  ;;  %v11406_v35 = vld [vmem:[%s17095_s12 + $0x1d8] sm:$0xff]  ;;  %v11412_v55 = vld [vmem:[%s17095_s12 + $0x28] sm:$0xff] }
 0xa0b   :  { %7698 = vmatpush3.msra.mxu0 %v11394_v29  ;;  %7676 = vmatprep.subr.mxu1 %v11400_v32  ;;  %17668 = vst [vmem:[#allocation98_spill] sm:$0xff] %v11406_v35  ;;  %17669 = vst [vmem:[#allocation99_spill] sm:$0xff] %v11412_v55  ;;  %v11418_v29 = vld [vmem:[%s17095_s12 + $0x158] sm:$0xff]  ;;  %v11424_v32 = vld [vmem:[%s17095_s12 + $0xa0] sm:$0xff] }
 0xa0c   :  { %7699 = vmatprep.subr.mxu0 %v11406_v35  ;;  %7677 = vmatpush3.msra.mxu1 %v11412_v55  ;;  %17670 = vst [vmem:[#allocation100_spill] sm:$0xff] %v11418_v29  ;;  %17671 = vst [vmem:[#allocation101_spill] sm:$0xff] %v11424_v32  ;;  %v11430_v35 = vld [vmem:[%s17095_s12 + $0x1d0] sm:$0xff]  ;;  %v11436_v55 = vld [vmem:[%s17095_s12 + $0x20] sm:$0xff] }
 0xa0d   :  { %7700 = vmatpush3.msra.mxu0 %v11418_v29  ;;  %7678 = vmatprep.subr.mxu1 %v11424_v32  ;;  %17672 = vst [vmem:[#allocation102_spill] sm:$0xff] %v11430_v35  ;;  %17673 = vst [vmem:[#allocation103_spill] sm:$0xff] %v11436_v55  ;;  %v11442_v29 = vld [vmem:[%s17095_s12 + $0x150] sm:$0xff]  ;;  %v11448_v32 = vld [vmem:[%s17095_s12 + $0x98] sm:$0xff] }
 0xa0e   :  { %7701 = vmatprep.subr.mxu0 %v11430_v35  ;;  %7679 = vmatpush3.msra.mxu1 %v11436_v55  ;;  %17674 = vst [vmem:[#allocation104_spill] sm:$0xff] %v11442_v29  ;;  %17675 = vst [vmem:[#allocation105_spill] sm:$0xff] %v11448_v32  ;;  %v11454_v35 = vld [vmem:[%s17095_s12 + $0x1c8] sm:$0xff]  ;;  %v11460_v55 = vld [vmem:[%s17095_s12 + $0x18] sm:$0xff] }
 0xa0f   :  { %7702 = vmatpush3.msra.mxu0 %v11442_v29  ;;  %7680 = vmatprep.subr.mxu1 %v11448_v32  ;;  %17676 = vst [vmem:[#allocation106_spill] sm:$0xff] %v11454_v35  ;;  %17677 = vst [vmem:[#allocation107_spill] sm:$0xff] %v11460_v55  ;;  %v11466_v29 = vld [vmem:[%s17095_s12 + $0x148] sm:$0xff]  ;;  %v11472_v32 = vld [vmem:[%s17095_s12 + $0x90] sm:$0xff] }
 0xa10   :  { %7703 = vmatprep.subr.mxu0 %v11454_v35  ;;  %7681 = vmatpush3.msra.mxu1 %v11460_v55  ;;  %17678 = vst [vmem:[#allocation108_spill] sm:$0xff] %v11466_v29  ;;  %17679 = vst [vmem:[#allocation109_spill] sm:$0xff] %v11472_v32  ;;  %v11478_v35 = vld [vmem:[%s17095_s12 + $0x1c0] sm:$0xff]  ;;  %v11484_v55 = vld [vmem:[%s17095_s12 + $0x10] sm:$0xff] }
 0xa11   :  { %7704 = vmatpush3.msra.mxu0 %v11466_v29  ;;  %7682 = vmatprep.subr.mxu1 %v11472_v32  ;;  %17680 = vst [vmem:[#allocation110_spill] sm:$0xff] %v11478_v35  ;;  %17681 = vst [vmem:[#allocation111_spill] sm:$0xff] %v11484_v55  ;;  %v11490_v29 = vld [vmem:[%s17095_s12 + $0x140] sm:$0xff]  ;;  %v11496_v32 = vld [vmem:[%s17095_s12 + $0x88] sm:$0xff] }
 0xa12   :  { %7705 = vmatprep.subr.mxu0 %v11478_v35  ;;  %7683 = vmatpush3.msra.mxu1 %v11484_v55  ;;  %17682 = vst [vmem:[#allocation112_spill] sm:$0xff] %v11490_v29  ;;  %17683 = vst [vmem:[#allocation113_spill] sm:$0xff] %v11496_v32  ;;  %v11502_v35 = vld [vmem:[%s17095_s12 + $0x1b8] sm:$0xff]  ;;  %v11508_v55 = vld [vmem:[%s17095_s12 + $0x8] sm:$0xff] }
 0xa13   :  { %7706 = vmatpush3.msra.mxu0 %v11490_v29  ;;  %7684 = vmatprep.subr.mxu1 %v11496_v32  ;;  %17684 = vst [vmem:[#allocation114_spill] sm:$0xff] %v11502_v35  ;;  %17685 = vst [vmem:[#allocation115_spill] sm:$0xff] %v11508_v55  ;;  %v11514_v29 = vld [vmem:[%s17095_s12 + $0x138] sm:$0xff]  ;;  %v11520_v32 = vld [vmem:[%s17095_s12 + $0x80] sm:$0xff] }
 0xa14   :  { %7707 = vmatprep.subr.mxu0 %v11502_v35  ;;  %7685 = vmatpush3.msra.mxu1 %v11508_v55  ;;  %17686 = vst [vmem:[#allocation116_spill] sm:$0xff] %v11514_v29  ;;  %17687 = vst [vmem:[#allocation117_spill] sm:$0xff] %v11520_v32  ;;  %v11526_v35 = vld [vmem:[%s17095_s12 + $0x1b0] sm:$0xff]  ;;  %v11532_v55 = vld [vmem:[%s17095_s12] sm:$0xff] }
 0xa15   :  { %7708 = vmatpush3.msra.mxu0 %v11514_v29  ;;  %7686 = vmatprep.subr.mxu1 %v11520_v32  ;;  %17688 = vst [vmem:[#allocation118_spill] sm:$0xff] %v11526_v35  ;;  %17689 = vst [vmem:[#allocation119_spill] sm:$0xff] %v11532_v55  ;;  %v11538_v29 = vld [vmem:[%s17095_s12 + $0x130] sm:$0xff]  ;;  %v11544_v32 = vld [vmem:[%s17095_s12 + $0x2f8] sm:$0xff] }
 0xa16   :  { %7709 = vmatprep.subr.mxu0 %v11526_v35  ;;  %7687 = vmatpush3.msra.mxu1 %v11532_v55  ;;  %17690 = vst [vmem:[#allocation120_spill] sm:$0xff] %v11538_v29  ;;  %17691 = vst [vmem:[#allocation121_spill] sm:$0xff] %v11544_v32  ;;  %v11550_v35 = vld [vmem:[%s17095_s12 + $0x1a8] sm:$0xff] }
 0xa17   :  { %7710 = vmatpush3.msra.mxu0 %v11538_v29  ;;  %7726 = vmatprep.subr.mxu1 %v11544_v32  ;;  %17692 = vst [vmem:[#allocation122_spill] sm:$0xff] %v11550_v35  ;;  %v11556_v55 = vld [vmem:[%s17095_s12 + $0x128] sm:$0xff]  ;;  %v11562_v29 = vld [vmem:[%s17095_s12 + $0x1a0] sm:$0xff] }
 0xa18   :  { %7711 = vmatprep.subr.mxu0 %v11550_v35  ;;  %17693 = vst [vmem:[#allocation123_spill] sm:$0xff] %v11556_v55  ;;  %17694 = vst [vmem:[#allocation124_spill] sm:$0xff] %v11562_v29  ;;  %v11568_v32 = vld [vmem:[%s17095_s12 + $0x120] sm:$0xff]  ;;  %v11574_v35 = vld [vmem:[%s17095_s12 + $0x198] sm:$0xff] }
 0xa19   :  { %7712 = vmatpush3.msra.mxu0 %v11556_v55  ;;  %17695 = vst [vmem:[#allocation125_spill] sm:$0xff] %v11568_v32  ;;  %17696 = vst [vmem:[#allocation126_spill] sm:$0xff] %v11574_v35  ;;  %v11580_v55 = vld [vmem:[%s17095_s12 + $0x118] sm:$0xff] }
 0xa1a   :  { %7713 = vmatprep.subr.mxu0 %v11562_v29  ;;  %17697 = vst [vmem:[#allocation127_spill] sm:$0xff] %v11580_v55  ;;  %v11586_v29 = vld [vmem:[%s17095_s12 + $0x190] sm:$0xff] }
 0xa1b   :  { %7714 = vmatpush3.msra.mxu0 %v11568_v32  ;;  %17698 = vst [vmem:[#allocation128_spill] sm:$0xff] %v11586_v29  ;;  %v11592_v32 = vld [vmem:[%s17095_s12 + $0x110] sm:$0xff] }
 0xa1c   :  { %7715 = vmatprep.subr.mxu0 %v11574_v35  ;;  %17699 = vst [vmem:[#allocation129_spill] sm:$0xff] %v11592_v32  ;;  %v11598_v35 = vld [vmem:[%s17095_s12 + $0x188] sm:$0xff] }
 0xa1d   :  { %7716 = vmatpush3.msra.mxu0 %v11580_v55  ;;  %17700 = vst [vmem:[#allocation130_spill] sm:$0xff] %v11598_v35  ;;  %v11604_v55 = vld [vmem:[%s17095_s12 + $0x108] sm:$0xff] }
 0xa1e   :  { %7717 = vmatprep.subr.mxu0 %v11586_v29  ;;  %17701 = vst [vmem:[#allocation131_spill] sm:$0xff] %v11604_v55  ;;  %v11610_v29 = vld [vmem:[%s17095_s12 + $0x180] sm:$0xff] }
 0xa1f   :  { %7718 = vmatpush3.msra.mxu0 %v11592_v32  ;;  %17702 = vst [vmem:[#allocation132_spill] sm:$0xff] %v11610_v29  ;;  %v11616_v32 = vld [vmem:[%s17095_s12 + $0x100] sm:$0xff] }
 0xa20   :  { %7719 = vmatprep.subr.mxu0 %v11598_v35  ;;  %17703 = vst [vmem:[#allocation133_spill] sm:$0xff] %v11616_v32  ;;  %v11622_v35 = vld [vmem:[%s17095_s12 + $0x3f8] sm:$0xff] }
 0xa21   :  { %7720 = vmatpush3.msra.mxu0 %v11604_v55  ;;  %17704 = vst [vmem:[#allocation134_spill] sm:$0xff] %v11622_v35 }
 0xa22   :  { %7721 = vmatprep.subr.mxu0 %v11610_v29 }
 0xa23   :  { %7722 = vmatpush3.msra.mxu0 %v11616_v32 }
 0xa24   :  { %7761 = vmatprep.subr.mxu0 %v11622_v35 }
 0xa5f   :  { %v1309_v55 = vpop.permute.xlu1 %1308 }
 0xa60   :  { %v11626_v8 = vsub.f32 %v11083_v28, %v1309_v55  ;;  %v11645_v55 = vld.sshfl [vmem:[%s17086_s3] sm:$0x3 pattern:$0x76325410]  ;;  %v1582_v28 = vpop.permute.xlu0 %1581 }
 0xa61   :  { %17706 = vst [vmem:[#allocation136_spill] sm:$0xff] %v11645_v55  ;;  %v1602_v59 = vsel %vm271_vm4, %v11120_v9, %v1582_v28 }
 0xa62   :  { %17705 = vst [vmem:[#allocation135_spill] sm:$0xff] %v11626_v8  ;;  %1620 = vrot.lane.b32.xlu0 %v11626_v8, %s9899_s21  ;;  %1617 = vrot.lane.b32.xlu1 %v11626_v8, %s9901_s27 }
 0xa63   :  { %v1600_v35 = vpop.permute.xlu1 %1599 }
 0xa64   :  { %v1585_v32 = vpop.permute.xlu0 %1584  ;;  %v1609_v29 = vsel %vm271_vm4, %v1600_v35, %v11120_v9 }
 0xa65   :  { %v1610_v6 = vsel %vm289_vm5, %v1609_v29, %v1582_v28  ;;  %v1603_v41 = vsel %vm289_vm5, %v1602_v59, %v1585_v32 }
 0xa66   :  { %1635 = vrot.lane.b32.xlu0 %v11626_v8, %s9906_s20  ;;  %1632 = vrot.lane.b32.xlu1 %v11626_v8, %s9902_s28  ;;  %v1611_v26 = vsel %vm732_vm11, %v1610_v6, %v1585_v32 }
 0xa67   :  { %v1588_v18 = vpop.permute.xlu1 %1587 }
 0xa68   :  { %v1591_v52 = vpop.permute.xlu0 %1590  ;;  %v1604_v23 = vsel %vm732_vm11, %v1603_v41, %v1588_v18  ;;  %v1612_v51 = vsel %vm734_vm12, %v1611_v26, %v1588_v18 }
 0xa69   :  { %v1605_v59 = vsel %vm734_vm12, %v1604_v23, %v1591_v52  ;;  %v1613_v44 = vsel %vm736_vm13, %v1612_v51, %v1591_v52 }
 0xa6a   :  { %1626 = vrot.lane.b32.xlu0 %v11626_v8, %s9896_s4  ;;  %1623 = vrot.lane.b32.xlu1 %v11626_v8, %s9900_s26 }
 0xa6b   :  { %v1594_v40 = vpop.permute.xlu1 %1593 }
 0xa6c   :  { %v1606_v6 = vsel %vm736_vm13, %v1605_v59, %v1594_v40  ;;  %v1597_v9 = vpop.permute.xlu0 %1596  ;;  %v1614_v11 = vsel %vm738_vm14, %v1613_v44, %v1594_v40 }
 0xa6d   :  { %v1607_v15 = vsel %vm738_vm14, %v1606_v6, %v1597_v9  ;;  %v1615_v38 = vsel %vm740_vm15, %v1614_v11, %v1597_v9 }
 0xa6e   :  { %1629 = vrot.lane.b32.xlu1 %v11626_v8, %s9905_s19  ;;  %2085 = vrot.lane.b32.xlu0 %v11645_v55, %s9901_s27  ;;  %v1608_v59 = vsel %vm740_vm15, %v1607_v15, %v1600_v35  ;;  %v11694_v15 = vld [vmem:[%s17095_s12 + $0x278] sm:$0xff] }
 0xa6f   :  { %17707 = vst [vmem:[#allocation137_spill] sm:$0xff] %v11694_v15 }
 0xab4   :  { %v11657_v55 = vpop.f32.mrf.mxu0  ;;  %v11659_v54 = vpop.f32.mrf.mxu1 }
 0xab5   :  { %v11664_v29 = vmul.f32 %v11659_v54, %v11657_v55  ;;  %v1659_v51 = vmul.f32 %v1608_v59, %v11657_v55 }
 0xab6   :  { %v11666_v46 = vpop.f32.mrf.mxu0  ;;  %v11668_v28 = vpop.f32.mrf.mxu1 }
 0xab7   :  { %v1660_v52 = vmul.f32 %v1608_v59, %v11666_v46 }
 0xab8   :  { %v1454_v41 = vpop.f32.mrf.mxu0  ;;  %v1536_v32 = vpop.f32.mrf.mxu1 }
 0xaba   :  { %v1455_v26 = vpop.f32.mrf.mxu0  ;;  %v1537_v18 = vpop.f32.mrf.mxu1 }
 0xabc   :  { %v11675_v63 = vpop.f32.mrf.mxu0 }
 0xabd   :  { %v1713_v23 = vmul.f32 %v11659_v54, %v11675_v63  ;;  %v1661_v41 = vmul.f32 %v1615_v38, %v11675_v63 }
 0xabe   :  { %v11682_v32 = vpop.f32.mrf.mxu0 }
 0xabf   :  { %v1662_v44 = vmul.f32 %v1615_v38, %v11682_v32  ;;  %v1663_v18 = vadd.f32 %v1661_v41, %v1659_v51  ;;  %v11706_v41 = vld [vmem:[%s17095_s12 + $0x2f0] sm:$0xff] }
 0xac0   :  { %v1495_v40 = vpop.f32.mrf.mxu0  ;;  %17708 = vst [vmem:[#allocation138_spill] sm:$0xff] %v11706_v41 }
 0xac1   :  { %v1664_v6 = vadd.f32 %v1662_v44, %v1660_v52  ;;  %v11715_v40 = vld [vmem:[%s17095_s12 + $0x270] sm:$0xff] }
 0xac2   :  { %v1496_v26 = vpop.f32.mrf.mxu0  ;;  %17709 = vst [vmem:[#allocation139_spill] sm:$0xff] %v11715_v40 }
 0xac3   :  { %1791 = vmatprep.mubr.f32.mxu1 %v1664_v6  ;;  %v1666_v26 = vmul.f32 %v1608_v59, %v11668_v28 }
 0xac4   :  { %v11687_v11 = vpop.f32.mrf.mxu0  ;;  %1792 = vmatmul.mubr.f32.vlgmr.msra.gmra.mxu1 %v1663_v18 }
 0xac5   :  { %v1711_v9 = vmul.f32 %v11687_v11, %v11657_v55  ;;  %7727 = vmatpush3.msra.mxu1 %v11694_v15  ;;  %v11699_v35 = vmul.f32 %v11687_v11, %v11675_v63  ;;  %v1667_v44 = vmul.f32 %v1615_v38, %v11687_v11 }
 0xac6   :  { %v11701_v52 = vpop.f32.mrf.mxu0  ;;  %7728 = vmatprep.subr.mxu1 %v11706_v41  ;;  %v11723_v41 = vld [vmem:[%s17095_s12 + $0x2e8] sm:$0xff] }
 0xac7   :  { %v11710_v51 = vadd.f32 %v1713_v23, %v1711_v9  ;;  %7729 = vmatpush3.msra.mxu1 %v11715_v40  ;;  %v1668_v18 = vmul.f32 %v1615_v38, %v11701_v52  ;;  %v1665_v23 = vmul.f32 %v1608_v59, %v11659_v54  ;;  %v11730_v9 = vld [vmem:[%s17095_s12 + $0x268] sm:$0xff]  ;;  %v11736_v38 = vld [vmem:[%s17095_s12 + $0x2e0] sm:$0xff] }
 0xac8   :  { %v1577_v6 = vpop.f32.mrf.mxu0  ;;  %7730 = vmatprep.subr.mxu1 %v11723_v41  ;;  %v11742_v59 = vld [vmem:[%s17095_s12 + $0x260] sm:$0xff] }
 0xac9   :  { %7731 = vmatpush3.msra.mxu1 %v11730_v9  ;;  %v1670_v40 = vadd.f32 %v1668_v18, %v1666_v26  ;;  %v1669_v15 = vadd.f32 %v1667_v44, %v1665_v23  ;;  %v11748_v26 = vld [vmem:[%s17095_s12 + $0x2d8] sm:$0xff] }
 0xaca   :  { %v1578_v6 = vpop.f32.mrf.mxu0  ;;  %7732 = vmatprep.subr.mxu1 %v11736_v38  ;;  %v11754_v44 = vld [vmem:[%s17095_s12 + $0x258] sm:$0xff] }
 0xacb   :  { %7733 = vmatpush3.msra.mxu1 %v11742_v59  ;;  %1861 = vmatprep.mubr.f32.mxu0 %v1670_v40  ;;  %v11761_v40 = vld [vmem:[%s17095_s12 + $0x2d0] sm:$0xff] }
 0xacc   :  { %7734 = vmatprep.subr.mxu1 %v11748_v26  ;;  %1862 = vmatmul.mubr.f32.vlgmr.msra.gmra.mxu0 %v1669_v15  ;;  %v11768_v15 = vld [vmem:[%s17095_s12 + $0x250] sm:$0xff] }
 0xacd   :  { %7735 = vmatpush3.msra.mxu1 %v11754_v44  ;;  %7762 = vmatpush3.msra.mxu0 %v10578_v22  ;;  %v11775_v22 = vld [vmem:[%s17095_s12 + $0x2c8] sm:$0xff] }
 0xace   :  { %7736 = vmatprep.subr.mxu1 %v11761_v40  ;;  %7763 = vmatprep.subr.mxu0 %v10592_v31  ;;  %v11782_v31 = vld [vmem:[%s17095_s12 + $0x248] sm:$0xff] }
 0xacf   :  { %7737 = vmatpush3.msra.mxu1 %v11768_v15  ;;  %7764 = vmatpush3.msra.mxu0 %v10604_v34  ;;  %v11789_v34 = vld [vmem:[%s17095_s12 + $0x2c0] sm:$0xff] }
 0xad0   :  { %7738 = vmatprep.subr.mxu1 %v11775_v22  ;;  %7765 = vmatprep.subr.mxu0 %v10620_v39 }
 0xad1   :  { %7739 = vmatpush3.msra.mxu1 %v11782_v31  ;;  %7766 = vmatpush3.msra.mxu0 %v10632_v47  ;;  %v11800_v47 = vmul.f32 %v11657_v55, %v11657_v55 }
 0xad2   :  { %7740 = vmatprep.subr.mxu1 %v11789_v34  ;;  %7767 = vmatprep.subr.mxu0 %v10649_v57  ;;  %v11810_v57 = vmul.f32 %v11668_v28, %v11668_v28 }
 0xad3   :  { %7741 = vmatpush3.msra.mxu1 %v10558_v0  ;;  %7768 = vmatpush3.msra.mxu0 %v10665_v61  ;;  %v11806_v0 = vmul.f32 %v11659_v54, %v11659_v54 }
 0xad4   :  { %v1621_v39 = vpop.permute.xlu0 %1620  ;;  %v1618_v18 = vpop.permute.xlu1 %1617  ;;  %7742 = vmatprep.subr.mxu1 %v10568_v13  ;;  %7769 = vmatprep.subr.mxu0 %v10678_v7  ;;  %v11814_v13 = vmul.f32 %v11668_v28, %v11666_v46 }
 0xad5   :  { %7743 = vmatpush3.msra.mxu1 %v10573_v20  ;;  %7770 = vmatpush3.msra.mxu0 %v10691_v48  ;;  %v1675_v20 = vmul.f32 %v11675_v63, %v11657_v55  ;;  %v11828_v48 = vmul.f32 %v11666_v46, %v11666_v46 }
 0xad6   :  { %7744 = vmatprep.subr.mxu1 %v10587_v3  ;;  %7771 = vmatprep.subr.mxu0 %v10706_v24  ;;  %v11822_v3 = vmul.f32 %v11675_v63, %v11675_v63  ;;  %v1638_v24 = vsel %vm271_vm4, %v1618_v18, %v1621_v39 }
 0xad7   :  { %7745 = vmatpush3.msra.mxu1 %v10599_v4  ;;  %7772 = vmatpush3.msra.mxu0 %v10718_v45  ;;  %v1714_v45 = vmul.f32 %v11668_v28, %v11682_v32  ;;  %v1639_v6 = vsel %vm289_vm5, %v1638_v24, %v11626_v8  ;;  %v1693_v24 = vmul.f32 %v11687_v11, %v11659_v54 }
 0xad8   :  { %v1636_v61 = vpop.permute.xlu0 %1635  ;;  %v1633_v7 = vpop.permute.xlu1 %1632  ;;  %7746 = vmatprep.subr.mxu1 %v10615_v21  ;;  %7773 = vmatprep.subr.mxu0 %v10731_v33  ;;  %v1722_v54 = vmul.f32 %v11701_v52, %v11682_v32 }
 0xad9   :  { %v1645_v4 = vsel %vm271_vm4, %v1636_v61, %v1618_v18  ;;  %v1652_v55 = vsel %vm271_vm4, %v1633_v7, %v1636_v61  ;;  %7747 = vmatpush3.msra.mxu1 %v10627_v43  ;;  %7774 = vmatpush3.msra.mxu0 %v10743_v37  ;;  %v1676_v43 = vmul.f32 %v11682_v32, %v11666_v46 }
 0xada   :  { %v1646_v63 = vsel %vm289_vm5, %v1645_v4, %v1621_v39  ;;  %v1653_v21 = vsel %vm289_vm5, %v1652_v55, %v1618_v18  ;;  %7748 = vmatprep.subr.mxu1 %v10644_v56  ;;  %7775 = vmatprep.subr.mxu0 %v10758_v50  ;;  %v1684_v50 = vmul.f32 %v11682_v32, %v11682_v32  ;;  %v17711_v32 = vld [vmem:[#allocation17_spill] sm:$0xff] }
 0xadb   :  { %v1647_v33 = vsel %vm732_vm11, %v1646_v63, %v11626_v8  ;;  %v1654_v23 = vsel %vm732_vm11, %v1653_v21, %v1621_v39  ;;  %7749 = vmatpush3.msra.mxu1 %v10658_v60  ;;  %7776 = vmatpush3.msra.mxu0 %v10771_v53  ;;  %v1712_v4 = vmul.f32 %v11701_v52, %v11666_v46 }
 0xadc   :  { %v1655_v56 = vsel %vm734_vm12, %v1654_v23, %v11626_v8  ;;  %v1624_v37 = vpop.permute.xlu1 %1623  ;;  %7750 = vmatprep.subr.mxu1 %v10670_v19  ;;  %7777 = vmatprep.subr.mxu0 %v10778_v62  ;;  %v1627_v60 = vpop.permute.xlu0 %1626  ;;  %v1694_v19 = vmul.f32 %v11701_v52, %v11668_v28  ;;  %v1701_v62 = vmul.f32 %v11687_v11, %v11687_v11  ;;  %v17713_v23 = vld [vmem:[#allocation18_spill] sm:$0xff] }
 0xadd   :  { %v1640_v39 = vsel %vm732_vm11, %v1639_v6, %v1624_v37  ;;  %v1648_v18 = vsel %vm734_vm12, %v1647_v33, %v1624_v37  ;;  %v1656_v53 = vsel %vm736_vm13, %v1655_v56, %v1624_v37  ;;  %7751 = vmatpush3.msra.mxu1 %v10683_v12  ;;  %7778 = vmatpush3.msra.mxu0 %v10792_v16  ;;  %v17712_v33 = vld [vmem:[#allocation22_spill] sm:$0xff]  ;;  %v1677_v6 = vmul.f32 2.0, %v1675_v20  ;;  %v17714_v37 = vld [vmem:[#allocation23_spill] sm:$0xff] }
 0xade   :  { %7752 = vmatprep.subr.mxu1 %v10696_v14  ;;  %7779 = vmatprep.subr.mxu0 %v10802_v36  ;;  %v1702_v12 = vmul.f32 %v11701_v52, %v11701_v52  ;;  %v1641_v46 = vsel %vm734_vm12, %v1640_v39, %v1627_v60  ;;  %v1649_v16 = vsel %vm736_vm13, %v1648_v18, %v1627_v60  ;;  %v17710_v36 = vld [vmem:[#allocation21_spill] sm:$0xff]  ;;  %v1696_v52 = vmul.f32 2.0, %v1694_v19 }
 0xadf   :  { %7753 = vmatpush3.msra.mxu1 %v10711_v30  ;;  %7780 = vmatpush3.msra.mxu0 %v10812_v49  ;;  %v1657_v14 = vsel %vm738_vm14, %v1656_v53, %v1627_v60  ;;  %v1678_v49 = vmul.f32 2.0, %v1676_v43  ;;  %v17715_v60 = vld [vmem:[#allocation19_spill] sm:$0xff]  ;;  %v1695_v43 = vmul.f32 2.0, %v1693_v24  ;;  %v17716_v53 = vld [vmem:[#allocation24_spill] sm:$0xff] }
 0xae0   :  { %v1630_v28 = vpop.permute.xlu1 %1629  ;;  %7754 = vmatprep.subr.mxu1 %v10723_v27  ;;  %7781 = vmatprep.subr.mxu0 %v17710_v36  ;;  %v1716_v27 = vadd.f32 %v1714_v45, %v1712_v4  ;;  %v17718_v45 = vld [vmem:[#allocation25_spill] sm:$0xff] }
 0xae1   :  { %v1642_v30 = vsel %vm736_vm13, %v1641_v46, %v1630_v28  ;;  %v1650_v11 = vsel %vm738_vm14, %v1649_v16, %v1630_v28  ;;  %v1658_v55 = vsel %vm740_vm15, %v1657_v14, %v1630_v28  ;;  %7755 = vmatpush3.msra.mxu1 %v17711_v32  ;;  %7782 = vmatpush3.msra.mxu0 %v17712_v33  ;;  %v17717_v16 = vld [vmem:[#allocation20_spill] sm:$0xff]  ;;  %v17719_v28 = vld [vmem:[#allocation27_spill] sm:$0xff]  ;;  %v17722_v33 = vld [vmem:[#allocation33_spill] sm:$0xff] }
 0xae2   :  { %v1643_v63 = vsel %vm738_vm14, %v1642_v30, %v1633_v7  ;;  %v1651_v21 = vsel %vm740_vm15, %v1650_v11, %v1633_v7  ;;  %7756 = vmatprep.subr.mxu1 %v17713_v23  ;;  %7783 = vmatprep.subr.mxu0 %v17714_v37  ;;  %v1680_v39 = vmul.f32 %v1678_v49, %v1658_v55  ;;  %v17720_v30 = vld [vmem:[#allocation29_spill] sm:$0xff]  ;;  %v17723_v37 = vld [vmem:[#allocation35_spill] sm:$0xff] }
 0xae3   :  { %v1644_v56 = vsel %vm740_vm15, %v1643_v63, %v1636_v61  ;;  %7757 = vmatpush3.msra.mxu1 %v17715_v60  ;;  %v1686_v18 = vmul.f32 %v1684_v50, %v1651_v21  ;;  %7784 = vmatpush3.msra.mxu0 %v17716_v53  ;;  %v1698_v46 = vmul.f32 %v1696_v52, %v1658_v55  ;;  %v11949_v53 = vld [vmem:[%s17095_s12 + $0x4e0] sm:$0xff] }
 0xae4   :  { %v1674_v19 = vmul.f32 %v11828_v48, %v1644_v56  ;;  %v1692_v7 = vmul.f32 %v11810_v57, %v1644_v56  ;;  %7796 = vmatprep.subr.mxu1 %v17717_v16  ;;  %7785 = vmatprep.subr.mxu0 %v17718_v45  ;;  %v1704_v20 = vmul.f32 %v1702_v12, %v1651_v21  ;;  %v17721_v12 = vld [vmem:[#allocation31_spill] sm:$0xff]  ;;  %v17729_v16 = vld [vmem:[#allocation28_spill] sm:$0xff]  ;;  %v17730_v45 = vld [vmem:[#allocation30_spill] sm:$0xff] }
 0xae5   :  { %v1673_v61 = vmul.f32 %v11800_v47, %v1644_v56  ;;  %v1679_v4 = vmul.f32 %v1677_v6, %v1658_v55  ;;  %v1691_v14 = vmul.f32 %v11806_v0, %v1644_v56  ;;  %7786 = vmatpush3.msra.mxu0 %v17719_v28  ;;  %v1685_v36 = vmul.f32 %v11822_v3, %v1651_v21  ;;  %v17735_v28 = vld [vmem:[#allocation40_spill] sm:$0xff] }
 0xae6   :  { %v1682_v50 = vadd.f32 %v1680_v39, %v1674_v19  ;;  %v1700_v24 = vadd.f32 %v1698_v46, %v1692_v7  ;;  %v1697_v48 = vmul.f32 %v1695_v43, %v1658_v55  ;;  %7787 = vmatprep.subr.mxu0 %v17720_v30  ;;  %v1703_v11 = vmul.f32 %v1701_v62, %v1651_v21  ;;  %v11942_v43 = vld [vmem:[%s17095_s12 + $0x468] sm:$0xff]  ;;  %v11957_v19 = vld [vmem:[%s17095_s12 + $0x460] sm:$0xff]  ;;  %v17727_v7 = vld [vmem:[#allocation26_spill] sm:$0xff] }
 0xae7   :  { %v1681_v57 = vadd.f32 %v1679_v4, %v1673_v61  ;;  %v1710_v32 = vmul.f32 %v11814_v13, %v1644_v56  ;;  %v1718_v49 = vmul.f32 %v1716_v27, %v1658_v55  ;;  %7788 = vmatpush3.msra.mxu0 %v17721_v12  ;;  %v1709_v0 = vmul.f32 %v11664_v29, %v1644_v56  ;;  %v17724_v13 = vld [vmem:[#allocation37_spill] sm:$0xff]  ;;  %v17726_v56 = vld [vmem:[#allocation46_spill] sm:$0xff]  ;;  %v17728_v46 = vld [vmem:[#allocation51_spill] sm:$0xff] }
 0xae8   :  { %v1688_v47 = vadd.f32 %v1686_v18, %v1682_v50  ;;  %v1706_v52 = vadd.f32 %v1704_v20, %v1700_v24  ;;  %v1699_v63 = vadd.f32 %v1697_v48, %v1691_v14  ;;  %7789 = vmatprep.subr.mxu0 %v17722_v33  ;;  %v1717_v3 = vmul.f32 %v11710_v51, %v1658_v55  ;;  %v17725_v18 = vld [vmem:[#allocation39_spill] sm:$0xff]  ;;  %v17731_v20 = vld [vmem:[#allocation32_spill] sm:$0xff]  ;;  %v17732_v61 = vld [vmem:[#allocation34_spill] sm:$0xff] }
 0xae9   :  { %v1687_v23 = vadd.f32 %v1685_v36, %v1681_v57  ;;  %v1720_v6 = vadd.f32 %v1718_v49, %v1710_v32  ;;  %7790 = vmatpush3.msra.mxu0 %v17723_v37  ;;  %v1724_v60 = vmul.f32 %v1722_v54, %v1651_v21  ;;  %v1723_v39 = vmul.f32 %v11699_v35, %v1651_v21  ;;  %v11916_v51 = vld [vmem:[%s17095_s12 + $0x478] sm:$0xff]  ;;  %v11922_v54 = vld [vmem:[%s17095_s12 + $0x4f0] sm:$0xff]  ;;  %v11935_v21 = vld [vmem:[%s17095_s12 + $0x4e8] sm:$0xff] }
 0xaea   :  { %1931 = vmatprep.mubr.f32.mxu1 %v1688_v47  ;;  %v1705_v62 = vadd.f32 %v1703_v11, %v1699_v63  ;;  %7791 = vmatprep.subr.mxu0 %v17724_v13  ;;  %v1719_v27 = vadd.f32 %v1717_v3, %v1709_v0  ;;  %v11928_v35 = vld [vmem:[%s17095_s12 + $0x470] sm:$0xff]  ;;  %v17733_v4 = vld [vmem:[#allocation36_spill] sm:$0xff]  ;;  %v17736_v50 = vld [vmem:[#allocation41_spill] sm:$0xff] }
 0xaeb   :  { %2001 = vmatprep.mubr.f32.mxu0 %v1706_v52  ;;  %7792 = vmatpush3.msra.mxu0 %v17725_v18  ;;  %v1726_v29 = vadd.f32 %v1724_v60, %v1720_v6  ;;  %v17734_v14 = vld [vmem:[#allocation38_spill] sm:$0xff]  ;;  %v17738_v36 = vld [vmem:[#allocation43_spill] sm:$0xff]  ;;  %v17739_v48 = vld [vmem:[#allocation44_spill] sm:$0xff] }
 0xaec   :  { %1932 = vmatmul.mubr.f32.vlgmr.msra.gmra.mxu1 %v1687_v23  ;;  %2002 = vmatmul.mubr.f32.vlgmr.msra.gmra.mxu0 %v1705_v62  ;;  %v1725_v55 = vadd.f32 %v1723_v39, %v1719_v27  ;;  %v17737_v24 = vld [vmem:[#allocation42_spill] sm:$0xff]  ;;  %v17740_v30 = vld [vmem:[#allocation45_spill] sm:$0xff]  ;;  %v17741_v57 = vld [vmem:[#allocation47_spill] sm:$0xff] }
 0xaed   :  { %7797 = vmatpush3.msra.mxu1 %v11916_v51  ;;  %2071 = vmatprep.mubr.f32.mxu1 %v1726_v29  ;;  %v17742_v11 = vld [vmem:[#allocation48_spill] sm:$0xff]  ;;  %v17743_v32 = vld [vmem:[#allocation49_spill] sm:$0xff]  ;;  %v17744_v49 = vld [vmem:[#allocation50_spill] sm:$0xff] }
 0xaee   :  { %7798 = vmatprep.subr.mxu1 %v11922_v54  ;;  %9009 = vmatprep.subr.bf16.mxu0 %v17613_v58  ;;  %v17745_v12 = vld [vmem:[#allocation52_spill] sm:$0xff]  ;;  %v17746_v47 = vld [vmem:[#allocation53_spill] sm:$0xff]  ;;  %v17747_v52 = vld [vmem:[#allocation54_spill] sm:$0xff] }
 0xaef   :  { %7799 = vmatpush3.msra.mxu1 %v11928_v35  ;;  %9010 = vmatpush3.bf16.msra.mxu0 %v17726_v56  ;;  %v17748_v63 = vld [vmem:[#allocation55_spill] sm:$0xff]  ;;  %v17749_v0 = vld [vmem:[#allocation56_spill] sm:$0xff]  ;;  %v17750_v33 = vld [vmem:[#allocation57_spill] sm:$0xff] }
 0xaf0   :  { %7800 = vmatprep.subr.mxu1 %v11935_v21  ;;  %9011 = vmatprep.subr.bf16.mxu0 %v17613_v58  ;;  %v17751_v23 = vld [vmem:[#allocation58_spill] sm:$0xff] }
 0xaf1   :  { %7801 = vmatpush3.msra.mxu1 %v11942_v43  ;;  %9013 = vmatprep.mubr.msk.bf16.mxu0 %vm9898_vm2, %v17613_v58 }
 0xaf2   :  { %7802 = vmatprep.subr.mxu1 %v11949_v53 }
 0xaf3   :  { %7803 = vmatpush3.msra.mxu1 %v11957_v19  ;;  %9012 = vmatpush3.bf16.msra.mxu0 %v17728_v46 }
 0xaf4   :  { %7804 = vmatprep.subr.mxu1 %v17727_v7  ;;  %9017 = vmatprep.subr.bf16.mxu0 %v17613_v58 }
 0xaf5   :  { %7805 = vmatpush3.msra.mxu1 %v17729_v16 }
 0xaf6   :  { %7806 = vmatprep.subr.mxu1 %v17730_v45 }
 0xaf7   :  { %7807 = vmatpush3.msra.mxu1 %v17731_v20 }
 0xaf8   :  { %7808 = vmatprep.subr.mxu1 %v17732_v61 }
 0xaf9   :  { %7809 = vmatpush3.msra.mxu1 %v17733_v4  ;;  %v2086_v4 = vpop.permute.xlu0 %2085 }
 0xafa   :  { %7810 = vmatprep.subr.mxu1 %v17734_v14 }
 0xafb   :  { %7811 = vmatpush3.msra.mxu1 %v17735_v28  ;;  %v2120_v28 = vld [vmem:[%s17084_s1] sm:$0x3] }
 0xafc   :  { %7812 = vmatprep.subr.mxu1 %v17736_v50 }
 0xafd   :  { %7813 = vmatpush3.msra.mxu1 %v17737_v24 }
 0xafe   :  { %7814 = vmatprep.subr.mxu1 %v17738_v36 }
 0xaff   :  { %7815 = vmatpush3.msra.mxu1 %v17739_v48 }
 0xb00   :  { %7816 = vmatprep.subr.mxu1 %v17740_v30  ;;  %v2119_v30 = vld [vmem:[%s17083_s0] sm:$0x3] }
 0xb01   :  { %7817 = vmatpush3.msra.mxu1 %v17741_v57 }
 0xb02   :  { %7818 = vmatprep.subr.mxu1 %v17742_v11 }
 0xb03   :  { %7819 = vmatpush3.msra.mxu1 %v17743_v32 }
 0xb04   :  { %7820 = vmatprep.subr.mxu1 %v17744_v49 }
 0xb05   :  { %7821 = vmatpush3.msra.mxu1 %v17745_v12  ;;  %v12014_v12 = vld [vmem:[%s17085_s2] sm:$0x3] }
 0xb06   :  { %7822 = vmatprep.subr.mxu1 %v17746_v47 }
 0xb07   :  { %7823 = vmatpush3.msra.mxu1 %v17747_v52 }
 0xb08   :  { %7824 = vmatprep.subr.mxu1 %v17748_v63 }
 0xb09   :  { %7825 = vmatpush3.msra.mxu1 %v17749_v0 }
 0xb0a   :  { %7826 = vmatprep.subr.mxu1 %v17750_v33 }
 0xb0b   :  { %7827 = vmatpush3.msra.mxu1 %v17751_v23 }
 0xb0c   :  { %2072 = vmatmul.mubr.f32.vlgmr.msra.gmra.mxu1 %v1725_v55  ;;  %2301 = vmatprep.subr.bf16.mxu1 %v10107_v1 }
 0xb0d   :  { %2302 = vmatpush1.bf16.msra.mxu1 %v10110_v2  ;;  %2319 = vmatprep.mubr.bf16.mxu1 %v17628_v5 }
 0xb0e   :  { %2342 = vmatprep.subr.bf16.mxu1 %v10126_v10 }
 0xb84   :  { %v7688_v6 = vpop.f32.mrf.mxu1 }
 0xb86   :  { %v7689_v3 = vpop.f32.mrf.mxu1 }
 0xb87   :  { %v7690_v18 = vadd.f32 %v7689_v3, %v7688_v6 }
 0xb8c   :  { %v7723_v37 = vpop.f32.mrf.mxu0 }
 0xb8e   :  { %v7724_v60 = vpop.f32.mrf.mxu0 }
 0xb8f   :  { %v7725_v27 = vadd.f32 %v7724_v60, %v7723_v37 }
 0xb91   :  { %v1864_v56 = vadd.f32 %v7725_v27, %v7690_v18  ;;  %v17756_v18 = vld [vmem:[#allocation63_spill] sm:$0xff] }
 0xbac   :  { %v7758_v62 = vpop.f32.mrf.mxu1  ;;  %v7793_v39 = vpop.f32.mrf.mxu0 }
 0xbae   :  { %v7759_v13 = vpop.f32.mrf.mxu1  ;;  %v7794_v55 = vpop.f32.mrf.mxu0 }
 0xbaf   :  { %v7760_v29 = vadd.f32 %v7759_v13, %v7758_v62  ;;  %v7795_v16 = vadd.f32 %v7794_v55, %v7793_v39  ;;  %v17755_v39 = vld [vmem:[#allocation62_spill] sm:$0xff] }
 0xbb0   :  { %v17759_v55 = vld [vmem:[#allocation66_spill] sm:$0xff] }
 0xbb1   :  { %v1934_v7 = vadd.f32 %v7760_v29, %v1864_v56  ;;  %v17757_v29 = vld [vmem:[#allocation64_spill] sm:$0xff]  ;;  %v17758_v56 = vld [vmem:[#allocation65_spill] sm:$0xff] }
 0xbb3   :  { %v2004_v20 = vadd.f32 %v7795_v16, %v1934_v7  ;;  %v17761_v7 = vld [vmem:[#allocation12_spill] sm:$0xff] }
 0xbb4   :  { %v17762_v16 = vld [vmem:[#allocation68_spill] sm:$0xff] }
 0xbcc   :  { %v7828_v46 = vpop.f32.mrf.mxu1 }
 0xbce   :  { %v7829_v45 = vpop.f32.mrf.mxu1 }
 0xbcf   :  { %v7830_v61 = vadd.f32 %v7829_v45, %v7828_v46 }
 0xbd1   :  { %v2074_v14 = vadd.f32 %v7830_v61, %v2004_v20 }
 0xbd3   :  { %v11994_v50 = vadd.f32 %v2074_v14, %v11077_v25  ;;  %v11996_v24 = vadd.f32 %v2086_v4, %v2074_v14 }
 0xbd5   :  { %17752 = vst [vmem:[#allocation21_spill] sm:$0xff] %v11994_v50  ;;  %17753 = vst [vmem:[#allocation17_spill] sm:$0xff] %v11996_v24  ;;  %2131 = vrot.lane.b32.xlu1 %v11996_v24, %s9896_s4  ;;  %v2123_v36 = vadd.f32 %v2120_v28, %v11994_v50 }
 0xbd7   :  { %9216 = vrcp.f32 %v2123_v36  ;;  %v17763_v36 = vld [vmem:[#allocation13_spill] sm:$0xff] }
 0xbe4   :  { %v9217_v48 = vpop.eup %9216 }
 0xbe5   :  { %2127 = vrot.lane.b32.xlu0 %v9217_v48, %s9896_s4  ;;  %v12006_v11 = vmul.f32 %v9217_v48, %v11994_v50  ;;  %v12058_v48 = vld [vmem:[%s17095_s12 + $0xf8] sm:$0xff] }
 0xc47   :  { %v2132_v57 = vpop.permute.xlu1 %2131 }
 0xc48   :  { %v2134_v32 = vsub.f32 %v2119_v30, %v2132_v57  ;;  %v17764_v57 = vld [vmem:[#allocation69_spill] sm:$0xff] }
 0xc4a   :  { %v2135_v49 = vmul.f32 %v2134_v32, %v12006_v11  ;;  %2137 = vrot.lane.b32.xlu1 %v2134_v32, %s9896_s4 }
 0xc4c   :  { %2142 = vrot.lane.b32.xlu0 %v2135_v49, %s9901_s27 }
 0xc50   :  { %2167 = vrot.lane.b32.xlu0 %v12014_v12, %s9901_s27 }
 0xc57   :  { %v2128_v47 = vpop.permute.xlu0 %2127 }
 0xc58   :  { %v2130_v52 = vmul.f32 %v2128_v47, %v11994_v50 }
 0xcbc   :  { %v2138_v63 = vpop.permute.xlu1 %2137 }
 0xcbd   :  { %v2140_v0 = vmul.f32 %v2138_v63, %v2130_v52 }
 0xcbe   :  { %v2143_v33 = vpop.permute.xlu0 %2142 }
 0xcbf   :  { %2146 = vrot.lane.b32.xlu1 %v2140_v0, %s9906_s20 }
 0xcc2   :  { %v2168_v6 = vpop.permute.xlu0 %2167 }
 0xcc3   :  { %2170 = vrot.lane.b32.xlu1 %v12014_v12, %s9899_s21 }
 0xd31   :  { %v2147_v23 = vpop.permute.xlu1 %2146 }
 0xd32   :  { %v2149_v37 = vsel %vm271_vm4, %v2143_v33, %v2147_v23  ;;  %v2151_v33 = vmul.f32 %v2130_v52, %v11994_v50 }
 0xd35   :  { %v2171_v3 = vpop.permute.xlu1 %2170 }
 0xd36   :  { %v12024_v62 = vsel %vm271_vm4, %v2168_v6, %v2171_v3 }
 0xd37   :  { %v2174_v60 = vmul.f32 %v12024_v62, %v2149_v37 }
 0xd39   :  { %v12028_v13 = vadd.f32 %v2174_v60, %v11996_v24  ;;  %v2150_v60 = vmul.f32 %v12006_v11, %v11994_v50 }
 0xd3b   :  { %17754 = vst [vmem:[#allocation22_spill] sm:$0xff] %v12028_v13  ;;  %v2183_v27 = vpack.c.bf16 %v12028_v13, %v12028_v13 }
 0xd3d   :  { %9014 = vmatmul.mubr.msk.bf16.vlgmr.msra.gmra.mxu0 %vm289_vm5, %v2183_v27 }
 0xd3e   :  { %9018 = vmatpush3.bf16.msra.mxu0 %v10019_v17  ;;  %9033 = vmatprep.mubr.msk.bf16.mxu0 %vm9898_vm2, %v17613_v58 }
 0xd3f   :  { %9019 = vmatprep.subr.bf16.mxu0 %v17613_v58 }
 0xd42   :  { %9020 = vmatpush3.bf16.msra.mxu0 %v11132_v42  ;;  %v17760_v42 = vld [vmem:[#allocation67_spill] sm:$0xff] }
 0xd43   :  { %9021 = vmatprep.subr.bf16.mxu0 %v17613_v58 }
 0xd46   :  { %9022 = vmatpush3.bf16.msra.mxu0 %v17755_v39 }
 0xd47   :  { %9023 = vmatprep.subr.bf16.mxu0 %v17613_v58 }
 0xd4a   :  { %9024 = vmatpush3.bf16.msra.mxu0 %v17756_v18 }
 0xd4b   :  { %9025 = vmatprep.subr.bf16.mxu0 %v17613_v58 }
 0xd4e   :  { %9026 = vmatpush3.bf16.msra.mxu0 %v17757_v29 }
 0xd4f   :  { %9027 = vmatprep.subr.bf16.mxu0 %v17613_v58 }
 0xd52   :  { %9028 = vmatpush3.bf16.msra.mxu0 %v17758_v56 }
 0xd53   :  { %9029 = vmatprep.subr.bf16.mxu0 %v17613_v58 }
 0xd56   :  { %9030 = vmatpush3.bf16.msra.mxu0 %v17759_v55 }
 0xd57   :  { %9031 = vmatprep.subr.bf16.mxu0 %v17613_v58 }
 0xd5a   :  { %9032 = vmatpush3.bf16.msra.mxu0 %v17760_v42  ;;  %v2176_v42 = vsel %vm289_vm5, %v12024_v62, %v12014_v12  ;;  %v17766_v12 = vld [vmem:[#allocation14_spill] sm:$0xff] }
 0xd5b   :  { %2383 = vmatprep.subr.bf16.mxu0 %v17761_v7  ;;  %v17767_v62 = vld [vmem:[#allocation70_spill] sm:$0xff] }
 0xdfd   :  { %v2221_v46 = vpop.f32.mrf.mxu0 }
 0xdfe   :  { %v2222_v45 = vadd.f32 %v17762_v16, %v2221_v46 }
 0xdff   :  { %v9015_v20 = vpop.f32.mrf.mxu0 }
 0xe00   :  { %9218 = vtanh.f32 %v2222_v45 }
 0xe01   :  { %v2224_v61 = vpop.f32.mrf.mxu0 }
 0xe02   :  { %v17765_v61 = vld [vmem:[#allocation11_spill] sm:$0xff] }
 0xe03   :  { %v9016_v4 = vpop.f32.mrf.mxu0 }
 0xe04   :  { %v17768_v4 = vld [vmem:[#allocation71_spill] sm:$0xff] }
 0xe0d   :  { %v9219_v14 = vpop.eup %9218 }
 0xe0e   :  { %v2228_v28 = vpack.c.bf16 %v9219_v14, %v9219_v14  ;;  %v17769_v14 = vld [vmem:[#allocation72_spill] sm:$0xff] }
 0xe10   :  { %9034 = vmatmul.mubr.msk.bf16.vlgmr.msra.gmra.mxu0 %vm419_vm6, %v2228_v28  ;;  %v17770_v28 = vld [vmem:[#allocation73_spill] sm:$0xff] }
 0xe11   :  { %2384 = vmatpush1.bf16.msra.mxu0 %v17763_v36  ;;  %2401 = vmatprep.mubr.bf16.mxu0 %v17628_v5 }
 0xe12   :  { %7843 = vmatprep.subr.mxu0 %v12058_v48 }
 0xed0   :  { %v2266_v30 = vpop.f32.mrf.mxu0 }
 0xed1   :  { %v2267_v32 = vadd.f32 %v17764_v57, %v2266_v30  ;;  %v17771_v30 = vld [vmem:[#allocation74_spill] sm:$0xff]  ;;  %v17772_v57 = vld [vmem:[#allocation75_spill] sm:$0xff] }
 0xed2   :  { %v9035_v49 = vpop.f32.mrf.mxu0 }
 0xed3   :  { %v2272_v47 = vsel %vm467_vm7, %v2267_v32, -inf  ;;  %v17774_v49 = vld [vmem:[#allocation76_spill] sm:$0xff] }
 0xed4   :  { %2273 = vmax.xlane.f32.xlu0 %v2272_v47  ;;  %v2269_v63 = vpop.f32.mrf.mxu0  ;;  %v17775_v47 = vld [vmem:[#allocation77_spill] sm:$0xff] }
 0xed5   :  { %v17776_v63 = vld [vmem:[#allocation78_spill] sm:$0xff] }
 0xed6   :  { %v9036_v0 = vpop.f32.mrf.mxu0 }
 0xed7   :  { %v17777_v0 = vld [vmem:[#allocation79_spill] sm:$0xff] }
 0xeea   :  { %2152 = vrot.lane.b32.xlu0 %v11994_v50, %s9901_s27 }
 0xeee   :  { %2161 = vrot.lane.b32.xlu0 %v2151_v33, %s9906_s20  ;;  %v17778_v33 = vld [vmem:[#allocation80_spill] sm:$0xff] }
 0xef2   :  { %2452 = vrot.lane.b32.xlu0 %v12028_v13, %s9900_s26 }
 0xef6   :  { %2455 = vrot.lane.b32.xlu0 %v12028_v13, %s9896_s4 }
 0xefa   :  { %2461 = vrot.lane.b32.xlu0 %v12028_v13, %s9902_s28 }
 0xefe   :  { %2467 = vrot.lane.b32.xlu0 %v12028_v13, %s9901_s27 }
 0xf5d   :  { %v2274_v23 = vpop.xlane.xlu0 %2273 }
 0xf5e   :  { %v2275_v6 = vsub.f32 %v2267_v32, %v2274_v23  ;;  %v17773_v32 = vld [vmem:[#allocation15_spill] sm:$0xff]  ;;  %v17779_v23 = vld [vmem:[#allocation81_spill] sm:$0xff] }
 0xf60   :  { %v2276_v3 = vmul.f32 1.442695, %v2275_v6  ;;  %v17780_v6 = vld [vmem:[#allocation82_spill] sm:$0xff] }
 0xf61   :  { %v2153_v27 = vpop.permute.xlu0 %2152 }
 0xf62   :  { %9220 = vpow2.f32 %v2276_v3  ;;  %v2155_v18 = vmul.f32 %v2153_v27, %v12006_v11  ;;  %v17781_v3 = vld [vmem:[#allocation83_spill] sm:$0xff] }
 0xf63   :  { %v17785_v27 = vld [vmem:[#allocation87_spill] sm:$0xff] }
 0xf65   :  { %v2162_v29 = vpop.permute.xlu0 %2161 }
 0xf6f   :  { %v9221_v37 = vpop.eup %9220 }
 0xf70   :  { %v2278_v52 = vsel %vm467_vm7, %v9221_v37, 0.0 }
 0xf71   :  { %2279 = vadd.xlane.f32.xlu1 %v2278_v52  ;;  %v17783_v52 = vld [vmem:[#allocation85_spill] sm:$0xff] }
 0xf82   :  { %2157 = vrot.lane.b32.xlu1 %v2150_v60, %s9901_s27  ;;  %v17784_v60 = vld [vmem:[#allocation86_spill] sm:$0xff] }
 0xffa   :  { %v2280_v39 = vpop.xlane.xlu1 %2279 }
 0xffb   :  { %9222 = vrcp.f32 %v2280_v39  ;;  %v17786_v39 = vld [vmem:[#allocation88_spill] sm:$0xff] }
 0xffe   :  { %v2158_v56 = vpop.permute.xlu1 %2157 }
 0xfff   :  { %v2164_v55 = vsel %vm271_vm4, %v2158_v56, %v2162_v29  ;;  %v17788_v29 = vld [vmem:[#allocation90_spill] sm:$0xff]  ;;  %v17789_v56 = vld [vmem:[#allocation91_spill] sm:$0xff] }
0x1000   :  { %v2165_v46 = vsel %vm289_vm5, %v2164_v55, %v2155_v18  ;;  %v17787_v18 = vld [vmem:[#allocation89_spill] sm:$0xff]  ;;  %v17790_v55 = vld [vmem:[#allocation92_spill] sm:$0xff] }
0x1001   :  { %v2177_v16 = vmul.f32 %v2176_v42, %v2165_v46  ;;  %v17791_v42 = vld [vmem:[#allocation93_spill] sm:$0xff]  ;;  %v17792_v46 = vld [vmem:[#allocation94_spill] sm:$0xff] }
0x1003   :  { %2179 = vrot.lane.b32.xlu1 %v2177_v16, %s9896_s4  ;;  %v17793_v16 = vld [vmem:[#allocation95_spill] sm:$0xff] }
0x1007   :  { %2470 = vrot.lane.b32.xlu1 %v12028_v13, %s9899_s21 }
0x1008   :  { %v9223_v45 = vpop.eup %9222 }
0x1009   :  { %v2282_v20 = vmul.f32 %v9223_v45, %v9221_v37  ;;  %v17782_v37 = vld [vmem:[#allocation84_spill] sm:$0xff] }
0x100a   :  { %v17794_v45 = vld [vmem:[#allocation96_spill] sm:$0xff] }
0x100b   :  { %2458 = vrot.lane.b32.xlu1 %v12028_v13, %s9905_s19  ;;  %v2283_v11 = vpack.c.bf16 %v2282_v20, %v2282_v20  ;;  %v17795_v20 = vld [vmem:[#allocation97_spill] sm:$0xff] }
0x100d   :  { %7418 = vmatmul.mubr.msk.bf16.vlgmr.msra.gmra.mxu1 %vm512_vm10, %v2283_v11  ;;  %7420 = vmatmul.mubr.msk.bf16.vlgmr.msra.gmra.mxu0 %vm512_vm10, %v2283_v11 }
0x100e   :  { %2343 = vmatpush1.bf16.msra.mxu1 %v17765_v61  ;;  %2360 = vmatprep.mubr.bf16.mxu1 %v17628_v5 }
0x100f   :  { %2464 = vrot.lane.b32.xlu1 %v12028_v13, %s9906_s20  ;;  %2424 = vmatprep.subr.bf16.mxu1 %v17766_v12 }
0x1010   :  { %7844 = vmatpush3.msra.mxu0 %v17767_v62  ;;  %v17797_v62 = vld [vmem:[#allocation99_spill] sm:$0xff] }
0x1011   :  { %7845 = vmatprep.subr.mxu0 %v17768_v4  ;;  %v17798_v4 = vld [vmem:[#allocation100_spill] sm:$0xff] }
0x1012   :  { %7846 = vmatpush3.msra.mxu0 %v17769_v14  ;;  %v17799_v14 = vld [vmem:[#allocation101_spill] sm:$0xff] }
0x1013   :  { %7847 = vmatprep.subr.mxu0 %v17770_v28  ;;  %v17800_v28 = vld [vmem:[#allocation102_spill] sm:$0xff] }
0x1014   :  { %7848 = vmatpush3.msra.mxu0 %v17771_v30  ;;  %v17801_v30 = vld [vmem:[#allocation103_spill] sm:$0xff] }
0x1015   :  { %7419 = vmatmul.mubr.msk.bf16.vlgmr.msra.gmra.mxu1 %vm512_vm10, %v2283_v11  ;;  %7849 = vmatprep.subr.mxu0 %v17772_v57  ;;  %v17802_v57 = vld [vmem:[#allocation104_spill] sm:$0xff] }
0x1016   :  { %2425 = vmatpush1.bf16.msra.mxu1 %v17773_v32  ;;  %2442 = vmatprep.mubr.bf16.mxu1 %v17628_v5 }
0x1017   :  { %7850 = vmatpush3.msra.mxu0 %v17774_v49  ;;  %7878 = vmatprep.subr.mxu1 %v17775_v47  ;;  %v17803_v49 = vld [vmem:[#allocation105_spill] sm:$0xff]  ;;  %v17804_v47 = vld [vmem:[#allocation106_spill] sm:$0xff] }
0x1018   :  { %7851 = vmatprep.subr.mxu0 %v17776_v63  ;;  %v17805_v63 = vld [vmem:[#allocation107_spill] sm:$0xff] }
0x1019   :  { %7852 = vmatpush3.msra.mxu0 %v17777_v0  ;;  %v17806_v0 = vld [vmem:[#allocation108_spill] sm:$0xff] }
0x101a   :  { %7853 = vmatprep.subr.mxu0 %v17778_v33  ;;  %v17807_v33 = vld [vmem:[#allocation109_spill] sm:$0xff] }
0x101b   :  { %7854 = vmatpush3.msra.mxu0 %v17779_v23  ;;  %v17808_v23 = vld [vmem:[#allocation110_spill] sm:$0xff] }
0x101c   :  { %7855 = vmatprep.subr.mxu0 %v17780_v6  ;;  %v17809_v6 = vld [vmem:[#allocation111_spill] sm:$0xff] }
0x101d   :  { %7421 = vmatmul.mubr.msk.bf16.vlgmr.msra.gmra.mxu1 %vm512_vm10, %v2283_v11  ;;  %7856 = vmatpush3.msra.mxu0 %v17781_v3  ;;  %v17796_v11 = vld [vmem:[#allocation98_spill] sm:$0xff]  ;;  %v17810_v3 = vld [vmem:[#allocation112_spill] sm:$0xff] }
0x101e   :  { %7879 = vmatpush3.msra.mxu1 %v17782_v37  ;;  %7857 = vmatprep.subr.mxu0 %v17783_v52  ;;  %v17811_v37 = vld [vmem:[#allocation113_spill] sm:$0xff]  ;;  %v17812_v52 = vld [vmem:[#allocation114_spill] sm:$0xff] }
0x101f   :  { %7880 = vmatprep.subr.mxu1 %v17784_v60  ;;  %7858 = vmatpush3.msra.mxu0 %v17785_v27  ;;  %v17813_v60 = vld [vmem:[#allocation115_spill] sm:$0xff]  ;;  %v17814_v27 = vld [vmem:[#allocation116_spill] sm:$0xff] }
0x1020   :  { %7881 = vmatpush3.msra.mxu1 %v17786_v39  ;;  %7859 = vmatprep.subr.mxu0 %v17787_v18  ;;  %v17815_v39 = vld [vmem:[#allocation117_spill] sm:$0xff]  ;;  %v17816_v18 = vld [vmem:[#allocation118_spill] sm:$0xff] }
0x1021   :  { %7882 = vmatprep.subr.mxu1 %v17788_v29  ;;  %7860 = vmatpush3.msra.mxu0 %v17789_v56  ;;  %v17817_v29 = vld [vmem:[#allocation119_spill] sm:$0xff]  ;;  %v17818_v56 = vld [vmem:[#allocation120_spill] sm:$0xff] }
0x1022   :  { %7883 = vmatpush3.msra.mxu1 %v17790_v55  ;;  %7861 = vmatprep.subr.mxu0 %v17791_v42  ;;  %v17819_v55 = vld [vmem:[#allocation121_spill] sm:$0xff]  ;;  %v17820_v42 = vld [vmem:[#allocation122_spill] sm:$0xff] }
0x1023   :  { %7884 = vmatprep.subr.mxu1 %v17792_v46  ;;  %7862 = vmatpush3.msra.mxu0 %v17793_v16  ;;  %v17821_v46 = vld [vmem:[#allocation123_spill] sm:$0xff]  ;;  %v17822_v16 = vld [vmem:[#allocation124_spill] sm:$0xff] }
0x1024   :  { %7885 = vmatpush3.msra.mxu1 %v17794_v45  ;;  %7863 = vmatprep.subr.mxu0 %v17795_v20  ;;  %v17823_v45 = vld [vmem:[#allocation125_spill] sm:$0xff]  ;;  %v17824_v20 = vld [vmem:[#allocation126_spill] sm:$0xff] }
0x1025   :  { %7886 = vmatprep.subr.mxu1 %v17796_v11  ;;  %7864 = vmatpush3.msra.mxu0 %v17797_v62  ;;  %v17825_v11 = vld [vmem:[#allocation127_spill] sm:$0xff]  ;;  %v17826_v62 = vld [vmem:[#allocation128_spill] sm:$0xff] }
0x1026   :  { %7887 = vmatpush3.msra.mxu1 %v17798_v4  ;;  %7865 = vmatprep.subr.mxu0 %v17799_v14  ;;  %v17827_v4 = vld [vmem:[#allocation129_spill] sm:$0xff]  ;;  %v17828_v14 = vld [vmem:[#allocation130_spill] sm:$0xff] }
0x1027   :  { %7888 = vmatprep.subr.mxu1 %v17800_v28  ;;  %7866 = vmatpush3.msra.mxu0 %v17801_v30  ;;  %v17829_v28 = vld [vmem:[#allocation131_spill] sm:$0xff]  ;;  %v17830_v30 = vld [vmem:[#allocation132_spill] sm:$0xff] }
0x1028   :  { %7889 = vmatpush3.msra.mxu1 %v17802_v57  ;;  %7867 = vmatprep.subr.mxu0 %v17803_v49  ;;  %v17831_v57 = vld [vmem:[#allocation133_spill] sm:$0xff]  ;;  %v17832_v49 = vld [vmem:[#allocation134_spill] sm:$0xff] }
0x1029   :  { %7890 = vmatprep.subr.mxu1 %v17804_v47  ;;  %7868 = vmatpush3.msra.mxu0 %v17805_v63 }
0x102a   :  { %7891 = vmatpush3.msra.mxu1 %v17806_v0  ;;  %7869 = vmatprep.subr.mxu0 %v17807_v33  ;;  %v17834_v0 = vld [vmem:[#allocation136_spill] sm:$0xff] }
0x102b   :  { %7892 = vmatprep.subr.mxu1 %v17808_v23  ;;  %7870 = vmatpush3.msra.mxu0 %v17809_v6  ;;  %v2991_v33 = vld [vmem:[%s17084_s1] sm:$0x3]  ;;  %v2453_v23 = vpop.permute.xlu0 %2452 }
0x102c   :  { %7893 = vmatpush3.msra.mxu1 %v17810_v3  ;;  %7871 = vmatprep.subr.mxu0 %v17811_v37 }
0x102d   :  { %7894 = vmatprep.subr.mxu1 %v17812_v52  ;;  %7872 = vmatpush3.msra.mxu0 %v17813_v60 }
0x102e   :  { %7895 = vmatpush3.msra.mxu1 %v17814_v27  ;;  %7873 = vmatprep.subr.mxu0 %v17815_v39  ;;  %v2473_v27 = vsel %vm271_vm4, %v12028_v13, %v2453_v23 }
0x102f   :  { %7896 = vmatprep.subr.mxu1 %v17816_v18  ;;  %7874 = vmatpush3.msra.mxu0 %v17817_v29  ;;  %v2456_v3 = vpop.permute.xlu0 %2455 }
0x1030   :  { %7897 = vmatpush3.msra.mxu1 %v17818_v56  ;;  %7913 = vmatprep.subr.mxu0 %v17819_v55  ;;  %v2474_v39 = vsel %vm289_vm5, %v2473_v27, %v2456_v3 }
0x1031   :  { %7898 = vmatprep.subr.mxu1 %v17820_v42 }
0x1032   :  { %7899 = vmatpush3.msra.mxu1 %v17821_v46 }
0x1033   :  { %7900 = vmatprep.subr.mxu1 %v17822_v16  ;;  %v2462_v18 = vpop.permute.xlu0 %2461 }
0x1034   :  { %7901 = vmatpush3.msra.mxu1 %v17823_v45 }
0x1035   :  { %7902 = vmatprep.subr.mxu1 %v17824_v20 }
0x1036   :  { %7903 = vmatpush3.msra.mxu1 %v17825_v11 }
0x1037   :  { %7904 = vmatprep.subr.mxu1 %v17826_v62 }
0x1038   :  { %7905 = vmatpush3.msra.mxu1 %v17827_v4 }
0x1039   :  { %7906 = vmatprep.subr.mxu1 %v17828_v14 }
0x103a   :  { %7907 = vmatpush3.msra.mxu1 %v17829_v28 }
0x103b   :  { %7908 = vmatprep.subr.mxu1 %v17830_v30  ;;  %v2468_v30 = vpop.permute.xlu0 %2467 }
0x103c   :  { %7909 = vmatpush3.msra.mxu1 %v17831_v57 }
0x103d   :  { %7948 = vmatprep.subr.mxu1 %v17832_v49 }
0x1075   :  { %v2180_v47 = vpop.permute.xlu1 %2179 }
0x1076   :  { %v12167_v63 = vsub.f32 %v11994_v50, %v2180_v47  ;;  %v12397_v50 = vld [vmem:[%s17095_s12 + $0x2a8] sm:$0xff] }
0x1077   :  { %17844 = vst [vmem:[#allocation29_spill] sm:$0xff] %v12397_v50 }
0x1078   :  { %17833 = vst [vmem:[#allocation18_spill] sm:$0xff] %v12167_v63  ;;  %2491 = vrot.lane.b32.xlu0 %v12167_v63, %s9899_s21  ;;  %2488 = vrot.lane.b32.xlu1 %v12167_v63, %s9901_s27 }
0x1079   :  { %v2471_v6 = vpop.permute.xlu1 %2470 }
0x107a   :  { %v2480_v37 = vsel %vm271_vm4, %v2471_v6, %v12028_v13  ;;  %v12380_v13 = vld [vmem:[%s17095_s12 + $0x230] sm:$0xff] }
0x107b   :  { %v2481_v60 = vsel %vm289_vm5, %v2480_v37, %v2453_v23  ;;  %17842 = vst [vmem:[#allocation25_spill] sm:$0xff] %v12380_v13 }
0x107c   :  { %2506 = vrot.lane.b32.xlu0 %v12167_v63, %s9906_s20  ;;  %2503 = vrot.lane.b32.xlu1 %v12167_v63, %s9902_s28  ;;  %v2482_v29 = vsel %vm732_vm11, %v2481_v60, %v2456_v3 }
0x107d   :  { %v2459_v52 = vpop.permute.xlu1 %2458 }
0x107e   :  { %v2475_v56 = vsel %vm732_vm11, %v2474_v39, %v2459_v52  ;;  %v2483_v16 = vsel %vm734_vm12, %v2482_v29, %v2459_v52 }
0x107f   :  { %v2476_v62 = vsel %vm734_vm12, %v2475_v56, %v2462_v18  ;;  %v2484_v57 = vsel %vm736_vm13, %v2483_v16, %v2462_v18 }
0x1080   :  { %2497 = vrot.lane.b32.xlu0 %v12167_v63, %s9896_s4  ;;  %2494 = vrot.lane.b32.xlu1 %v12167_v63, %s9900_s26 }
0x1081   :  { %v2465_v46 = vpop.permute.xlu1 %2464 }
0x1082   :  { %v2477_v4 = vsel %vm736_vm13, %v2476_v62, %v2465_v46  ;;  %v2485_v49 = vsel %vm738_vm14, %v2484_v57, %v2465_v46 }
0x1083   :  { %v2486_v3 = vsel %vm740_vm15, %v2485_v49, %v2468_v30 }
0x1084   :  { %2500 = vrot.lane.b32.xlu1 %v12167_v63, %s9905_s19  ;;  %2956 = vrot.lane.b32.xlu0 %v17834_v0, %s9902_s28 }
0x1088   :  { %2995 = vrot.lane.b32.xlu1 %v2991_v33, %s9899_s21  ;;  %v2478_v33 = vsel %vm738_vm14, %v2477_v4, %v2468_v30  ;;  %v17836_v30 = vld [vmem:[#allocation138_spill] sm:$0xff] }
0x1089   :  { %v2479_v52 = vsel %vm740_vm15, %v2478_v33, %v2471_v6 }
0x10cd   :  { %v12197_v55 = vpop.f32.mrf.mxu1  ;;  %v12199_v42 = vpop.f32.mrf.mxu0 }
0x10ce   :  { %v12204_v45 = vmul.f32 %v12199_v42, %v12197_v55  ;;  %v2530_v29 = vmul.f32 %v2479_v52, %v12197_v55 }
0x10cf   :  { %v12206_v20 = vpop.f32.mrf.mxu1  ;;  %v12208_v11 = vpop.f32.mrf.mxu0 }
0x10d0   :  { %v2531_v39 = vmul.f32 %v2479_v52, %v12206_v20  ;;  %v2537_v33 = vmul.f32 %v2479_v52, %v12208_v11 }
0x10d1   :  { %v2325_v14 = vpop.f32.mrf.mxu1  ;;  %v2407_v28 = vpop.f32.mrf.mxu0 }
0x10d2   :  { %v17835_v14 = vld [vmem:[#allocation137_spill] sm:$0xff] }
0x10d3   :  { %v2326_v47 = vpop.f32.mrf.mxu1  ;;  %v2408_v0 = vpop.f32.mrf.mxu0 }
0x10d4   :  { %v17837_v47 = vld [vmem:[#allocation139_spill] sm:$0xff] }
0x10d5   :  { %v12215_v23 = vpop.f32.mrf.mxu1 }
0x10d6   :  { %v2584_v37 = vmul.f32 %v12199_v42, %v12215_v23  ;;  %v2532_v60 = vmul.f32 %v2486_v3, %v12215_v23 }
0x10d7   :  { %v12222_v27 = vpop.f32.mrf.mxu1 }
0x10d8   :  { %v2533_v18 = vmul.f32 %v2486_v3, %v12222_v27  ;;  %v2534_v62 = vadd.f32 %v2532_v60, %v2530_v29  ;;  %v2547_v8 = vmul.f32 %v12222_v27, %v12206_v20  ;;  %v2585_v24 = vmul.f32 %v12208_v11, %v12222_v27 }
0x10d9   :  { %v2366_v56 = vpop.f32.mrf.mxu1 }
0x10da   :  { %v2535_v46 = vadd.f32 %v2533_v18, %v2531_v39  ;;  %v2536_v39 = vmul.f32 %v2479_v52, %v12199_v42  ;;  %v12316_v52 = vld [vmem:[%s17095_s12 + $0x2b8] sm:$0xff] }
0x10db   :  { %v2367_v16 = vpop.f32.mrf.mxu1 }
0x10dc   :  { %2662 = vmatprep.mubr.f32.mxu0 %v2535_v46  ;;  %v12321_v46 = vmul.f32 %v12208_v11, %v12208_v11  ;;  %v12325_v16 = vmul.f32 %v12208_v11, %v12206_v20 }
0x10dd   :  { %v12227_v4 = vpop.f32.mrf.mxu1  ;;  %2663 = vmatmul.mubr.f32.vlgmr.msra.gmra.mxu0 %v2534_v62  ;;  %v12329_v62 = vmul.f32 %v12215_v23, %v12197_v55 }
0x10de   :  { %v2582_v6 = vmul.f32 %v12227_v4, %v12197_v55  ;;  %7914 = vmatpush3.msra.mxu0 %v17835_v14  ;;  %v2538_v57 = vmul.f32 %v2486_v3, %v12227_v4 }
0x10df   :  { %v12232_v28 = vpop.f32.mrf.mxu1  ;;  %7915 = vmatprep.subr.mxu0 %v17836_v30 }
0x10e0   :  { %v12236_v49 = vadd.f32 %v2584_v37, %v2582_v6  ;;  %7916 = vmatpush3.msra.mxu0 %v17837_v47  ;;  %v2539_v60 = vmul.f32 %v2486_v3, %v12232_v28  ;;  %v2540_v56 = vadd.f32 %v2538_v57, %v2536_v39  ;;  %v12305_v3 = vmul.f32 %v12206_v20, %v12206_v20  ;;  %v12310_v37 = vld [vmem:[%s17095_s12 + $0x360] sm:$0xff]  ;;  %v12334_v6 = vld [vmem:[%s17095_s12 + $0x3d8] sm:$0xff] }
0x10e1   :  { %v2448_v0 = vpop.f32.mrf.mxu1  ;;  %7917 = vmatprep.subr.mxu0 %v11723_v41  ;;  %v12251_v41 = vld [vmem:[%s17095_s12 + $0x378] sm:$0xff]  ;;  %v12367_v39 = vmul.f32 %v12215_v23, %v12215_v23 }
0x10e2   :  { %7918 = vmatpush3.msra.mxu0 %v11730_v9  ;;  %v2541_v29 = vadd.f32 %v2539_v60, %v2537_v33  ;;  %v12258_v9 = vld [vmem:[%s17095_s12 + $0x3f0] sm:$0xff]  ;;  %v12344_v57 = vld [vmem:[%s17095_s12 + $0x238] sm:$0xff] }
0x10e3   :  { %v2449_v18 = vpop.f32.mrf.mxu1  ;;  %7919 = vmatprep.subr.mxu0 %v11736_v38  ;;  %v12265_v38 = vld [vmem:[%s17095_s12 + $0x370] sm:$0xff]  ;;  %17838 = vst [vmem:[#allocation23_spill] sm:$0xff] %v12344_v57  ;;  %v12351_v47 = vld [vmem:[%s17095_s12 + $0x358] sm:$0xff] }
0x10e4   :  { %7920 = vmatpush3.msra.mxu0 %v11742_v59  ;;  %2732 = vmatprep.mubr.f32.mxu1 %v2541_v29  ;;  %v12272_v59 = vld [vmem:[%s17095_s12 + $0x3e8] sm:$0xff]  ;;  %17839 = vst [vmem:[#allocation19_spill] sm:$0xff] %v12351_v47  ;;  %v12362_v60 = vld [vmem:[%s17095_s12 + $0x2b0] sm:$0xff] }
0x10e5   :  { %7921 = vmatprep.subr.mxu0 %v11748_v26  ;;  %2733 = vmatmul.mubr.f32.vlgmr.msra.gmra.mxu1 %v2540_v56  ;;  %17840 = vst [vmem:[#allocation24_spill] sm:$0xff] %v12362_v60  ;;  %v12374_v56 = vld [vmem:[%s17095_s12 + $0x3d0] sm:$0xff] }
0x10e6   :  { %7922 = vmatpush3.msra.mxu0 %v11754_v44  ;;  %7949 = vmatpush3.msra.mxu1 %v12251_v41  ;;  %17841 = vst [vmem:[#allocation20_spill] sm:$0xff] %v12374_v56 }
0x10e7   :  { %7923 = vmatprep.subr.mxu0 %v11761_v40  ;;  %7950 = vmatprep.subr.mxu1 %v12258_v9  ;;  %v12279_v40 = vld [vmem:[%s17095_s12 + $0x368] sm:$0xff] }
0x10e8   :  { %7924 = vmatpush3.msra.mxu0 %v11768_v15  ;;  %7951 = vmatpush3.msra.mxu1 %v12265_v38  ;;  %v12286_v15 = vld [vmem:[%s17095_s12 + $0x3e0] sm:$0xff] }
0x10e9   :  { %7925 = vmatprep.subr.mxu0 %v11775_v22  ;;  %7952 = vmatprep.subr.mxu1 %v12272_v59  ;;  %v12292_v22 = vld [vmem:[%s17095_s12 + $0x240] sm:$0xff] }
0x10ea   :  { %v2489_v26 = vpop.permute.xlu1 %2488  ;;  %v2492_v44 = vpop.permute.xlu0 %2491  ;;  %7926 = vmatpush3.msra.mxu0 %v11782_v31  ;;  %7953 = vmatpush3.msra.mxu1 %v12279_v40  ;;  %v12297_v31 = vmul.f32 %v12197_v55, %v12197_v55 }
0x10eb   :  { %7927 = vmatprep.subr.mxu0 %v11789_v34  ;;  %7954 = vmatprep.subr.mxu1 %v12286_v15  ;;  %v12301_v34 = vmul.f32 %v12199_v42, %v12199_v42  ;;  %v2509_v55 = vsel %vm271_vm4, %v2489_v26, %v2492_v44 }
0x10ec   :  { %7928 = vmatpush3.msra.mxu0 %v12292_v22  ;;  %7955 = vmatpush3.msra.mxu1 %v12310_v37 }
0x10ed   :  { %7929 = vmatprep.subr.mxu0 %v12316_v52  ;;  %7956 = vmatprep.subr.mxu1 %v12334_v6 }
0x10ee   :  { %v12337_v14 = vpop.permute.xlu1 %2503  ;;  %v12339_v30 = vpop.permute.xlu0 %2506  ;;  %7930 = vmatpush3.msra.mxu0 %v12344_v57  ;;  %7957 = vmatpush3.msra.mxu1 %v12351_v47  ;;  %v12500_v57 = vld [vmem:[%s17095_s12 + $0x290] sm:$0xff] }
0x10ef   :  { %v2516_v0 = vsel %vm271_vm4, %v12339_v30, %v2489_v26  ;;  %v2523_v33 = vsel %vm271_vm4, %v12337_v14, %v12339_v30  ;;  %7931 = vmatprep.subr.mxu0 %v12362_v60  ;;  %7958 = vmatprep.subr.mxu1 %v12374_v56  ;;  %v12430_v56 = vld [vmem:[%s17095_s12 + $0x2a0] sm:$0xff] }
0x10f0   :  { %v2517_v18 = vsel %vm289_vm5, %v2516_v0, %v2492_v44  ;;  %v2524_v29 = vsel %vm289_vm5, %v2523_v33, %v2489_v26  ;;  %7932 = vmatpush3.msra.mxu0 %v12380_v13  ;;  %v12388_v26 = vld [vmem:[%s17095_s12 + $0x350] sm:$0xff]  ;;  %v12405_v13 = vld [vmem:[%s17095_s12 + $0x3c8] sm:$0xff]  ;;  %17848 = vst [vmem:[#allocation37_spill] sm:$0xff] %v12430_v56 }
0x10f1   :  { %17843 = vst [vmem:[#allocation27_spill] sm:$0xff] %v12388_v26  ;;  %7959 = vmatpush3.msra.mxu1 %v12388_v26  ;;  %v2518_v0 = vsel %vm732_vm11, %v2517_v18, %v12167_v63  ;;  %v2525_v33 = vsel %vm732_vm11, %v2524_v29, %v2492_v44  ;;  %7933 = vmatprep.subr.mxu0 %v12397_v50  ;;  %17845 = vst [vmem:[#allocation31_spill] sm:$0xff] %v12405_v13  ;;  %v12415_v50 = vld [vmem:[%s17095_s12 + $0x228] sm:$0xff] }
0x10f2   :  { %7960 = vmatprep.subr.mxu1 %v12405_v13  ;;  %v2495_v18 = vpop.permute.xlu1 %2494  ;;  %v2510_v44 = vsel %vm289_vm5, %v2509_v55, %v12167_v63  ;;  %v2526_v29 = vsel %vm734_vm12, %v2525_v33, %v12167_v63  ;;  %17846 = vst [vmem:[#allocation33_spill] sm:$0xff] %v12415_v50  ;;  %7934 = vmatpush3.msra.mxu0 %v12415_v50  ;;  %v12421_v26 = vld [vmem:[%s17095_s12 + $0x348] sm:$0xff]  ;;  %v2498_v63 = vpop.permute.xlu0 %2497 }
0x10f3   :  { %17847 = vst [vmem:[#allocation35_spill] sm:$0xff] %v12421_v26  ;;  %7961 = vmatpush3.msra.mxu1 %v12421_v26  ;;  %v2511_v13 = vsel %vm732_vm11, %v2510_v44, %v2495_v18  ;;  %v2519_v55 = vsel %vm734_vm12, %v2518_v0, %v2495_v18  ;;  %v2527_v33 = vsel %vm736_vm13, %v2526_v29, %v2495_v18  ;;  %v12440_v0 = vld [vmem:[%s17095_s12 + $0x3c0] sm:$0xff] }
0x10f4   :  { %7935 = vmatprep.subr.mxu0 %v12430_v56  ;;  %v2565_v50 = vmul.f32 %v12232_v28, %v12208_v11  ;;  %v2583_v26 = vmul.f32 %v12232_v28, %v12206_v20  ;;  %17849 = vst [vmem:[#allocation39_spill] sm:$0xff] %v12440_v0  ;;  %7962 = vmatprep.subr.mxu1 %v12440_v0  ;;  %v12446_v18 = vld [vmem:[%s17095_s12 + $0x220] sm:$0xff] }
0x10f5   :  { %17850 = vst [vmem:[#allocation46_spill] sm:$0xff] %v12446_v18  ;;  %7936 = vmatpush3.msra.mxu0 %v12446_v18  ;;  %v2555_v11 = vmul.f32 %v12222_v27, %v12222_v27  ;;  %v2564_v20 = vmul.f32 %v12227_v4, %v12199_v42  ;;  %v12455_v44 = vmul.f32 %v12227_v4, %v12227_v4  ;;  %v12460_v29 = vld [vmem:[%s17095_s12 + $0x340] sm:$0xff]  ;;  %v12466_v18 = vld [vmem:[%s17095_s12 + $0x298] sm:$0xff] }
0x10f6   :  { %17851 = vst [vmem:[#allocation26_spill] sm:$0xff] %v12460_v29  ;;  %7963 = vmatpush3.msra.mxu1 %v12460_v29  ;;  %17852 = vst [vmem:[#allocation51_spill] sm:$0xff] %v12466_v18  ;;  %7937 = vmatprep.subr.mxu0 %v12466_v18  ;;  %v2573_v42 = vmul.f32 %v12232_v28, %v12232_v28  ;;  %v2512_v0 = vsel %vm734_vm12, %v2511_v13, %v2498_v63  ;;  %v12477_v29 = vld [vmem:[%s17095_s12 + $0x3b8] sm:$0xff]  ;;  %v2501_v47 = vpop.permute.xlu1 %2500  ;;  %v2549_v13 = vmul.f32 2.0, %v2547_v8 }
0x10f7   :  { %v2520_v56 = vsel %vm736_vm13, %v2519_v55, %v2498_v63  ;;  %v2528_v60 = vsel %vm738_vm14, %v2527_v33, %v2498_v63  ;;  %17853 = vst [vmem:[#allocation28_spill] sm:$0xff] %v12477_v29  ;;  %7964 = vmatprep.subr.mxu1 %v12477_v29  ;;  %v12483_v18 = vld [vmem:[%s17095_s12 + $0x218] sm:$0xff]  ;;  %v2513_v55 = vsel %vm736_vm13, %v2512_v0, %v2501_v47  ;;  %v2567_v8 = vmul.f32 2.0, %v2565_v50  ;;  %v12527_v0 = vld [vmem:[%s17095_s12 + $0x330] sm:$0xff] }
0x10f8   :  { %17854 = vst [vmem:[#allocation30_spill] sm:$0xff] %v12483_v18  ;;  %7938 = vmatpush3.msra.mxu0 %v12483_v18  ;;  %v12489_v63 = vld [vmem:[%s17095_s12 + $0x338] sm:$0xff]  ;;  %v2521_v33 = vsel %vm738_vm14, %v2520_v56, %v2501_v47  ;;  %v12495_v29 = vsel %vm740_vm15, %v2528_v60, %v2501_v47  ;;  %v2514_v18 = vsel %vm738_vm14, %v2513_v55, %v12337_v14  ;;  %v12512_v47 = vld [vmem:[%s17095_s12 + $0x3b0] sm:$0xff]  ;;  %v2548_v56 = vmul.f32 2.0, %v12329_v62  ;;  %v12533_v55 = vld [vmem:[%s17095_s12 + $0x288] sm:$0xff] }
0x10f9   :  { %17855 = vst [vmem:[#allocation32_spill] sm:$0xff] %v12489_v63  ;;  %7965 = vmatpush3.msra.mxu1 %v12489_v63  ;;  %7939 = vmatprep.subr.mxu0 %v12500_v57  ;;  %v12507_v63 = vsel %vm740_vm15, %v2521_v33, %v12337_v14  ;;  %v12518_v60 = vld [vmem:[%s17095_s12 + $0x210] sm:$0xff]  ;;  %v2587_v50 = vadd.f32 %v2585_v24, %v2583_v26  ;;  %17856 = vst [vmem:[#allocation34_spill] sm:$0xff] %v12533_v55  ;;  %v12547_v26 = vld [vmem:[%s17095_s12 + $0x208] sm:$0xff] }
0x10fa   :  { %7966 = vmatprep.subr.mxu1 %v12512_v47  ;;  %7940 = vmatpush3.msra.mxu0 %v12518_v60  ;;  %v2515_v14 = vsel %vm740_vm15, %v2514_v18, %v12339_v30  ;;  %v2551_v24 = vmul.f32 %v2549_v13, %v12495_v29  ;;  %v2557_v62 = vmul.f32 %v2555_v11, %v12507_v63  ;;  %v12541_v30 = vld [vmem:[%s17095_s12 + $0x3a8] sm:$0xff] }
0x10fb   :  { %7967 = vmatpush3.msra.mxu1 %v12527_v0  ;;  %7941 = vmatprep.subr.mxu0 %v12533_v55  ;;  %17857 = vst [vmem:[#allocation36_spill] sm:$0xff] %v12541_v30  ;;  %17858 = vst [vmem:[#allocation38_spill] sm:$0xff] %v12547_v26  ;;  %v2545_v18 = vmul.f32 %v12305_v3, %v2515_v14  ;;  %v2563_v13 = vmul.f32 %v12321_v46, %v2515_v14  ;;  %v12556_v33 = vld [vmem:[%s17095_s12 + $0x328] sm:$0xff]  ;;  %v12571_v55 = vld [vmem:[%s17095_s12 + $0x3a0] sm:$0xff] }
0x10fc   :  { %7968 = vmatprep.subr.mxu1 %v12541_v30  ;;  %7942 = vmatpush3.msra.mxu0 %v12547_v26  ;;  %v2569_v11 = vmul.f32 %v2567_v8, %v12495_v29  ;;  %17859 = vst [vmem:[#allocation40_spill] sm:$0xff] %v12556_v33  ;;  %v12562_v30 = vld [vmem:[%s17095_s12 + $0x280] sm:$0xff]  ;;  %v2575_v3 = vmul.f32 %v2573_v42, %v12507_v63  ;;  %v2566_v26 = vmul.f32 2.0, %v2564_v20  ;;  %17861 = vst [vmem:[#allocation42_spill] sm:$0xff] %v12571_v55 }
0x10fd   :  { %7969 = vmatpush3.msra.mxu1 %v12556_v33  ;;  %17860 = vst [vmem:[#allocation41_spill] sm:$0xff] %v12562_v30  ;;  %7943 = vmatprep.subr.mxu0 %v12562_v30  ;;  %v2544_v46 = vmul.f32 %v12297_v31, %v2515_v14  ;;  %v2550_v8 = vmul.f32 %v2548_v56, %v12495_v29  ;;  %v12577_v33 = vld [vmem:[%s17095_s12 + $0x200] sm:$0xff]  ;;  %v12590_v56 = vld [vmem:[%s17095_s12 + $0x4f8] sm:$0xff] }
0x10fe   :  { %7970 = vmatprep.subr.mxu1 %v12571_v55  ;;  %17862 = vst [vmem:[#allocation43_spill] sm:$0xff] %v12577_v33  ;;  %7944 = vmatpush3.msra.mxu0 %v12577_v33  ;;  %v2553_v42 = vadd.f32 %v2551_v24, %v2545_v18  ;;  %v2571_v30 = vadd.f32 %v2569_v11, %v2563_v13  ;;  %v12584_v20 = vld [vmem:[%s17095_s12 + $0x320] sm:$0xff]  ;;  %v12599_v18 = vld [vmem:[%s17095_s12 + $0x398] sm:$0xff] }
0x10ff   :  { %v2581_v31 = vmul.f32 %v12325_v16, %v2515_v14  ;;  %17863 = vst [vmem:[#allocation44_spill] sm:$0xff] %v12584_v20  ;;  %7971 = vmatpush3.msra.mxu1 %v12584_v20  ;;  %7983 = vmatprep.subr.mxu0 %v12590_v56  ;;  %v2552_v55 = vadd.f32 %v2550_v8, %v2544_v46  ;;  %17864 = vst [vmem:[#allocation45_spill] sm:$0xff] %v12599_v18  ;;  %v12607_v46 = vld [vmem:[%s17095_s12 + $0x318] sm:$0xff] }
0x1100   :  { %v2556_v24 = vmul.f32 %v12367_v39, %v12507_v63  ;;  %v2589_v16 = vmul.f32 %v2587_v50, %v12495_v29  ;;  %7972 = vmatprep.subr.mxu1 %v12599_v18  ;;  %v2559_v13 = vadd.f32 %v2557_v62, %v2553_v42  ;;  %v2577_v11 = vadd.f32 %v2575_v3, %v2571_v30  ;;  %v12716_v3 = vld [vmem:[%s17095_s12 + $0x448] sm:$0xff]  ;;  %v12722_v42 = vld [vmem:[%s17095_s12 + $0x4c0] sm:$0xff] }
0x1101   :  { %v2562_v20 = vmul.f32 %v12301_v34, %v2515_v14  ;;  %v2568_v33 = vmul.f32 %v2566_v26, %v12495_v29  ;;  %7973 = vmatpush3.msra.mxu1 %v12607_v46  ;;  %v2593_v8 = vmul.f32 %v12232_v28, %v12222_v27  ;;  %v2580_v18 = vmul.f32 %v12204_v45, %v2515_v14  ;;  %v12618_v34 = vld [vmem:[%s17095_s12 + $0x390] sm:$0xff]  ;;  %v12649_v26 = vld [vmem:[%s17095_s12 + $0x380] sm:$0xff] }
0x1102   :  { %v2558_v39 = vadd.f32 %v2556_v24, %v2552_v55  ;;  %v2591_v50 = vadd.f32 %v2589_v16, %v2581_v31  ;;  %v2592_v62 = vmul.f32 %v12227_v4, %v12215_v23  ;;  %7974 = vmatprep.subr.mxu1 %v12618_v34  ;;  %2802 = vmatprep.mubr.f32.mxu0 %v2559_v13  ;;  %v12626_v27 = vld [vmem:[%s17095_s12 + $0x310] sm:$0xff]  ;;  %v12633_v23 = vld [vmem:[%s17095_s12 + $0x388] sm:$0xff]  ;;  %v12728_v31 = vld [vmem:[%s17095_s12 + $0x440] sm:$0xff] }
0x1103   :  { %v2570_v30 = vadd.f32 %v2568_v33, %v2562_v20  ;;  %v2588_v55 = vmul.f32 %v12236_v49, %v12495_v29  ;;  %7975 = vmatpush3.msra.mxu1 %v12626_v27  ;;  %2872 = vmatprep.mubr.f32.mxu1 %v2577_v11  ;;  %v2595_v45 = vmul.f32 %v2593_v8, %v12507_v63  ;;  %v12642_v29 = vld [vmem:[%s17095_s12 + $0x308] sm:$0xff]  ;;  %v12658_v33 = vld [vmem:[%s17095_s12 + $0x300] sm:$0xff]  ;;  %v12734_v20 = vld [vmem:[%s17095_s12 + $0x4b8] sm:$0xff] }
0x1104   :  { %7976 = vmatprep.subr.mxu1 %v12633_v23  ;;  %2803 = vmatmul.mubr.f32.vlgmr.msra.gmra.mxu0 %v2558_v39  ;;  %v2574_v4 = vmul.f32 %v12455_v44, %v12507_v63  ;;  %v2594_v49 = vmul.f32 %v2592_v62, %v12507_v63  ;;  %17865 = vst [vmem:[#allocation47_spill] sm:$0xff] %v12728_v31  ;;  %17866 = vst [vmem:[#allocation48_spill] sm:$0xff] %v12734_v20  ;;  %v12740_v24 = vld [vmem:[%s17095_s12 + $0x438] sm:$0xff]  ;;  %v12746_v16 = vld [vmem:[%s17095_s12 + $0x4b0] sm:$0xff] }
0x1105   :  { %v2590_v28 = vadd.f32 %v2588_v55, %v2580_v18  ;;  %7977 = vmatpush3.msra.mxu1 %v12642_v29  ;;  %7984 = vmatpush3.msra.mxu0 %v11916_v51  ;;  %v2597_v14 = vadd.f32 %v2595_v45, %v2591_v50  ;;  %v12668_v51 = vld [vmem:[%s17090_s7 + $0x8] sm:$0xff]   ;;  %17867 = vst [vmem:[#allocation49_spill] sm:$0xff] %v12740_v24  ;;  %17868 = vst [vmem:[#allocation50_spill] sm:$0xff] %v12746_v16  ;;  %v12752_v18 = vld [vmem:[%s17095_s12 + $0x430] sm:$0xff] }
0x1106   :  { %7978 = vmatprep.subr.mxu1 %v12649_v26  ;;  %7985 = vmatprep.subr.mxu0 %v11922_v54  ;;  %v2576_v44 = vadd.f32 %v2574_v4, %v2570_v30  ;;  %v12679_v54 = vld [vmem:[%s17095_s12 + $0x4d8] sm:$0xff]  ;;  %17869 = vst [vmem:[#allocation52_spill] sm:$0xff] %v12752_v18  ;;  %v12758_v13 = vld [vmem:[%s17095_s12 + $0x4a8] sm:$0xff]  ;;  %v12770_v39 = vld [vmem:[%s17095_s12 + $0x4a0] sm:$0xff] }
0x1107   :  { %v12653_v63 = vadd.f32 %v2594_v49, %v2590_v28  ;;  %2942 = vmatprep.mubr.f32.mxu0 %v2597_v14  ;;  %7979 = vmatpush3.msra.mxu1 %v12658_v33  ;;  %17870 = vst [vmem:[#allocation53_spill] sm:$0xff] %v12758_v13  ;;  %v12764_v11 = vld [vmem:[%s17095_s12 + $0x428] sm:$0xff]  ;;  %17872 = vst [vmem:[#allocation55_spill] sm:$0xff] %v12770_v39  ;;  %v12776_v50 = vld [vmem:[%s17095_s12 + $0x420] sm:$0xff] }
0x1108   :  { %7986 = vmatpush3.msra.mxu0 %v11928_v35  ;;  %2873 = vmatmul.mubr.f32.vlgmr.msra.gmra.mxu1 %v2576_v44  ;;  %v12685_v35 = vld [vmem:[%s17095_s12 + $0x458] sm:$0xff]  ;;  %17871 = vst [vmem:[#allocation54_spill] sm:$0xff] %v12764_v11  ;;  %17873 = vst [vmem:[#allocation56_spill] sm:$0xff] %v12776_v50  ;;  %v12794_v30 = vld [vmem:[%s17095_s12 + $0x490] sm:$0xff] }
0x1109   :  { %7987 = vmatprep.subr.mxu0 %v11935_v21  ;;  %9037 = vmatprep.subr.bf16.mxu1 %v17613_v58  ;;  %v12691_v21 = vld [vmem:[%s17090_s7] sm:$0xff]   ;;  %v12782_v8 = vld [vmem:[%s17095_s12 + $0x498] sm:$0xff]  ;;  %17876 = vst [vmem:[#allocation62_spill] sm:$0xff] %v12794_v30  ;;  %v12800_v55 = vld [vmem:[%s17095_s12 + $0x410] sm:$0xff] }
0x110a   :  { %7988 = vmatpush3.msra.mxu0 %v11942_v43  ;;  %9038 = vmatpush3.bf16.msra.mxu1 %v12668_v51  ;;  %v12697_v43 = vld [vmem:[%s17095_s12 + $0x4d0] sm:$0xff]  ;;  %17874 = vst [vmem:[#allocation57_spill] sm:$0xff] %v12782_v8  ;;  %v12788_v62 = vld [vmem:[%s17095_s12 + $0x418] sm:$0xff]  ;;  %17877 = vst [vmem:[#allocation63_spill] sm:$0xff] %v12800_v55 }
0x110b   :  { %7989 = vmatprep.subr.mxu0 %v11949_v53  ;;  %9039 = vmatprep.subr.bf16.mxu1 %v17613_v58  ;;  %v12704_v53 = vld [vmem:[%s17095_s12 + $0x450] sm:$0xff]  ;;  %17875 = vst [vmem:[#allocation58_spill] sm:$0xff] %v12788_v62  ;;  %v12806_v45 = vld [vmem:[%s17095_s12 + $0x488] sm:$0xff]  ;;  %v12818_v28 = vld [vmem:[%s17095_s12 + $0x480] sm:$0xff] }
0x110c   :  { %7990 = vmatpush3.msra.mxu0 %v11957_v19  ;;  %9041 = vmatprep.mubr.msk.bf16.mxu1 %vm9898_vm2, %v17613_v58  ;;  %v12710_v19 = vld [vmem:[%s17095_s12 + $0x4c8] sm:$0xff]  ;;  %17878 = vst [vmem:[#allocation64_spill] sm:$0xff] %v12806_v45  ;;  %17880 = vst [vmem:[#allocation66_spill] sm:$0xff] %v12818_v28  ;;  %v12824_v49 = vld [vmem:[%s17095_s12 + $0x400] sm:$0xff] }
0x110d   :  { %7991 = vmatprep.subr.mxu0 %v12679_v54  ;;  %v12812_v4 = vld [vmem:[%s17095_s12 + $0x408] sm:$0xff]  ;;  %17881 = vst [vmem:[#allocation67_spill] sm:$0xff] %v12824_v49 }
0x110e   :  { %7992 = vmatpush3.msra.mxu0 %v12685_v35  ;;  %9040 = vmatpush3.bf16.msra.mxu1 %v12691_v21  ;;  %17879 = vst [vmem:[#allocation65_spill] sm:$0xff] %v12812_v4 }
0x110f   :  { %7993 = vmatprep.subr.mxu0 %v12697_v43  ;;  %9045 = vmatprep.subr.bf16.mxu1 %v17613_v58 }
0x1110   :  { %7994 = vmatpush3.msra.mxu0 %v12704_v53 }
0x1111   :  { %7995 = vmatprep.subr.mxu0 %v12710_v19 }
0x1112   :  { %7996 = vmatpush3.msra.mxu0 %v12716_v3 }
0x1113   :  { %7997 = vmatprep.subr.mxu0 %v12722_v42 }
0x1114   :  { %7998 = vmatpush3.msra.mxu0 %v12728_v31 }
0x1115   :  { %7999 = vmatprep.subr.mxu0 %v12734_v20 }
0x1116   :  { %8000 = vmatpush3.msra.mxu0 %v12740_v24  ;;  %v2996_v24 = vpop.permute.xlu1 %2995 }
0x1117   :  { %8001 = vmatprep.subr.mxu0 %v12746_v16  ;;  %v2957_v16 = vpop.permute.xlu0 %2956 }
0x1118   :  { %8002 = vmatpush3.msra.mxu0 %v12752_v18 }
0x1119   :  { %8003 = vmatprep.subr.mxu0 %v12758_v13 }
0x111a   :  { %8004 = vmatpush3.msra.mxu0 %v12764_v11 }
0x111b   :  { %8005 = vmatprep.subr.mxu0 %v12770_v39 }
0x111c   :  { %8006 = vmatpush3.msra.mxu0 %v12776_v50 }
0x111d   :  { %8007 = vmatprep.subr.mxu0 %v12782_v8 }
0x111e   :  { %8008 = vmatpush3.msra.mxu0 %v12788_v62 }
0x111f   :  { %8009 = vmatprep.subr.mxu0 %v12794_v30 }
0x1120   :  { %8010 = vmatpush3.msra.mxu0 %v12800_v55 }
0x1121   :  { %8011 = vmatprep.subr.mxu0 %v12806_v45 }
0x1122   :  { %8012 = vmatpush3.msra.mxu0 %v12812_v4 }
0x1123   :  { %8013 = vmatprep.subr.mxu0 %v12818_v28 }
0x1124   :  { %8014 = vmatpush3.msra.mxu0 %v12824_v49 }
0x1125   :  { %2943 = vmatmul.mubr.f32.vlgmr.msra.gmra.mxu0 %v12653_v63  ;;  %3182 = vmatprep.subr.bf16.mxu0 %v10107_v1 }
0x1126   :  { %3183 = vmatpush1.bf16.msra.mxu0 %v10110_v2  ;;  %3200 = vmatprep.mubr.bf16.mxu0 %v17628_v5 }
0x1127   :  { %3223 = vmatprep.subr.bf16.mxu0 %v10126_v10 }
0x119d   :  { %v7875_v14 = vpop.f32.mrf.mxu0 }
0x119f   :  { %v7876_v44 = vpop.f32.mrf.mxu0 }
0x11a0   :  { %v7877_v8 = vadd.f32 %v7876_v44, %v7875_v14 }
0x11a5   :  { %v7910_v28 = vpop.f32.mrf.mxu1 }
0x11a7   :  { %v7911_v45 = vpop.f32.mrf.mxu1 }
0x11a8   :  { %v7912_v62 = vadd.f32 %v7911_v45, %v7910_v28 }
0x11aa   :  { %v2735_v63 = vadd.f32 %v7912_v62, %v7877_v8  ;;  %v12859_v62 = vld [vmem:[%s17085_s2] sm:$0x3] }
0x11c4   :  { %v7945_v4 = vpop.f32.mrf.mxu0 }
0x11c6   :  { %v7946_v55 = vpop.f32.mrf.mxu0 }
0x11c7   :  { %v7947_v49 = vadd.f32 %v7946_v55, %v7945_v4 }
0x11c8   :  { %v7980_v30 = vpop.f32.mrf.mxu1 }
0x11c9   :  { %v2805_v39 = vadd.f32 %v7947_v49, %v2735_v63 }
0x11ca   :  { %v7981_v50 = vpop.f32.mrf.mxu1 }
0x11cb   :  { %v7982_v1 = vadd.f32 %v7981_v50, %v7980_v30 }
0x11cd   :  { %v2875_v13 = vadd.f32 %v7982_v1, %v2805_v39  ;;  %v2990_v1 = vld [vmem:[%s17083_s0] sm:$0x3] }
0x11e5   :  { %v8015_v11 = vpop.f32.mrf.mxu0 }
0x11e7   :  { %v8016_v2 = vpop.f32.mrf.mxu0 }
0x11e8   :  { %v8017_v18 = vadd.f32 %v8016_v2, %v8015_v11 }
0x11ea   :  { %v2945_v10 = vadd.f32 %v8017_v18, %v2875_v13 }
0x11ec   :  { %v12833_v20 = vadd.f32 %v2945_v10, %v11077_v25  ;;  %v12835_v31 = vadd.f32 %v2957_v16, %v2945_v10 }
0x11ee   :  { %17882 = vst [vmem:[#allocation68_spill] sm:$0xff] %v12833_v20  ;;  %17883 = vst [vmem:[#allocation69_spill] sm:$0xff] %v12835_v31  ;;  %v2998_v45 = vadd.f32 %v2996_v24, %v12833_v20  ;;  %3006 = vrot.lane.b32.xlu0 %v12835_v31, %s9905_s19 }
0x11f0   :  { %9224 = vrcp.f32 %v2998_v45 }
0x11fd   :  { %v9225_v8 = vpop.eup %9224 }
0x11fe   :  { %3002 = vrot.lane.b32.xlu1 %v9225_v8, %s9896_s4  ;;  %v12850_v16 = vmul.f32 %v9225_v8, %v12833_v20  ;;  %v12883_v8 = vld [vmem:[%s17092_s9 + $0x30] sm:$0xff]  }
0x1260   :  { %v3007_v2 = vpop.permute.xlu0 %3006 }
0x1261   :  { %v3009_v18 = vsub.f32 %v2990_v1, %v3007_v2  ;;  %v12890_v1 = vld [vmem:[%s17092_s9 + $0x28] sm:$0xff]   ;;  %v12897_v2 = vld [vmem:[%s17092_s9 + $0x20] sm:$0xff]  }
0x1263   :  { %3015 = vrot.lane.b32.xlu1 %v3009_v18, %s9900_s26  ;;  %3011 = vrot.lane.b32.xlu0 %v3009_v18, %s9899_s21  ;;  %v12904_v18 = vld [vmem:[%s17092_s9 + $0x18] sm:$0xff]  }
0x1270   :  { %v3003_v10 = vpop.permute.xlu1 %3002 }
0x1271   :  { %v12847_v24 = vmul.f32 %v3003_v10, %v12833_v20  ;;  %v12911_v10 = vld [vmem:[%s17092_s9 + $0x10] sm:$0xff]  }
0x1272   :  { %17885 = vst [vmem:[#allocation71_spill] sm:$0xff] %v12911_v10 }
0x12d5   :  { %v3016_v13 = vpop.permute.xlu1 %3015  ;;  %v3012_v11 = vpop.permute.xlu0 %3011 }
0x12d6   :  { %v3018_v39 = vmul.f32 %v3016_v13, %v12847_v24  ;;  %v3014_v50 = vmul.f32 %v3012_v11, %v12850_v16  ;;  %v12918_v13 = vld [vmem:[%s17092_s9 + $0x8] sm:$0xff]   ;;  %v12925_v11 = vld [vmem:[%s17092_s9] sm:$0xff]  }
0x12d7   :  { %17886 = vst [vmem:[#allocation72_spill] sm:$0xff] %v12918_v13  ;;  %17887 = vst [vmem:[#allocation73_spill] sm:$0xff] %v12925_v11 }
0x12d8   :  { %3024 = vrot.lane.b32.xlu1 %v3018_v39, %s9906_s20  ;;  %3020 = vrot.lane.b32.xlu0 %v3014_v50, %s9901_s27  ;;  %v12932_v50 = vld [vmem:[%s17091_s8] ss:$0 sm:$0xff] }
0x12d9   :  { %17888 = vst [vmem:[#allocation74_spill] sm:$0xff] %v12932_v50 }
0x12dc   :  { %3048 = vrot.lane.b32.xlu1 %v12859_v62, %s9901_s27  ;;  %3045 = vrot.lane.b32.xlu0 %v12859_v62, %s9906_s20 }
0x134a   :  { %v3025_v30 = vpop.permute.xlu1 %3024  ;;  %v3021_v55 = vpop.permute.xlu0 %3020 }
0x134b   :  { %v3027_v49 = vsel %vm271_vm4, %v3021_v55, %v3025_v30 }
0x134e   :  { %v3049_v4 = vpop.permute.xlu1 %3048  ;;  %v3046_v28 = vpop.permute.xlu0 %3045 }
0x134f   :  { %v12867_v14 = vsel %vm271_vm4, %v3046_v28, %v3049_v4 }
0x1350   :  { %v3052_v44 = vmul.f32 %v12867_v14, %v3027_v49 }
0x1352   :  { %v12871_v63 = vadd.f32 %v3052_v44, %v12835_v31  ;;  %v12942_v31 = vld [vmem:[%s17093_s10] ss:$0 sm:$0xff] }
0x1353   :  { %17889 = vst [vmem:[#allocation75_spill] sm:$0xff] %v12942_v31 }
0x1354   :  { %17884 = vst [vmem:[#allocation70_spill] sm:$0xff] %v12871_v63  ;;  %v3064_v45 = vpack.c.bf16 %v12871_v63, %v12871_v63 }
0x1356   :  { %9042 = vmatmul.mubr.msk.bf16.vlgmr.msra.gmra.mxu1 %vm289_vm5, %v3064_v45 }
0x1357   :  { %9046 = vmatpush3.bf16.msra.mxu1 %v10019_v17  ;;  %9061 = vmatprep.mubr.msk.bf16.mxu1 %vm9898_vm2, %v17613_v58 }
0x1358   :  { %9047 = vmatprep.subr.bf16.mxu1 %v17613_v58 }
0x135b   :  { %9048 = vmatpush3.bf16.msra.mxu1 %v12883_v8 }
0x135c   :  { %9049 = vmatprep.subr.bf16.mxu1 %v17613_v58 }
0x135f   :  { %9050 = vmatpush3.bf16.msra.mxu1 %v12890_v1 }
0x1360   :  { %9051 = vmatprep.subr.bf16.mxu1 %v17613_v58 }
0x1363   :  { %9052 = vmatpush3.bf16.msra.mxu1 %v12897_v2 }
0x1364   :  { %9053 = vmatprep.subr.bf16.mxu1 %v17613_v58 }
0x1367   :  { %9054 = vmatpush3.bf16.msra.mxu1 %v12904_v18 }
0x1368   :  { %9055 = vmatprep.subr.bf16.mxu1 %v17613_v58 }
0x136b   :  { %9056 = vmatpush3.bf16.msra.mxu1 %v12911_v10  ;;  %v17983_v10 = vld [vmem:[#allocation26_spill] sm:$0xff] }
0x136c   :  { %9057 = vmatprep.subr.bf16.mxu1 %v17613_v58 }
0x136f   :  { %9058 = vmatpush3.bf16.msra.mxu1 %v12918_v13  ;;  %v17982_v13 = vld [vmem:[#allocation46_spill] sm:$0xff] }
0x1370   :  { %9059 = vmatprep.subr.bf16.mxu1 %v17613_v58 }
0x1373   :  { %9060 = vmatpush3.bf16.msra.mxu1 %v12925_v11 }
0x1374   :  { %3264 = vmatprep.subr.bf16.mxu1 %v17761_v7 }
0x1416   :  { %v3102_v39 = vpop.f32.mrf.mxu1 }
0x1417   :  { %v3103_v30 = vadd.f32 %v12932_v50, %v3102_v39 }
0x1418   :  { %v9043_v55 = vpop.f32.mrf.mxu1 }
0x1419   :  { %9226 = vtanh.f32 %v3103_v30 }
0x141a   :  { %v3105_v4 = vpop.f32.mrf.mxu1 }
0x141c   :  { %v9044_v28 = vpop.f32.mrf.mxu1 }
0x1426   :  { %v9227_v49 = vpop.eup %9226 }
0x1427   :  { %v3109_v44 = vpack.c.bf16 %v9227_v49, %v9227_v49 }
0x1429   :  { %9062 = vmatmul.mubr.msk.bf16.vlgmr.msra.gmra.mxu1 %vm419_vm6, %v3109_v44 }
0x142a   :  { %3265 = vmatpush1.bf16.msra.mxu1 %v17763_v36  ;;  %3282 = vmatprep.mubr.bf16.mxu1 %v17628_v5 }
0x142b   :  { %8030 = vmatprep.subr.mxu1 %v12058_v48  ;;  %v3029_v48 = vmul.f32 %v12847_v24, %v12833_v20 }
0x14e9   :  { %v3147_v45 = vpop.f32.mrf.mxu1 }
0x14ea   :  { %v3148_v39 = vadd.f32 %v12942_v31, %v3147_v45 }
0x14eb   :  { %v9063_v30 = vpop.f32.mrf.mxu1 }
0x14ec   :  { %v3153_v55 = vsel %vm467_vm7, %v3148_v39, -inf  ;;  %v3028_v30 = vmul.f32 %v12850_v16, %v12833_v20 }
0x14ed   :  { %3154 = vmax.xlane.f32.xlu0 %v3153_v55  ;;  %v3150_v4 = vpop.f32.mrf.mxu1 }
0x14ef   :  { %v9064_v28 = vpop.f32.mrf.mxu1 }
0x1503   :  { %3030 = vrot.lane.b32.xlu0 %v12833_v20, %s9901_s27 }
0x1507   :  { %3039 = vrot.lane.b32.xlu0 %v3029_v48, %s9906_s20 }
0x1576   :  { %v3155_v49 = vpop.xlane.xlu0 %3154 }
0x1577   :  { %v3156_v44 = vsub.f32 %v3148_v39, %v3155_v49 }
0x1579   :  { %v3157_v36 = vmul.f32 1.442695, %v3156_v44 }
0x157b   :  { %9228 = vpow2.f32 %v3157_v36  ;;  %v3031_v36 = vpop.permute.xlu0 %3030 }
0x157f   :  { %v3040_v55 = vpop.permute.xlu0 %3039 }
0x1588   :  { %v9229_v50 = vpop.eup %9228 }
0x1589   :  { %v3159_v45 = vsel %vm467_vm7, %v9229_v50, 0.0 }
0x158a   :  { %3160 = vadd.xlane.f32.xlu1 %v3159_v45 }
0x159b   :  { %3035 = vrot.lane.b32.xlu1 %v3028_v30, %s9901_s27 }
0x159f   :  { %3054 = vrot.lane.b32.xlu1 %v12859_v62, %s9899_s21  ;;  %v3033_v62 = vmul.f32 %v3031_v36, %v12850_v16  ;;  %v12983_v16 = vld [vmem:[%s17095_s12 + $0x78] sm:$0xff]  ;;  %v13003_v36 = vld [vmem:[%s17095_s12 + $0xe8] sm:$0xff] }
0x15a0   :  { %17890 = vst [vmem:[#allocation76_spill] sm:$0xff] %v12983_v16  ;;  %17893 = vst [vmem:[#allocation79_spill] sm:$0xff] %v13003_v36 }
0x15a3   :  { %3333 = vrot.lane.b32.xlu1 %v12871_v63, %s9900_s26 }
0x15a7   :  { %3336 = vrot.lane.b32.xlu1 %v12871_v63, %s9896_s4 }
0x15ab   :  { %3342 = vrot.lane.b32.xlu1 %v12871_v63, %s9902_s28 }
0x15af   :  { %3348 = vrot.lane.b32.xlu1 %v12871_v63, %s9901_s27 }
0x1613   :  { %v3161_v24 = vpop.xlane.xlu1 %3160 }
0x1614   :  { %9230 = vrcp.f32 %v3161_v24 }
0x1617   :  { %v3036_v39 = vpop.permute.xlu1 %3035 }
0x1618   :  { %v3042_v4 = vsel %vm271_vm4, %v3036_v39, %v3040_v55  ;;  %v13009_v39 = vld [vmem:[%s17095_s12 + $0x68] sm:$0xff]  ;;  %v13016_v55 = vld [vmem:[%s17095_s12 + $0xe0] sm:$0xff] }
0x1619   :  { %v3043_v48 = vsel %vm289_vm5, %v3042_v4, %v3033_v62  ;;  %17894 = vst [vmem:[#allocation80_spill] sm:$0xff] %v13009_v39  ;;  %17895 = vst [vmem:[#allocation81_spill] sm:$0xff] %v13016_v55  ;;  %v13024_v4 = vld [vmem:[%s17095_s12 + $0x60] sm:$0xff]  ;;  %v13030_v62 = vld [vmem:[%s17095_s12 + $0x1f8] sm:$0xff] }
0x161a   :  { %17896 = vst [vmem:[#allocation82_spill] sm:$0xff] %v13024_v4  ;;  %17897 = vst [vmem:[#allocation83_spill] sm:$0xff] %v13030_v62 }
0x161b   :  { %v3055_v28 = vpop.permute.xlu1 %3054 }
0x161c   :  { %v3057_v49 = vsel %vm289_vm5, %v12867_v14, %v3055_v28  ;;  %v12989_v14 = vld [vmem:[%s17095_s12 + $0xf0] sm:$0xff]  ;;  %v13036_v28 = vld [vmem:[%s17095_s12 + $0xd8] sm:$0xff] }
0x161d   :  { %v3058_v44 = vmul.f32 %v3057_v49, %v3043_v48  ;;  %17891 = vst [vmem:[#allocation77_spill] sm:$0xff] %v12989_v14  ;;  %17898 = vst [vmem:[#allocation84_spill] sm:$0xff] %v13036_v28  ;;  %v13042_v48 = vld [vmem:[%s17095_s12 + $0x58] sm:$0xff]  ;;  %v13048_v49 = vld [vmem:[%s17095_s12 + $0xd0] sm:$0xff] }
0x161e   :  { %17899 = vst [vmem:[#allocation85_spill] sm:$0xff] %v13042_v48  ;;  %17900 = vst [vmem:[#allocation86_spill] sm:$0xff] %v13048_v49 }
0x161f   :  { %3060 = vrot.lane.b32.xlu0 %v3058_v44, %s9896_s4  ;;  %v13054_v44 = vld [vmem:[%s17095_s12 + $0x50] sm:$0xff] }
0x1620   :  { %17901 = vst [vmem:[#allocation87_spill] sm:$0xff] %v13054_v44 }
0x1621   :  { %v9231_v45 = vpop.eup %9230 }
0x1622   :  { %v3163_v30 = vmul.f32 %v9231_v45, %v9229_v50  ;;  %v12997_v50 = vld [vmem:[%s17095_s12 + $0x70] sm:$0xff]  ;;  %v13060_v45 = vld [vmem:[%s17095_s12 + $0xc8] sm:$0xff] }
0x1623   :  { %3351 = vrot.lane.b32.xlu0 %v12871_v63, %s9899_s21  ;;  %17892 = vst [vmem:[#allocation78_spill] sm:$0xff] %v12997_v50  ;;  %17902 = vst [vmem:[#allocation88_spill] sm:$0xff] %v13060_v45 }
0x1624   :  { %v3164_v24 = vpack.c.bf16 %v3163_v30, %v3163_v30  ;;  %v13067_v30 = vld [vmem:[%s17095_s12 + $0x48] sm:$0xff] }
0x1625   :  { %17903 = vst [vmem:[#allocation89_spill] sm:$0xff] %v13067_v30 }
0x1626   :  { %7425 = vmatmul.mubr.msk.bf16.vlgmr.msra.gmra.mxu0 %vm512_vm10, %v3164_v24  ;;  %7427 = vmatmul.mubr.msk.bf16.vlgmr.msra.gmra.mxu1 %vm512_vm10, %v3164_v24 }
0x1627   :  { %3339 = vrot.lane.b32.xlu0 %v12871_v63, %s9905_s19  ;;  %3224 = vmatpush1.bf16.msra.mxu0 %v17765_v61 }
0x1628   :  { %3241 = vmatprep.mubr.bf16.mxu0 %v17628_v5  ;;  %3305 = vmatprep.subr.bf16.mxu0 %v17766_v12 }
0x1629   :  { %8031 = vmatpush3.msra.mxu1 %v12983_v16 }
0x162a   :  { %8032 = vmatprep.subr.mxu1 %v12989_v14 }
0x162b   :  { %3345 = vrot.lane.b32.xlu0 %v12871_v63, %s9906_s20  ;;  %8033 = vmatpush3.msra.mxu1 %v12997_v50 }
0x162c   :  { %8034 = vmatprep.subr.mxu1 %v13003_v36 }
0x162d   :  { %8035 = vmatpush3.msra.mxu1 %v13009_v39 }
0x162e   :  { %7426 = vmatmul.mubr.msk.bf16.vlgmr.msra.gmra.mxu0 %vm512_vm10, %v3164_v24  ;;  %8036 = vmatprep.subr.mxu1 %v13016_v55 }
0x162f   :  { %3306 = vmatpush1.bf16.msra.mxu0 %v17773_v32  ;;  %3323 = vmatprep.mubr.bf16.mxu0 %v17628_v5 }
0x1630   :  { %8037 = vmatpush3.msra.mxu1 %v13024_v4  ;;  %8065 = vmatprep.subr.mxu0 %v13030_v62 }
0x1631   :  { %8038 = vmatprep.subr.mxu1 %v13036_v28 }
0x1632   :  { %8039 = vmatpush3.msra.mxu1 %v13042_v48 }
0x1633   :  { %8040 = vmatprep.subr.mxu1 %v13048_v49 }
0x1634   :  { %8041 = vmatpush3.msra.mxu1 %v13054_v44  ;;  %v13073_v44 = vld [vmem:[%s17095_s12 + $0x178] sm:$0xff] }
0x1635   :  { %8042 = vmatprep.subr.mxu1 %v13060_v45  ;;  %17904 = vst [vmem:[#allocation90_spill] sm:$0xff] %v13073_v44  ;;  %v13079_v45 = vld [vmem:[%s17095_s12 + $0xc0] sm:$0xff] }
0x1636   :  { %7428 = vmatmul.mubr.msk.bf16.vlgmr.msra.gmra.mxu0 %vm512_vm10, %v3164_v24  ;;  %8043 = vmatpush3.msra.mxu1 %v13067_v30  ;;  %17905 = vst [vmem:[#allocation91_spill] sm:$0xff] %v13079_v45  ;;  %v13085_v24 = vld [vmem:[%s17095_s12 + $0x1f0] sm:$0xff]  ;;  %v13091_v30 = vld [vmem:[%s17095_s12 + $0x40] sm:$0xff] }
0x1637   :  { %8066 = vmatpush3.msra.mxu0 %v13073_v44  ;;  %8044 = vmatprep.subr.mxu1 %v13079_v45  ;;  %17906 = vst [vmem:[#allocation92_spill] sm:$0xff] %v13085_v24  ;;  %17907 = vst [vmem:[#allocation93_spill] sm:$0xff] %v13091_v30  ;;  %v13097_v44 = vld [vmem:[%s17095_s12 + $0x170] sm:$0xff]  ;;  %v13103_v45 = vld [vmem:[%s17095_s12 + $0xb8] sm:$0xff] }
0x1638   :  { %8067 = vmatprep.subr.mxu0 %v13085_v24  ;;  %8045 = vmatpush3.msra.mxu1 %v13091_v30  ;;  %17908 = vst [vmem:[#allocation94_spill] sm:$0xff] %v13097_v44  ;;  %17909 = vst [vmem:[#allocation95_spill] sm:$0xff] %v13103_v45  ;;  %v13109_v24 = vld [vmem:[%s17095_s12 + $0x1e8] sm:$0xff]  ;;  %v13115_v30 = vld [vmem:[%s17095_s12 + $0x38] sm:$0xff] }
0x1639   :  { %8068 = vmatpush3.msra.mxu0 %v13097_v44  ;;  %8046 = vmatprep.subr.mxu1 %v13103_v45  ;;  %17910 = vst [vmem:[#allocation96_spill] sm:$0xff] %v13109_v24  ;;  %17911 = vst [vmem:[#allocation97_spill] sm:$0xff] %v13115_v30  ;;  %v13121_v44 = vld [vmem:[%s17095_s12 + $0x168] sm:$0xff]  ;;  %v13127_v45 = vld [vmem:[%s17095_s12 + $0xb0] sm:$0xff] }
0x163a   :  { %8069 = vmatprep.subr.mxu0 %v13109_v24  ;;  %8047 = vmatpush3.msra.mxu1 %v13115_v30  ;;  %17912 = vst [vmem:[#allocation98_spill] sm:$0xff] %v13121_v44  ;;  %17913 = vst [vmem:[#allocation99_spill] sm:$0xff] %v13127_v45  ;;  %v13133_v24 = vld [vmem:[%s17095_s12 + $0x1e0] sm:$0xff]  ;;  %v13139_v30 = vld [vmem:[%s17095_s12 + $0x30] sm:$0xff] }
0x163b   :  { %8070 = vmatpush3.msra.mxu0 %v13121_v44  ;;  %8048 = vmatprep.subr.mxu1 %v13127_v45  ;;  %17914 = vst [vmem:[#allocation100_spill] sm:$0xff] %v13133_v24  ;;  %17915 = vst [vmem:[#allocation101_spill] sm:$0xff] %v13139_v30  ;;  %v13145_v44 = vld [vmem:[%s17095_s12 + $0x160] sm:$0xff]  ;;  %v13151_v45 = vld [vmem:[%s17095_s12 + $0xa8] sm:$0xff] }
0x163c   :  { %8071 = vmatprep.subr.mxu0 %v13133_v24  ;;  %8049 = vmatpush3.msra.mxu1 %v13139_v30  ;;  %17916 = vst [vmem:[#allocation102_spill] sm:$0xff] %v13145_v44  ;;  %17917 = vst [vmem:[#allocation103_spill] sm:$0xff] %v13151_v45  ;;  %v13157_v24 = vld [vmem:[%s17095_s12 + $0x1d8] sm:$0xff]  ;;  %v13163_v30 = vld [vmem:[%s17095_s12 + $0x28] sm:$0xff] }
0x163d   :  { %8072 = vmatpush3.msra.mxu0 %v13145_v44  ;;  %8050 = vmatprep.subr.mxu1 %v13151_v45  ;;  %17918 = vst [vmem:[#allocation104_spill] sm:$0xff] %v13157_v24  ;;  %17919 = vst [vmem:[#allocation105_spill] sm:$0xff] %v13163_v30  ;;  %v13169_v44 = vld [vmem:[%s17095_s12 + $0x158] sm:$0xff]  ;;  %v13175_v45 = vld [vmem:[%s17095_s12 + $0xa0] sm:$0xff] }
0x163e   :  { %8073 = vmatprep.subr.mxu0 %v13157_v24  ;;  %8051 = vmatpush3.msra.mxu1 %v13163_v30  ;;  %17920 = vst [vmem:[#allocation106_spill] sm:$0xff] %v13169_v44  ;;  %17921 = vst [vmem:[#allocation107_spill] sm:$0xff] %v13175_v45  ;;  %v13181_v24 = vld [vmem:[%s17095_s12 + $0x1d0] sm:$0xff]  ;;  %v13187_v30 = vld [vmem:[%s17095_s12 + $0x20] sm:$0xff] }
0x163f   :  { %8074 = vmatpush3.msra.mxu0 %v13169_v44  ;;  %8052 = vmatprep.subr.mxu1 %v13175_v45  ;;  %17922 = vst [vmem:[#allocation108_spill] sm:$0xff] %v13181_v24  ;;  %17923 = vst [vmem:[#allocation109_spill] sm:$0xff] %v13187_v30  ;;  %v13193_v44 = vld [vmem:[%s17095_s12 + $0x150] sm:$0xff]  ;;  %v13199_v45 = vld [vmem:[%s17095_s12 + $0x98] sm:$0xff] }
0x1640   :  { %8075 = vmatprep.subr.mxu0 %v13181_v24  ;;  %8053 = vmatpush3.msra.mxu1 %v13187_v30  ;;  %17924 = vst [vmem:[#allocation110_spill] sm:$0xff] %v13193_v44  ;;  %17925 = vst [vmem:[#allocation111_spill] sm:$0xff] %v13199_v45  ;;  %v13205_v24 = vld [vmem:[%s17095_s12 + $0x1c8] sm:$0xff]  ;;  %v13211_v30 = vld [vmem:[%s17095_s12 + $0x18] sm:$0xff] }
0x1641   :  { %8076 = vmatpush3.msra.mxu0 %v13193_v44  ;;  %8054 = vmatprep.subr.mxu1 %v13199_v45  ;;  %17926 = vst [vmem:[#allocation112_spill] sm:$0xff] %v13205_v24  ;;  %17927 = vst [vmem:[#allocation113_spill] sm:$0xff] %v13211_v30  ;;  %v13217_v44 = vld [vmem:[%s17095_s12 + $0x148] sm:$0xff]  ;;  %v13223_v45 = vld [vmem:[%s17095_s12 + $0x90] sm:$0xff] }
0x1642   :  { %8077 = vmatprep.subr.mxu0 %v13205_v24  ;;  %8055 = vmatpush3.msra.mxu1 %v13211_v30  ;;  %17928 = vst [vmem:[#allocation114_spill] sm:$0xff] %v13217_v44  ;;  %17929 = vst [vmem:[#allocation115_spill] sm:$0xff] %v13223_v45  ;;  %v13229_v24 = vld [vmem:[%s17095_s12 + $0x1c0] sm:$0xff]  ;;  %v13235_v30 = vld [vmem:[%s17095_s12 + $0x10] sm:$0xff] }
0x1643   :  { %8078 = vmatpush3.msra.mxu0 %v13217_v44  ;;  %8056 = vmatprep.subr.mxu1 %v13223_v45  ;;  %17930 = vst [vmem:[#allocation116_spill] sm:$0xff] %v13229_v24  ;;  %17931 = vst [vmem:[#allocation117_spill] sm:$0xff] %v13235_v30  ;;  %v13241_v44 = vld [vmem:[%s17095_s12 + $0x140] sm:$0xff]  ;;  %v13247_v45 = vld [vmem:[%s17095_s12 + $0x88] sm:$0xff] }
0x1644   :  { %8079 = vmatprep.subr.mxu0 %v13229_v24  ;;  %8057 = vmatpush3.msra.mxu1 %v13235_v30  ;;  %17932 = vst [vmem:[#allocation118_spill] sm:$0xff] %v13241_v44  ;;  %17933 = vst [vmem:[#allocation119_spill] sm:$0xff] %v13247_v45  ;;  %v13253_v24 = vld [vmem:[%s17095_s12 + $0x1b8] sm:$0xff]  ;;  %v13259_v30 = vld [vmem:[%s17095_s12 + $0x8] sm:$0xff] }
0x1645   :  { %8080 = vmatpush3.msra.mxu0 %v13241_v44  ;;  %8058 = vmatprep.subr.mxu1 %v13247_v45  ;;  %17934 = vst [vmem:[#allocation120_spill] sm:$0xff] %v13253_v24  ;;  %17935 = vst [vmem:[#allocation121_spill] sm:$0xff] %v13259_v30  ;;  %v13265_v44 = vld [vmem:[%s17095_s12 + $0x138] sm:$0xff]  ;;  %v13271_v45 = vld [vmem:[%s17095_s12 + $0x80] sm:$0xff] }
0x1646   :  { %8081 = vmatprep.subr.mxu0 %v13253_v24  ;;  %8059 = vmatpush3.msra.mxu1 %v13259_v30  ;;  %17936 = vst [vmem:[#allocation122_spill] sm:$0xff] %v13265_v44  ;;  %17937 = vst [vmem:[#allocation123_spill] sm:$0xff] %v13271_v45  ;;  %v13277_v24 = vld [vmem:[%s17095_s12 + $0x1b0] sm:$0xff]  ;;  %v13283_v30 = vld [vmem:[%s17095_s12] sm:$0xff] }
0x1647   :  { %8082 = vmatpush3.msra.mxu0 %v13265_v44  ;;  %8060 = vmatprep.subr.mxu1 %v13271_v45  ;;  %17938 = vst [vmem:[#allocation124_spill] sm:$0xff] %v13277_v24  ;;  %17939 = vst [vmem:[#allocation125_spill] sm:$0xff] %v13283_v30  ;;  %v13289_v44 = vld [vmem:[%s17095_s12 + $0x130] sm:$0xff]  ;;  %v13295_v45 = vld [vmem:[%s17095_s12 + $0x2f8] sm:$0xff] }
0x1648   :  { %8083 = vmatprep.subr.mxu0 %v13277_v24  ;;  %8061 = vmatpush3.msra.mxu1 %v13283_v30  ;;  %17940 = vst [vmem:[#allocation126_spill] sm:$0xff] %v13289_v44  ;;  %17941 = vst [vmem:[#allocation127_spill] sm:$0xff] %v13295_v45  ;;  %v13301_v24 = vld [vmem:[%s17095_s12 + $0x1a8] sm:$0xff] }
0x1649   :  { %8084 = vmatpush3.msra.mxu0 %v13289_v44  ;;  %8100 = vmatprep.subr.mxu1 %v13295_v45  ;;  %17942 = vst [vmem:[#allocation128_spill] sm:$0xff] %v13301_v24  ;;  %v13307_v30 = vld [vmem:[%s17095_s12 + $0x128] sm:$0xff]  ;;  %v13313_v44 = vld [vmem:[%s17095_s12 + $0x1a0] sm:$0xff] }
0x164a   :  { %8085 = vmatprep.subr.mxu0 %v13301_v24  ;;  %17943 = vst [vmem:[#allocation129_spill] sm:$0xff] %v13307_v30  ;;  %17944 = vst [vmem:[#allocation130_spill] sm:$0xff] %v13313_v44  ;;  %v13319_v45 = vld [vmem:[%s17095_s12 + $0x120] sm:$0xff]  ;;  %v13325_v24 = vld [vmem:[%s17095_s12 + $0x198] sm:$0xff] }
0x164b   :  { %8086 = vmatpush3.msra.mxu0 %v13307_v30  ;;  %17945 = vst [vmem:[#allocation131_spill] sm:$0xff] %v13319_v45  ;;  %17946 = vst [vmem:[#allocation132_spill] sm:$0xff] %v13325_v24  ;;  %v13331_v30 = vld [vmem:[%s17095_s12 + $0x118] sm:$0xff] }
0x164c   :  { %8087 = vmatprep.subr.mxu0 %v13313_v44  ;;  %17947 = vst [vmem:[#allocation133_spill] sm:$0xff] %v13331_v30  ;;  %v13337_v44 = vld [vmem:[%s17095_s12 + $0x190] sm:$0xff] }
0x164d   :  { %8088 = vmatpush3.msra.mxu0 %v13319_v45  ;;  %17948 = vst [vmem:[#allocation134_spill] sm:$0xff] %v13337_v44  ;;  %v13343_v45 = vld [vmem:[%s17095_s12 + $0x110] sm:$0xff] }
0x164e   :  { %8089 = vmatprep.subr.mxu0 %v13325_v24  ;;  %17949 = vst [vmem:[#allocation136_spill] sm:$0xff] %v13343_v45  ;;  %v13349_v24 = vld [vmem:[%s17095_s12 + $0x188] sm:$0xff] }
0x164f   :  { %8090 = vmatpush3.msra.mxu0 %v13331_v30  ;;  %17950 = vst [vmem:[#allocation137_spill] sm:$0xff] %v13349_v24  ;;  %v13355_v30 = vld [vmem:[%s17095_s12 + $0x108] sm:$0xff] }
0x1650   :  { %8091 = vmatprep.subr.mxu0 %v13337_v44  ;;  %17951 = vst [vmem:[#allocation138_spill] sm:$0xff] %v13355_v30  ;;  %v13361_v44 = vld [vmem:[%s17095_s12 + $0x180] sm:$0xff] }
0x1651   :  { %8092 = vmatpush3.msra.mxu0 %v13343_v45  ;;  %17952 = vst [vmem:[#allocation139_spill] sm:$0xff] %v13361_v44  ;;  %v13367_v45 = vld [vmem:[%s17095_s12 + $0x100] sm:$0xff] }
0x1652   :  { %8093 = vmatprep.subr.mxu0 %v13349_v24  ;;  %17953 = vst [vmem:[#allocation140_spill] sm:$0xff] %v13367_v45  ;;  %v13373_v24 = vld [vmem:[%s17095_s12 + $0x3f8] sm:$0xff] }
0x1653   :  { %8094 = vmatpush3.msra.mxu0 %v13355_v30  ;;  %17954 = vst [vmem:[#allocation141_spill] sm:$0xff] %v13373_v24 }
0x1654   :  { %8095 = vmatprep.subr.mxu0 %v13361_v44 }
0x1655   :  { %8096 = vmatpush3.msra.mxu0 %v13367_v45 }
0x1656   :  { %8135 = vmatprep.subr.mxu0 %v13373_v24  ;;  %v3334_v24 = vpop.permute.xlu1 %3333 }
0x1657   :  { %v3354_v4 = vsel %vm271_vm4, %v12871_v63, %v3334_v24 }
0x165a   :  { %v3337_v44 = vpop.permute.xlu1 %3336 }
0x165b   :  { %v3355_v32 = vsel %vm289_vm5, %v3354_v4, %v3337_v44 }
0x165e   :  { %v3343_v55 = vpop.permute.xlu1 %3342 }
0x1691   :  { %v3061_v30 = vpop.permute.xlu0 %3060 }
0x1692   :  { %v13377_v49 = vsub.f32 %v12833_v20, %v3061_v30  ;;  %v7429_v30 = vld.sshfl [vmem:[%s17086_s3] sm:$0x3 pattern:$0x76325410] }
0x1693   :  { %v3872_v20 = vld [vmem:[%s17084_s1] sm:$0x3] }
0x1694   :  { %17955 = vst [vmem:[#allocation142_spill] sm:$0xff] %v13377_v49  ;;  %3372 = vrot.lane.b32.xlu1 %v13377_v49, %s9899_s21  ;;  %3369 = vrot.lane.b32.xlu0 %v13377_v49, %s9901_s27 }
0x1695   :  { %v3352_v45 = vpop.permute.xlu0 %3351 }
0x1696   :  { %v3361_v48 = vsel %vm271_vm4, %v3352_v45, %v12871_v63  ;;  %v3349_v63 = vpop.permute.xlu1 %3348 }
0x1697   :  { %v3362_v62 = vsel %vm289_vm5, %v3361_v48, %v3334_v24 }
0x1698   :  { %3387 = vrot.lane.b32.xlu1 %v13377_v49, %s9906_s20  ;;  %3384 = vrot.lane.b32.xlu0 %v13377_v49, %s9902_s28  ;;  %v3363_v39 = vsel %vm732_vm11, %v3362_v62, %v3337_v44 }
0x1699   :  { %v3340_v28 = vpop.permute.xlu0 %3339 }
0x169a   :  { %v3364_v14 = vsel %vm734_vm12, %v3363_v39, %v3340_v28 }
0x169b   :  { %v3365_v12 = vsel %vm736_vm13, %v3364_v14, %v3343_v55 }
0x169c   :  { %3378 = vrot.lane.b32.xlu1 %v13377_v49, %s9896_s4  ;;  %3375 = vrot.lane.b32.xlu0 %v13377_v49, %s9900_s26 }
0x169d   :  { %v3346_v50 = vpop.permute.xlu0 %3345 }
0x169e   :  { %v3366_v61 = vsel %vm738_vm14, %v3365_v12, %v3346_v50 }
0x169f   :  { %v3367_v11 = vsel %vm740_vm15, %v3366_v61, %v3349_v63 }
0x16a0   :  { %3381 = vrot.lane.b32.xlu0 %v13377_v49, %s9905_s19  ;;  %3837 = vrot.lane.b32.xlu1 %v7429_v30, %s9896_s4  ;;  %v3356_v30 = vsel %vm732_vm11, %v3355_v32, %v3340_v28 }
0x16a1   :  { %v3357_v4 = vsel %vm734_vm12, %v3356_v30, %v3343_v55 }
0x16a2   :  { %v3358_v62 = vsel %vm736_vm13, %v3357_v4, %v3346_v50 }
0x16a3   :  { %v3359_v31 = vsel %vm738_vm14, %v3358_v62, %v3349_v63  ;;  %v13446_v63 = vld [vmem:[%s17095_s12 + $0x278] sm:$0xff] }
0x16a4   :  { %3876 = vrot.lane.b32.xlu0 %v3872_v20, %s9901_s27  ;;  %v3360_v4 = vsel %vm740_vm15, %v3359_v31, %v3352_v45  ;;  %17956 = vst [vmem:[#allocation143_spill] sm:$0xff] %v13446_v63 }
0x16e6   :  { %v13409_v20 = vpop.f32.mrf.mxu0  ;;  %v13411_v36 = vpop.f32.mrf.mxu1 }
0x16e7   :  { %v13416_v48 = vmul.f32 %v13411_v36, %v13409_v20  ;;  %v3411_v50 = vmul.f32 %v3360_v4, %v13409_v20 }
0x16e8   :  { %v13418_v16 = vpop.f32.mrf.mxu0  ;;  %v13420_v24 = vpop.f32.mrf.mxu1 }
0x16e9   :  { %v3412_v14 = vmul.f32 %v3360_v4, %v13418_v16 }
0x16ea   :  { %v3206_v32 = vpop.f32.mrf.mxu0  ;;  %v3288_v44 = vpop.f32.mrf.mxu1 }
0x16ec   :  { %v3207_v39 = vpop.f32.mrf.mxu0  ;;  %v3289_v28 = vpop.f32.mrf.mxu1 }
0x16ee   :  { %v13427_v7 = vpop.f32.mrf.mxu0 }
0x16ef   :  { %v3465_v30 = vmul.f32 %v13411_v36, %v13427_v7  ;;  %v3413_v32 = vmul.f32 %v3367_v11, %v13427_v7 }
0x16f0   :  { %v13434_v44 = vpop.f32.mrf.mxu0 }
0x16f1   :  { %v3414_v12 = vmul.f32 %v3367_v11, %v13434_v44  ;;  %v3415_v28 = vadd.f32 %v3413_v32, %v3411_v50  ;;  %v13458_v32 = vld [vmem:[%s17095_s12 + $0x2f0] sm:$0xff] }
0x16f2   :  { %v3247_v55 = vpop.f32.mrf.mxu0  ;;  %17957 = vst [vmem:[#allocation144_spill] sm:$0xff] %v13458_v32 }
0x16f3   :  { %v3416_v62 = vadd.f32 %v3414_v12, %v3412_v14  ;;  %v13467_v55 = vld [vmem:[%s17095_s12 + $0x270] sm:$0xff] }
0x16f4   :  { %v3248_v39 = vpop.f32.mrf.mxu0  ;;  %17958 = vst [vmem:[#allocation145_spill] sm:$0xff] %v13467_v55 }
0x16f5   :  { %3543 = vmatprep.mubr.f32.mxu1 %v3416_v62  ;;  %v3418_v39 = vmul.f32 %v3360_v4, %v13420_v24 }
0x16f6   :  { %v13439_v61 = vpop.f32.mrf.mxu0  ;;  %3544 = vmatmul.mubr.f32.vlgmr.msra.gmra.mxu1 %v3415_v28 }
0x16f7   :  { %v3463_v31 = vmul.f32 %v13439_v61, %v13409_v20  ;;  %8101 = vmatpush3.msra.mxu1 %v13446_v63  ;;  %v13451_v45 = vmul.f32 %v13439_v61, %v13427_v7  ;;  %v3419_v12 = vmul.f32 %v3367_v11, %v13439_v61 }
0x16f8   :  { %v13453_v14 = vpop.f32.mrf.mxu0  ;;  %8102 = vmatprep.subr.mxu1 %v13458_v32  ;;  %v13475_v32 = vld [vmem:[%s17095_s12 + $0x2e8] sm:$0xff] }
0x16f9   :  { %v13462_v50 = vadd.f32 %v3465_v30, %v3463_v31  ;;  %8103 = vmatpush3.msra.mxu1 %v13467_v55  ;;  %v3420_v28 = vmul.f32 %v3367_v11, %v13453_v14  ;;  %17959 = vst [vmem:[#allocation146_spill] sm:$0xff] %v13475_v32  ;;  %v3417_v30 = vmul.f32 %v3360_v4, %v13411_v36  ;;  %v13482_v31 = vld [vmem:[%s17095_s12 + $0x268] sm:$0xff]  ;;  %v13488_v11 = vld [vmem:[%s17095_s12 + $0x2e0] sm:$0xff] }
0x16fa   :  { %v3329_v62 = vpop.f32.mrf.mxu0  ;;  %8104 = vmatprep.subr.mxu1 %v13475_v32  ;;  %17960 = vst [vmem:[#allocation147_spill] sm:$0xff] %v13482_v31  ;;  %17961 = vst [vmem:[#allocation148_spill] sm:$0xff] %v13488_v11  ;;  %v13494_v4 = vld [vmem:[%s17095_s12 + $0x260] sm:$0xff] }
0x16fb   :  { %8105 = vmatpush3.msra.mxu1 %v13482_v31  ;;  %v3422_v55 = vadd.f32 %v3420_v28, %v3418_v39  ;;  %v3421_v63 = vadd.f32 %v3419_v12, %v3417_v30  ;;  %17962 = vst [vmem:[#allocation149_spill] sm:$0xff] %v13494_v4  ;;  %v13500_v39 = vld [vmem:[%s17095_s12 + $0x2d8] sm:$0xff]  ;;  %v13552_v30 = vmul.f32 %v13409_v20, %v13409_v20 }
0x16fc   :  { %v3330_v62 = vpop.f32.mrf.mxu0  ;;  %8106 = vmatprep.subr.mxu1 %v13488_v11  ;;  %17963 = vst [vmem:[#allocation150_spill] sm:$0xff] %v13500_v39  ;;  %v13506_v12 = vld [vmem:[%s17095_s12 + $0x258] sm:$0xff] }
0x16fd   :  { %8107 = vmatpush3.msra.mxu1 %v13494_v4  ;;  %3613 = vmatprep.mubr.f32.mxu0 %v3422_v55  ;;  %17964 = vst [vmem:[#allocation151_spill] sm:$0xff] %v13506_v12  ;;  %v13513_v55 = vld [vmem:[%s17095_s12 + $0x2d0] sm:$0xff]  ;;  %v17971_v62 = vld [vmem:[#allocation19_spill] sm:$0xff]  ;;  %v17978_v4 = vld [vmem:[#allocation33_spill] sm:$0xff] }
0x16fe   :  { %8108 = vmatprep.subr.mxu1 %v13500_v39  ;;  %3614 = vmatmul.mubr.f32.vlgmr.msra.gmra.mxu0 %v3421_v63  ;;  %17965 = vst [vmem:[#allocation152_spill] sm:$0xff] %v13513_v55  ;;  %v13520_v63 = vld [vmem:[%s17095_s12 + $0x250] sm:$0xff]  ;;  %v17979_v11 = vld [vmem:[#allocation35_spill] sm:$0xff] }
0x16ff   :  { %8109 = vmatpush3.msra.mxu1 %v13506_v12  ;;  %8136 = vmatpush3.msra.mxu0 %v12251_v41  ;;  %17966 = vst [vmem:[#allocation153_spill] sm:$0xff] %v13520_v63  ;;  %v13527_v41 = vld [vmem:[%s17095_s12 + $0x2c8] sm:$0xff]  ;;  %v17981_v31 = vld [vmem:[#allocation39_spill] sm:$0xff] }
0x1700   :  { %8110 = vmatprep.subr.mxu1 %v13513_v55  ;;  %8137 = vmatprep.subr.mxu0 %v12258_v9  ;;  %17967 = vst [vmem:[#allocation154_spill] sm:$0xff] %v13527_v41  ;;  %v13534_v9 = vld [vmem:[%s17095_s12 + $0x248] sm:$0xff] }
0x1701   :  { %8111 = vmatpush3.msra.mxu1 %v13520_v63  ;;  %8138 = vmatpush3.msra.mxu0 %v12265_v38  ;;  %17968 = vst [vmem:[#allocation155_spill] sm:$0xff] %v13534_v9  ;;  %v13541_v38 = vld [vmem:[%s17095_s12 + $0x2c0] sm:$0xff]  ;;  %v17976_v55 = vld [vmem:[#allocation29_spill] sm:$0xff] }
0x1702   :  { %8112 = vmatprep.subr.mxu1 %v13527_v41  ;;  %8139 = vmatprep.subr.mxu0 %v12272_v59  ;;  %17969 = vst [vmem:[#allocation156_spill] sm:$0xff] %v13541_v38 }
0x1703   :  { %8113 = vmatpush3.msra.mxu1 %v13534_v9  ;;  %8140 = vmatpush3.msra.mxu0 %v12279_v40  ;;  %v17970_v40 = vld [vmem:[#allocation23_spill] sm:$0xff] }
0x1704   :  { %8114 = vmatprep.subr.mxu1 %v13541_v38  ;;  %8141 = vmatprep.subr.mxu0 %v12286_v15  ;;  %v17972_v38 = vld [vmem:[#allocation24_spill] sm:$0xff]  ;;  %v13558_v15 = vmul.f32 %v13411_v36, %v13411_v36  ;;  %v17975_v9 = vld [vmem:[#allocation27_spill] sm:$0xff] }
0x1705   :  { %8115 = vmatpush3.msra.mxu1 %v12292_v22  ;;  %8142 = vmatpush3.msra.mxu0 %v12310_v37  ;;  %v13562_v22 = vmul.f32 %v13418_v16, %v13418_v16  ;;  %v13566_v37 = vmul.f32 %v13420_v24, %v13420_v24 }
0x1706   :  { %v3373_v59 = vpop.permute.xlu1 %3372  ;;  %v3370_v28 = vpop.permute.xlu0 %3369  ;;  %8116 = vmatprep.subr.mxu1 %v12316_v52  ;;  %8143 = vmatprep.subr.mxu0 %v12334_v6  ;;  %v17973_v52 = vld [vmem:[#allocation20_spill] sm:$0xff]  ;;  %v17974_v6 = vld [vmem:[#allocation25_spill] sm:$0xff] }
0x1707   :  { %8117 = vmatpush3.msra.mxu1 %v17970_v40  ;;  %8144 = vmatpush3.msra.mxu0 %v17971_v62  ;;  %v13572_v40 = vmul.f32 %v13420_v24, %v13418_v16  ;;  %v13578_v62 = vmul.f32 %v13427_v7, %v13427_v7 }
0x1708   :  { %8118 = vmatprep.subr.mxu1 %v17972_v38  ;;  %8145 = vmatprep.subr.mxu0 %v17973_v52  ;;  %v3427_v38 = vmul.f32 %v13427_v7, %v13409_v20  ;;  %v3390_v52 = vsel %vm271_vm4, %v3370_v28, %v3373_v59  ;;  %v3428_v7 = vmul.f32 %v13434_v44, %v13418_v16 }
0x1709   :  { %8119 = vmatpush3.msra.mxu1 %v17974_v6  ;;  %8146 = vmatpush3.msra.mxu0 %v17975_v9  ;;  %v17977_v6 = vld [vmem:[#allocation31_spill] sm:$0xff] }
0x170a   :  { %v3388_v41 = vpop.permute.xlu1 %3387  ;;  %v3385_v63 = vpop.permute.xlu0 %3384  ;;  %8120 = vmatprep.subr.mxu1 %v17976_v55  ;;  %8147 = vmatprep.subr.mxu0 %v17977_v6  ;;  %v17980_v55 = vld [vmem:[#allocation37_spill] sm:$0xff]  ;;  %v3466_v6 = vmul.f32 %v13420_v24, %v13434_v44 }
0x170b   :  { %v3397_v12 = vsel %vm271_vm4, %v3388_v41, %v3370_v28  ;;  %v3404_v39 = vsel %vm271_vm4, %v3385_v63, %v3388_v41  ;;  %8121 = vmatpush3.msra.mxu1 %v17978_v4  ;;  %8148 = vmatpush3.msra.mxu0 %v17979_v11 }
0x170c   :  { %v3398_v20 = vsel %vm289_vm5, %v3397_v12, %v3373_v59  ;;  %v3405_v9 = vsel %vm289_vm5, %v3404_v39, %v3370_v28  ;;  %8122 = vmatprep.subr.mxu1 %v17980_v55  ;;  %8149 = vmatprep.subr.mxu0 %v17981_v31  ;;  %v3391_v39 = vsel %vm289_vm5, %v3390_v52, %v13377_v49  ;;  %v17984_v28 = vld [vmem:[#allocation51_spill] sm:$0xff]  ;;  %v17985_v55 = vld [vmem:[#allocation28_spill] sm:$0xff] }
0x170d   :  { %v3399_v32 = vsel %vm732_vm11, %v3398_v20, %v13377_v49  ;;  %v3406_v4 = vsel %vm732_vm11, %v3405_v9, %v3373_v59  ;;  %8123 = vmatpush3.msra.mxu1 %v17982_v13  ;;  %8150 = vmatpush3.msra.mxu0 %v17983_v10  ;;  %v3436_v31 = vmul.f32 %v13434_v44, %v13434_v44  ;;  %v17986_v9 = vld [vmem:[#allocation30_spill] sm:$0xff] }
0x170e   :  { %v3407_v11 = vsel %vm734_vm12, %v3406_v4, %v13377_v49  ;;  %v3376_v12 = vpop.permute.xlu0 %3375  ;;  %8124 = vmatprep.subr.mxu1 %v17984_v28  ;;  %8151 = vmatprep.subr.mxu0 %v17985_v55  ;;  %v3379_v20 = vpop.permute.xlu1 %3378  ;;  %v3445_v52 = vmul.f32 %v13439_v61, %v13411_v36  ;;  %v3446_v4 = vmul.f32 %v13453_v14, %v13420_v24  ;;  %v17987_v49 = vld [vmem:[#allocation32_spill] sm:$0xff] }
0x170f   :  { %v3392_v59 = vsel %vm732_vm11, %v3391_v39, %v3376_v12  ;;  %v3400_v13 = vsel %vm734_vm12, %v3399_v32, %v3376_v12  ;;  %v3408_v10 = vsel %vm736_vm13, %v3407_v11, %v3376_v12  ;;  %8125 = vmatpush3.msra.mxu1 %v17986_v9  ;;  %v3464_v28 = vmul.f32 %v13453_v14, %v13418_v16  ;;  %v17989_v11 = vld [vmem:[#allocation36_spill] sm:$0xff] }
0x1710   :  { %8152 = vmatpush3.msra.mxu0 %v17987_v49  ;;  %8126 = vmatprep.subr.mxu1 %v12500_v57  ;;  %v3453_v32 = vmul.f32 %v13439_v61, %v13439_v61  ;;  %v3454_v36 = vmul.f32 %v13453_v14, %v13453_v14  ;;  %v3474_v24 = vmul.f32 %v13453_v14, %v13434_v44  ;;  %v17988_v61 = vld [vmem:[#allocation34_spill] sm:$0xff] }
0x1711   :  { %8153 = vmatprep.subr.mxu0 %v12512_v47  ;;  %8127 = vmatpush3.msra.mxu1 %v12518_v60  ;;  %v3393_v16 = vsel %vm734_vm12, %v3392_v59, %v3379_v20  ;;  %v3401_v49 = vsel %vm736_vm13, %v3400_v13, %v3379_v20  ;;  %v3409_v57 = vsel %vm738_vm14, %v3408_v10, %v3379_v20  ;;  %v3430_v47 = vmul.f32 2.0, %v3428_v7  ;;  %v17990_v14 = vld [vmem:[#allocation38_spill] sm:$0xff]  ;;  %v17991_v20 = vld [vmem:[#allocation40_spill] sm:$0xff]  ;;  %v17992_v13 = vld [vmem:[#allocation41_spill] sm:$0xff] }
0x1712   :  { %8154 = vmatpush3.msra.mxu0 %v12527_v0  ;;  %v3382_v39 = vpop.permute.xlu0 %3381  ;;  %8128 = vmatprep.subr.mxu1 %v17988_v61  ;;  %v3448_v0 = vmul.f32 2.0, %v3446_v4  ;;  %v3468_v7 = vadd.f32 %v3466_v6, %v3464_v28  ;;  %v3429_v10 = vmul.f32 2.0, %v3427_v38  ;;  %v3447_v61 = vmul.f32 2.0, %v3445_v52  ;;  %v17995_v4 = vld [vmem:[#allocation44_spill] sm:$0xff]  ;;  %v17996_v6 = vld [vmem:[#allocation45_spill] sm:$0xff] }
0x1713   :  { %8155 = vmatprep.subr.mxu0 %v17989_v11  ;;  %v3394_v60 = vsel %vm736_vm13, %v3393_v16, %v3382_v39  ;;  %v3402_v12 = vsel %vm738_vm14, %v3401_v49, %v3382_v39  ;;  %v3410_v44 = vsel %vm740_vm15, %v3409_v57, %v3382_v39  ;;  %8129 = vmatpush3.msra.mxu1 %v17990_v14  ;;  %v17993_v16 = vld [vmem:[#allocation42_spill] sm:$0xff]  ;;  %v17994_v49 = vld [vmem:[#allocation43_spill] sm:$0xff] }
0x1714   :  { %v3395_v55 = vsel %vm738_vm14, %v3394_v60, %v3385_v63  ;;  %v3403_v59 = vsel %vm740_vm15, %v3402_v12, %v3385_v63  ;;  %8156 = vmatpush3.msra.mxu0 %v17991_v20  ;;  %8130 = vmatprep.subr.mxu1 %v17992_v13  ;;  %v3432_v57 = vmul.f32 %v3430_v47, %v3410_v44  ;;  %v18002_v13 = vld [vmem:[#allocation53_spill] sm:$0xff] }
0x1715   :  { %v3396_v9 = vsel %vm740_vm15, %v3395_v55, %v3388_v41  ;;  %8157 = vmatprep.subr.mxu0 %v17993_v16  ;;  %8131 = vmatpush3.msra.mxu1 %v17994_v49  ;;  %v3438_v39 = vmul.f32 %v3436_v31, %v3403_v59  ;;  %v3450_v60 = vmul.f32 %v3448_v0, %v3410_v44  ;;  %v18011_v16 = vld [vmem:[#allocation65_spill] sm:$0xff]  ;;  %v18012_v49 = vld [vmem:[#allocation66_spill] sm:$0xff] }
0x1716   :  { %8158 = vmatpush3.msra.mxu0 %v17995_v4  ;;  %v3426_v11 = vmul.f32 %v13562_v22, %v3396_v9  ;;  %v3444_v63 = vmul.f32 %v13566_v37, %v3396_v9  ;;  %8170 = vmatprep.subr.mxu1 %v12590_v56  ;;  %v3456_v38 = vmul.f32 %v3454_v36, %v3403_v59  ;;  %v18016_v4 = vld [vmem:[#allocation10_spill] sm:$0xff] }
0x1717   :  { %8159 = vmatprep.subr.mxu0 %v17996_v6  ;;  %v3425_v41 = vmul.f32 %v13552_v30, %v3396_v9  ;;  %v3431_v28 = vmul.f32 %v3429_v10, %v3410_v44  ;;  %v3443_v12 = vmul.f32 %v13558_v15, %v3396_v9  ;;  %v3437_v47 = vmul.f32 %v13578_v62, %v3403_v59  ;;  %v18009_v10 = vld [vmem:[#allocation63_spill] sm:$0xff] }
0x1718   :  { %8160 = vmatpush3.msra.mxu0 %v12607_v46  ;;  %v3434_v31 = vadd.f32 %v3432_v57, %v3426_v11  ;;  %v3452_v52 = vadd.f32 %v3450_v60, %v3444_v63  ;;  %v3449_v22 = vmul.f32 %v3447_v61, %v3410_v44  ;;  %v3455_v14 = vmul.f32 %v3453_v32, %v3403_v59  ;;  %v18013_v57 = vld [vmem:[#allocation67_spill] sm:$0xff]  ;;  %v18015_v61 = vld [vmem:[#allocation9_spill] sm:$0xff] }
0x1719   :  { %8161 = vmatprep.subr.mxu0 %v12618_v34  ;;  %v3433_v37 = vadd.f32 %v3431_v28, %v3425_v41  ;;  %v3462_v56 = vmul.f32 %v13572_v40, %v3396_v9  ;;  %v3470_v0 = vmul.f32 %v3468_v7, %v3410_v44  ;;  %v3461_v15 = vmul.f32 %v13416_v48, %v3396_v9  ;;  %v18008_v7 = vld [vmem:[#allocation62_spill] sm:$0xff]  ;;  %v18010_v9 = vld [vmem:[#allocation64_spill] sm:$0xff] }
0x171a   :  { %8162 = vmatpush3.msra.mxu0 %v12626_v27  ;;  %v3440_v30 = vadd.f32 %v3438_v39, %v3434_v31  ;;  %v3458_v36 = vadd.f32 %v3456_v38, %v3452_v52  ;;  %v3451_v55 = vadd.f32 %v3449_v22, %v3443_v12  ;;  %v3469_v62 = vmul.f32 %v13462_v50, %v3410_v44  ;;  %v13694_v50 = vld [vmem:[%s17095_s12 + $0x468] sm:$0xff]  ;;  %v17997_v44 = vld [vmem:[#allocation47_spill] sm:$0xff]  ;;  %v18014_v39 = vld [vmem:[#allocation8_spill] sm:$0xff] }
0x171b   :  { %8163 = vmatprep.subr.mxu0 %v12633_v23  ;;  %v3439_v46 = vadd.f32 %v3437_v47, %v3433_v37  ;;  %v3472_v20 = vadd.f32 %v3470_v0, %v3462_v56  ;;  %v3476_v32 = vmul.f32 %v3474_v24, %v3403_v59  ;;  %v3475_v40 = vmul.f32 %v13451_v45, %v3403_v59  ;;  %v13668_v23 = vld [vmem:[%s17095_s12 + $0x478] sm:$0xff]  ;;  %v13687_v45 = vld [vmem:[%s17095_s12 + $0x4e8] sm:$0xff]  ;;  %v13701_v24 = vld [vmem:[%s17095_s12 + $0x4e0] sm:$0xff] }
0x171c   :  { %8164 = vmatpush3.msra.mxu0 %v12642_v29  ;;  %3683 = vmatprep.mubr.f32.mxu1 %v3440_v30  ;;  %v3457_v34 = vadd.f32 %v3455_v14, %v3451_v55  ;;  %v3471_v27 = vadd.f32 %v3469_v62, %v3461_v15  ;;  %v17998_v59 = vld [vmem:[#allocation48_spill] sm:$0xff]  ;;  %v3838_v55 = vpop.permute.xlu1 %3837 }
0x171d   :  { %8165 = vmatprep.subr.mxu0 %v12649_v26  ;;  %3753 = vmatprep.mubr.f32.mxu0 %v3458_v36  ;;  %v3478_v48 = vadd.f32 %v3476_v32, %v3472_v20  ;;  %v13674_v26 = vld [vmem:[%s17095_s12 + $0x4f0] sm:$0xff] }
0x171e   :  { %8166 = vmatpush3.msra.mxu0 %v12658_v33  ;;  %3684 = vmatmul.mubr.f32.vlgmr.msra.gmra.mxu1 %v3439_v46  ;;  %v3477_v29 = vadd.f32 %v3475_v40, %v3471_v27  ;;  %v13680_v33 = vld [vmem:[%s17095_s12 + $0x470] sm:$0xff]  ;;  %v3877_v46 = vpop.permute.xlu0 %3876  ;;  %v3871_v27 = vld [vmem:[%s17083_s0] sm:$0x3] }
0x171f   :  { %3754 = vmatmul.mubr.f32.vlgmr.msra.gmra.mxu0 %v3457_v34  ;;  %8171 = vmatpush3.msra.mxu1 %v13668_v23 }
0x1720   :  { %8172 = vmatprep.subr.mxu1 %v13674_v26  ;;  %3823 = vmatprep.mubr.f32.mxu1 %v3478_v48 }
0x1721   :  { %8173 = vmatpush3.msra.mxu1 %v13680_v33  ;;  %9065 = vmatprep.subr.bf16.mxu0 %v17613_v58 }
0x1722   :  { %8174 = vmatprep.subr.mxu1 %v13687_v45  ;;  %9066 = vmatpush3.bf16.msra.mxu0 %v12668_v51  ;;  %v13709_v51 = vld [vmem:[%s17095_s12 + $0x460] sm:$0xff] }
0x1723   :  { %8175 = vmatpush3.msra.mxu1 %v13694_v50  ;;  %9067 = vmatprep.subr.bf16.mxu0 %v17613_v58 }
0x1724   :  { %8176 = vmatprep.subr.mxu1 %v13701_v24  ;;  %9069 = vmatprep.mubr.msk.bf16.mxu0 %vm9898_vm2, %v17613_v58 }
0x1725   :  { %8177 = vmatpush3.msra.mxu1 %v13709_v51 }
0x1726   :  { %8178 = vmatprep.subr.mxu1 %v12679_v54  ;;  %9068 = vmatpush3.bf16.msra.mxu0 %v12691_v21  ;;  %v17999_v54 = vld [vmem:[#allocation49_spill] sm:$0xff]  ;;  %v18000_v21 = vld [vmem:[#allocation50_spill] sm:$0xff] }
0x1727   :  { %8179 = vmatpush3.msra.mxu1 %v12685_v35  ;;  %9073 = vmatprep.subr.bf16.mxu0 %v17613_v58  ;;  %v18001_v35 = vld [vmem:[#allocation52_spill] sm:$0xff] }
0x1728   :  { %8180 = vmatprep.subr.mxu1 %v12697_v43  ;;  %v18003_v43 = vld [vmem:[#allocation54_spill] sm:$0xff] }
0x1729   :  { %8181 = vmatpush3.msra.mxu1 %v12704_v53  ;;  %v18004_v53 = vld [vmem:[#allocation55_spill] sm:$0xff] }
0x172a   :  { %8182 = vmatprep.subr.mxu1 %v12710_v19  ;;  %v18005_v19 = vld [vmem:[#allocation56_spill] sm:$0xff] }
0x172b   :  { %8183 = vmatpush3.msra.mxu1 %v12716_v3  ;;  %v18006_v3 = vld [vmem:[#allocation57_spill] sm:$0xff] }
0x172c   :  { %8184 = vmatprep.subr.mxu1 %v12722_v42  ;;  %v18007_v42 = vld [vmem:[#allocation58_spill] sm:$0xff] }
0x172d   :  { %8185 = vmatpush3.msra.mxu1 %v17997_v44 }
0x172e   :  { %8186 = vmatprep.subr.mxu1 %v17998_v59 }
0x172f   :  { %8187 = vmatpush3.msra.mxu1 %v17999_v54  ;;  %v13760_v54 = vld [vmem:[%s17085_s2] sm:$0x3] }
0x1730   :  { %8188 = vmatprep.subr.mxu1 %v18000_v21 }
0x1731   :  { %8189 = vmatpush3.msra.mxu1 %v18001_v35 }
0x1732   :  { %8190 = vmatprep.subr.mxu1 %v18002_v13 }
0x1733   :  { %8191 = vmatpush3.msra.mxu1 %v18003_v43 }
0x1734   :  { %8192 = vmatprep.subr.mxu1 %v18004_v53 }
0x1735   :  { %8193 = vmatpush3.msra.mxu1 %v18005_v19 }
0x1736   :  { %8194 = vmatprep.subr.mxu1 %v18006_v3 }
0x1737   :  { %8195 = vmatpush3.msra.mxu1 %v18007_v42 }
0x1738   :  { %8196 = vmatprep.subr.mxu1 %v18008_v7 }
0x1739   :  { %8197 = vmatpush3.msra.mxu1 %v18009_v10 }
0x173a   :  { %8198 = vmatprep.subr.mxu1 %v18010_v9 }
0x173b   :  { %8199 = vmatpush3.msra.mxu1 %v18011_v16 }
0x173c   :  { %8200 = vmatprep.subr.mxu1 %v18012_v49  ;;  %v18020_v49 = vld [vmem:[#allocation71_spill] sm:$0xff] }
0x173d   :  { %8201 = vmatpush3.msra.mxu1 %v18013_v57  ;;  %v18021_v57 = vld [vmem:[#allocation72_spill] sm:$0xff] }
0x173e   :  { %3824 = vmatmul.mubr.f32.vlgmr.msra.gmra.mxu1 %v3477_v29  ;;  %4060 = vmatprep.subr.bf16.mxu1 %v18014_v39 }
0x173f   :  { %4061 = vmatpush1.bf16.msra.mxu1 %v18015_v61  ;;  %4078 = vmatprep.mubr.bf16.mxu1 %v17628_v5 }
0x1740   :  { %4101 = vmatprep.subr.bf16.mxu1 %v18016_v4 }
0x17b6   :  { %v8062_v11 = vpop.f32.mrf.mxu1 }
0x17b8   :  { %v8063_v63 = vpop.f32.mrf.mxu1 }
0x17b9   :  { %v8064_v31 = vadd.f32 %v8063_v63, %v8062_v11 }
0x17be   :  { %v8097_v60 = vpop.f32.mrf.mxu0 }
0x17c0   :  { %v8098_v38 = vpop.f32.mrf.mxu0 }
0x17c1   :  { %v8099_v28 = vadd.f32 %v8098_v38, %v8097_v60 }
0x17c3   :  { %v3616_v47 = vadd.f32 %v8099_v28, %v8064_v31  ;;  %v18025_v28 = vld [vmem:[#allocation13_spill] sm:$0xff] }
0x17de   :  { %v8132_v6 = vpop.f32.mrf.mxu1 }
0x17df   :  { %v8167_v12 = vpop.f32.mrf.mxu0 }
0x17e0   :  { %v8133_v41 = vpop.f32.mrf.mxu1 }
0x17e1   :  { %v8134_v52 = vadd.f32 %v8133_v41, %v8132_v6  ;;  %v8168_v22 = vpop.f32.mrf.mxu0 }
0x17e2   :  { %v8169_v56 = vadd.f32 %v8168_v22, %v8167_v12  ;;  %v13807_v12 = vld [vmem:[%s17095_s12 + $0xf8] sm:$0xff] }
0x17e3   :  { %v3686_v37 = vadd.f32 %v8134_v52, %v3616_v47  ;;  %v18026_v52 = vld [vmem:[#allocation75_spill] sm:$0xff] }
0x17e5   :  { %v3756_v30 = vadd.f32 %v8169_v56, %v3686_v37 }
0x17fe   :  { %v8202_v14 = vpop.f32.mrf.mxu1 }
0x1800   :  { %v8203_v0 = vpop.f32.mrf.mxu1 }
0x1801   :  { %v8204_v36 = vadd.f32 %v8203_v0, %v8202_v14 }
0x1803   :  { %v3826_v15 = vadd.f32 %v8204_v36, %v3756_v30 }
0x1805   :  { %v13743_v20 = vadd.f32 %v3826_v15, %v11077_v25  ;;  %v13745_v62 = vadd.f32 %v3838_v55, %v3826_v15 }
0x1807   :  { %18017 = vst [vmem:[#allocation23_spill] sm:$0xff] %v13743_v20  ;;  %18018 = vst [vmem:[#allocation19_spill] sm:$0xff] %v13745_v62  ;;  %v3879_v34 = vadd.f32 %v3877_v46, %v13743_v20  ;;  %3887 = vrot.lane.b32.xlu1 %v13745_v62, %s9902_s28 }
0x1809   :  { %9232 = vrcp.f32 %v3879_v34 }
0x1816   :  { %v9233_v32 = vpop.eup %9232 }
0x1817   :  { %3883 = vrot.lane.b32.xlu0 %v9233_v32, %s9896_s4  ;;  %v13765_v21 = vmul.f32 %v9233_v32, %v13743_v20 }
0x1819   :  { %v3906_v34 = vmul.f32 %v13765_v21, %v13743_v20 }
0x1879   :  { %v3888_v40 = vpop.permute.xlu1 %3887 }
0x187a   :  { %v3890_v48 = vsub.f32 %v3871_v27, %v3888_v40 }
0x187c   :  { %3892 = vrot.lane.b32.xlu1 %v3890_v48, %s9901_s27 }
0x1889   :  { %v3884_v29 = vpop.permute.xlu0 %3883 }
0x188a   :  { %v3886_v44 = vmul.f32 %v3884_v29, %v13743_v20 }
0x188c   :  { %v3896_v59 = vmul.f32 %v3890_v48, %v3886_v44  ;;  %v3907_v0 = vmul.f32 %v3886_v44, %v13743_v20 }
0x188e   :  { %3902 = vrot.lane.b32.xlu1 %v3896_v59, %s9906_s20 }
0x1892   :  { %3926 = vrot.lane.b32.xlu1 %v13760_v54, %s9906_s20 }
0x18ee   :  { %v3893_v35 = vpop.permute.xlu1 %3892 }
0x18ef   :  { %v3895_v13 = vmul.f32 %v3893_v35, %v13765_v21 }
0x18f1   :  { %3898 = vrot.lane.b32.xlu0 %v3895_v13, %s9901_s27 }
0x18f5   :  { %3923 = vrot.lane.b32.xlu0 %v13760_v54, %s9902_s28 }
0x1900   :  { %v3903_v43 = vpop.permute.xlu1 %3902 }
0x1904   :  { %v3927_v19 = vpop.permute.xlu1 %3926 }
0x1963   :  { %v3899_v53 = vpop.permute.xlu0 %3898 }
0x1964   :  { %v3905_v42 = vsel %vm271_vm4, %v3899_v53, %v3903_v43 }
0x1967   :  { %v3924_v3 = vpop.permute.xlu0 %3923 }
0x1968   :  { %v13773_v7 = vsel %vm271_vm4, %v3924_v3, %v3927_v19  ;;  %v18028_v3 = vld [vmem:[#allocation14_spill] sm:$0xff] }
0x1969   :  { %v3930_v10 = vmul.f32 %v13773_v7, %v3905_v42  ;;  %v18029_v42 = vld [vmem:[#allocation76_spill] sm:$0xff] }
0x196b   :  { %v13777_v9 = vadd.f32 %v3930_v10, %v13745_v62  ;;  %v18031_v10 = vld [vmem:[#allocation78_spill] sm:$0xff] }
0x196d   :  { %18019 = vst [vmem:[#allocation24_spill] sm:$0xff] %v13777_v9  ;;  %v3942_v16 = vpack.c.bf16 %v13777_v9, %v13777_v9 }
0x196f   :  { %9070 = vmatmul.mubr.msk.bf16.vlgmr.msra.gmra.mxu0 %vm289_vm5, %v3942_v16  ;;  %v18032_v16 = vld [vmem:[#allocation79_spill] sm:$0xff] }
0x1970   :  { %9074 = vmatpush3.bf16.msra.mxu0 %v10019_v17  ;;  %9089 = vmatprep.mubr.msk.bf16.mxu0 %vm9898_vm2, %v17613_v58 }
0x1971   :  { %9075 = vmatprep.subr.bf16.mxu0 %v17613_v58 }
0x1974   :  { %9076 = vmatpush3.bf16.msra.mxu0 %v12883_v8  ;;  %v18022_v8 = vld [vmem:[#allocation73_spill] sm:$0xff] }
0x1975   :  { %9077 = vmatprep.subr.bf16.mxu0 %v17613_v58 }
0x1978   :  { %9078 = vmatpush3.bf16.msra.mxu0 %v12890_v1  ;;  %v18023_v1 = vld [vmem:[#allocation12_spill] sm:$0xff] }
0x1979   :  { %9079 = vmatprep.subr.bf16.mxu0 %v17613_v58 }
0x197c   :  { %9080 = vmatpush3.bf16.msra.mxu0 %v12897_v2  ;;  %v18024_v2 = vld [vmem:[#allocation74_spill] sm:$0xff] }
0x197d   :  { %9081 = vmatprep.subr.bf16.mxu0 %v17613_v58 }
0x1980   :  { %9082 = vmatpush3.bf16.msra.mxu0 %v12904_v18 }
0x1981   :  { %9083 = vmatprep.subr.bf16.mxu0 %v17613_v58 }
0x1984   :  { %9084 = vmatpush3.bf16.msra.mxu0 %v18020_v49  ;;  %v18033_v49 = vld [vmem:[#allocation80_spill] sm:$0xff] }
0x1985   :  { %9085 = vmatprep.subr.bf16.mxu0 %v17613_v58 }
0x1988   :  { %9086 = vmatpush3.bf16.msra.mxu0 %v18021_v57  ;;  %v18034_v57 = vld [vmem:[#allocation81_spill] sm:$0xff] }
0x1989   :  { %9087 = vmatprep.subr.bf16.mxu0 %v17613_v58 }
0x198c   :  { %9088 = vmatpush3.bf16.msra.mxu0 %v18022_v8  ;;  %v18035_v8 = vld [vmem:[#allocation15_spill] sm:$0xff] }
0x198d   :  { %4142 = vmatprep.subr.bf16.mxu0 %v18023_v1 }
0x1a2f   :  { %v3980_v11 = vpop.f32.mrf.mxu0 }
0x1a30   :  { %v3981_v63 = vadd.f32 %v18024_v2, %v3980_v11  ;;  %v18036_v11 = vld [vmem:[#allocation82_spill] sm:$0xff]  ;;  %v18037_v2 = vld [vmem:[#allocation83_spill] sm:$0xff] }
0x1a31   :  { %v9071_v60 = vpop.f32.mrf.mxu0 }
0x1a32   :  { %9234 = vtanh.f32 %v3981_v63  ;;  %v18038_v63 = vld [vmem:[#allocation84_spill] sm:$0xff]  ;;  %v18039_v60 = vld [vmem:[#allocation85_spill] sm:$0xff] }
0x1a33   :  { %v3983_v18 = vpop.f32.mrf.mxu0 }
0x1a34   :  { %v18040_v18 = vld [vmem:[#allocation86_spill] sm:$0xff] }
0x1a35   :  { %v9072_v6 = vpop.f32.mrf.mxu0 }
0x1a36   :  { %v18041_v6 = vld [vmem:[#allocation87_spill] sm:$0xff] }
0x1a3f   :  { %v9235_v38 = vpop.eup %9234 }
0x1a40   :  { %v3987_v41 = vpack.c.bf16 %v9235_v38, %v9235_v38  ;;  %v18042_v38 = vld [vmem:[#allocation88_spill] sm:$0xff] }
0x1a42   :  { %9090 = vmatmul.mubr.msk.bf16.vlgmr.msra.gmra.mxu0 %vm419_vm6, %v3987_v41  ;;  %v18043_v41 = vld [vmem:[#allocation89_spill] sm:$0xff] }
0x1a43   :  { %4143 = vmatpush1.bf16.msra.mxu0 %v18025_v28  ;;  %4160 = vmatprep.mubr.bf16.mxu0 %v17628_v5 }
0x1a44   :  { %8217 = vmatprep.subr.mxu0 %v13807_v12 }
0x1b02   :  { %v4025_v31 = vpop.f32.mrf.mxu0 }
0x1b03   :  { %v4026_v47 = vadd.f32 %v18026_v52, %v4025_v31  ;;  %v18044_v31 = vld [vmem:[#allocation90_spill] sm:$0xff]  ;;  %v18045_v52 = vld [vmem:[#allocation91_spill] sm:$0xff] }
0x1b04   :  { %v9091_v22 = vpop.f32.mrf.mxu0 }
0x1b05   :  { %v4031_v37 = vsel %vm467_vm7, %v4026_v47, -inf  ;;  %v18047_v22 = vld [vmem:[#allocation93_spill] sm:$0xff] }
0x1b06   :  { %4032 = vmax.xlane.f32.xlu0 %v4031_v37  ;;  %v4028_v14 = vpop.f32.mrf.mxu0  ;;  %v18048_v37 = vld [vmem:[#allocation94_spill] sm:$0xff] }
0x1b07   :  { %v18049_v14 = vld [vmem:[#allocation95_spill] sm:$0xff] }
0x1b08   :  { %v9092_v56 = vpop.f32.mrf.mxu0 }
0x1b09   :  { %v18050_v56 = vld [vmem:[#allocation96_spill] sm:$0xff] }
0x1b1c   :  { %3908 = vrot.lane.b32.xlu0 %v13743_v20, %s9901_s27 }
0x1b20   :  { %3917 = vrot.lane.b32.xlu0 %v3907_v0, %s9906_s20  ;;  %v18051_v0 = vld [vmem:[#allocation97_spill] sm:$0xff] }
0x1b8f   :  { %v4033_v30 = vpop.xlane.xlu0 %4032 }
0x1b90   :  { %v4034_v36 = vsub.f32 %v4026_v47, %v4033_v30  ;;  %v18046_v47 = vld [vmem:[#allocation92_spill] sm:$0xff]  ;;  %v18052_v30 = vld [vmem:[#allocation98_spill] sm:$0xff] }
0x1b92   :  { %v4035_v55 = vmul.f32 1.442695, %v4034_v36  ;;  %v18053_v36 = vld [vmem:[#allocation99_spill] sm:$0xff] }
0x1b93   :  { %v3909_v32 = vpop.permute.xlu0 %3908 }
0x1b94   :  { %9236 = vpow2.f32 %v4035_v55  ;;  %v3911_v44 = vmul.f32 %v3909_v32, %v13765_v21  ;;  %v18027_v21 = vld [vmem:[#allocation11_spill] sm:$0xff]  ;;  %v18054_v55 = vld [vmem:[#allocation100_spill] sm:$0xff] }
0x1b95   :  { %v18058_v32 = vld [vmem:[#allocation104_spill] sm:$0xff] }
0x1b97   :  { %v3918_v48 = vpop.permute.xlu0 %3917 }
0x1ba1   :  { %v9237_v15 = vpop.eup %9236 }
0x1ba2   :  { %v4037_v46 = vsel %vm467_vm7, %v9237_v15, 0.0 }
0x1ba3   :  { %4038 = vadd.xlane.f32.xlu1 %v4037_v46  ;;  %v18056_v46 = vld [vmem:[#allocation102_spill] sm:$0xff] }
0x1bb4   :  { %3913 = vrot.lane.b32.xlu1 %v3906_v34, %s9901_s27  ;;  %v18057_v34 = vld [vmem:[#allocation103_spill] sm:$0xff] }
0x1bb8   :  { %3932 = vrot.lane.b32.xlu1 %v13760_v54, %s9901_s27 }
0x1bbc   :  { %4211 = vrot.lane.b32.xlu1 %v13777_v9, %s9900_s26 }
0x1bc0   :  { %4214 = vrot.lane.b32.xlu1 %v13777_v9, %s9896_s4 }
0x1bc4   :  { %4220 = vrot.lane.b32.xlu1 %v13777_v9, %s9902_s28 }
0x1bc8   :  { %4226 = vrot.lane.b32.xlu1 %v13777_v9, %s9901_s27 }
0x1c2c   :  { %v4039_v27 = vpop.xlane.xlu1 %4038 }
0x1c2d   :  { %9238 = vrcp.f32 %v4039_v27  ;;  %v18059_v27 = vld [vmem:[#allocation105_spill] sm:$0xff] }
0x1c30   :  { %v3914_v40 = vpop.permute.xlu1 %3913 }
0x1c31   :  { %v3920_v29 = vsel %vm271_vm4, %v3914_v40, %v3918_v48  ;;  %v18060_v40 = vld [vmem:[#allocation106_spill] sm:$0xff]  ;;  %v18061_v48 = vld [vmem:[#allocation107_spill] sm:$0xff] }
0x1c32   :  { %v3921_v54 = vsel %vm289_vm5, %v3920_v29, %v3911_v44  ;;  %v18062_v29 = vld [vmem:[#allocation108_spill] sm:$0xff]  ;;  %v18063_v44 = vld [vmem:[#allocation109_spill] sm:$0xff] }
0x1c34   :  { %v3933_v59 = vpop.permute.xlu1 %3932 }
0x1c35   :  { %v3935_v35 = vsel %vm289_vm5, %v13773_v7, %v3933_v59  ;;  %v18030_v7 = vld [vmem:[#allocation77_spill] sm:$0xff]  ;;  %v18064_v59 = vld [vmem:[#allocation110_spill] sm:$0xff] }
0x1c36   :  { %v3936_v13 = vmul.f32 %v3935_v35, %v3921_v54  ;;  %v18065_v54 = vld [vmem:[#allocation111_spill] sm:$0xff]  ;;  %v18066_v35 = vld [vmem:[#allocation112_spill] sm:$0xff] }
0x1c38   :  { %3938 = vrot.lane.b32.xlu0 %v3936_v13, %s9896_s4  ;;  %v18067_v13 = vld [vmem:[#allocation113_spill] sm:$0xff] }
0x1c3a   :  { %v9239_v43 = vpop.eup %9238 }
0x1c3b   :  { %v4041_v53 = vmul.f32 %v9239_v43, %v9237_v15  ;;  %v18055_v15 = vld [vmem:[#allocation101_spill] sm:$0xff]  ;;  %v18068_v43 = vld [vmem:[#allocation114_spill] sm:$0xff] }
0x1c3c   :  { %4229 = vrot.lane.b32.xlu0 %v13777_v9, %s9899_s21 }
0x1c3d   :  { %v4042_v19 = vpack.c.bf16 %v4041_v53, %v4041_v53  ;;  %v18069_v53 = vld [vmem:[#allocation115_spill] sm:$0xff] }
0x1c3f   :  { %7432 = vmatmul.mubr.msk.bf16.vlgmr.msra.gmra.mxu1 %vm512_vm10, %v4042_v19  ;;  %7434 = vmatmul.mubr.msk.bf16.vlgmr.msra.gmra.mxu0 %vm512_vm10, %v4042_v19 }
0x1c40   :  { %4217 = vrot.lane.b32.xlu0 %v13777_v9, %s9905_s19  ;;  %4102 = vmatpush1.bf16.msra.mxu1 %v18027_v21 }
0x1c41   :  { %4119 = vmatprep.mubr.bf16.mxu1 %v17628_v5  ;;  %4183 = vmatprep.subr.bf16.mxu1 %v18028_v3 }
0x1c42   :  { %8218 = vmatpush3.msra.mxu0 %v18029_v42  ;;  %v18071_v42 = vld [vmem:[#allocation117_spill] sm:$0xff] }
0x1c43   :  { %8219 = vmatprep.subr.mxu0 %v18030_v7  ;;  %v18072_v7 = vld [vmem:[#allocation118_spill] sm:$0xff] }
0x1c44   :  { %4223 = vrot.lane.b32.xlu0 %v13777_v9, %s9906_s20  ;;  %8220 = vmatpush3.msra.mxu0 %v18031_v10  ;;  %v18073_v10 = vld [vmem:[#allocation119_spill] sm:$0xff] }
0x1c45   :  { %8221 = vmatprep.subr.mxu0 %v18032_v16  ;;  %v18074_v16 = vld [vmem:[#allocation120_spill] sm:$0xff] }
0x1c46   :  { %8222 = vmatpush3.msra.mxu0 %v18033_v49  ;;  %v18075_v49 = vld [vmem:[#allocation121_spill] sm:$0xff] }
0x1c47   :  { %7433 = vmatmul.mubr.msk.bf16.vlgmr.msra.gmra.mxu1 %vm512_vm10, %v4042_v19  ;;  %8223 = vmatprep.subr.mxu0 %v18034_v57  ;;  %v18076_v57 = vld [vmem:[#allocation122_spill] sm:$0xff] }
0x1c48   :  { %4184 = vmatpush1.bf16.msra.mxu1 %v18035_v8  ;;  %4201 = vmatprep.mubr.bf16.mxu1 %v17628_v5 }
0x1c49   :  { %8224 = vmatpush3.msra.mxu0 %v18036_v11  ;;  %8252 = vmatprep.subr.mxu1 %v18037_v2  ;;  %v18077_v11 = vld [vmem:[#allocation123_spill] sm:$0xff]  ;;  %v18078_v2 = vld [vmem:[#allocation124_spill] sm:$0xff] }
0x1c4a   :  { %8225 = vmatprep.subr.mxu0 %v18038_v63  ;;  %v18079_v63 = vld [vmem:[#allocation125_spill] sm:$0xff] }
0x1c4b   :  { %8226 = vmatpush3.msra.mxu0 %v18039_v60  ;;  %v18080_v60 = vld [vmem:[#allocation126_spill] sm:$0xff] }
0x1c4c   :  { %8227 = vmatprep.subr.mxu0 %v18040_v18  ;;  %v18081_v18 = vld [vmem:[#allocation127_spill] sm:$0xff] }
0x1c4d   :  { %8228 = vmatpush3.msra.mxu0 %v18041_v6  ;;  %v18082_v6 = vld [vmem:[#allocation128_spill] sm:$0xff] }
0x1c4e   :  { %8229 = vmatprep.subr.mxu0 %v18042_v38  ;;  %v18083_v38 = vld [vmem:[#allocation129_spill] sm:$0xff] }
0x1c4f   :  { %7435 = vmatmul.mubr.msk.bf16.vlgmr.msra.gmra.mxu1 %vm512_vm10, %v4042_v19  ;;  %8230 = vmatpush3.msra.mxu0 %v18043_v41  ;;  %v18070_v19 = vld [vmem:[#allocation116_spill] sm:$0xff]  ;;  %v18084_v41 = vld [vmem:[#allocation130_spill] sm:$0xff] }
0x1c50   :  { %8253 = vmatpush3.msra.mxu1 %v18044_v31  ;;  %8231 = vmatprep.subr.mxu0 %v18045_v52  ;;  %v18085_v31 = vld [vmem:[#allocation131_spill] sm:$0xff]  ;;  %v18086_v52 = vld [vmem:[#allocation132_spill] sm:$0xff] }
0x1c51   :  { %8254 = vmatprep.subr.mxu1 %v18046_v47  ;;  %8232 = vmatpush3.msra.mxu0 %v18047_v22  ;;  %v18087_v47 = vld [vmem:[#allocation133_spill] sm:$0xff]  ;;  %v18088_v22 = vld [vmem:[#allocation134_spill] sm:$0xff] }
0x1c52   :  { %8255 = vmatpush3.msra.mxu1 %v18048_v37  ;;  %8233 = vmatprep.subr.mxu0 %v18049_v14  ;;  %v18089_v37 = vld [vmem:[#allocation136_spill] sm:$0xff]  ;;  %v18090_v14 = vld [vmem:[#allocation137_spill] sm:$0xff] }
0x1c53   :  { %8256 = vmatprep.subr.mxu1 %v18050_v56  ;;  %8234 = vmatpush3.msra.mxu0 %v18051_v0  ;;  %v18091_v56 = vld [vmem:[#allocation138_spill] sm:$0xff]  ;;  %v18092_v0 = vld [vmem:[#allocation139_spill] sm:$0xff] }
0x1c54   :  { %8257 = vmatpush3.msra.mxu1 %v18052_v30  ;;  %8235 = vmatprep.subr.mxu0 %v18053_v36  ;;  %v18093_v30 = vld [vmem:[#allocation140_spill] sm:$0xff]  ;;  %v18094_v36 = vld [vmem:[#allocation141_spill] sm:$0xff] }
0x1c55   :  { %8258 = vmatprep.subr.mxu1 %v18054_v55  ;;  %8236 = vmatpush3.msra.mxu0 %v18055_v15 }
0x1c56   :  { %8259 = vmatpush3.msra.mxu1 %v18056_v46  ;;  %8237 = vmatprep.subr.mxu0 %v18057_v34  ;;  %v4732_v46 = vld [vmem:[%s17084_s1] sm:$0x3]  ;;  %v4212_v34 = vpop.permute.xlu1 %4211 }
0x1c57   :  { %8260 = vmatprep.subr.mxu1 %v18058_v32  ;;  %8238 = vmatpush3.msra.mxu0 %v18059_v27 }
0x1c58   :  { %8261 = vmatpush3.msra.mxu1 %v18060_v40  ;;  %8239 = vmatprep.subr.mxu0 %v18061_v48 }
0x1c59   :  { %8262 = vmatprep.subr.mxu1 %v18062_v29  ;;  %8240 = vmatpush3.msra.mxu0 %v18063_v44  ;;  %v4232_v44 = vsel %vm271_vm4, %v13777_v9, %v4212_v34 }
0x1c5a   :  { %8263 = vmatpush3.msra.mxu1 %v18064_v59  ;;  %8241 = vmatprep.subr.mxu0 %v18065_v54  ;;  %v4215_v27 = vpop.permute.xlu1 %4214 }
0x1c5b   :  { %8264 = vmatprep.subr.mxu1 %v18066_v35  ;;  %8242 = vmatpush3.msra.mxu0 %v18067_v13  ;;  %v4233_v59 = vsel %vm289_vm5, %v4232_v44, %v4215_v27  ;;  %v18097_v44 = vld [vmem:[#allocation144_spill] sm:$0xff] }
0x1c5c   :  { %8265 = vmatpush3.msra.mxu1 %v18068_v43  ;;  %8243 = vmatprep.subr.mxu0 %v18069_v53 }
0x1c5d   :  { %8266 = vmatprep.subr.mxu1 %v18070_v19  ;;  %8244 = vmatpush3.msra.mxu0 %v18071_v42 }
0x1c5e   :  { %8267 = vmatpush3.msra.mxu1 %v18072_v7  ;;  %8245 = vmatprep.subr.mxu0 %v18073_v10  ;;  %v4221_v54 = vpop.permute.xlu1 %4220 }
0x1c5f   :  { %8268 = vmatprep.subr.mxu1 %v18074_v16  ;;  %8246 = vmatpush3.msra.mxu0 %v18075_v49 }
0x1c60   :  { %8269 = vmatpush3.msra.mxu1 %v18076_v57  ;;  %8247 = vmatprep.subr.mxu0 %v18077_v11 }
0x1c61   :  { %8270 = vmatprep.subr.mxu1 %v18078_v2  ;;  %8248 = vmatpush3.msra.mxu0 %v18079_v63 }
0x1c62   :  { %8271 = vmatpush3.msra.mxu1 %v18080_v60  ;;  %8287 = vmatprep.subr.mxu0 %v18081_v18  ;;  %v4227_v63 = vpop.permute.xlu1 %4226 }
0x1c63   :  { %8272 = vmatprep.subr.mxu1 %v18082_v6 }
0x1c64   :  { %8273 = vmatpush3.msra.mxu1 %v18083_v38 }
0x1c65   :  { %8274 = vmatprep.subr.mxu1 %v18084_v41 }
0x1c66   :  { %8275 = vmatpush3.msra.mxu1 %v18085_v31 }
0x1c67   :  { %8276 = vmatprep.subr.mxu1 %v18086_v52 }
0x1c68   :  { %8277 = vmatpush3.msra.mxu1 %v18087_v47 }
0x1c69   :  { %8278 = vmatprep.subr.mxu1 %v18088_v22 }
0x1c6a   :  { %8279 = vmatpush3.msra.mxu1 %v18089_v37 }
0x1c6b   :  { %8280 = vmatprep.subr.mxu1 %v18090_v14 }
0x1c6c   :  { %8281 = vmatpush3.msra.mxu1 %v18091_v56 }
0x1c6d   :  { %8282 = vmatprep.subr.mxu1 %v18092_v0 }
0x1c6e   :  { %8283 = vmatpush3.msra.mxu1 %v18093_v30 }
0x1c6f   :  { %8322 = vmatprep.subr.mxu1 %v18094_v36 }
0x1caa   :  { %v3939_v55 = vpop.permute.xlu0 %3938 }
0x1cab   :  { %v13917_v15 = vsub.f32 %v13743_v20, %v3939_v55  ;;  %v14154_v20 = vld [vmem:[%s17095_s12 + $0x228] sm:$0xff] }
0x1cac   :  { %18117 = vst [vmem:[#allocation39_spill] sm:$0xff] %v14154_v20 }
0x1cad   :  { %18095 = vst [vmem:[#allocation20_spill] sm:$0xff] %v13917_v15  ;;  %4250 = vrot.lane.b32.xlu1 %v13917_v15, %s9899_s21  ;;  %4247 = vrot.lane.b32.xlu0 %v13917_v15, %s9901_s27 }
0x1cae   :  { %v4230_v32 = vpop.permute.xlu0 %4229 }
0x1caf   :  { %v4239_v40 = vsel %vm271_vm4, %v4230_v32, %v13777_v9 }
0x1cb0   :  { %v4240_v29 = vsel %vm289_vm5, %v4239_v40, %v4212_v34  ;;  %v18096_v40 = vld [vmem:[#allocation143_spill] sm:$0xff] }
0x1cb1   :  { %4265 = vrot.lane.b32.xlu1 %v13917_v15, %s9906_s20  ;;  %4262 = vrot.lane.b32.xlu0 %v13917_v15, %s9902_s28  ;;  %v4241_v35 = vsel %vm732_vm11, %v4240_v29, %v4215_v27 }
0x1cb2   :  { %v4218_v48 = vpop.permute.xlu0 %4217 }
0x1cb3   :  { %v4234_v13 = vsel %vm732_vm11, %v4233_v59, %v4218_v48  ;;  %v4242_v42 = vsel %vm734_vm12, %v4241_v35, %v4218_v48  ;;  %v18098_v35 = vld [vmem:[#allocation145_spill] sm:$0xff] }
0x1cb4   :  { %v4235_v49 = vsel %vm734_vm12, %v4234_v13, %v4221_v54  ;;  %v4243_v60 = vsel %vm736_vm13, %v4242_v42, %v4221_v54 }
0x1cb5   :  { %4256 = vrot.lane.b32.xlu1 %v13917_v15, %s9896_s4  ;;  %4253 = vrot.lane.b32.xlu0 %v13917_v15, %s9900_s26 }
0x1cb6   :  { %v4224_v19 = vpop.permute.xlu0 %4223 }
0x1cb7   :  { %v4236_v57 = vsel %vm736_vm13, %v4235_v49, %v4224_v19  ;;  %v4244_v18 = vsel %vm738_vm14, %v4243_v60, %v4224_v19  ;;  %v18099_v49 = vld [vmem:[#allocation146_spill] sm:$0xff]  ;;  %v18101_v60 = vld [vmem:[#allocation148_spill] sm:$0xff] }
0x1cb8   :  { %v4237_v41 = vsel %vm738_vm14, %v4236_v57, %v4227_v63  ;;  %v4245_v52 = vsel %vm740_vm15, %v4244_v18, %v4227_v63 }
0x1cb9   :  { %4259 = vrot.lane.b32.xlu0 %v13917_v15, %s9905_s19  ;;  %4736 = vrot.lane.b32.xlu1 %v4732_v46, %s9906_s20  ;;  %v4238_v22 = vsel %vm740_vm15, %v4237_v41, %v4230_v32  ;;  %v18104_v41 = vld [vmem:[#allocation151_spill] sm:$0xff] }
0x1cff   :  { %v13945_v43 = vpop.f32.mrf.mxu1  ;;  %v13947_v53 = vpop.f32.mrf.mxu0 }
0x1d00   :  { %v13952_v7 = vmul.f32 %v13947_v53, %v13945_v43  ;;  %v4289_v30 = vmul.f32 %v4238_v22, %v13945_v43  ;;  %v4295_v57 = vmul.f32 %v4238_v22, %v13947_v53 }
0x1d01   :  { %v13954_v10 = vpop.f32.mrf.mxu1  ;;  %v13956_v16 = vpop.f32.mrf.mxu0 }
0x1d02   :  { %v4290_v56 = vmul.f32 %v4238_v22, %v13954_v10  ;;  %v4296_v19 = vmul.f32 %v4238_v22, %v13956_v16  ;;  %v14010_v22 = vld [vmem:[%s17095_s12 + $0x3f0] sm:$0xff] }
0x1d03   :  { %v4084_v11 = vpop.f32.mrf.mxu1  ;;  %v4166_v2 = vpop.f32.mrf.mxu0 }
0x1d04   :  { %v18100_v11 = vld [vmem:[#allocation147_spill] sm:$0xff] }
0x1d05   :  { %v4085_v6 = vpop.f32.mrf.mxu1  ;;  %v4167_v38 = vpop.f32.mrf.mxu0 }
0x1d06   :  { %v18102_v6 = vld [vmem:[#allocation149_spill] sm:$0xff]  ;;  %v18103_v38 = vld [vmem:[#allocation150_spill] sm:$0xff] }
0x1d07   :  { %v13963_v31 = vpop.f32.mrf.mxu1 }
0x1d08   :  { %v4343_v47 = vmul.f32 %v13947_v53, %v13963_v31  ;;  %v4291_v37 = vmul.f32 %v4245_v52, %v13963_v31 }
0x1d09   :  { %v13970_v14 = vpop.f32.mrf.mxu1 }
0x1d0a   :  { %v4292_v0 = vmul.f32 %v4245_v52, %v13970_v14  ;;  %v4293_v34 = vadd.f32 %v4291_v37, %v4289_v30  ;;  %v18106_v37 = vld [vmem:[#allocation153_spill] sm:$0xff]  ;;  %v4306_v62 = vmul.f32 %v13970_v14, %v13954_v10 }
0x1d0b   :  { %v4125_v36 = vpop.f32.mrf.mxu1  ;;  %v14024_v30 = vld [vmem:[%s17095_s12 + $0x3e8] sm:$0xff] }
0x1d0c   :  { %v4294_v55 = vadd.f32 %v4292_v0, %v4290_v56  ;;  %v14017_v56 = vld [vmem:[%s17095_s12 + $0x370] sm:$0xff]  ;;  %v18108_v36 = vld [vmem:[#allocation155_spill] sm:$0xff] }
0x1d0d   :  { %v4126_v46 = vpop.f32.mrf.mxu1  ;;  %v18107_v0 = vld [vmem:[#allocation154_spill] sm:$0xff] }
0x1d0e   :  { %4421 = vmatprep.mubr.f32.mxu0 %v4294_v55  ;;  %v14031_v55 = vld [vmem:[%s17095_s12 + $0x368] sm:$0xff]  ;;  %v18109_v46 = vld [vmem:[#allocation156_spill] sm:$0xff] }
0x1d0f   :  { %v13975_v27 = vpop.f32.mrf.mxu1  ;;  %4422 = vmatmul.mubr.f32.vlgmr.msra.gmra.mxu0 %v4293_v34  ;;  %v14038_v34 = vld [vmem:[%s17095_s12 + $0x3e0] sm:$0xff] }
0x1d10   :  { %v4341_v32 = vmul.f32 %v13975_v27, %v13945_v43  ;;  %8288 = vmatpush3.msra.mxu0 %v18096_v40  ;;  %v13982_v48 = vmul.f32 %v13975_v27, %v13963_v31  ;;  %v4297_v59 = vmul.f32 %v4245_v52, %v13975_v27  ;;  %v14050_v40 = vld [vmem:[%s17095_s12 + $0x360] sm:$0xff] }
0x1d11   :  { %v13984_v29 = vpop.f32.mrf.mxu1  ;;  %8289 = vmatprep.subr.mxu0 %v18097_v44 }
0x1d12   :  { %v13988_v54 = vadd.f32 %v4343_v47, %v4341_v32  ;;  %8290 = vmatpush3.msra.mxu0 %v18098_v35  ;;  %v4298_v42 = vmul.f32 %v4245_v52, %v13984_v29  ;;  %v4299_v18 = vadd.f32 %v4297_v59, %v4295_v57  ;;  %v14003_v52 = vld [vmem:[%s17095_s12 + $0x378] sm:$0xff]  ;;  %v18105_v47 = vld [vmem:[#allocation152_spill] sm:$0xff]  ;;  %v14084_v57 = vld [vmem:[%s17095_s12 + $0x2b0] sm:$0xff] }
0x1d13   :  { %v4207_v13 = vpop.f32.mrf.mxu1  ;;  %8291 = vmatprep.subr.mxu0 %v18099_v49  ;;  %v14044_v32 = vld [vmem:[%s17095_s12 + $0x240] sm:$0xff]  ;;  %v14056_v35 = vld [vmem:[%s17095_s12 + $0x2b8] sm:$0xff]  ;;  %18111 = vst [vmem:[#allocation27_spill] sm:$0xff] %v14084_v57 }
0x1d14   :  { %8292 = vmatpush3.msra.mxu0 %v18100_v11  ;;  %v4300_v63 = vadd.f32 %v4298_v42, %v4296_v19  ;;  %v14062_v13 = vld [vmem:[%s17095_s12 + $0x3d8] sm:$0xff]  ;;  %v14073_v42 = vmul.f32 %v13945_v43, %v13945_v43  ;;  %v14089_v11 = vmul.f32 %v13947_v53, %v13947_v53 }
0x1d15   :  { %v4208_v2 = vpop.f32.mrf.mxu1  ;;  %8293 = vmatprep.subr.mxu0 %v18101_v60  ;;  %v14068_v19 = vld [vmem:[%s17095_s12 + $0x238] sm:$0xff]  ;;  %v14102_v60 = vld [vmem:[%s17095_s12 + $0x3d0] sm:$0xff] }
0x1d16   :  { %8294 = vmatpush3.msra.mxu0 %v18102_v6  ;;  %4491 = vmatprep.mubr.f32.mxu1 %v4300_v63  ;;  %v14078_v49 = vld [vmem:[%s17095_s12 + $0x358] sm:$0xff]  ;;  %v14093_v2 = vmul.f32 %v13954_v10, %v13954_v10  ;;  %v14097_v63 = vmul.f32 %v13956_v16, %v13956_v16  ;;  %18112 = vst [vmem:[#allocation29_spill] sm:$0xff] %v14102_v60 }
0x1d17   :  { %8295 = vmatprep.subr.mxu0 %v18103_v38  ;;  %4492 = vmatmul.mubr.f32.vlgmr.msra.gmra.mxu1 %v4299_v18  ;;  %18110 = vst [vmem:[#allocation25_spill] sm:$0xff] %v14078_v49  ;;  %v14108_v18 = vld [vmem:[%s17095_s12 + $0x230] sm:$0xff]  ;;  %v14113_v6 = vmul.f32 %v13956_v16, %v13954_v10  ;;  %v14117_v38 = vmul.f32 %v13963_v31, %v13945_v43  ;;  %v14136_v43 = vld [vmem:[%s17095_s12 + $0x2a8] sm:$0xff] }
0x1d18   :  { %8296 = vmatpush3.msra.mxu0 %v18104_v41  ;;  %8323 = vmatpush3.msra.mxu1 %v14003_v52  ;;  %18113 = vst [vmem:[#allocation31_spill] sm:$0xff] %v14108_v18  ;;  %v14121_v41 = vmul.f32 %v13963_v31, %v13963_v31  ;;  %18115 = vst [vmem:[#allocation35_spill] sm:$0xff] %v14136_v43 }
0x1d19   :  { %8297 = vmatprep.subr.mxu0 %v18105_v47  ;;  %8324 = vmatprep.subr.mxu1 %v14010_v22  ;;  %v14126_v47 = vld [vmem:[%s17095_s12 + $0x350] sm:$0xff] }
0x1d1a   :  { %8298 = vmatpush3.msra.mxu0 %v18106_v37  ;;  %8325 = vmatpush3.msra.mxu1 %v14017_v56  ;;  %18114 = vst [vmem:[#allocation33_spill] sm:$0xff] %v14126_v47 }
0x1d1b   :  { %8299 = vmatprep.subr.mxu0 %v18107_v0  ;;  %8326 = vmatprep.subr.mxu1 %v14024_v30 }
0x1d1c   :  { %8300 = vmatpush3.msra.mxu0 %v18108_v36  ;;  %8327 = vmatpush3.msra.mxu1 %v14031_v55  ;;  %v14143_v36 = vld [vmem:[%s17095_s12 + $0x3c8] sm:$0xff] }
0x1d1d   :  { %8301 = vmatprep.subr.mxu0 %v18109_v46  ;;  %8328 = vmatprep.subr.mxu1 %v14038_v34  ;;  %18116 = vst [vmem:[#allocation37_spill] sm:$0xff] %v14143_v36 }
0x1d1e   :  { %8302 = vmatpush3.msra.mxu0 %v14044_v32  ;;  %8329 = vmatpush3.msra.mxu1 %v14050_v40 }
0x1d1f   :  { %v4251_v44 = vpop.permute.xlu1 %4250  ;;  %v4248_v59 = vpop.permute.xlu0 %4247  ;;  %8303 = vmatprep.subr.mxu0 %v14056_v35  ;;  %8330 = vmatprep.subr.mxu1 %v14062_v13 }
0x1d20   :  { %8304 = vmatpush3.msra.mxu0 %v14068_v19  ;;  %8331 = vmatpush3.msra.mxu1 %v14078_v49  ;;  %v4268_v31 = vsel %vm271_vm4, %v4248_v59, %v4251_v44  ;;  %v14273_v49 = vld [vmem:[%s17095_s12 + $0x288] sm:$0xff] }
0x1d21   :  { %8305 = vmatprep.subr.mxu0 %v14084_v57  ;;  %8332 = vmatprep.subr.mxu1 %v14102_v60  ;;  %v4323_v57 = vmul.f32 %v13975_v27, %v13947_v53  ;;  %v4331_v53 = vmul.f32 %v13975_v27, %v13975_v27  ;;  %v14259_v27 = vmul.f32 %v13984_v29, %v13970_v14 }
0x1d22   :  { %8306 = vmatpush3.msra.mxu0 %v14108_v18  ;;  %8333 = vmatpush3.msra.mxu1 %v14126_v47  ;;  %v14164_v47 = vld [vmem:[%s17095_s12 + $0x348] sm:$0xff]  ;;  %v14170_v18 = vld [vmem:[%s17095_s12 + $0x2a0] sm:$0xff]  ;;  %18130 = vst [vmem:[#allocation43_spill] sm:$0xff] %v14273_v49 }
0x1d23   :  { %v14129_v37 = vpop.permute.xlu1 %4265  ;;  %v14131_v0 = vpop.permute.xlu0 %4262  ;;  %8307 = vmatprep.subr.mxu0 %v14136_v43  ;;  %8334 = vmatprep.subr.mxu1 %v14143_v36  ;;  %18118 = vst [vmem:[#allocation46_spill] sm:$0xff] %v14164_v47  ;;  %18119 = vst [vmem:[#allocation26_spill] sm:$0xff] %v14170_v18 }
0x1d24   :  { %v4275_v46 = vsel %vm271_vm4, %v14129_v37, %v4248_v59  ;;  %v4282_v9 = vsel %vm271_vm4, %v14131_v0, %v14129_v37  ;;  %8308 = vmatpush3.msra.mxu0 %v14154_v20  ;;  %8335 = vmatpush3.msra.mxu1 %v14164_v47  ;;  %v4344_v20 = vmul.f32 %v13956_v16, %v13970_v14  ;;  %v14187_v47 = vld [vmem:[%s17095_s12 + $0x220] sm:$0xff] }
0x1d25   :  { %v4276_v43 = vsel %vm289_vm5, %v4275_v46, %v4251_v44  ;;  %v4283_v36 = vsel %vm289_vm5, %v4282_v9, %v4248_v59  ;;  %8309 = vmatprep.subr.mxu0 %v14170_v18  ;;  %v14178_v9 = vld [vmem:[%s17095_s12 + $0x3c0] sm:$0xff]  ;;  %18121 = vst [vmem:[#allocation28_spill] sm:$0xff] %v14187_v47 }
0x1d26   :  { %18120 = vst [vmem:[#allocation51_spill] sm:$0xff] %v14178_v9  ;;  %8336 = vmatprep.subr.mxu1 %v14178_v9  ;;  %v4277_v59 = vsel %vm732_vm11, %v4276_v43, %v13917_v15  ;;  %v4284_v46 = vsel %vm732_vm11, %v4283_v36, %v4251_v44  ;;  %8310 = vmatpush3.msra.mxu0 %v14187_v47  ;;  %v14193_v18 = vld [vmem:[%s17095_s12 + $0x340] sm:$0xff]  ;;  %v14203_v36 = vld [vmem:[%s17095_s12 + $0x298] sm:$0xff] }
0x1d27   :  { %18122 = vst [vmem:[#allocation30_spill] sm:$0xff] %v14193_v18  ;;  %8337 = vmatpush3.msra.mxu1 %v14193_v18  ;;  %v4269_v9 = vsel %vm289_vm5, %v4268_v31, %v13917_v15  ;;  %v4285_v44 = vsel %vm734_vm12, %v4284_v46, %v13917_v15  ;;  %v4254_v43 = vpop.permute.xlu0 %4253  ;;  %18123 = vst [vmem:[#allocation32_spill] sm:$0xff] %v14203_v36  ;;  %8311 = vmatprep.subr.mxu0 %v14203_v36  ;;  %v14211_v18 = vld [vmem:[%s17095_s12 + $0x3b8] sm:$0xff]  ;;  %v4257_v31 = vpop.permute.xlu1 %4256 }
0x1d28   :  { %v4314_v47 = vmul.f32 %v13970_v14, %v13970_v14  ;;  %18124 = vst [vmem:[#allocation34_spill] sm:$0xff] %v14211_v18  ;;  %8338 = vmatprep.subr.mxu1 %v14211_v18  ;;  %v4270_v46 = vsel %vm732_vm11, %v4269_v9, %v4254_v43  ;;  %v4278_v15 = vsel %vm734_vm12, %v4277_v59, %v4254_v43  ;;  %v14220_v36 = vld [vmem:[%s17095_s12 + $0x218] sm:$0xff]  ;;  %v4308_v14 = vmul.f32 2.0, %v4306_v62 }
0x1d29   :  { %v4286_v60 = vsel %vm736_vm13, %v4285_v44, %v4254_v43  ;;  %18125 = vst [vmem:[#allocation36_spill] sm:$0xff] %v14220_v36  ;;  %8312 = vmatpush3.msra.mxu0 %v14220_v36  ;;  %v4324_v18 = vmul.f32 %v13984_v29, %v13956_v16  ;;  %v4342_v9 = vmul.f32 %v13984_v29, %v13954_v10  ;;  %v14232_v59 = vld [vmem:[%s17095_s12 + $0x338] sm:$0xff]  ;;  %v14238_v44 = vld [vmem:[%s17095_s12 + $0x290] sm:$0xff] }
0x1d2a   :  { %18126 = vst [vmem:[#allocation38_spill] sm:$0xff] %v14232_v59  ;;  %8339 = vmatpush3.msra.mxu1 %v14232_v59  ;;  %18127 = vst [vmem:[#allocation40_spill] sm:$0xff] %v14238_v44  ;;  %8313 = vmatprep.subr.mxu0 %v14238_v44  ;;  %v14246_v10 = vld [vmem:[%s17095_s12 + $0x3b0] sm:$0xff]  ;;  %v4332_v43 = vmul.f32 %v13984_v29, %v13984_v29  ;;  %v4279_v59 = vsel %vm736_vm13, %v4278_v15, %v4257_v31  ;;  %v14279_v29 = vld [vmem:[%s17095_s12 + $0x3a8] sm:$0xff] }
0x1d2b   :  { %18128 = vst [vmem:[#allocation41_spill] sm:$0xff] %v14246_v10  ;;  %8340 = vmatprep.subr.mxu1 %v14246_v10  ;;  %v14252_v16 = vld [vmem:[%s17095_s12 + $0x210] sm:$0xff]  ;;  %v4271_v10 = vsel %vm734_vm12, %v4270_v46, %v4257_v31  ;;  %v4260_v36 = vpop.permute.xlu0 %4259  ;;  %18131 = vst [vmem:[#allocation44_spill] sm:$0xff] %v14279_v29  ;;  %v14288_v46 = vld [vmem:[%s17095_s12 + $0x208] sm:$0xff]  ;;  %v4326_v62 = vmul.f32 2.0, %v4324_v18  ;;  %v4346_v18 = vadd.f32 %v4344_v20, %v4342_v9 }
0x1d2c   :  { %18129 = vst [vmem:[#allocation42_spill] sm:$0xff] %v14252_v16  ;;  %8314 = vmatpush3.msra.mxu0 %v14252_v16  ;;  %v14264_v44 = vld [vmem:[%s17095_s12 + $0x330] sm:$0xff]  ;;  %v4287_v16 = vsel %vm738_vm14, %v4286_v60, %v4257_v31  ;;  %v4272_v15 = vsel %vm736_vm13, %v4271_v10, %v4260_v36  ;;  %v4280_v60 = vsel %vm738_vm14, %v4279_v59, %v4260_v36  ;;  %v14298_v59 = vld [vmem:[%s17095_s12 + $0x328] sm:$0xff]  ;;  %v4307_v10 = vmul.f32 2.0, %v14117_v38 }
0x1d2d   :  { %8341 = vmatpush3.msra.mxu1 %v14264_v44  ;;  %8315 = vmatprep.subr.mxu0 %v14273_v49  ;;  %v4288_v31 = vsel %vm740_vm15, %v4287_v16, %v4260_v36  ;;  %v4273_v49 = vsel %vm738_vm14, %v4272_v15, %v14131_v0  ;;  %18132 = vst [vmem:[#allocation45_spill] sm:$0xff] %v14298_v59  ;;  %v14304_v36 = vld [vmem:[%s17095_s12 + $0x280] sm:$0xff]  ;;  %v4325_v38 = vmul.f32 2.0, %v4323_v57  ;;  %v14339_v57 = vld [vmem:[%s17095_s12 + $0x398] sm:$0xff] }
0x1d2e   :  { %8342 = vmatprep.subr.mxu1 %v14279_v29  ;;  %8316 = vmatpush3.msra.mxu0 %v14288_v46  ;;  %v4281_v29 = vsel %vm740_vm15, %v4280_v60, %v14131_v0  ;;  %18133 = vst [vmem:[#allocation47_spill] sm:$0xff] %v14304_v36  ;;  %v4274_v0 = vsel %vm740_vm15, %v4273_v49, %v14129_v37  ;;  %v14313_v16 = vld [vmem:[%s17095_s12 + $0x3a0] sm:$0xff]  ;;  %18138 = vst [vmem:[#allocation53_spill] sm:$0xff] %v14339_v57 }
0x1d2f   :  { %8343 = vmatpush3.msra.mxu1 %v14298_v59  ;;  %8317 = vmatprep.subr.mxu0 %v14304_v36  ;;  %18134 = vst [vmem:[#allocation48_spill] sm:$0xff] %v14313_v16  ;;  %v14319_v15 = vld [vmem:[%s17095_s12 + $0x200] sm:$0xff]  ;;  %v4310_v20 = vmul.f32 %v4308_v14, %v4288_v31  ;;  %v4316_v9 = vmul.f32 %v4314_v47, %v4281_v29  ;;  %v14333_v36 = vld [vmem:[%s17095_s12 + $0x4f8] sm:$0xff] }
0x1d30   :  { %8344 = vmatprep.subr.mxu1 %v14313_v16  ;;  %18135 = vst [vmem:[#allocation49_spill] sm:$0xff] %v14319_v15  ;;  %8318 = vmatpush3.msra.mxu0 %v14319_v15  ;;  %v14325_v49 = vld [vmem:[%s17095_s12 + $0x320] sm:$0xff]  ;;  %v4304_v37 = vmul.f32 %v14093_v2, %v4274_v0  ;;  %v4322_v60 = vmul.f32 %v14097_v63, %v4274_v0  ;;  %18137 = vst [vmem:[#allocation52_spill] sm:$0xff] %v14333_v36 }
0x1d31   :  { %18136 = vst [vmem:[#allocation50_spill] sm:$0xff] %v14325_v49  ;;  %8345 = vmatpush3.msra.mxu1 %v14325_v49  ;;  %v4328_v16 = vmul.f32 %v4326_v62, %v4288_v31  ;;  %8357 = vmatprep.subr.mxu0 %v14333_v36  ;;  %v4334_v47 = vmul.f32 %v4332_v43, %v4281_v29  ;;  %v14347_v62 = vld [vmem:[%s17095_s12 + $0x318] sm:$0xff]  ;;  %v14354_v43 = vld [vmem:[%s17095_s12 + $0x390] sm:$0xff] }
0x1d32   :  { %8346 = vmatprep.subr.mxu1 %v14339_v57  ;;  %v4303_v2 = vmul.f32 %v14073_v42, %v4274_v0  ;;  %v4309_v14 = vmul.f32 %v4307_v10, %v4288_v31  ;;  %v4321_v63 = vmul.f32 %v14089_v11, %v4274_v0  ;;  %v4312_v36 = vadd.f32 %v4310_v20, %v4304_v37  ;;  %v14361_v20 = vld [vmem:[%s17095_s12 + $0x310] sm:$0xff] }
0x1d33   :  { %8347 = vmatpush3.msra.mxu1 %v14347_v62  ;;  %v4330_v49 = vadd.f32 %v4328_v16, %v4322_v60  ;;  %v4315_v15 = vmul.f32 %v14121_v41, %v4281_v29  ;;  %v4327_v59 = vmul.f32 %v4325_v38, %v4288_v31  ;;  %v4333_v11 = vmul.f32 %v4331_v53, %v4281_v29  ;;  %v14368_v60 = vld [vmem:[%s17095_s12 + $0x388] sm:$0xff] }
0x1d34   :  { %8348 = vmatprep.subr.mxu1 %v14354_v43  ;;  %v4311_v42 = vadd.f32 %v4309_v14, %v4303_v2  ;;  %v4340_v10 = vmul.f32 %v14113_v6, %v4274_v0  ;;  %v4348_v57 = vmul.f32 %v4346_v18, %v4288_v31  ;;  %v4318_v41 = vadd.f32 %v4316_v9, %v4312_v36  ;;  %v14375_v2 = vld [vmem:[%s17095_s12 + $0x308] sm:$0xff]  ;;  %v14382_v36 = vld [vmem:[%s17095_s12 + $0x380] sm:$0xff]  ;;  %v14487_v14 = vld [vmem:[%s17095_s12 + $0x430] sm:$0xff] }
0x1d35   :  { %8349 = vmatpush3.msra.mxu1 %v14361_v20  ;;  %v4336_v16 = vadd.f32 %v4334_v47, %v4330_v49  ;;  %v4329_v38 = vadd.f32 %v4327_v59, %v4321_v63  ;;  %v4339_v37 = vmul.f32 %v13952_v7, %v4274_v0  ;;  %v4347_v18 = vmul.f32 %v13988_v54, %v4288_v31  ;;  %v14389_v0 = vld [vmem:[%s17095_s12 + $0x300] sm:$0xff]  ;;  %v14469_v49 = vld [vmem:[%s17095_s12 + $0x4b8] sm:$0xff]  ;;  %v14481_v47 = vld [vmem:[%s17095_s12 + $0x4b0] sm:$0xff] }
0x1d36   :  { %8350 = vmatprep.subr.mxu1 %v14368_v60  ;;  %v4317_v6 = vadd.f32 %v4315_v15, %v4311_v42  ;;  %v4350_v53 = vadd.f32 %v4348_v57, %v4340_v10  ;;  %4561 = vmatprep.mubr.f32.mxu0 %v4318_v41  ;;  %v4354_v59 = vmul.f32 %v14259_v27, %v4281_v29  ;;  %v14463_v9 = vld [vmem:[%s17095_s12 + $0x440] sm:$0xff]  ;;  %v14475_v57 = vld [vmem:[%s17095_s12 + $0x438] sm:$0xff]  ;;  %v14493_v63 = vld [vmem:[%s17095_s12 + $0x4a8] sm:$0xff] }
0x1d37   :  { %8351 = vmatpush3.msra.mxu1 %v14375_v2  ;;  %v4335_v7 = vadd.f32 %v4333_v11, %v4329_v38  ;;  %4631 = vmatprep.mubr.f32.mxu1 %v4336_v16  ;;  %v4349_v54 = vadd.f32 %v4347_v18, %v4339_v37  ;;  %v4353_v31 = vmul.f32 %v13982_v48, %v4281_v29  ;;  %v14402_v48 = vld [vmem:[%s17090_s7 + $0x8] sm:$0xff]   ;;  %v14457_v29 = vld [vmem:[%s17095_s12 + $0x4c0] sm:$0xff]  ;;  %v14517_v41 = vld [vmem:[%s17095_s12 + $0x498] sm:$0xff] }
0x1d38   :  { %8352 = vmatprep.subr.mxu1 %v14382_v36  ;;  %4562 = vmatmul.mubr.f32.vlgmr.msra.gmra.mxu0 %v4317_v6  ;;  %v4356_v27 = vadd.f32 %v4354_v59, %v4350_v53  ;;  %18139 = vst [vmem:[#allocation54_spill] sm:$0xff] %v14481_v47  ;;  %18140 = vst [vmem:[#allocation55_spill] sm:$0xff] %v14487_v14  ;;  %v14499_v42 = vld [vmem:[%s17095_s12 + $0x428] sm:$0xff]  ;;  %v14505_v11 = vld [vmem:[%s17095_s12 + $0x4a0] sm:$0xff] }
0x1d39   :  { %8353 = vmatpush3.msra.mxu1 %v14389_v0  ;;  %8358 = vmatpush3.msra.mxu0 %v13668_v23  ;;  %v14393_v15 = vadd.f32 %v4353_v31, %v4349_v54  ;;  %v14414_v23 = vld [vmem:[%s17095_s12 + $0x4d8] sm:$0xff]  ;;  %18141 = vst [vmem:[#allocation56_spill] sm:$0xff] %v14493_v63  ;;  %18142 = vst [vmem:[#allocation57_spill] sm:$0xff] %v14499_v42  ;;  %v14511_v10 = vld [vmem:[%s17095_s12 + $0x420] sm:$0xff] }
0x1d3a   :  { %4632 = vmatmul.mubr.f32.vlgmr.msra.gmra.mxu1 %v4335_v7  ;;  %8359 = vmatprep.subr.mxu0 %v13674_v26  ;;  %v14420_v26 = vld [vmem:[%s17090_s7] sm:$0xff]   ;;  %18143 = vst [vmem:[#allocation58_spill] sm:$0xff] %v14505_v11  ;;  %18144 = vst [vmem:[#allocation62_spill] sm:$0xff] %v14511_v10  ;;  %v14523_v16 = vld [vmem:[%s17095_s12 + $0x418] sm:$0xff] }
0x1d3b   :  { %4701 = vmatprep.mubr.f32.mxu0 %v4356_v27  ;;  %8360 = vmatpush3.msra.mxu0 %v13680_v33  ;;  %v14426_v33 = vld [vmem:[%s17095_s12 + $0x458] sm:$0xff]  ;;  %18145 = vst [vmem:[#allocation63_spill] sm:$0xff] %v14517_v41  ;;  %18146 = vst [vmem:[#allocation64_spill] sm:$0xff] %v14523_v16  ;;  %v14529_v38 = vld [vmem:[%s17095_s12 + $0x490] sm:$0xff] }
0x1d3c   :  { %9093 = vmatprep.subr.bf16.mxu1 %v17613_v58  ;;  %8361 = vmatprep.subr.mxu0 %v13687_v45  ;;  %v14433_v45 = vld [vmem:[%s17095_s12 + $0x4d0] sm:$0xff]  ;;  %18147 = vst [vmem:[#allocation65_spill] sm:$0xff] %v14529_v38  ;;  %v14541_v6 = vld [vmem:[%s17095_s12 + $0x488] sm:$0xff]  ;;  %v14553_v18 = vld [vmem:[%s17095_s12 + $0x480] sm:$0xff] }
0x1d3d   :  { %9094 = vmatpush3.bf16.msra.mxu1 %v14402_v48  ;;  %8362 = vmatpush3.msra.mxu0 %v13694_v50  ;;  %v14439_v50 = vld [vmem:[%s17095_s12 + $0x450] sm:$0xff]  ;;  %18149 = vst [vmem:[#allocation67_spill] sm:$0xff] %v14541_v6  ;;  %v14547_v53 = vld [vmem:[%s17095_s12 + $0x408] sm:$0xff]  ;;  %18151 = vst [vmem:[#allocation72_spill] sm:$0xff] %v14553_v18 }
0x1d3e   :  { %9095 = vmatprep.subr.bf16.mxu1 %v17613_v58  ;;  %8363 = vmatprep.subr.mxu0 %v13701_v24  ;;  %v14445_v24 = vld [vmem:[%s17095_s12 + $0x4c8] sm:$0xff]  ;;  %v14535_v37 = vld [vmem:[%s17095_s12 + $0x410] sm:$0xff]  ;;  %18150 = vst [vmem:[#allocation71_spill] sm:$0xff] %v14547_v53  ;;  %v14559_v7 = vld [vmem:[%s17095_s12 + $0x400] sm:$0xff] }
0x1d3f   :  { %9097 = vmatprep.mubr.msk.bf16.mxu1 %vm9898_vm2, %v17613_v58  ;;  %8364 = vmatpush3.msra.mxu0 %v13709_v51  ;;  %v14451_v51 = vld [vmem:[%s17095_s12 + $0x448] sm:$0xff]  ;;  %18148 = vst [vmem:[#allocation66_spill] sm:$0xff] %v14535_v37  ;;  %18152 = vst [vmem:[#allocation73_spill] sm:$0xff] %v14559_v7 }
0x1d40   :  { %8365 = vmatprep.subr.mxu0 %v14414_v23 }
0x1d41   :  { %9096 = vmatpush3.bf16.msra.mxu1 %v14420_v26  ;;  %8366 = vmatpush3.msra.mxu0 %v14426_v33 }
0x1d42   :  { %9101 = vmatprep.subr.bf16.mxu1 %v17613_v58  ;;  %8367 = vmatprep.subr.mxu0 %v14433_v45 }
0x1d43   :  { %8368 = vmatpush3.msra.mxu0 %v14439_v50 }
0x1d44   :  { %8369 = vmatprep.subr.mxu0 %v14445_v24 }
0x1d45   :  { %8370 = vmatpush3.msra.mxu0 %v14451_v51 }
0x1d46   :  { %8371 = vmatprep.subr.mxu0 %v14457_v29 }
0x1d47   :  { %8372 = vmatpush3.msra.mxu0 %v14463_v9 }
0x1d48   :  { %8373 = vmatprep.subr.mxu0 %v14469_v49 }
0x1d49   :  { %8374 = vmatpush3.msra.mxu0 %v14475_v57 }
0x1d4a   :  { %8375 = vmatprep.subr.mxu0 %v14481_v47 }
0x1d4b   :  { %8376 = vmatpush3.msra.mxu0 %v14487_v14  ;;  %v4737_v14 = vpop.permute.xlu1 %4736 }
0x1d4c   :  { %8377 = vmatprep.subr.mxu0 %v14493_v63 }
0x1d4d   :  { %8378 = vmatpush3.msra.mxu0 %v14499_v42 }
0x1d4e   :  { %8379 = vmatprep.subr.mxu0 %v14505_v11 }
0x1d4f   :  { %8380 = vmatpush3.msra.mxu0 %v14511_v10 }
0x1d50   :  { %8381 = vmatprep.subr.mxu0 %v14517_v41 }
0x1d51   :  { %8382 = vmatpush3.msra.mxu0 %v14523_v16 }
0x1d52   :  { %8383 = vmatprep.subr.mxu0 %v14529_v38 }
0x1d53   :  { %8384 = vmatpush3.msra.mxu0 %v14535_v37 }
0x1d54   :  { %8385 = vmatprep.subr.mxu0 %v14541_v6 }
0x1d55   :  { %8386 = vmatpush3.msra.mxu0 %v14547_v53 }
0x1d56   :  { %8387 = vmatprep.subr.mxu0 %v14553_v18 }
0x1d57   :  { %8388 = vmatpush3.msra.mxu0 %v14559_v7 }
0x1d58   :  { %4702 = vmatmul.mubr.f32.vlgmr.msra.gmra.mxu0 %v14393_v15  ;;  %4920 = vmatprep.subr.bf16.mxu0 %v18014_v39 }
0x1d59   :  { %4921 = vmatpush1.bf16.msra.mxu0 %v18015_v61  ;;  %4938 = vmatprep.mubr.bf16.mxu0 %v17628_v5 }
0x1d5a   :  { %4961 = vmatprep.subr.bf16.mxu0 %v18016_v4  ;;  %v3874_v4 = vld [vmem:[%s17086_s3 + $0x2] sm:$0x3] }
0x1dcf   :  { %v8249_v59 = vpop.f32.mrf.mxu0 }
0x1dd1   :  { %v8250_v54 = vpop.f32.mrf.mxu0 }
0x1dd2   :  { %v8251_v38 = vadd.f32 %v8250_v54, %v8249_v59 }
0x1dd7   :  { %v8284_v31 = vpop.f32.mrf.mxu1 }
0x1dd9   :  { %v8285_v18 = vpop.f32.mrf.mxu1 }
0x1dda   :  { %v8286_v6 = vadd.f32 %v8285_v18, %v8284_v31 }
0x1ddc   :  { %v4494_v16 = vadd.f32 %v8286_v6, %v8251_v38 }
0x1df8   :  { %v8319_v27 = vpop.f32.mrf.mxu0 }
0x1dfa   :  { %v8320_v53 = vpop.f32.mrf.mxu0  ;;  %v8354_v37 = vpop.f32.mrf.mxu1 }
0x1dfb   :  { %v8321_v7 = vadd.f32 %v8320_v53, %v8319_v27 }
0x1dfc   :  { %v8355_v15 = vpop.f32.mrf.mxu1 }
0x1dfd   :  { %v4564_v41 = vadd.f32 %v8321_v7, %v4494_v16  ;;  %v8356_v10 = vadd.f32 %v8355_v15, %v8354_v37  ;;  %v14597_v37 = vld [vmem:[%s17085_s2] sm:$0x3] }
0x1dff   :  { %v4634_v11 = vadd.f32 %v8356_v10, %v4564_v41 }
0x1e18   :  { %v8389_v39 = vpop.f32.mrf.mxu0 }
0x1e1a   :  { %v8390_v61 = vpop.f32.mrf.mxu0 }
0x1e1b   :  { %v8391_v42 = vadd.f32 %v8390_v61, %v8389_v39  ;;  %v4731_v39 = vld [vmem:[%s17083_s0] sm:$0x3] }
0x1e1d   :  { %v4704_v63 = vadd.f32 %v8391_v42, %v4634_v11 }
0x1e1f   :  { %v4707_v47 = vadd.f32 %v4704_v63, %v3874_v4  ;;  %v14571_v18 = vadd.f32 %v4704_v63, %v11077_v25 }
0x1e21   :  { %18153 = vst [vmem:[#allocation74_spill] sm:$0xff] %v14571_v18  ;;  %v4739_v53 = vadd.f32 %v4737_v14, %v14571_v18  ;;  %4710 = vrot.lane.b32.xlu0 %v4707_v47, %s9906_s20 }
0x1e23   :  { %9240 = vrcp.f32 %v4739_v53 }
0x1e30   :  { %v9241_v16 = vpop.eup %9240 }
0x1e31   :  { %4743 = vrot.lane.b32.xlu1 %v9241_v16, %s9896_s4  ;;  %v14588_v63 = vmul.f32 %v9241_v16, %v14571_v18 }
0x1e93   :  { %v14579_v61 = vpop.permute.xlu0 %4710 }
0x1e94   :  { %18154 = vst [vmem:[#allocation75_spill] sm:$0xff] %v14579_v61  ;;  %v4747_v42 = vsub.f32 %v4731_v39, %v14579_v61  ;;  %v14620_v39 = vld [vmem:[%s17092_s9 + $0x30] sm:$0xff]  }
0x1e96   :  { %4753 = vrot.lane.b32.xlu1 %v4747_v42, %s9899_s21  ;;  %4749 = vrot.lane.b32.xlu0 %v4747_v42, %s9906_s20  ;;  %v14634_v42 = vld [vmem:[%s17092_s9 + $0x20] sm:$0xff]  }
0x1e97   :  { %18156 = vst [vmem:[#allocation77_spill] sm:$0xff] %v14634_v42 }
0x1ea3   :  { %v4744_v4 = vpop.permute.xlu1 %4743 }
0x1ea4   :  { %v14585_v14 = vmul.f32 %v4744_v4, %v14571_v18  ;;  %v14641_v4 = vld [vmem:[%s17092_s9 + $0x18] sm:$0xff]  }
0x1ea5   :  { %18157 = vst [vmem:[#allocation78_spill] sm:$0xff] %v14641_v4 }
0x1f08   :  { %v4754_v11 = vpop.permute.xlu1 %4753  ;;  %v4750_v10 = vpop.permute.xlu0 %4749 }
0x1f09   :  { %v4756_v41 = vmul.f32 %v4754_v11, %v14585_v14  ;;  %v4752_v38 = vmul.f32 %v4750_v10, %v14588_v63  ;;  %v14648_v11 = vld [vmem:[%s17092_s9 + $0x10] sm:$0xff]   ;;  %v14655_v10 = vld [vmem:[%s17092_s9 + $0x8] sm:$0xff]  }
0x1f0a   :  { %18158 = vst [vmem:[#allocation79_spill] sm:$0xff] %v14648_v11  ;;  %18159 = vst [vmem:[#allocation80_spill] sm:$0xff] %v14655_v10 }
0x1f0b   :  { %4762 = vrot.lane.b32.xlu1 %v4756_v41, %s9906_s20  ;;  %4758 = vrot.lane.b32.xlu0 %v4752_v38, %s9901_s27  ;;  %v14662_v41 = vld [vmem:[%s17092_s9] sm:$0xff]  }
0x1f0c   :  { %18160 = vst [vmem:[#allocation81_spill] sm:$0xff] %v14662_v41 }
0x1f0f   :  { %4786 = vrot.lane.b32.xlu1 %v14597_v37, %s9902_s28  ;;  %4783 = vrot.lane.b32.xlu0 %v14597_v37, %s9905_s19 }
0x1f7d   :  { %v4763_v6 = vpop.permute.xlu1 %4762  ;;  %v4759_v7 = vpop.permute.xlu0 %4758 }
0x1f7e   :  { %v4765_v31 = vsel %vm271_vm4, %v4759_v7, %v4763_v6  ;;  %v14669_v6 = vld [vmem:[%s17091_s8] ss:$0 sm:$0xff] }
0x1f7f   :  { %18161 = vst [vmem:[#allocation82_spill] sm:$0xff] %v14669_v6 }
0x1f81   :  { %v4787_v59 = vpop.permute.xlu1 %4786  ;;  %v4784_v54 = vpop.permute.xlu0 %4783 }
0x1f82   :  { %v14605_v27 = vsel %vm271_vm4, %v4784_v54, %v4787_v59 }
0x1f83   :  { %v4790_v15 = vmul.f32 %v14605_v27, %v4765_v31 }
0x1f85   :  { %v14608_v53 = vadd.f32 %v4790_v15, %v4707_v47  ;;  %v14627_v47 = vld [vmem:[%s17092_s9 + $0x28] sm:$0xff]  }
0x1f87   :  { %18155 = vst [vmem:[#allocation76_spill] sm:$0xff] %v14608_v53  ;;  %v4802_v16 = vpack.c.bf16 %v14608_v53, %v14608_v53 }
0x1f89   :  { %9098 = vmatmul.mubr.msk.bf16.vlgmr.msra.gmra.mxu1 %vm289_vm5, %v4802_v16 }
0x1f8a   :  { %9102 = vmatpush3.bf16.msra.mxu1 %v10019_v17  ;;  %9117 = vmatprep.mubr.msk.bf16.mxu1 %vm9898_vm2, %v17613_v58 }
0x1f8b   :  { %9103 = vmatprep.subr.bf16.mxu1 %v17613_v58 }
0x1f8e   :  { %9104 = vmatpush3.bf16.msra.mxu1 %v14620_v39 }
0x1f8f   :  { %9105 = vmatprep.subr.bf16.mxu1 %v17613_v58 }
0x1f92   :  { %9106 = vmatpush3.bf16.msra.mxu1 %v14627_v47 }
0x1f93   :  { %9107 = vmatprep.subr.bf16.mxu1 %v17613_v58 }
0x1f96   :  { %9108 = vmatpush3.bf16.msra.mxu1 %v14634_v42 }
0x1f97   :  { %9109 = vmatprep.subr.bf16.mxu1 %v17613_v58 }
0x1f9a   :  { %9110 = vmatpush3.bf16.msra.mxu1 %v14641_v4 }
0x1f9b   :  { %9111 = vmatprep.subr.bf16.mxu1 %v17613_v58 }
0x1f9e   :  { %9112 = vmatpush3.bf16.msra.mxu1 %v14648_v11  ;;  %v18258_v11 = vld [vmem:[#allocation34_spill] sm:$0xff] }
0x1f9f   :  { %9113 = vmatprep.subr.bf16.mxu1 %v17613_v58 }
0x1fa2   :  { %9114 = vmatpush3.bf16.msra.mxu1 %v14655_v10 }
0x1fa3   :  { %9115 = vmatprep.subr.bf16.mxu1 %v17613_v58 }
0x1fa6   :  { %9116 = vmatpush3.bf16.msra.mxu1 %v14662_v41 }
0x1fa7   :  { %5002 = vmatprep.subr.bf16.mxu1 %v18023_v1  ;;  %v14679_v1 = vld [vmem:[%s17093_s10] ss:$0 sm:$0xff] }
0x1fa8   :  { %18162 = vst [vmem:[#allocation83_spill] sm:$0xff] %v14679_v1 }
0x2049   :  { %v4840_v38 = vpop.f32.mrf.mxu1 }
0x204a   :  { %v4841_v7 = vadd.f32 %v14669_v6, %v4840_v38 }
0x204b   :  { %v9099_v59 = vpop.f32.mrf.mxu1 }
0x204c   :  { %9242 = vtanh.f32 %v4841_v7 }
0x204d   :  { %v4843_v54 = vpop.f32.mrf.mxu1 }
0x204f   :  { %v9100_v31 = vpop.f32.mrf.mxu1 }
0x2059   :  { %v9243_v15 = vpop.eup %9242 }
0x205a   :  { %v4847_v16 = vpack.c.bf16 %v9243_v15, %v9243_v15 }
0x205c   :  { %9118 = vmatmul.mubr.msk.bf16.vlgmr.msra.gmra.mxu1 %vm419_vm6, %v4847_v16 }
0x205d   :  { %5003 = vmatpush1.bf16.msra.mxu1 %v18025_v28  ;;  %5020 = vmatprep.mubr.bf16.mxu1 %v17628_v5 }
0x205e   :  { %8404 = vmatprep.subr.mxu1 %v13807_v12  ;;  %v4767_v12 = vmul.f32 %v14585_v14, %v14571_v18 }
0x211c   :  { %v4885_v61 = vpop.f32.mrf.mxu1 }
0x211d   :  { %v4886_v38 = vadd.f32 %v14679_v1, %v4885_v61 }
0x211e   :  { %v9119_v7 = vpop.f32.mrf.mxu1 }
0x211f   :  { %v4891_v59 = vsel %vm467_vm7, %v4886_v38, -inf  ;;  %v4766_v7 = vmul.f32 %v14588_v63, %v14571_v18 }
0x2120   :  { %4892 = vmax.xlane.f32.xlu0 %v4891_v59  ;;  %v4888_v54 = vpop.f32.mrf.mxu1 }
0x2122   :  { %v9120_v31 = vpop.f32.mrf.mxu1 }
0x2136   :  { %4768 = vrot.lane.b32.xlu0 %v14571_v18, %s9901_s27 }
0x213a   :  { %4777 = vrot.lane.b32.xlu0 %v4767_v12, %s9906_s20 }
0x21a9   :  { %v4893_v15 = vpop.xlane.xlu0 %4892 }
0x21aa   :  { %v4894_v16 = vsub.f32 %v4886_v38, %v4893_v15 }
0x21ac   :  { %v4895_v28 = vmul.f32 1.442695, %v4894_v16 }
0x21ae   :  { %9244 = vpow2.f32 %v4895_v28  ;;  %v4769_v28 = vpop.permute.xlu0 %4768 }
0x21b2   :  { %v4778_v59 = vpop.permute.xlu0 %4777 }
0x21bb   :  { %v9245_v6 = vpop.eup %9244 }
0x21bc   :  { %v4897_v61 = vsel %vm467_vm7, %v9245_v6, 0.0 }
0x21bd   :  { %4898 = vadd.xlane.f32.xlu1 %v4897_v61 }
0x21ce   :  { %4773 = vrot.lane.b32.xlu1 %v4766_v7, %s9901_s27 }
0x21d2   :  { %4792 = vrot.lane.b32.xlu1 %v14597_v37, %s9906_s20  ;;  %v4771_v37 = vmul.f32 %v4769_v28, %v14588_v63  ;;  %v14720_v63 = vld [vmem:[%s17095_s12 + $0x78] sm:$0xff]  ;;  %v14740_v28 = vld [vmem:[%s17095_s12 + $0xe8] sm:$0xff] }
0x21d3   :  { %18163 = vst [vmem:[#allocation84_spill] sm:$0xff] %v14720_v63  ;;  %18166 = vst [vmem:[#allocation87_spill] sm:$0xff] %v14740_v28 }
0x21d6   :  { %5071 = vrot.lane.b32.xlu1 %v14608_v53, %s9900_s26 }
0x21da   :  { %5074 = vrot.lane.b32.xlu1 %v14608_v53, %s9896_s4 }
0x21de   :  { %5080 = vrot.lane.b32.xlu1 %v14608_v53, %s9902_s28 }
0x21e2   :  { %5086 = vrot.lane.b32.xlu1 %v14608_v53, %s9901_s27 }
0x2246   :  { %v4899_v14 = vpop.xlane.xlu1 %4898 }
0x2247   :  { %9246 = vrcp.f32 %v4899_v14 }
0x224a   :  { %v4774_v38 = vpop.permute.xlu1 %4773 }
0x224b   :  { %v4780_v54 = vsel %vm271_vm4, %v4774_v38, %v4778_v59  ;;  %v14746_v38 = vld [vmem:[%s17095_s12 + $0x68] sm:$0xff]  ;;  %v14753_v59 = vld [vmem:[%s17095_s12 + $0xe0] sm:$0xff] }
0x224c   :  { %v4781_v12 = vsel %vm289_vm5, %v4780_v54, %v4771_v37  ;;  %18167 = vst [vmem:[#allocation88_spill] sm:$0xff] %v14746_v38  ;;  %18168 = vst [vmem:[#allocation89_spill] sm:$0xff] %v14753_v59  ;;  %v14761_v54 = vld [vmem:[%s17095_s12 + $0x60] sm:$0xff]  ;;  %v14767_v37 = vld [vmem:[%s17095_s12 + $0x1f8] sm:$0xff] }
0x224d   :  { %18169 = vst [vmem:[#allocation90_spill] sm:$0xff] %v14761_v54  ;;  %18170 = vst [vmem:[#allocation91_spill] sm:$0xff] %v14767_v37 }
0x224e   :  { %v4793_v31 = vpop.permute.xlu1 %4792 }
0x224f   :  { %v4795_v15 = vsel %vm289_vm5, %v14605_v27, %v4793_v31  ;;  %v14726_v27 = vld [vmem:[%s17095_s12 + $0xf0] sm:$0xff]  ;;  %v14773_v31 = vld [vmem:[%s17095_s12 + $0xd8] sm:$0xff] }
0x2250   :  { %v4796_v16 = vmul.f32 %v4795_v15, %v4781_v12  ;;  %18164 = vst [vmem:[#allocation85_spill] sm:$0xff] %v14726_v27  ;;  %18171 = vst [vmem:[#allocation92_spill] sm:$0xff] %v14773_v31  ;;  %v14779_v12 = vld [vmem:[%s17095_s12 + $0x58] sm:$0xff]  ;;  %v14785_v15 = vld [vmem:[%s17095_s12 + $0xd0] sm:$0xff] }
0x2251   :  { %18172 = vst [vmem:[#allocation93_spill] sm:$0xff] %v14779_v12  ;;  %18173 = vst [vmem:[#allocation94_spill] sm:$0xff] %v14785_v15 }
0x2252   :  { %4798 = vrot.lane.b32.xlu0 %v4796_v16, %s9896_s4  ;;  %v14791_v16 = vld [vmem:[%s17095_s12 + $0x50] sm:$0xff] }
0x2253   :  { %18174 = vst [vmem:[#allocation95_spill] sm:$0xff] %v14791_v16 }
0x2254   :  { %v9247_v61 = vpop.eup %9246 }
0x2255   :  { %v4901_v7 = vmul.f32 %v9247_v61, %v9245_v6  ;;  %v14734_v6 = vld [vmem:[%s17095_s12 + $0x70] sm:$0xff]  ;;  %v14797_v61 = vld [vmem:[%s17095_s12 + $0xc8] sm:$0xff] }
0x2256   :  { %5089 = vrot.lane.b32.xlu0 %v14608_v53, %s9899_s21  ;;  %18165 = vst [vmem:[#allocation86_spill] sm:$0xff] %v14734_v6  ;;  %18175 = vst [vmem:[#allocation96_spill] sm:$0xff] %v14797_v61 }
0x2257   :  { %v4902_v14 = vpack.c.bf16 %v4901_v7, %v4901_v7  ;;  %v14804_v7 = vld [vmem:[%s17095_s12 + $0x48] sm:$0xff] }
0x2258   :  { %18176 = vst [vmem:[#allocation97_spill] sm:$0xff] %v14804_v7 }
0x2259   :  { %7438 = vmatmul.mubr.msk.bf16.vlgmr.msra.gmra.mxu0 %vm512_vm10, %v4902_v14  ;;  %7440 = vmatmul.mubr.msk.bf16.vlgmr.msra.gmra.mxu1 %vm512_vm10, %v4902_v14 }
0x225a   :  { %5077 = vrot.lane.b32.xlu0 %v14608_v53, %s9905_s19  ;;  %4962 = vmatpush1.bf16.msra.mxu0 %v18027_v21 }
0x225b   :  { %4979 = vmatprep.mubr.bf16.mxu0 %v17628_v5  ;;  %5043 = vmatprep.subr.bf16.mxu0 %v18028_v3 }
0x225c   :  { %8405 = vmatpush3.msra.mxu1 %v14720_v63 }
0x225d   :  { %8406 = vmatprep.subr.mxu1 %v14726_v27 }
0x225e   :  { %5083 = vrot.lane.b32.xlu0 %v14608_v53, %s9906_s20  ;;  %8407 = vmatpush3.msra.mxu1 %v14734_v6 }
0x225f   :  { %8408 = vmatprep.subr.mxu1 %v14740_v28 }
0x2260   :  { %8409 = vmatpush3.msra.mxu1 %v14746_v38 }
0x2261   :  { %7439 = vmatmul.mubr.msk.bf16.vlgmr.msra.gmra.mxu0 %vm512_vm10, %v4902_v14  ;;  %8410 = vmatprep.subr.mxu1 %v14753_v59 }
0x2262   :  { %5044 = vmatpush1.bf16.msra.mxu0 %v18035_v8  ;;  %5061 = vmatprep.mubr.bf16.mxu0 %v17628_v5 }
0x2263   :  { %8411 = vmatpush3.msra.mxu1 %v14761_v54  ;;  %8439 = vmatprep.subr.mxu0 %v14767_v37 }
0x2264   :  { %8412 = vmatprep.subr.mxu1 %v14773_v31 }
0x2265   :  { %8413 = vmatpush3.msra.mxu1 %v14779_v12 }
0x2266   :  { %8414 = vmatprep.subr.mxu1 %v14785_v15 }
0x2267   :  { %8415 = vmatpush3.msra.mxu1 %v14791_v16  ;;  %v14810_v16 = vld [vmem:[%s17095_s12 + $0x178] sm:$0xff] }
0x2268   :  { %8416 = vmatprep.subr.mxu1 %v14797_v61  ;;  %18177 = vst [vmem:[#allocation98_spill] sm:$0xff] %v14810_v16  ;;  %v14816_v61 = vld [vmem:[%s17095_s12 + $0xc0] sm:$0xff] }
0x2269   :  { %7441 = vmatmul.mubr.msk.bf16.vlgmr.msra.gmra.mxu0 %vm512_vm10, %v4902_v14  ;;  %8417 = vmatpush3.msra.mxu1 %v14804_v7  ;;  %18178 = vst [vmem:[#allocation99_spill] sm:$0xff] %v14816_v61  ;;  %v14822_v14 = vld [vmem:[%s17095_s12 + $0x1f0] sm:$0xff]  ;;  %v14828_v7 = vld [vmem:[%s17095_s12 + $0x40] sm:$0xff] }
0x226a   :  { %8440 = vmatpush3.msra.mxu0 %v14810_v16  ;;  %8418 = vmatprep.subr.mxu1 %v14816_v61  ;;  %18179 = vst [vmem:[#allocation100_spill] sm:$0xff] %v14822_v14  ;;  %18180 = vst [vmem:[#allocation101_spill] sm:$0xff] %v14828_v7  ;;  %v14834_v16 = vld [vmem:[%s17095_s12 + $0x170] sm:$0xff]  ;;  %v14840_v61 = vld [vmem:[%s17095_s12 + $0xb8] sm:$0xff] }
0x226b   :  { %8441 = vmatprep.subr.mxu0 %v14822_v14  ;;  %8419 = vmatpush3.msra.mxu1 %v14828_v7  ;;  %18181 = vst [vmem:[#allocation102_spill] sm:$0xff] %v14834_v16  ;;  %18182 = vst [vmem:[#allocation103_spill] sm:$0xff] %v14840_v61  ;;  %v14846_v14 = vld [vmem:[%s17095_s12 + $0x1e8] sm:$0xff]  ;;  %v14852_v7 = vld [vmem:[%s17095_s12 + $0x38] sm:$0xff] }
0x226c   :  { %8442 = vmatpush3.msra.mxu0 %v14834_v16  ;;  %8420 = vmatprep.subr.mxu1 %v14840_v61  ;;  %18183 = vst [vmem:[#allocation104_spill] sm:$0xff] %v14846_v14  ;;  %18184 = vst [vmem:[#allocation105_spill] sm:$0xff] %v14852_v7  ;;  %v14858_v16 = vld [vmem:[%s17095_s12 + $0x168] sm:$0xff]  ;;  %v14864_v61 = vld [vmem:[%s17095_s12 + $0xb0] sm:$0xff] }
0x226d   :  { %8443 = vmatprep.subr.mxu0 %v14846_v14  ;;  %8421 = vmatpush3.msra.mxu1 %v14852_v7  ;;  %18185 = vst [vmem:[#allocation106_spill] sm:$0xff] %v14858_v16  ;;  %18186 = vst [vmem:[#allocation107_spill] sm:$0xff] %v14864_v61  ;;  %v14870_v14 = vld [vmem:[%s17095_s12 + $0x1e0] sm:$0xff]  ;;  %v14876_v7 = vld [vmem:[%s17095_s12 + $0x30] sm:$0xff] }
0x226e   :  { %8444 = vmatpush3.msra.mxu0 %v14858_v16  ;;  %8422 = vmatprep.subr.mxu1 %v14864_v61  ;;  %18187 = vst [vmem:[#allocation108_spill] sm:$0xff] %v14870_v14  ;;  %18188 = vst [vmem:[#allocation109_spill] sm:$0xff] %v14876_v7  ;;  %v14882_v16 = vld [vmem:[%s17095_s12 + $0x160] sm:$0xff]  ;;  %v14888_v61 = vld [vmem:[%s17095_s12 + $0xa8] sm:$0xff] }
0x226f   :  { %8445 = vmatprep.subr.mxu0 %v14870_v14  ;;  %8423 = vmatpush3.msra.mxu1 %v14876_v7  ;;  %18189 = vst [vmem:[#allocation110_spill] sm:$0xff] %v14882_v16  ;;  %18190 = vst [vmem:[#allocation111_spill] sm:$0xff] %v14888_v61  ;;  %v14894_v14 = vld [vmem:[%s17095_s12 + $0x1d8] sm:$0xff]  ;;  %v14900_v7 = vld [vmem:[%s17095_s12 + $0x28] sm:$0xff] }
0x2270   :  { %8446 = vmatpush3.msra.mxu0 %v14882_v16  ;;  %8424 = vmatprep.subr.mxu1 %v14888_v61  ;;  %18191 = vst [vmem:[#allocation112_spill] sm:$0xff] %v14894_v14  ;;  %18192 = vst [vmem:[#allocation113_spill] sm:$0xff] %v14900_v7  ;;  %v14906_v16 = vld [vmem:[%s17095_s12 + $0x158] sm:$0xff]  ;;  %v14912_v61 = vld [vmem:[%s17095_s12 + $0xa0] sm:$0xff] }
0x2271   :  { %8447 = vmatprep.subr.mxu0 %v14894_v14  ;;  %8425 = vmatpush3.msra.mxu1 %v14900_v7  ;;  %18193 = vst [vmem:[#allocation114_spill] sm:$0xff] %v14906_v16  ;;  %18194 = vst [vmem:[#allocation115_spill] sm:$0xff] %v14912_v61  ;;  %v14918_v14 = vld [vmem:[%s17095_s12 + $0x1d0] sm:$0xff]  ;;  %v14924_v7 = vld [vmem:[%s17095_s12 + $0x20] sm:$0xff] }
0x2272   :  { %8448 = vmatpush3.msra.mxu0 %v14906_v16  ;;  %8426 = vmatprep.subr.mxu1 %v14912_v61  ;;  %18195 = vst [vmem:[#allocation116_spill] sm:$0xff] %v14918_v14  ;;  %18196 = vst [vmem:[#allocation117_spill] sm:$0xff] %v14924_v7  ;;  %v14930_v16 = vld [vmem:[%s17095_s12 + $0x150] sm:$0xff]  ;;  %v14936_v61 = vld [vmem:[%s17095_s12 + $0x98] sm:$0xff] }
0x2273   :  { %8449 = vmatprep.subr.mxu0 %v14918_v14  ;;  %8427 = vmatpush3.msra.mxu1 %v14924_v7  ;;  %18197 = vst [vmem:[#allocation118_spill] sm:$0xff] %v14930_v16  ;;  %18198 = vst [vmem:[#allocation119_spill] sm:$0xff] %v14936_v61  ;;  %v14942_v14 = vld [vmem:[%s17095_s12 + $0x1c8] sm:$0xff]  ;;  %v14948_v7 = vld [vmem:[%s17095_s12 + $0x18] sm:$0xff] }
0x2274   :  { %8450 = vmatpush3.msra.mxu0 %v14930_v16  ;;  %8428 = vmatprep.subr.mxu1 %v14936_v61  ;;  %18199 = vst [vmem:[#allocation120_spill] sm:$0xff] %v14942_v14  ;;  %18200 = vst [vmem:[#allocation121_spill] sm:$0xff] %v14948_v7  ;;  %v14954_v16 = vld [vmem:[%s17095_s12 + $0x148] sm:$0xff]  ;;  %v14960_v61 = vld [vmem:[%s17095_s12 + $0x90] sm:$0xff] }
0x2275   :  { %8451 = vmatprep.subr.mxu0 %v14942_v14  ;;  %8429 = vmatpush3.msra.mxu1 %v14948_v7  ;;  %18201 = vst [vmem:[#allocation122_spill] sm:$0xff] %v14954_v16  ;;  %18202 = vst [vmem:[#allocation123_spill] sm:$0xff] %v14960_v61  ;;  %v14966_v14 = vld [vmem:[%s17095_s12 + $0x1c0] sm:$0xff]  ;;  %v14972_v7 = vld [vmem:[%s17095_s12 + $0x10] sm:$0xff] }
0x2276   :  { %8452 = vmatpush3.msra.mxu0 %v14954_v16  ;;  %8430 = vmatprep.subr.mxu1 %v14960_v61  ;;  %18203 = vst [vmem:[#allocation124_spill] sm:$0xff] %v14966_v14  ;;  %18204 = vst [vmem:[#allocation125_spill] sm:$0xff] %v14972_v7  ;;  %v14978_v16 = vld [vmem:[%s17095_s12 + $0x140] sm:$0xff]  ;;  %v14984_v61 = vld [vmem:[%s17095_s12 + $0x88] sm:$0xff] }
0x2277   :  { %8453 = vmatprep.subr.mxu0 %v14966_v14  ;;  %8431 = vmatpush3.msra.mxu1 %v14972_v7  ;;  %18205 = vst [vmem:[#allocation126_spill] sm:$0xff] %v14978_v16  ;;  %18206 = vst [vmem:[#allocation127_spill] sm:$0xff] %v14984_v61  ;;  %v14990_v14 = vld [vmem:[%s17095_s12 + $0x1b8] sm:$0xff]  ;;  %v14996_v7 = vld [vmem:[%s17095_s12 + $0x8] sm:$0xff] }
0x2278   :  { %8454 = vmatpush3.msra.mxu0 %v14978_v16  ;;  %8432 = vmatprep.subr.mxu1 %v14984_v61  ;;  %18207 = vst [vmem:[#allocation128_spill] sm:$0xff] %v14990_v14  ;;  %18208 = vst [vmem:[#allocation129_spill] sm:$0xff] %v14996_v7  ;;  %v15002_v16 = vld [vmem:[%s17095_s12 + $0x138] sm:$0xff]  ;;  %v15008_v61 = vld [vmem:[%s17095_s12 + $0x80] sm:$0xff] }
0x2279   :  { %8455 = vmatprep.subr.mxu0 %v14990_v14  ;;  %8433 = vmatpush3.msra.mxu1 %v14996_v7  ;;  %18209 = vst [vmem:[#allocation130_spill] sm:$0xff] %v15002_v16  ;;  %18210 = vst [vmem:[#allocation131_spill] sm:$0xff] %v15008_v61  ;;  %v15014_v14 = vld [vmem:[%s17095_s12 + $0x1b0] sm:$0xff]  ;;  %v15020_v7 = vld [vmem:[%s17095_s12] sm:$0xff] }
0x227a   :  { %8456 = vmatpush3.msra.mxu0 %v15002_v16  ;;  %8434 = vmatprep.subr.mxu1 %v15008_v61  ;;  %18211 = vst [vmem:[#allocation132_spill] sm:$0xff] %v15014_v14  ;;  %18212 = vst [vmem:[#allocation133_spill] sm:$0xff] %v15020_v7  ;;  %v15026_v16 = vld [vmem:[%s17095_s12 + $0x130] sm:$0xff]  ;;  %v15032_v61 = vld [vmem:[%s17095_s12 + $0x2f8] sm:$0xff] }
0x227b   :  { %8457 = vmatprep.subr.mxu0 %v15014_v14  ;;  %8435 = vmatpush3.msra.mxu1 %v15020_v7  ;;  %18213 = vst [vmem:[#allocation134_spill] sm:$0xff] %v15026_v16  ;;  %18214 = vst [vmem:[#allocation136_spill] sm:$0xff] %v15032_v61  ;;  %v15038_v14 = vld [vmem:[%s17095_s12 + $0x1a8] sm:$0xff] }
0x227c   :  { %8458 = vmatpush3.msra.mxu0 %v15026_v16  ;;  %8474 = vmatprep.subr.mxu1 %v15032_v61  ;;  %18215 = vst [vmem:[#allocation137_spill] sm:$0xff] %v15038_v14  ;;  %v15044_v7 = vld [vmem:[%s17095_s12 + $0x128] sm:$0xff]  ;;  %v15050_v16 = vld [vmem:[%s17095_s12 + $0x1a0] sm:$0xff] }
0x227d   :  { %8459 = vmatprep.subr.mxu0 %v15038_v14  ;;  %18216 = vst [vmem:[#allocation138_spill] sm:$0xff] %v15044_v7  ;;  %18217 = vst [vmem:[#allocation139_spill] sm:$0xff] %v15050_v16  ;;  %v15056_v61 = vld [vmem:[%s17095_s12 + $0x120] sm:$0xff]  ;;  %v15062_v14 = vld [vmem:[%s17095_s12 + $0x198] sm:$0xff] }
0x227e   :  { %8460 = vmatpush3.msra.mxu0 %v15044_v7  ;;  %18218 = vst [vmem:[#allocation140_spill] sm:$0xff] %v15056_v61  ;;  %18219 = vst [vmem:[#allocation141_spill] sm:$0xff] %v15062_v14  ;;  %v15068_v7 = vld [vmem:[%s17095_s12 + $0x118] sm:$0xff] }
0x227f   :  { %8461 = vmatprep.subr.mxu0 %v15050_v16  ;;  %18220 = vst [vmem:[#allocation143_spill] sm:$0xff] %v15068_v7  ;;  %v15074_v16 = vld [vmem:[%s17095_s12 + $0x190] sm:$0xff] }
0x2280   :  { %8462 = vmatpush3.msra.mxu0 %v15056_v61  ;;  %18221 = vst [vmem:[#allocation144_spill] sm:$0xff] %v15074_v16  ;;  %v15080_v61 = vld [vmem:[%s17095_s12 + $0x110] sm:$0xff] }
0x2281   :  { %8463 = vmatprep.subr.mxu0 %v15062_v14  ;;  %18222 = vst [vmem:[#allocation145_spill] sm:$0xff] %v15080_v61  ;;  %v15086_v14 = vld [vmem:[%s17095_s12 + $0x188] sm:$0xff] }
0x2282   :  { %8464 = vmatpush3.msra.mxu0 %v15068_v7  ;;  %18223 = vst [vmem:[#allocation146_spill] sm:$0xff] %v15086_v14  ;;  %v15092_v7 = vld [vmem:[%s17095_s12 + $0x108] sm:$0xff] }
0x2283   :  { %8465 = vmatprep.subr.mxu0 %v15074_v16  ;;  %18224 = vst [vmem:[#allocation147_spill] sm:$0xff] %v15092_v7  ;;  %v15098_v16 = vld [vmem:[%s17095_s12 + $0x180] sm:$0xff] }
0x2284   :  { %8466 = vmatpush3.msra.mxu0 %v15080_v61  ;;  %18225 = vst [vmem:[#allocation148_spill] sm:$0xff] %v15098_v16  ;;  %v15104_v61 = vld [vmem:[%s17095_s12 + $0x100] sm:$0xff] }
0x2285   :  { %8467 = vmatprep.subr.mxu0 %v15086_v14  ;;  %18226 = vst [vmem:[#allocation149_spill] sm:$0xff] %v15104_v61  ;;  %v15110_v14 = vld [vmem:[%s17095_s12 + $0x3f8] sm:$0xff] }
0x2286   :  { %8468 = vmatpush3.msra.mxu0 %v15092_v7  ;;  %18227 = vst [vmem:[#allocation150_spill] sm:$0xff] %v15110_v14 }
0x2287   :  { %8469 = vmatprep.subr.mxu0 %v15098_v16 }
0x2288   :  { %8470 = vmatpush3.msra.mxu0 %v15104_v61 }
0x2289   :  { %8509 = vmatprep.subr.mxu0 %v15110_v14  ;;  %v5072_v14 = vpop.permute.xlu1 %5071 }
0x228a   :  { %v5092_v54 = vsel %vm271_vm4, %v14608_v53, %v5072_v14 }
0x228d   :  { %v5075_v16 = vpop.permute.xlu1 %5074 }
0x228e   :  { %v5093_v8 = vsel %vm289_vm5, %v5092_v54, %v5075_v16 }
0x2291   :  { %v5081_v59 = vpop.permute.xlu1 %5080 }
0x22c4   :  { %v4799_v7 = vpop.permute.xlu0 %4798 }
0x22c5   :  { %v15114_v15 = vsub.f32 %v14571_v18, %v4799_v7  ;;  %v15133_v7 = vld.sshfl [vmem:[%s17086_s3 + $0x2] sm:$0x3 pattern:$0x76325410]  ;;  %v5607_v18 = vld [vmem:[%s17084_s1] sm:$0x3] }
0x22c6   :  { %18229 = vst [vmem:[#allocation152_spill] sm:$0xff] %v15133_v7 }
0x22c7   :  { %18228 = vst [vmem:[#allocation151_spill] sm:$0xff] %v15114_v15  ;;  %5110 = vrot.lane.b32.xlu1 %v15114_v15, %s9899_s21  ;;  %5107 = vrot.lane.b32.xlu0 %v15114_v15, %s9901_s27 }
0x22c8   :  { %v5090_v61 = vpop.permute.xlu0 %5089 }
0x22c9   :  { %v5099_v12 = vsel %vm271_vm4, %v5090_v61, %v14608_v53  ;;  %v5087_v53 = vpop.permute.xlu1 %5086 }
0x22ca   :  { %v5100_v37 = vsel %vm289_vm5, %v5099_v12, %v5072_v14 }
0x22cb   :  { %5125 = vrot.lane.b32.xlu1 %v15114_v15, %s9906_s20  ;;  %5122 = vrot.lane.b32.xlu0 %v15114_v15, %s9902_s28  ;;  %v5101_v38 = vsel %vm732_vm11, %v5100_v37, %v5075_v16 }
0x22cc   :  { %v5078_v31 = vpop.permute.xlu0 %5077 }
0x22cd   :  { %v5102_v27 = vsel %vm734_vm12, %v5101_v38, %v5078_v31 }
0x22ce   :  { %v5103_v3 = vsel %vm736_vm13, %v5102_v27, %v5081_v59 }
0x22cf   :  { %5116 = vrot.lane.b32.xlu1 %v15114_v15, %s9896_s4  ;;  %5113 = vrot.lane.b32.xlu0 %v15114_v15, %s9900_s26 }
0x22d0   :  { %v5084_v6 = vpop.permute.xlu0 %5083 }
0x22d1   :  { %v5104_v21 = vsel %vm738_vm14, %v5103_v3, %v5084_v6 }
0x22d2   :  { %v5105_v10 = vsel %vm740_vm15, %v5104_v21, %v5087_v53 }
0x22d3   :  { %5119 = vrot.lane.b32.xlu0 %v15114_v15, %s9905_s19  ;;  %5575 = vrot.lane.b32.xlu1 %v15133_v7, %s9901_s27  ;;  %v5094_v7 = vsel %vm732_vm11, %v5093_v8, %v5078_v31 }
0x22d4   :  { %v5095_v54 = vsel %vm734_vm12, %v5094_v7, %v5081_v59 }
0x22d5   :  { %v5096_v37 = vsel %vm736_vm13, %v5095_v54, %v5084_v6 }
0x22d6   :  { %v5097_v1 = vsel %vm738_vm14, %v5096_v37, %v5087_v53  ;;  %v15186_v53 = vld [vmem:[%s17095_s12 + $0x278] sm:$0xff] }
0x22d7   :  { %5611 = vrot.lane.b32.xlu0 %v5607_v18, %s9902_s28  ;;  %v5098_v54 = vsel %vm740_vm15, %v5097_v1, %v5090_v61  ;;  %18230 = vst [vmem:[#allocation153_spill] sm:$0xff] %v15186_v53 }
0x2319   :  { %v15149_v18 = vpop.f32.mrf.mxu0  ;;  %v15151_v28 = vpop.f32.mrf.mxu1 }
0x231a   :  { %v15156_v12 = vmul.f32 %v15151_v28, %v15149_v18  ;;  %v5149_v6 = vmul.f32 %v5098_v54, %v15149_v18 }
0x231b   :  { %v15158_v63 = vpop.f32.mrf.mxu0  ;;  %v15160_v14 = vpop.f32.mrf.mxu1 }
0x231c   :  { %v5150_v27 = vmul.f32 %v5098_v54, %v15158_v63 }
0x231d   :  { %v4944_v8 = vpop.f32.mrf.mxu0  ;;  %v5026_v16 = vpop.f32.mrf.mxu1 }
0x231f   :  { %v4945_v38 = vpop.f32.mrf.mxu0  ;;  %v5027_v31 = vpop.f32.mrf.mxu1 }
0x2321   :  { %v15167_v41 = vpop.f32.mrf.mxu0 }
0x2322   :  { %v5203_v7 = vmul.f32 %v15151_v28, %v15167_v41  ;;  %v5151_v8 = vmul.f32 %v5105_v10, %v15167_v41 }
0x2323   :  { %v15174_v16 = vpop.f32.mrf.mxu0 }
0x2324   :  { %v5152_v3 = vmul.f32 %v5105_v10, %v15174_v16  ;;  %v5153_v31 = vadd.f32 %v5151_v8, %v5149_v6  ;;  %v15198_v8 = vld [vmem:[%s17095_s12 + $0x2f0] sm:$0xff] }
0x2325   :  { %v4985_v59 = vpop.f32.mrf.mxu0  ;;  %18231 = vst [vmem:[#allocation154_spill] sm:$0xff] %v15198_v8 }
0x2326   :  { %v5154_v37 = vadd.f32 %v5152_v3, %v5150_v27  ;;  %v15207_v59 = vld [vmem:[%s17095_s12 + $0x270] sm:$0xff] }
0x2327   :  { %v4986_v38 = vpop.f32.mrf.mxu0  ;;  %18232 = vst [vmem:[#allocation155_spill] sm:$0xff] %v15207_v59 }
0x2328   :  { %5281 = vmatprep.mubr.f32.mxu1 %v5154_v37  ;;  %v5156_v38 = vmul.f32 %v5098_v54, %v15160_v14 }
0x2329   :  { %v15179_v21 = vpop.f32.mrf.mxu0  ;;  %5282 = vmatmul.mubr.f32.vlgmr.msra.gmra.mxu1 %v5153_v31 }
0x232a   :  { %v5201_v1 = vmul.f32 %v15179_v21, %v15149_v18  ;;  %8475 = vmatpush3.msra.mxu1 %v15186_v53  ;;  %v15191_v61 = vmul.f32 %v15179_v21, %v15167_v41  ;;  %v5157_v3 = vmul.f32 %v5105_v10, %v15179_v21 }
0x232b   :  { %v15193_v27 = vpop.f32.mrf.mxu0  ;;  %8476 = vmatprep.subr.mxu1 %v15198_v8  ;;  %v15215_v8 = vld [vmem:[%s17095_s12 + $0x2e8] sm:$0xff] }
0x232c   :  { %v15202_v6 = vadd.f32 %v5203_v7, %v5201_v1  ;;  %8477 = vmatpush3.msra.mxu1 %v15207_v59  ;;  %v5158_v31 = vmul.f32 %v5105_v10, %v15193_v27  ;;  %18233 = vst [vmem:[#allocation156_spill] sm:$0xff] %v15215_v8  ;;  %v5155_v7 = vmul.f32 %v5098_v54, %v15151_v28  ;;  %v15222_v1 = vld [vmem:[%s17095_s12 + $0x268] sm:$0xff]  ;;  %v15228_v10 = vld [vmem:[%s17095_s12 + $0x2e0] sm:$0xff] }
0x232d   :  { %v5067_v37 = vpop.f32.mrf.mxu0  ;;  %8478 = vmatprep.subr.mxu1 %v15215_v8  ;;  %18234 = vst [vmem:[#allocation157_spill] sm:$0xff] %v15222_v1  ;;  %18235 = vst [vmem:[#allocation158_spill] sm:$0xff] %v15228_v10  ;;  %v15234_v54 = vld [vmem:[%s17095_s12 + $0x260] sm:$0xff] }
0x232e   :  { %8479 = vmatpush3.msra.mxu1 %v15222_v1  ;;  %v5160_v59 = vadd.f32 %v5158_v31, %v5156_v38  ;;  %v5159_v53 = vadd.f32 %v5157_v3, %v5155_v7  ;;  %18236 = vst [vmem:[#allocation159_spill] sm:$0xff] %v15234_v54  ;;  %v15240_v38 = vld [vmem:[%s17095_s12 + $0x2d8] sm:$0xff]  ;;  %v18244_v7 = vld [vmem:[#allocation25_spill] sm:$0xff]  ;;  %v18255_v8 = vld [vmem:[#allocation28_spill] sm:$0xff] }
0x232f   :  { %v5068_v37 = vpop.f32.mrf.mxu0  ;;  %8480 = vmatprep.subr.mxu1 %v15228_v10  ;;  %18237 = vst [vmem:[#allocation160_spill] sm:$0xff] %v15240_v38  ;;  %v15246_v3 = vld [vmem:[%s17095_s12 + $0x258] sm:$0xff] }
0x2330   :  { %8481 = vmatpush3.msra.mxu1 %v15234_v54  ;;  %5351 = vmatprep.mubr.f32.mxu0 %v5160_v59  ;;  %18238 = vst [vmem:[#allocation161_spill] sm:$0xff] %v15246_v3  ;;  %v15253_v59 = vld [vmem:[%s17095_s12 + $0x2d0] sm:$0xff]  ;;  %v18245_v37 = vld [vmem:[#allocation27_spill] sm:$0xff] }
0x2331   :  { %8482 = vmatprep.subr.mxu1 %v15240_v38  ;;  %5352 = vmatmul.mubr.f32.vlgmr.msra.gmra.mxu0 %v5159_v53  ;;  %18239 = vst [vmem:[#allocation162_spill] sm:$0xff] %v15253_v59  ;;  %v15260_v53 = vld [vmem:[%s17095_s12 + $0x250] sm:$0xff]  ;;  %v18251_v38 = vld [vmem:[#allocation39_spill] sm:$0xff] }
0x2332   :  { %8483 = vmatpush3.msra.mxu1 %v15246_v3  ;;  %8510 = vmatpush3.msra.mxu0 %v14003_v52  ;;  %18240 = vst [vmem:[#allocation163_spill] sm:$0xff] %v15260_v53  ;;  %v15267_v52 = vld [vmem:[%s17095_s12 + $0x2c8] sm:$0xff]  ;;  %v18252_v54 = vld [vmem:[#allocation46_spill] sm:$0xff]  ;;  %v18254_v10 = vld [vmem:[#allocation51_spill] sm:$0xff] }
0x2333   :  { %8484 = vmatprep.subr.mxu1 %v15253_v59  ;;  %8511 = vmatprep.subr.mxu0 %v14010_v22  ;;  %18241 = vst [vmem:[#allocation164_spill] sm:$0xff] %v15267_v52  ;;  %v15274_v22 = vld [vmem:[%s17095_s12 + $0x248] sm:$0xff] }
0x2334   :  { %8485 = vmatpush3.msra.mxu1 %v15260_v53  ;;  %8512 = vmatpush3.msra.mxu0 %v14017_v56  ;;  %18242 = vst [vmem:[#allocation165_spill] sm:$0xff] %v15274_v22  ;;  %v15281_v56 = vld [vmem:[%s17095_s12 + $0x2c0] sm:$0xff]  ;;  %v18249_v53 = vld [vmem:[#allocation35_spill] sm:$0xff] }
0x2335   :  { %8486 = vmatprep.subr.mxu1 %v15267_v52  ;;  %8513 = vmatprep.subr.mxu0 %v14024_v30  ;;  %18243 = vst [vmem:[#allocation166_spill] sm:$0xff] %v15281_v56 }
0x2336   :  { %8487 = vmatpush3.msra.mxu1 %v15274_v22  ;;  %8514 = vmatpush3.msra.mxu0 %v14031_v55  ;;  %v15292_v55 = vmul.f32 %v15149_v18, %v15149_v18 }
0x2337   :  { %8488 = vmatprep.subr.mxu1 %v15281_v56  ;;  %8515 = vmatprep.subr.mxu0 %v14038_v34  ;;  %v15298_v34 = vmul.f32 %v15151_v28, %v15151_v28  ;;  %v18248_v56 = vld [vmem:[#allocation33_spill] sm:$0xff] }
0x2338   :  { %8489 = vmatpush3.msra.mxu1 %v14044_v32  ;;  %8516 = vmatpush3.msra.mxu0 %v14050_v40  ;;  %v15302_v32 = vmul.f32 %v15158_v63, %v15158_v63  ;;  %v15306_v40 = vmul.f32 %v15160_v14, %v15160_v14 }
0x2339   :  { %v5111_v30 = vpop.permute.xlu1 %5110  ;;  %v5108_v31 = vpop.permute.xlu0 %5107  ;;  %8490 = vmatprep.subr.mxu1 %v14056_v35  ;;  %8517 = vmatprep.subr.mxu0 %v14062_v13  ;;  %v18246_v35 = vld [vmem:[#allocation29_spill] sm:$0xff]  ;;  %v18247_v13 = vld [vmem:[#allocation31_spill] sm:$0xff] }
0x233a   :  { %8491 = vmatpush3.msra.mxu1 %v14068_v19  ;;  %8518 = vmatpush3.msra.mxu0 %v18244_v7  ;;  %v15312_v19 = vmul.f32 %v15160_v14, %v15158_v63  ;;  %v5165_v7 = vmul.f32 %v15167_v41, %v15149_v18 }
0x233b   :  { %8492 = vmatprep.subr.mxu1 %v18245_v37  ;;  %8519 = vmatprep.subr.mxu0 %v18246_v35  ;;  %v15318_v37 = vmul.f32 %v15167_v41, %v15167_v41  ;;  %v5128_v35 = vsel %vm271_vm4, %v5108_v31, %v5111_v30  ;;  %v5166_v41 = vmul.f32 %v15174_v16, %v15158_v63 }
0x233c   :  { %8493 = vmatpush3.msra.mxu1 %v18247_v13  ;;  %8520 = vmatpush3.msra.mxu0 %v18248_v56  ;;  %v18250_v13 = vld [vmem:[#allocation37_spill] sm:$0xff] }
0x233d   :  { %v5126_v22 = vpop.permute.xlu1 %5125  ;;  %v5123_v52 = vpop.permute.xlu0 %5122  ;;  %8494 = vmatprep.subr.mxu1 %v18249_v53  ;;  %8521 = vmatprep.subr.mxu0 %v18250_v13  ;;  %v18253_v53 = vld [vmem:[#allocation26_spill] sm:$0xff]  ;;  %v5204_v13 = vmul.f32 %v15160_v14, %v15174_v16 }
0x233e   :  { %v5135_v59 = vsel %vm271_vm4, %v5126_v22, %v5108_v31  ;;  %v5142_v3 = vsel %vm271_vm4, %v5123_v52, %v5126_v22  ;;  %8495 = vmatpush3.msra.mxu1 %v18251_v38  ;;  %8522 = vmatpush3.msra.mxu0 %v18252_v54  ;;  %v5129_v54 = vsel %vm289_vm5, %v5128_v35, %v15114_v15 }
0x233f   :  { %v5136_v18 = vsel %vm289_vm5, %v5135_v59, %v5111_v30  ;;  %v5143_v56 = vsel %vm289_vm5, %v5142_v3, %v5108_v31  ;;  %8496 = vmatprep.subr.mxu1 %v18253_v53  ;;  %8523 = vmatprep.subr.mxu0 %v18254_v10  ;;  %v5183_v59 = vmul.f32 %v15179_v21, %v15151_v28  ;;  %v18256_v3 = vld [vmem:[#allocation30_spill] sm:$0xff]  ;;  %v18257_v10 = vld [vmem:[#allocation32_spill] sm:$0xff] }
0x2340   :  { %v5137_v1 = vsel %vm732_vm11, %v5136_v18, %v15114_v15  ;;  %v5144_v38 = vsel %vm732_vm11, %v5143_v56, %v5111_v30  ;;  %8497 = vmatpush3.msra.mxu1 %v18255_v8  ;;  %8524 = vmatpush3.msra.mxu0 %v18256_v3  ;;  %v18259_v56 = vld [vmem:[#allocation36_spill] sm:$0xff]  ;;  %v5184_v35 = vmul.f32 %v15193_v27, %v15160_v14  ;;  %v18260_v3 = vld [vmem:[#allocation38_spill] sm:$0xff] }
0x2341   :  { %v5145_v31 = vsel %vm734_vm12, %v5144_v38, %v15114_v15  ;;  %v5114_v53 = vpop.permute.xlu0 %5113  ;;  %8498 = vmatprep.subr.mxu1 %v18257_v10  ;;  %8525 = vmatprep.subr.mxu0 %v18258_v11  ;;  %v5117_v18 = vpop.permute.xlu1 %5116  ;;  %v5202_v38 = vmul.f32 %v15193_v27, %v15158_v63  ;;  %v18261_v10 = vld [vmem:[#allocation40_spill] sm:$0xff]  ;;  %v5174_v11 = vmul.f32 %v15174_v16, %v15174_v16  ;;  %v18264_v15 = vld [vmem:[#allocation43_spill] sm:$0xff] }
0x2342   :  { %v5130_v30 = vsel %vm732_vm11, %v5129_v54, %v5114_v53  ;;  %v5138_v8 = vsel %vm734_vm12, %v5137_v1, %v5114_v53  ;;  %v5146_v28 = vsel %vm736_vm13, %v5145_v31, %v5114_v53  ;;  %8499 = vmatpush3.msra.mxu1 %v18259_v56  ;;  %8526 = vmatpush3.msra.mxu0 %v18260_v3  ;;  %v18262_v54 = vld [vmem:[#allocation41_spill] sm:$0xff]  ;;  %v18263_v31 = vld [vmem:[#allocation42_spill] sm:$0xff]  ;;  %v5168_v53 = vmul.f32 2.0, %v5166_v41 }
0x2343   :  { %8500 = vmatprep.subr.mxu1 %v18261_v10  ;;  %v5191_v1 = vmul.f32 %v15179_v21, %v15179_v21  ;;  %8527 = vmatprep.subr.mxu0 %v18262_v54  ;;  %v5192_v14 = vmul.f32 %v15193_v27, %v15193_v27  ;;  %v5212_v63 = vmul.f32 %v15193_v27, %v15174_v16  ;;  %v5185_v54 = vmul.f32 2.0, %v5183_v59 }
0x2344   :  { %8501 = vmatpush3.msra.mxu1 %v18263_v31  ;;  %8528 = vmatpush3.msra.mxu0 %v14264_v44  ;;  %v5131_v56 = vsel %vm734_vm12, %v5130_v30, %v5117_v18  ;;  %v5139_v3 = vsel %vm736_vm13, %v5138_v8, %v5117_v18  ;;  %v5147_v10 = vsel %vm738_vm14, %v5146_v28, %v5117_v18  ;;  %v18265_v31 = vld [vmem:[#allocation44_spill] sm:$0xff]  ;;  %v5186_v44 = vmul.f32 2.0, %v5184_v35  ;;  %v18266_v18 = vld [vmem:[#allocation45_spill] sm:$0xff]  ;;  %v18267_v30 = vld [vmem:[#allocation47_spill] sm:$0xff] }
0x2345   :  { %v5120_v21 = vpop.permute.xlu0 %5119  ;;  %8502 = vmatprep.subr.mxu1 %v18264_v15  ;;  %8529 = vmatprep.subr.mxu0 %v18265_v31  ;;  %v5206_v15 = vadd.f32 %v5204_v13, %v5202_v38  ;;  %v5167_v59 = vmul.f32 2.0, %v5165_v7  ;;  %v18272_v7 = vld [vmem:[#allocation52_spill] sm:$0xff] }
0x2346   :  { %v5132_v4 = vsel %vm736_vm13, %v5131_v56, %v5120_v21  ;;  %v5140_v42 = vsel %vm738_vm14, %v5139_v3, %v5120_v21  ;;  %v5148_v16 = vsel %vm740_vm15, %v5147_v10, %v5120_v21  ;;  %8503 = vmatpush3.msra.mxu1 %v14288_v46  ;;  %8530 = vmatpush3.msra.mxu0 %v18266_v18  ;;  %v18268_v56 = vld [vmem:[#allocation48_spill] sm:$0xff]  ;;  %v18269_v3 = vld [vmem:[#allocation49_spill] sm:$0xff]  ;;  %v18270_v46 = vld [vmem:[#allocation50_spill] sm:$0xff] }
0x2347   :  { %v5133_v27 = vsel %vm738_vm14, %v5132_v4, %v5123_v52  ;;  %v5141_v41 = vsel %vm740_vm15, %v5140_v42, %v5123_v52  ;;  %8504 = vmatprep.subr.mxu1 %v18267_v30  ;;  %v5187_v28 = vmul.f32 %v5185_v54, %v5148_v16  ;;  %8531 = vmatprep.subr.mxu0 %v18268_v56  ;;  %v18271_v21 = vld [vmem:[#allocation53_spill] sm:$0xff] }
0x2348   :  { %v5134_v8 = vsel %vm740_vm15, %v5133_v27, %v5126_v22  ;;  %8505 = vmatpush3.msra.mxu1 %v18269_v3  ;;  %v5170_v10 = vmul.f32 %v5168_v53, %v5148_v16  ;;  %8532 = vmatpush3.msra.mxu0 %v18270_v46  ;;  %v5176_v35 = vmul.f32 %v5174_v11, %v5141_v41 }
0x2349   :  { %v5164_v4 = vmul.f32 %v15302_v32, %v5134_v8  ;;  %v5182_v42 = vmul.f32 %v15306_v40, %v5134_v8  ;;  %v5188_v52 = vmul.f32 %v5186_v44, %v5148_v16  ;;  %8533 = vmatprep.subr.mxu0 %v18271_v21  ;;  %v5194_v13 = vmul.f32 %v5192_v14, %v5141_v41 }
0x234a   :  { %8544 = vmatprep.subr.mxu1 %v18272_v7  ;;  %v5163_v22 = vmul.f32 %v15292_v55, %v5134_v8  ;;  %v5169_v38 = vmul.f32 %v5167_v59, %v5148_v16  ;;  %8534 = vmatpush3.msra.mxu0 %v14347_v62  ;;  %v5175_v31 = vmul.f32 %v15318_v37, %v5141_v41  ;;  %v18287_v59 = vld [vmem:[#allocation8_spill] sm:$0xff] }
0x234b   :  { %v5172_v54 = vadd.f32 %v5170_v10, %v5164_v4  ;;  %v5190_v53 = vadd.f32 %v5188_v52, %v5182_v42  ;;  %v5181_v32 = vmul.f32 %v15298_v34, %v5134_v8  ;;  %8535 = vmatprep.subr.mxu0 %v14354_v43  ;;  %v5193_v11 = vmul.f32 %v5191_v1, %v5141_v41 }
0x234c   :  { %v5171_v40 = vadd.f32 %v5169_v38, %v5163_v22  ;;  %v5200_v44 = vmul.f32 %v15312_v19, %v5134_v8  ;;  %v5208_v14 = vmul.f32 %v5206_v15, %v5148_v16  ;;  %8536 = vmatpush3.msra.mxu0 %v14361_v20  ;;  %v5199_v62 = vmul.f32 %v15156_v12, %v5134_v8  ;;  %v18286_v15 = vld [vmem:[#allocation73_spill] sm:$0xff] }
0x234d   :  { %v5178_v27 = vadd.f32 %v5176_v35, %v5172_v54  ;;  %v5196_v55 = vadd.f32 %v5194_v13, %v5190_v53  ;;  %v5189_v18 = vadd.f32 %v5187_v28, %v5181_v32  ;;  %8537 = vmatprep.subr.mxu0 %v14368_v60  ;;  %v5207_v34 = vmul.f32 %v15202_v6, %v5148_v16  ;;  %v15408_v60 = vld [vmem:[%s17095_s12 + $0x478] sm:$0xff]  ;;  %v15434_v6 = vld [vmem:[%s17095_s12 + $0x468] sm:$0xff]  ;;  %v18289_v28 = vld [vmem:[#allocation10_spill] sm:$0xff] }
0x234e   :  { %v5177_v30 = vadd.f32 %v5175_v31, %v5171_v40  ;;  %v5210_v37 = vadd.f32 %v5208_v14, %v5200_v44  ;;  %8538 = vmatpush3.msra.mxu0 %v14375_v2  ;;  %v5214_v1 = vmul.f32 %v5212_v63, %v5141_v41  ;;  %v5213_v19 = vmul.f32 %v15191_v61, %v5141_v41  ;;  %v15427_v61 = vld [vmem:[%s17095_s12 + $0x4e8] sm:$0xff]  ;;  %v15441_v63 = vld [vmem:[%s17095_s12 + $0x4e0] sm:$0xff]  ;;  %v18284_v16 = vld [vmem:[#allocation71_spill] sm:$0xff]  ;;  %v5612_v14 = vpop.permute.xlu0 %5611 }
0x234f   :  { %5421 = vmatprep.mubr.f32.mxu1 %v5178_v27  ;;  %v5195_v43 = vadd.f32 %v5193_v11, %v5189_v18  ;;  %8539 = vmatprep.subr.mxu0 %v14382_v36  ;;  %v5209_v20 = vadd.f32 %v5207_v34, %v5199_v62  ;;  %v15414_v36 = vld [vmem:[%s17095_s12 + $0x4f0] sm:$0xff]  ;;  %v18285_v41 = vld [vmem:[#allocation72_spill] sm:$0xff]  ;;  %v18288_v8 = vld [vmem:[#allocation9_spill] sm:$0xff]  ;;  %v5576_v11 = vpop.permute.xlu1 %5575 }
0x2350   :  { %5491 = vmatprep.mubr.f32.mxu0 %v5196_v55  ;;  %8540 = vmatpush3.msra.mxu0 %v14389_v0  ;;  %v5216_v12 = vadd.f32 %v5214_v1, %v5210_v37  ;;  %v15420_v0 = vld [vmem:[%s17095_s12 + $0x470] sm:$0xff] }
0x2351   :  { %5422 = vmatmul.mubr.f32.vlgmr.msra.gmra.mxu1 %v5177_v30  ;;  %5492 = vmatmul.mubr.f32.vlgmr.msra.gmra.mxu0 %v5195_v43  ;;  %v5215_v2 = vadd.f32 %v5213_v19, %v5209_v20  ;;  %v5606_v30 = vld [vmem:[%s17083_s0] sm:$0x3] }
0x2352   :  { %8545 = vmatpush3.msra.mxu1 %v15408_v60  ;;  %5561 = vmatprep.mubr.f32.mxu1 %v5216_v12 }
0x2353   :  { %8546 = vmatprep.subr.mxu1 %v15414_v36  ;;  %9121 = vmatprep.subr.bf16.mxu0 %v17613_v58 }
0x2354   :  { %8547 = vmatpush3.msra.mxu1 %v15420_v0  ;;  %9122 = vmatpush3.bf16.msra.mxu0 %v14402_v48  ;;  %v15449_v48 = vld [vmem:[%s17095_s12 + $0x460] sm:$0xff] }
0x2355   :  { %8548 = vmatprep.subr.mxu1 %v15427_v61  ;;  %9123 = vmatprep.subr.bf16.mxu0 %v17613_v58 }
0x2356   :  { %8549 = vmatpush3.msra.mxu1 %v15434_v6  ;;  %9125 = vmatprep.mubr.msk.bf16.mxu0 %vm9898_vm2, %v17613_v58 }
0x2357   :  { %8550 = vmatprep.subr.mxu1 %v15441_v63 }
0x2358   :  { %8551 = vmatpush3.msra.mxu1 %v15449_v48  ;;  %9124 = vmatpush3.bf16.msra.mxu0 %v14420_v26  ;;  %v18274_v26 = vld [vmem:[#allocation55_spill] sm:$0xff] }
0x2359   :  { %8552 = vmatprep.subr.mxu1 %v14414_v23  ;;  %9129 = vmatprep.subr.bf16.mxu0 %v17613_v58  ;;  %v18273_v23 = vld [vmem:[#allocation54_spill] sm:$0xff] }
0x235a   :  { %8553 = vmatpush3.msra.mxu1 %v14426_v33  ;;  %v18275_v33 = vld [vmem:[#allocation56_spill] sm:$0xff] }
0x235b   :  { %8554 = vmatprep.subr.mxu1 %v14433_v45  ;;  %v18276_v45 = vld [vmem:[#allocation57_spill] sm:$0xff] }
0x235c   :  { %8555 = vmatpush3.msra.mxu1 %v14439_v50  ;;  %v18277_v50 = vld [vmem:[#allocation58_spill] sm:$0xff] }
0x235d   :  { %8556 = vmatprep.subr.mxu1 %v14445_v24  ;;  %v18278_v24 = vld [vmem:[#allocation62_spill] sm:$0xff] }
0x235e   :  { %8557 = vmatpush3.msra.mxu1 %v14451_v51  ;;  %v18279_v51 = vld [vmem:[#allocation63_spill] sm:$0xff] }
0x235f   :  { %8558 = vmatprep.subr.mxu1 %v14457_v29  ;;  %v18280_v29 = vld [vmem:[#allocation64_spill] sm:$0xff] }
0x2360   :  { %8559 = vmatpush3.msra.mxu1 %v14463_v9  ;;  %v18281_v9 = vld [vmem:[#allocation65_spill] sm:$0xff] }
0x2361   :  { %8560 = vmatprep.subr.mxu1 %v14469_v49  ;;  %v18282_v49 = vld [vmem:[#allocation66_spill] sm:$0xff] }
0x2362   :  { %8561 = vmatpush3.msra.mxu1 %v14475_v57  ;;  %v18283_v57 = vld [vmem:[#allocation67_spill] sm:$0xff] }
0x2363   :  { %8562 = vmatprep.subr.mxu1 %v18273_v23 }
0x2364   :  { %8563 = vmatpush3.msra.mxu1 %v18274_v26  ;;  %v5608_v26 = vld [vmem:[%s17085_s2] sm:$0x3] }
0x2365   :  { %8564 = vmatprep.subr.mxu1 %v18275_v33 }
0x2366   :  { %8565 = vmatpush3.msra.mxu1 %v18276_v45 }
0x2367   :  { %8566 = vmatprep.subr.mxu1 %v18277_v50 }
0x2368   :  { %8567 = vmatpush3.msra.mxu1 %v18278_v24 }
0x2369   :  { %8568 = vmatprep.subr.mxu1 %v18279_v51 }
0x236a   :  { %8569 = vmatpush3.msra.mxu1 %v18280_v29 }
0x236b   :  { %8570 = vmatprep.subr.mxu1 %v18281_v9 }
0x236c   :  { %8571 = vmatpush3.msra.mxu1 %v18282_v49 }
0x236d   :  { %8572 = vmatprep.subr.mxu1 %v18283_v57 }
0x236e   :  { %8573 = vmatpush3.msra.mxu1 %v18284_v16  ;;  %v18291_v16 = vld [vmem:[#allocation77_spill] sm:$0xff] }
0x236f   :  { %8574 = vmatprep.subr.mxu1 %v18285_v41  ;;  %v18292_v41 = vld [vmem:[#allocation78_spill] sm:$0xff] }
0x2370   :  { %8575 = vmatpush3.msra.mxu1 %v18286_v15  ;;  %v18293_v15 = vld [vmem:[#allocation79_spill] sm:$0xff] }
0x2371   :  { %5562 = vmatmul.mubr.f32.vlgmr.msra.gmra.mxu1 %v5215_v2  ;;  %5798 = vmatprep.subr.bf16.mxu1 %v18287_v59 }
0x2372   :  { %5799 = vmatpush1.bf16.msra.mxu1 %v18288_v8  ;;  %5816 = vmatprep.mubr.bf16.mxu1 %v17628_v5 }
0x2373   :  { %5839 = vmatprep.subr.bf16.mxu1 %v18289_v28 }
0x23e9   :  { %v8436_v56 = vpop.f32.mrf.mxu1 }
0x23eb   :  { %v8437_v3 = vpop.f32.mrf.mxu1 }
0x23ec   :  { %v8438_v21 = vadd.f32 %v8437_v3, %v8436_v56  ;;  %v18294_v56 = vld [vmem:[#allocation80_spill] sm:$0xff] }
0x23f1   :  { %v8471_v10 = vpop.f32.mrf.mxu0 }
0x23f3   :  { %v8472_v4 = vpop.f32.mrf.mxu0 }
0x23f4   :  { %v8473_v42 = vadd.f32 %v8472_v4, %v8471_v10  ;;  %v18297_v10 = vld [vmem:[#allocation82_spill] sm:$0xff] }
0x23f6   :  { %v5354_v7 = vadd.f32 %v8473_v42, %v8438_v21 }
0x2411   :  { %v8506_v46 = vpop.f32.mrf.mxu1  ;;  %v8541_v52 = vpop.f32.mrf.mxu0 }
0x2413   :  { %v8507_v35 = vpop.f32.mrf.mxu1  ;;  %v8542_v22 = vpop.f32.mrf.mxu0 }
0x2414   :  { %v8508_v13 = vadd.f32 %v8507_v35, %v8506_v46  ;;  %v8543_v53 = vadd.f32 %v8542_v22, %v8541_v52 }
0x2416   :  { %v5424_v38 = vadd.f32 %v8508_v13, %v5354_v7  ;;  %v18298_v13 = vld [vmem:[#allocation13_spill] sm:$0xff]  ;;  %v15544_v7 = vld [vmem:[%s17095_s12 + $0xf8] sm:$0xff] }
0x2418   :  { %v5494_v32 = vadd.f32 %v8543_v53, %v5424_v38  ;;  %v18299_v38 = vld [vmem:[#allocation83_spill] sm:$0xff] }
0x2431   :  { %v8576_v54 = vpop.f32.mrf.mxu1 }
0x2433   :  { %v8577_v31 = vpop.f32.mrf.mxu1 }
0x2434   :  { %v8578_v40 = vadd.f32 %v8577_v31, %v8576_v54 }
0x2436   :  { %v5564_v44 = vadd.f32 %v8578_v40, %v5494_v32 }
0x2438   :  { %v15482_v27 = vadd.f32 %v5576_v11, %v5564_v44  ;;  %v15485_v55 = vadd.f32 %v5564_v44, %v11077_v25 }
0x243a   :  { %v5614_v18 = vadd.f32 %v5612_v14, %v15485_v55  ;;  %5622 = vrot.lane.b32.xlu1 %v15482_v27, %s9901_s27 }
0x243c   :  { %9248 = vrcp.f32 %v5614_v18 }
0x2449   :  { %v9249_v62 = vpop.eup %9248 }
0x244a   :  { %5618 = vrot.lane.b32.xlu0 %v9249_v62, %s9896_s4  ;;  %v15498_v20 = vmul.f32 %v9249_v62, %v15485_v55 }
0x244c   :  { %v5644_v11 = vmul.f32 %v15498_v20, %v15485_v55 }
0x24ac   :  { %v5623_v37 = vpop.permute.xlu1 %5622 }
0x24ad   :  { %v5625_v34 = vsub.f32 %v5606_v30, %v5623_v37 }
0x24af   :  { %5631 = vrot.lane.b32.xlu0 %v5625_v34, %s9901_s27  ;;  %5627 = vrot.lane.b32.xlu1 %v5625_v34, %s9902_s28 }
0x24bc   :  { %v5619_v43 = vpop.permute.xlu0 %5618 }
0x24bd   :  { %v5621_v1 = vmul.f32 %v5619_v43, %v15485_v55 }
0x24bf   :  { %v5645_v44 = vmul.f32 %v5621_v1, %v15485_v55 }
0x2521   :  { %v5632_v19 = vpop.permute.xlu0 %5631  ;;  %v5628_v12 = vpop.permute.xlu1 %5627 }
0x2522   :  { %v5634_v2 = vmul.f32 %v5632_v19, %v5621_v1  ;;  %v5630_v23 = vmul.f32 %v5628_v12, %v15498_v20 }
0x2524   :  { %5640 = vrot.lane.b32.xlu0 %v5634_v2, %s9906_s20  ;;  %5636 = vrot.lane.b32.xlu1 %v5630_v23, %s9901_s27 }
0x2528   :  { %5664 = vrot.lane.b32.xlu0 %v5608_v26, %s9905_s19  ;;  %5661 = vrot.lane.b32.xlu1 %v5608_v26, %s9896_s4 }
0x2596   :  { %v5641_v33 = vpop.permute.xlu0 %5640  ;;  %v5637_v45 = vpop.permute.xlu1 %5636 }
0x2597   :  { %v5643_v51 = vsel %vm271_vm4, %v5637_v45, %v5641_v33 }
0x259a   :  { %v5665_v50 = vpop.permute.xlu0 %5664  ;;  %v5662_v24 = vpop.permute.xlu1 %5661 }
0x259b   :  { %v15510_v29 = vsel %vm271_vm4, %v5662_v24, %v5665_v50 }
0x259c   :  { %v5668_v9 = vmul.f32 %v15510_v29, %v5643_v51 }
0x259e   :  { %v15514_v49 = vadd.f32 %v5668_v9, %v15482_v27  ;;  %v18302_v9 = vld [vmem:[#allocation84_spill] sm:$0xff] }
0x25a0   :  { %18290 = vst [vmem:[#allocation25_spill] sm:$0xff] %v15514_v49  ;;  %v5680_v57 = vpack.c.bf16 %v15514_v49, %v15514_v49 }
0x25a2   :  { %9126 = vmatmul.mubr.msk.bf16.vlgmr.msra.gmra.mxu0 %vm289_vm5, %v5680_v57  ;;  %v18303_v57 = vld [vmem:[#allocation85_spill] sm:$0xff] }
0x25a3   :  { %9130 = vmatpush3.bf16.msra.mxu0 %v10019_v17  ;;  %9145 = vmatprep.mubr.msk.bf16.mxu0 %vm9898_vm2, %v17613_v58 }
0x25a4   :  { %9131 = vmatprep.subr.bf16.mxu0 %v17613_v58 }
0x25a7   :  { %9132 = vmatpush3.bf16.msra.mxu0 %v14620_v39  ;;  %v18295_v39 = vld [vmem:[#allocation81_spill] sm:$0xff] }
0x25a8   :  { %9133 = vmatprep.subr.bf16.mxu0 %v17613_v58 }
0x25ab   :  { %9134 = vmatpush3.bf16.msra.mxu0 %v14627_v47  ;;  %v18296_v47 = vld [vmem:[#allocation12_spill] sm:$0xff] }
0x25ac   :  { %9135 = vmatprep.subr.bf16.mxu0 %v17613_v58 }
0x25af   :  { %9136 = vmatpush3.bf16.msra.mxu0 %v18291_v16  ;;  %v18304_v16 = vld [vmem:[#allocation86_spill] sm:$0xff] }
0x25b0   :  { %9137 = vmatprep.subr.bf16.mxu0 %v17613_v58 }
0x25b3   :  { %9138 = vmatpush3.bf16.msra.mxu0 %v18292_v41  ;;  %v18305_v41 = vld [vmem:[#allocation87_spill] sm:$0xff] }
0x25b4   :  { %9139 = vmatprep.subr.bf16.mxu0 %v17613_v58 }
0x25b7   :  { %9140 = vmatpush3.bf16.msra.mxu0 %v18293_v15  ;;  %v18306_v15 = vld [vmem:[#allocation88_spill] sm:$0xff] }
0x25b8   :  { %9141 = vmatprep.subr.bf16.mxu0 %v17613_v58 }
0x25bb   :  { %9142 = vmatpush3.bf16.msra.mxu0 %v18294_v56  ;;  %v18307_v56 = vld [vmem:[#allocation89_spill] sm:$0xff] }
0x25bc   :  { %9143 = vmatprep.subr.bf16.mxu0 %v17613_v58 }
0x25bf   :  { %9144 = vmatpush3.bf16.msra.mxu0 %v18295_v39  ;;  %v18308_v39 = vld [vmem:[#allocation15_spill] sm:$0xff] }
0x25c0   :  { %5880 = vmatprep.subr.bf16.mxu0 %v18296_v47 }
0x2662   :  { %v5718_v3 = vpop.f32.mrf.mxu0 }
0x2663   :  { %v5719_v46 = vadd.f32 %v18297_v10, %v5718_v3  ;;  %v18309_v3 = vld [vmem:[#allocation90_spill] sm:$0xff]  ;;  %v18310_v10 = vld [vmem:[#allocation91_spill] sm:$0xff] }
0x2664   :  { %v9127_v4 = vpop.f32.mrf.mxu0 }
0x2665   :  { %9250 = vtanh.f32 %v5719_v46  ;;  %v18311_v46 = vld [vmem:[#allocation92_spill] sm:$0xff]  ;;  %v18312_v4 = vld [vmem:[#allocation93_spill] sm:$0xff] }
0x2666   :  { %v5721_v35 = vpop.f32.mrf.mxu0 }
0x2667   :  { %v18313_v35 = vld [vmem:[#allocation94_spill] sm:$0xff] }
0x2668   :  { %v9128_v42 = vpop.f32.mrf.mxu0 }
0x2669   :  { %v18314_v42 = vld [vmem:[#allocation95_spill] sm:$0xff] }
0x2672   :  { %v9251_v52 = vpop.eup %9250 }
0x2673   :  { %v5725_v21 = vpack.c.bf16 %v9251_v52, %v9251_v52  ;;  %v18315_v52 = vld [vmem:[#allocation96_spill] sm:$0xff] }
0x2675   :  { %9146 = vmatmul.mubr.msk.bf16.vlgmr.msra.gmra.mxu0 %vm419_vm6, %v5725_v21  ;;  %v18316_v21 = vld [vmem:[#allocation97_spill] sm:$0xff] }
0x2676   :  { %5881 = vmatpush1.bf16.msra.mxu0 %v18298_v13  ;;  %5898 = vmatprep.mubr.bf16.mxu0 %v17628_v5 }
0x2677   :  { %8591 = vmatprep.subr.mxu0 %v15544_v7 }
0x2735   :  { %v5763_v22 = vpop.f32.mrf.mxu0 }
0x2736   :  { %v5764_v54 = vadd.f32 %v18299_v38, %v5763_v22  ;;  %v18317_v22 = vld [vmem:[#allocation98_spill] sm:$0xff]  ;;  %v18318_v38 = vld [vmem:[#allocation99_spill] sm:$0xff] }
0x2737   :  { %v9147_v53 = vpop.f32.mrf.mxu0 }
0x2738   :  { %v5769_v31 = vsel %vm467_vm7, %v5764_v54, -inf  ;;  %v18320_v53 = vld [vmem:[#allocation101_spill] sm:$0xff] }
0x2739   :  { %5770 = vmax.xlane.f32.xlu1 %v5769_v31  ;;  %v5766_v32 = vpop.f32.mrf.mxu0  ;;  %v18321_v31 = vld [vmem:[#allocation102_spill] sm:$0xff] }
0x273a   :  { %v18322_v32 = vld [vmem:[#allocation103_spill] sm:$0xff] }
0x273b   :  { %v9148_v40 = vpop.f32.mrf.mxu0 }
0x273c   :  { %v18323_v40 = vld [vmem:[#allocation104_spill] sm:$0xff] }
0x274a   :  { %5651 = vrot.lane.b32.xlu1 %v5644_v11, %s9901_s27  ;;  %v18324_v11 = vld [vmem:[#allocation105_spill] sm:$0xff] }
0x274e   :  { %5655 = vrot.lane.b32.xlu1 %v5645_v44, %s9906_s20  ;;  %v18325_v44 = vld [vmem:[#allocation106_spill] sm:$0xff] }
0x27c2   :  { %v5771_v14 = vpop.xlane.xlu1 %5770 }
0x27c3   :  { %v5772_v18 = vsub.f32 %v5764_v54, %v5771_v14  ;;  %v18319_v54 = vld [vmem:[#allocation100_spill] sm:$0xff]  ;;  %v18326_v14 = vld [vmem:[#allocation107_spill] sm:$0xff] }
0x27c5   :  { %v5773_v62 = vmul.f32 1.442695, %v5772_v18  ;;  %v18327_v18 = vld [vmem:[#allocation108_spill] sm:$0xff] }
0x27c6   :  { %v5652_v34 = vpop.permute.xlu1 %5651 }
0x27c7   :  { %9252 = vpow2.f32 %v5773_v62  ;;  %v18328_v62 = vld [vmem:[#allocation109_spill] sm:$0xff] }
0x27ca   :  { %v5656_v19 = vpop.permute.xlu1 %5655 }
0x27cb   :  { %v5658_v2 = vsel %vm271_vm4, %v5652_v34, %v5656_v19  ;;  %v18331_v34 = vld [vmem:[#allocation112_spill] sm:$0xff]  ;;  %v18334_v19 = vld [vmem:[#allocation115_spill] sm:$0xff] }
0x27d4   :  { %v9253_v30 = vpop.eup %9252 }
0x27d5   :  { %v5775_v37 = vsel %vm467_vm7, %v9253_v30, 0.0 }
0x27d6   :  { %5776 = vadd.xlane.f32.xlu0 %v5775_v37  ;;  %v18330_v37 = vld [vmem:[#allocation111_spill] sm:$0xff] }
0x27ec   :  { %5646 = vrot.lane.b32.xlu0 %v15485_v55, %s9901_s27 }
0x27f0   :  { %5670 = vrot.lane.b32.xlu0 %v5608_v26, %s9902_s28 }
0x27f4   :  { %5949 = vrot.lane.b32.xlu0 %v15514_v49, %s9900_s26 }
0x27f8   :  { %5952 = vrot.lane.b32.xlu0 %v15514_v49, %s9896_s4 }
0x27fc   :  { %5958 = vrot.lane.b32.xlu0 %v15514_v49, %s9902_s28 }
0x2800   :  { %5964 = vrot.lane.b32.xlu0 %v15514_v49, %s9901_s27 }
0x285f   :  { %v5777_v43 = vpop.xlane.xlu0 %5776 }
0x2860   :  { %9254 = vrcp.f32 %v5777_v43  ;;  %v18332_v43 = vld [vmem:[#allocation113_spill] sm:$0xff] }
0x2863   :  { %v5647_v1 = vpop.permute.xlu0 %5646 }
0x2864   :  { %v5649_v12 = vmul.f32 %v5647_v1, %v15498_v20  ;;  %v18300_v20 = vld [vmem:[#allocation11_spill] sm:$0xff]  ;;  %v18333_v1 = vld [vmem:[#allocation114_spill] sm:$0xff] }
0x2866   :  { %v5659_v26 = vsel %vm289_vm5, %v5658_v2, %v5649_v12  ;;  %v18335_v12 = vld [vmem:[#allocation116_spill] sm:$0xff]  ;;  %v18336_v2 = vld [vmem:[#allocation117_spill] sm:$0xff] }
0x2867   :  { %v5671_v23 = vpop.permute.xlu0 %5670 }
0x2868   :  { %v5673_v33 = vsel %vm289_vm5, %v15510_v29, %v5671_v23  ;;  %v18301_v29 = vld [vmem:[#allocation14_spill] sm:$0xff] }
0x2869   :  { %v5674_v45 = vmul.f32 %v5673_v33, %v5659_v26  ;;  %v18337_v23 = vld [vmem:[#allocation118_spill] sm:$0xff]  ;;  %v18338_v26 = vld [vmem:[#allocation119_spill] sm:$0xff]  ;;  %v18339_v33 = vld [vmem:[#allocation120_spill] sm:$0xff] }
0x286b   :  { %5676 = vrot.lane.b32.xlu1 %v5674_v45, %s9896_s4  ;;  %v18340_v45 = vld [vmem:[#allocation121_spill] sm:$0xff] }
0x286d   :  { %v9255_v50 = vpop.eup %9254 }
0x286e   :  { %v5779_v24 = vmul.f32 %v9255_v50, %v9253_v30  ;;  %v18329_v30 = vld [vmem:[#allocation110_spill] sm:$0xff] }
0x286f   :  { %5967 = vrot.lane.b32.xlu1 %v15514_v49, %s9899_s21  ;;  %v18341_v50 = vld [vmem:[#allocation122_spill] sm:$0xff] }
0x2870   :  { %v5780_v51 = vpack.c.bf16 %v5779_v24, %v5779_v24  ;;  %v18342_v24 = vld [vmem:[#allocation123_spill] sm:$0xff] }
0x2872   :  { %7445 = vmatmul.mubr.msk.bf16.vlgmr.msra.gmra.mxu1 %vm512_vm10, %v5780_v51  ;;  %7447 = vmatmul.mubr.msk.bf16.vlgmr.msra.gmra.mxu0 %vm512_vm10, %v5780_v51 }
0x2873   :  { %5955 = vrot.lane.b32.xlu1 %v15514_v49, %s9905_s19  ;;  %5840 = vmatpush1.bf16.msra.mxu1 %v18300_v20 }
0x2874   :  { %5857 = vmatprep.mubr.bf16.mxu1 %v17628_v5  ;;  %5921 = vmatprep.subr.bf16.mxu1 %v18301_v29 }
0x2875   :  { %8592 = vmatpush3.msra.mxu0 %v18302_v9  ;;  %v18344_v9 = vld [vmem:[#allocation125_spill] sm:$0xff] }
0x2876   :  { %8593 = vmatprep.subr.mxu0 %v18303_v57  ;;  %v18345_v57 = vld [vmem:[#allocation126_spill] sm:$0xff] }
0x2877   :  { %5961 = vrot.lane.b32.xlu1 %v15514_v49, %s9906_s20  ;;  %8594 = vmatpush3.msra.mxu0 %v18304_v16  ;;  %v18346_v16 = vld [vmem:[#allocation127_spill] sm:$0xff] }
0x2878   :  { %8595 = vmatprep.subr.mxu0 %v18305_v41  ;;  %v18347_v41 = vld [vmem:[#allocation128_spill] sm:$0xff] }
0x2879   :  { %8596 = vmatpush3.msra.mxu0 %v18306_v15  ;;  %v18348_v15 = vld [vmem:[#allocation129_spill] sm:$0xff] }
0x287a   :  { %7446 = vmatmul.mubr.msk.bf16.vlgmr.msra.gmra.mxu1 %vm512_vm10, %v5780_v51  ;;  %8597 = vmatprep.subr.mxu0 %v18307_v56  ;;  %v18349_v56 = vld [vmem:[#allocation130_spill] sm:$0xff] }
0x287b   :  { %5922 = vmatpush1.bf16.msra.mxu1 %v18308_v39  ;;  %5939 = vmatprep.mubr.bf16.mxu1 %v17628_v5 }
0x287c   :  { %8598 = vmatpush3.msra.mxu0 %v18309_v3  ;;  %8626 = vmatprep.subr.mxu1 %v18310_v10  ;;  %v18350_v3 = vld [vmem:[#allocation131_spill] sm:$0xff]  ;;  %v18351_v10 = vld [vmem:[#allocation132_spill] sm:$0xff] }
0x287d   :  { %8599 = vmatprep.subr.mxu0 %v18311_v46  ;;  %v18352_v46 = vld [vmem:[#allocation133_spill] sm:$0xff] }
0x287e   :  { %8600 = vmatpush3.msra.mxu0 %v18312_v4  ;;  %v18353_v4 = vld [vmem:[#allocation134_spill] sm:$0xff] }
0x287f   :  { %8601 = vmatprep.subr.mxu0 %v18313_v35  ;;  %v18354_v35 = vld [vmem:[#allocation136_spill] sm:$0xff] }
0x2880   :  { %8602 = vmatpush3.msra.mxu0 %v18314_v42  ;;  %v18355_v42 = vld [vmem:[#allocation137_spill] sm:$0xff] }
0x2881   :  { %8603 = vmatprep.subr.mxu0 %v18315_v52  ;;  %v18356_v52 = vld [vmem:[#allocation138_spill] sm:$0xff] }
0x2882   :  { %7448 = vmatmul.mubr.msk.bf16.vlgmr.msra.gmra.mxu1 %vm512_vm10, %v5780_v51  ;;  %8604 = vmatpush3.msra.mxu0 %v18316_v21  ;;  %v18343_v51 = vld [vmem:[#allocation124_spill] sm:$0xff]  ;;  %v18357_v21 = vld [vmem:[#allocation139_spill] sm:$0xff] }
0x2883   :  { %8627 = vmatpush3.msra.mxu1 %v18317_v22  ;;  %8605 = vmatprep.subr.mxu0 %v18318_v38  ;;  %v18358_v22 = vld [vmem:[#allocation140_spill] sm:$0xff]  ;;  %v18359_v38 = vld [vmem:[#allocation141_spill] sm:$0xff] }
0x2884   :  { %8628 = vmatprep.subr.mxu1 %v18319_v54  ;;  %8606 = vmatpush3.msra.mxu0 %v18320_v53  ;;  %v18360_v54 = vld [vmem:[#allocation143_spill] sm:$0xff]  ;;  %v18361_v53 = vld [vmem:[#allocation144_spill] sm:$0xff] }
0x2885   :  { %8629 = vmatpush3.msra.mxu1 %v18321_v31  ;;  %8607 = vmatprep.subr.mxu0 %v18322_v32  ;;  %v18362_v31 = vld [vmem:[#allocation145_spill] sm:$0xff]  ;;  %v18363_v32 = vld [vmem:[#allocation146_spill] sm:$0xff] }
0x2886   :  { %8630 = vmatprep.subr.mxu1 %v18323_v40  ;;  %8608 = vmatpush3.msra.mxu0 %v18324_v11  ;;  %v18364_v40 = vld [vmem:[#allocation147_spill] sm:$0xff]  ;;  %v18365_v11 = vld [vmem:[#allocation148_spill] sm:$0xff] }
0x2887   :  { %8631 = vmatpush3.msra.mxu1 %v18325_v44  ;;  %8609 = vmatprep.subr.mxu0 %v18326_v14  ;;  %v18366_v44 = vld [vmem:[#allocation149_spill] sm:$0xff]  ;;  %v18367_v14 = vld [vmem:[#allocation150_spill] sm:$0xff] }
0x2888   :  { %8632 = vmatprep.subr.mxu1 %v18327_v18  ;;  %8610 = vmatpush3.msra.mxu0 %v18328_v62 }
0x2889   :  { %8633 = vmatpush3.msra.mxu1 %v18329_v30  ;;  %8611 = vmatprep.subr.mxu0 %v18330_v37  ;;  %v18369_v30 = vld [vmem:[#allocation152_spill] sm:$0xff] }
0x288a   :  { %8634 = vmatprep.subr.mxu1 %v18331_v34  ;;  %8612 = vmatpush3.msra.mxu0 %v18332_v43  ;;  %v6485_v37 = vld [vmem:[%s17084_s1] sm:$0x3]  ;;  %v5950_v34 = vpop.permute.xlu0 %5949 }
0x288b   :  { %8635 = vmatpush3.msra.mxu1 %v18333_v1  ;;  %8613 = vmatprep.subr.mxu0 %v18334_v19 }
0x288c   :  { %8636 = vmatprep.subr.mxu1 %v18335_v12  ;;  %8614 = vmatpush3.msra.mxu0 %v18336_v2 }
0x288d   :  { %8637 = vmatpush3.msra.mxu1 %v18337_v23  ;;  %8615 = vmatprep.subr.mxu0 %v18338_v26  ;;  %v5970_v23 = vsel %vm271_vm4, %v15514_v49, %v5950_v34 }
0x288e   :  { %8638 = vmatprep.subr.mxu1 %v18339_v33  ;;  %8616 = vmatpush3.msra.mxu0 %v18340_v45  ;;  %v5953_v19 = vpop.permute.xlu0 %5952 }
0x288f   :  { %8639 = vmatpush3.msra.mxu1 %v18341_v50  ;;  %8617 = vmatprep.subr.mxu0 %v18342_v24  ;;  %v5971_v26 = vsel %vm289_vm5, %v5970_v23, %v5953_v19 }
0x2890   :  { %8640 = vmatprep.subr.mxu1 %v18343_v51  ;;  %8618 = vmatpush3.msra.mxu0 %v18344_v9 }
0x2891   :  { %8641 = vmatpush3.msra.mxu1 %v18345_v57  ;;  %8619 = vmatprep.subr.mxu0 %v18346_v16 }
0x2892   :  { %8642 = vmatprep.subr.mxu1 %v18347_v41  ;;  %8620 = vmatpush3.msra.mxu0 %v18348_v15  ;;  %v5959_v24 = vpop.permute.xlu0 %5958 }
0x2893   :  { %8643 = vmatpush3.msra.mxu1 %v18349_v56  ;;  %8621 = vmatprep.subr.mxu0 %v18350_v3 }
0x2894   :  { %8644 = vmatprep.subr.mxu1 %v18351_v10  ;;  %8622 = vmatpush3.msra.mxu0 %v18352_v46 }
0x2895   :  { %8645 = vmatpush3.msra.mxu1 %v18353_v4  ;;  %8661 = vmatprep.subr.mxu0 %v18354_v35 }
0x2896   :  { %8646 = vmatprep.subr.mxu1 %v18355_v42 }
0x2897   :  { %8647 = vmatpush3.msra.mxu1 %v18356_v52  ;;  %v5965_v52 = vpop.permute.xlu0 %5964 }
0x2898   :  { %8648 = vmatprep.subr.mxu1 %v18357_v21 }
0x2899   :  { %8649 = vmatpush3.msra.mxu1 %v18358_v22 }
0x289a   :  { %8650 = vmatprep.subr.mxu1 %v18359_v38 }
0x289b   :  { %8651 = vmatpush3.msra.mxu1 %v18360_v54 }
0x289c   :  { %8652 = vmatprep.subr.mxu1 %v18361_v53 }
0x289d   :  { %8653 = vmatpush3.msra.mxu1 %v18362_v31 }
0x289e   :  { %8654 = vmatprep.subr.mxu1 %v18363_v32 }
0x289f   :  { %8655 = vmatpush3.msra.mxu1 %v18364_v40 }
0x28a0   :  { %8656 = vmatprep.subr.mxu1 %v18365_v11 }
0x28a1   :  { %8657 = vmatpush3.msra.mxu1 %v18366_v44 }
0x28a2   :  { %8696 = vmatprep.subr.mxu1 %v18367_v14 }
0x28dd   :  { %v5677_v18 = vpop.permute.xlu1 %5676 }
0x28de   :  { %v15653_v62 = vsub.f32 %v15485_v55, %v5677_v18 }
0x28e0   :  { %18368 = vst [vmem:[#allocation27_spill] sm:$0xff] %v15653_v62  ;;  %5988 = vrot.lane.b32.xlu0 %v15653_v62, %s9899_s21  ;;  %5985 = vrot.lane.b32.xlu1 %v15653_v62, %s9901_s27 }
0x28e1   :  { %v5968_v43 = vpop.permute.xlu1 %5967 }
0x28e2   :  { %v5977_v1 = vsel %vm271_vm4, %v5968_v43, %v15514_v49  ;;  %v15884_v49 = vld [vmem:[%s17095_s12 + $0x2a8] sm:$0xff] }
0x28e3   :  { %v5978_v2 = vsel %vm289_vm5, %v5977_v1, %v5950_v34  ;;  %18392 = vst [vmem:[#allocation51_spill] sm:$0xff] %v15884_v49 }
0x28e4   :  { %6003 = vrot.lane.b32.xlu0 %v15653_v62, %s9906_s20  ;;  %6000 = vrot.lane.b32.xlu1 %v15653_v62, %s9902_s28  ;;  %v5979_v33 = vsel %vm732_vm11, %v5978_v2, %v5953_v19  ;;  %v18370_v2 = vld [vmem:[#allocation153_spill] sm:$0xff] }
0x28e5   :  { %v5956_v12 = vpop.permute.xlu1 %5955 }
0x28e6   :  { %v5972_v51 = vsel %vm732_vm11, %v5971_v26, %v5956_v12  ;;  %v5980_v15 = vsel %vm734_vm12, %v5979_v33, %v5956_v12  ;;  %v18371_v33 = vld [vmem:[#allocation154_spill] sm:$0xff] }
0x28e7   :  { %v5973_v56 = vsel %vm734_vm12, %v5972_v51, %v5959_v24  ;;  %v5981_v4 = vsel %vm736_vm13, %v5980_v15, %v5959_v24  ;;  %v18372_v15 = vld [vmem:[#allocation155_spill] sm:$0xff] }
0x28e8   :  { %5994 = vrot.lane.b32.xlu0 %v15653_v62, %s9896_s4  ;;  %5991 = vrot.lane.b32.xlu1 %v15653_v62, %s9900_s26 }
0x28e9   :  { %v5962_v9 = vpop.permute.xlu1 %5961 }
0x28ea   :  { %v5974_v46 = vsel %vm736_vm13, %v5973_v56, %v5962_v9  ;;  %v5982_v21 = vsel %vm738_vm14, %v5981_v4, %v5962_v9  ;;  %v18374_v4 = vld [vmem:[#allocation157_spill] sm:$0xff] }
0x28eb   :  { %v5975_v22 = vsel %vm738_vm14, %v5974_v46, %v5965_v52  ;;  %v5983_v53 = vsel %vm740_vm15, %v5982_v21, %v5965_v52  ;;  %v18376_v52 = vld [vmem:[#allocation159_spill] sm:$0xff]  ;;  %v18377_v21 = vld [vmem:[#allocation160_spill] sm:$0xff] }
0x28ec   :  { %5997 = vrot.lane.b32.xlu1 %v15653_v62, %s9905_s19  ;;  %6453 = vrot.lane.b32.xlu0 %v18369_v30, %s9902_s28  ;;  %v5976_v32 = vsel %vm740_vm15, %v5975_v22, %v5968_v43  ;;  %v15740_v22 = vld [vmem:[%s17095_s12 + $0x378] sm:$0xff] }
0x28f0   :  { %6489 = vrot.lane.b32.xlu1 %v6485_v37, %s9905_s19 }
0x2932   :  { %v15682_v45 = vpop.f32.mrf.mxu1  ;;  %v15684_v50 = vpop.f32.mrf.mxu0 }
0x2933   :  { %v15689_v57 = vmul.f32 %v15684_v50, %v15682_v45  ;;  %v6027_v18 = vmul.f32 %v5976_v32, %v15682_v45  ;;  %v6033_v56 = vmul.f32 %v5976_v32, %v15684_v50 }
0x2934   :  { %v15691_v16 = vpop.f32.mrf.mxu1  ;;  %v15693_v41 = vpop.f32.mrf.mxu0 }
0x2935   :  { %v6028_v44 = vmul.f32 %v5976_v32, %v15691_v16  ;;  %v6034_v51 = vmul.f32 %v5976_v32, %v15693_v41  ;;  %v18379_v32 = vld [vmem:[#allocation162_spill] sm:$0xff] }
0x2936   :  { %v5822_v3 = vpop.f32.mrf.mxu1  ;;  %v5904_v10 = vpop.f32.mrf.mxu0 }
0x2937   :  { %v18373_v3 = vld [vmem:[#allocation156_spill] sm:$0xff] }
0x2938   :  { %v5823_v35 = vpop.f32.mrf.mxu1  ;;  %v5905_v42 = vpop.f32.mrf.mxu0 }
0x2939   :  { %v18375_v42 = vld [vmem:[#allocation158_spill] sm:$0xff] }
0x293a   :  { %v15701_v38 = vpop.f32.mrf.mxu1 }
0x293b   :  { %v6081_v54 = vmul.f32 %v15684_v50, %v15701_v38  ;;  %v6029_v40 = vmul.f32 %v5983_v53, %v15701_v38 }
0x293c   :  { %v15706_v31 = vpop.f32.mrf.mxu1 }
0x293d   :  { %v6030_v14 = vmul.f32 %v5983_v53, %v15706_v31  ;;  %v6031_v34 = vadd.f32 %v6029_v40, %v6027_v18  ;;  %v15754_v40 = vld [vmem:[%s17095_s12 + $0x370] sm:$0xff]  ;;  %v15768_v18 = vld [vmem:[%s17095_s12 + $0x368] sm:$0xff] }
0x293e   :  { %v5863_v11 = vpop.f32.mrf.mxu1 }
0x293f   :  { %v6032_v37 = vadd.f32 %v6030_v14, %v6028_v44  ;;  %v18380_v11 = vld [vmem:[#allocation163_spill] sm:$0xff]  ;;  %v15761_v44 = vld [vmem:[%s17095_s12 + $0x3e8] sm:$0xff]  ;;  %v18381_v14 = vld [vmem:[#allocation164_spill] sm:$0xff] }
0x2940   :  { %v5864_v30 = vpop.f32.mrf.mxu1 }
0x2941   :  { %6159 = vmatprep.mubr.f32.mxu0 %v6032_v37  ;;  %v18382_v30 = vld [vmem:[#allocation165_spill] sm:$0xff]  ;;  %v15775_v37 = vld [vmem:[%s17095_s12 + $0x3e0] sm:$0xff] }
0x2942   :  { %v15713_v1 = vpop.f32.mrf.mxu1  ;;  %6160 = vmatmul.mubr.f32.vlgmr.msra.gmra.mxu0 %v6031_v34  ;;  %v18383_v34 = vld [vmem:[#allocation166_spill] sm:$0xff] }
0x2943   :  { %v6079_v19 = vmul.f32 %v15713_v1, %v15682_v45  ;;  %v15719_v43 = vmul.f32 %v15713_v1, %v15701_v38  ;;  %8662 = vmatpush3.msra.mxu0 %v18370_v2  ;;  %v6035_v23 = vmul.f32 %v5983_v53, %v15713_v1 }
0x2944   :  { %v15721_v12 = vpop.f32.mrf.mxu1  ;;  %8663 = vmatprep.subr.mxu0 %v18371_v33  ;;  %v15788_v33 = vld [vmem:[%s17095_s12 + $0x240] sm:$0xff] }
0x2945   :  { %v15725_v26 = vadd.f32 %v6081_v54, %v6079_v19  ;;  %v6036_v9 = vmul.f32 %v5983_v53, %v15721_v12  ;;  %8664 = vmatpush3.msra.mxu0 %v18372_v15  ;;  %v6037_v35 = vadd.f32 %v6035_v23, %v6033_v56  ;;  %v18378_v54 = vld [vmem:[#allocation161_spill] sm:$0xff]  ;;  %v15747_v53 = vld [vmem:[%s17095_s12 + $0x3f0] sm:$0xff]  ;;  %v15782_v19 = vld [vmem:[%s17095_s12 + $0x360] sm:$0xff] }
0x2946   :  { %v5945_v24 = vpop.f32.mrf.mxu1  ;;  %8665 = vmatprep.subr.mxu0 %v18373_v3  ;;  %v15810_v15 = vld [vmem:[%s17095_s12 + $0x358] sm:$0xff]  ;;  %v15821_v3 = vmul.f32 %v15684_v50, %v15684_v50 }
0x2947   :  { %v6038_v46 = vadd.f32 %v6036_v9, %v6034_v51  ;;  %8666 = vmatpush3.msra.mxu0 %v18374_v4  ;;  %v15794_v24 = vld [vmem:[%s17095_s12 + $0x3d8] sm:$0xff]  ;;  %v15805_v9 = vmul.f32 %v15682_v45, %v15682_v45  ;;  %18385 = vst [vmem:[#allocation31_spill] sm:$0xff] %v15810_v15  ;;  %v15834_v4 = vld [vmem:[%s17095_s12 + $0x3d0] sm:$0xff] }
0x2948   :  { %v5946_v10 = vpop.f32.mrf.mxu1  ;;  %8667 = vmatprep.subr.mxu0 %v18375_v42  ;;  %v15800_v51 = vld [vmem:[%s17095_s12 + $0x2b8] sm:$0xff]  ;;  %18387 = vst [vmem:[#allocation35_spill] sm:$0xff] %v15834_v4  ;;  %v15845_v42 = vmul.f32 %v15693_v41, %v15691_v16 }
0x2949   :  { %6229 = vmatprep.mubr.f32.mxu1 %v6038_v46  ;;  %8668 = vmatpush3.msra.mxu0 %v18376_v52  ;;  %18384 = vst [vmem:[#allocation29_spill] sm:$0xff] %v15800_v51  ;;  %v15816_v56 = vld [vmem:[%s17095_s12 + $0x238] sm:$0xff]  ;;  %v15825_v10 = vmul.f32 %v15691_v16, %v15691_v16  ;;  %v15829_v46 = vmul.f32 %v15693_v41, %v15693_v41 }
0x294a   :  { %6230 = vmatmul.mubr.f32.vlgmr.msra.gmra.mxu1 %v6037_v35  ;;  %8669 = vmatprep.subr.mxu0 %v18377_v21  ;;  %18386 = vst [vmem:[#allocation33_spill] sm:$0xff] %v15816_v56  ;;  %v15840_v35 = vld [vmem:[%s17095_s12 + $0x2b0] sm:$0xff]  ;;  %v6043_v52 = vmul.f32 %v15701_v38, %v15682_v45  ;;  %v15851_v21 = vmul.f32 %v15701_v38, %v15701_v38  ;;  %v15873_v38 = vld [vmem:[%s17095_s12 + $0x3c8] sm:$0xff] }
0x294b   :  { %8697 = vmatpush3.msra.mxu1 %v15740_v22  ;;  %8670 = vmatpush3.msra.mxu0 %v18378_v54  ;;  %18388 = vst [vmem:[#allocation37_spill] sm:$0xff] %v15840_v35  ;;  %v15856_v54 = vld [vmem:[%s17095_s12 + $0x350] sm:$0xff]  ;;  %18391 = vst [vmem:[#allocation26_spill] sm:$0xff] %v15873_v38 }
0x294c   :  { %8698 = vmatprep.subr.mxu1 %v15747_v53  ;;  %8671 = vmatprep.subr.mxu0 %v18379_v32  ;;  %18389 = vst [vmem:[#allocation39_spill] sm:$0xff] %v15856_v54 }
0x294d   :  { %8699 = vmatpush3.msra.mxu1 %v15754_v40  ;;  %8672 = vmatpush3.msra.mxu0 %v18380_v11 }
0x294e   :  { %8700 = vmatprep.subr.mxu1 %v15761_v44  ;;  %8673 = vmatprep.subr.mxu0 %v18381_v14  ;;  %v15866_v14 = vld [vmem:[%s17095_s12 + $0x230] sm:$0xff] }
0x294f   :  { %8701 = vmatpush3.msra.mxu1 %v15768_v18  ;;  %8674 = vmatpush3.msra.mxu0 %v18382_v30  ;;  %18390 = vst [vmem:[#allocation46_spill] sm:$0xff] %v15866_v14 }
0x2950   :  { %8702 = vmatprep.subr.mxu1 %v15775_v37  ;;  %8675 = vmatprep.subr.mxu0 %v18383_v34 }
0x2951   :  { %8703 = vmatpush3.msra.mxu1 %v15782_v19  ;;  %8676 = vmatpush3.msra.mxu0 %v15788_v33 }
0x2952   :  { %v5989_v2 = vpop.permute.xlu0 %5988  ;;  %v5986_v23 = vpop.permute.xlu1 %5985  ;;  %8704 = vmatprep.subr.mxu1 %v15794_v24  ;;  %8677 = vmatprep.subr.mxu0 %v15800_v51 }
0x2953   :  { %8705 = vmatpush3.msra.mxu1 %v15810_v15  ;;  %8678 = vmatpush3.msra.mxu0 %v15816_v56  ;;  %v6006_v45 = vsel %vm271_vm4, %v5986_v23, %v5989_v2  ;;  %v6061_v15 = vmul.f32 %v15713_v1, %v15684_v50  ;;  %v15975_v50 = vmul.f32 %v15713_v1, %v15713_v1 }
0x2954   :  { %8706 = vmatprep.subr.mxu1 %v15834_v4  ;;  %8679 = vmatprep.subr.mxu0 %v15840_v35  ;;  %v15894_v35 = vld [vmem:[%s17095_s12 + $0x348] sm:$0xff]  ;;  %v15993_v1 = vmul.f32 %v15721_v12, %v15706_v31 }
0x2955   :  { %8707 = vmatpush3.msra.mxu1 %v15856_v54  ;;  %8680 = vmatpush3.msra.mxu0 %v15866_v14  ;;  %v6044_v14 = vmul.f32 %v15706_v31, %v15691_v16  ;;  %18393 = vst [vmem:[#allocation28_spill] sm:$0xff] %v15894_v35  ;;  %v15900_v4 = vld [vmem:[%s17095_s12 + $0x228] sm:$0xff] }
0x2956   :  { %v15859_v32 = vpop.permute.xlu0 %6003  ;;  %v15861_v11 = vpop.permute.xlu1 %6000  ;;  %8708 = vmatprep.subr.mxu1 %v15873_v38  ;;  %8681 = vmatprep.subr.mxu0 %v15884_v49  ;;  %18394 = vst [vmem:[#allocation30_spill] sm:$0xff] %v15900_v4  ;;  %v6082_v49 = vmul.f32 %v15693_v41, %v15706_v31 }
0x2957   :  { %v6013_v30 = vsel %vm271_vm4, %v15859_v32, %v5986_v23  ;;  %v6020_v34 = vsel %vm271_vm4, %v15861_v11, %v15859_v32  ;;  %8709 = vmatpush3.msra.mxu1 %v15894_v35  ;;  %8682 = vmatpush3.msra.mxu0 %v15900_v4  ;;  %v15917_v35 = vld [vmem:[%s17095_s12 + $0x2a0] sm:$0xff] }
0x2958   :  { %v6014_v54 = vsel %vm289_vm5, %v6013_v30, %v5989_v2  ;;  %v6021_v38 = vsel %vm289_vm5, %v6020_v34, %v5986_v23  ;;  %v15908_v23 = vld [vmem:[%s17095_s12 + $0x3c0] sm:$0xff]  ;;  %18396 = vst [vmem:[#allocation34_spill] sm:$0xff] %v15917_v35  ;;  %8683 = vmatprep.subr.mxu0 %v15917_v35  ;;  %v15938_v35 = vmul.f32 %v15706_v31, %v15706_v31  ;;  %v16007_v31 = vld [vmem:[%s17095_s12 + $0x210] sm:$0xff] }
0x2959   :  { %18395 = vst [vmem:[#allocation32_spill] sm:$0xff] %v15908_v23  ;;  %8710 = vmatprep.subr.mxu1 %v15908_v23  ;;  %v6015_v30 = vsel %vm732_vm11, %v6014_v54, %v15653_v62  ;;  %v6022_v34 = vsel %vm732_vm11, %v6021_v38, %v5989_v2  ;;  %v15923_v4 = vld [vmem:[%s17095_s12 + $0x340] sm:$0xff]  ;;  %v6007_v23 = vsel %vm289_vm5, %v6006_v45, %v15653_v62  ;;  %18405 = vst [vmem:[#allocation47_spill] sm:$0xff] %v16007_v31 }
0x295a   :  { %18397 = vst [vmem:[#allocation36_spill] sm:$0xff] %v15923_v4  ;;  %8711 = vmatpush3.msra.mxu1 %v15923_v4  ;;  %v6023_v2 = vsel %vm734_vm12, %v6022_v34, %v15653_v62  ;;  %v5992_v54 = vpop.permute.xlu1 %5991  ;;  %v15933_v38 = vld [vmem:[%s17095_s12 + $0x220] sm:$0xff]  ;;  %v15943_v4 = vld [vmem:[%s17095_s12 + $0x3b8] sm:$0xff]  ;;  %v5995_v45 = vpop.permute.xlu0 %5994 }
0x295b   :  { %18398 = vst [vmem:[#allocation38_spill] sm:$0xff] %v15933_v38  ;;  %8684 = vmatpush3.msra.mxu0 %v15933_v38  ;;  %18399 = vst [vmem:[#allocation40_spill] sm:$0xff] %v15943_v4  ;;  %8712 = vmatprep.subr.mxu1 %v15943_v4  ;;  %v6008_v34 = vsel %vm732_vm11, %v6007_v23, %v5992_v54  ;;  %v6016_v62 = vsel %vm734_vm12, %v6015_v30, %v5992_v54  ;;  %v15952_v38 = vld [vmem:[%s17095_s12 + $0x298] sm:$0xff] }
0x295c   :  { %v6024_v56 = vsel %vm736_vm13, %v6023_v2, %v5992_v54  ;;  %18400 = vst [vmem:[#allocation41_spill] sm:$0xff] %v15952_v38  ;;  %8685 = vmatprep.subr.mxu0 %v15952_v38  ;;  %v6062_v4 = vmul.f32 %v15721_v12, %v15693_v41  ;;  %v6080_v23 = vmul.f32 %v15721_v12, %v15691_v16  ;;  %v15964_v30 = vld [vmem:[%s17095_s12 + $0x338] sm:$0xff]  ;;  %v15980_v16 = vld [vmem:[%s17095_s12 + $0x3b0] sm:$0xff] }
0x295d   :  { %18401 = vst [vmem:[#allocation42_spill] sm:$0xff] %v15964_v30  ;;  %8713 = vmatpush3.msra.mxu1 %v15964_v30  ;;  %v15970_v2 = vld [vmem:[%s17095_s12 + $0x218] sm:$0xff]  ;;  %18403 = vst [vmem:[#allocation44_spill] sm:$0xff] %v15980_v16  ;;  %v15986_v41 = vld [vmem:[%s17095_s12 + $0x290] sm:$0xff]  ;;  %v6070_v54 = vmul.f32 %v15721_v12, %v15721_v12  ;;  %v6017_v38 = vsel %vm736_vm13, %v6016_v62, %v5995_v45  ;;  %v6046_v12 = vmul.f32 2.0, %v6044_v14 }
0x295e   :  { %18402 = vst [vmem:[#allocation43_spill] sm:$0xff] %v15970_v2  ;;  %8686 = vmatpush3.msra.mxu0 %v15970_v2  ;;  %8714 = vmatprep.subr.mxu1 %v15980_v16  ;;  %18404 = vst [vmem:[#allocation45_spill] sm:$0xff] %v15986_v41  ;;  %v6045_v2 = vmul.f32 2.0, %v6043_v52  ;;  %v15998_v30 = vld [vmem:[%s17095_s12 + $0x330] sm:$0xff]  ;;  %v6009_v16 = vsel %vm734_vm12, %v6008_v34, %v5995_v45  ;;  %v5998_v51 = vpop.permute.xlu1 %5997  ;;  %v16013_v52 = vld [vmem:[%s17095_s12 + $0x3a8] sm:$0xff]  ;;  %v6064_v14 = vmul.f32 2.0, %v6062_v4 }
0x295f   :  { %8687 = vmatprep.subr.mxu0 %v15986_v41  ;;  %8715 = vmatpush3.msra.mxu1 %v15998_v30  ;;  %v6025_v41 = vsel %vm738_vm14, %v6024_v56, %v5995_v45  ;;  %18406 = vst [vmem:[#allocation48_spill] sm:$0xff] %v16013_v52  ;;  %v6010_v62 = vsel %vm736_vm13, %v6009_v16, %v5998_v51  ;;  %v16022_v34 = vld [vmem:[%s17095_s12 + $0x288] sm:$0xff]  ;;  %v16040_v4 = vld [vmem:[%s17095_s12 + $0x3a0] sm:$0xff] }
0x2960   :  { %8688 = vmatpush3.msra.mxu0 %v16007_v31  ;;  %8716 = vmatprep.subr.mxu1 %v16013_v52  ;;  %v6018_v56 = vsel %vm738_vm14, %v6017_v38, %v5998_v51  ;;  %v6026_v45 = vsel %vm740_vm15, %v6025_v41, %v5998_v51  ;;  %v6011_v31 = vsel %vm738_vm14, %v6010_v62, %v15861_v11  ;;  %v16032_v38 = vld [vmem:[%s17095_s12 + $0x328] sm:$0xff] }
0x2961   :  { %8689 = vmatprep.subr.mxu0 %v16022_v34  ;;  %v6019_v52 = vsel %vm740_vm15, %v6018_v56, %v15861_v11  ;;  %8717 = vmatpush3.msra.mxu1 %v16032_v38  ;;  %v6084_v51 = vadd.f32 %v6082_v49, %v6080_v23  ;;  %v6012_v16 = vsel %vm740_vm15, %v6011_v31, %v15859_v32  ;;  %v16046_v11 = vld [vmem:[%s17095_s12 + $0x208] sm:$0xff]  ;;  %v16052_v49 = vld [vmem:[%s17095_s12 + $0x320] sm:$0xff]  ;;  %v16066_v56 = vld [vmem:[%s17095_s12 + $0x398] sm:$0xff] }
0x2962   :  { %v6047_v41 = vmul.f32 %v6045_v2, %v6026_v45  ;;  %8718 = vmatprep.subr.mxu1 %v16040_v4  ;;  %18407 = vst [vmem:[#allocation49_spill] sm:$0xff] %v16046_v11  ;;  %8690 = vmatpush3.msra.mxu0 %v16046_v11  ;;  %v6048_v62 = vmul.f32 %v6046_v12, %v6026_v45  ;;  %18408 = vst [vmem:[#allocation50_spill] sm:$0xff] %v16052_v49  ;;  %v16058_v32 = vld [vmem:[%s17095_s12 + $0x280] sm:$0xff]  ;;  %v6063_v12 = vmul.f32 2.0, %v6061_v15  ;;  %v16080_v15 = vld [vmem:[%s17095_s12 + $0x318] sm:$0xff] }
0x2963   :  { %8719 = vmatpush3.msra.mxu1 %v16052_v49  ;;  %18409 = vst [vmem:[#allocation53_spill] sm:$0xff] %v16058_v32  ;;  %8691 = vmatprep.subr.mxu0 %v16058_v32  ;;  %v6042_v23 = vmul.f32 %v15825_v10, %v6012_v16  ;;  %v6060_v2 = vmul.f32 %v15829_v46, %v6012_v16  ;;  %18410 = vst [vmem:[#allocation52_spill] sm:$0xff] %v16066_v56  ;;  %v16072_v49 = vld [vmem:[%s17095_s12 + $0x200] sm:$0xff]  ;;  %v16086_v11 = vld [vmem:[%s17095_s12 + $0x4f8] sm:$0xff] }
0x2964   :  { %v6066_v31 = vmul.f32 %v6064_v14, %v6026_v45  ;;  %8720 = vmatprep.subr.mxu1 %v16066_v56  ;;  %18411 = vst [vmem:[#allocation54_spill] sm:$0xff] %v16072_v49  ;;  %8692 = vmatpush3.msra.mxu0 %v16072_v49  ;;  %v6054_v10 = vmul.f32 %v15938_v35, %v6019_v52  ;;  %18412 = vst [vmem:[#allocation55_spill] sm:$0xff] %v16080_v15 }
0x2965   :  { %v6072_v32 = vmul.f32 %v6070_v54, %v6019_v52  ;;  %v6041_v46 = vmul.f32 %v15805_v9, %v6012_v16  ;;  %8721 = vmatpush3.msra.mxu1 %v16080_v15  ;;  %v6050_v14 = vadd.f32 %v6048_v62, %v6042_v23  ;;  %18413 = vst [vmem:[#allocation56_spill] sm:$0xff] %v16086_v11  ;;  %v16093_v9 = vld [vmem:[%s17095_s12 + $0x390] sm:$0xff] }
0x2966   :  { %v6068_v56 = vadd.f32 %v6066_v31, %v6060_v2  ;;  %8731 = vmatprep.subr.mxu0 %v16086_v11  ;;  %v6059_v35 = vmul.f32 %v15821_v3, %v6012_v16  ;;  %8722 = vmatprep.subr.mxu1 %v16093_v9  ;;  %v6053_v62 = vmul.f32 %v15851_v21, %v6019_v52  ;;  %v16102_v11 = vld [vmem:[%s17095_s12 + $0x310] sm:$0xff] }
0x2967   :  { %v6049_v54 = vadd.f32 %v6047_v41, %v6041_v46  ;;  %v6065_v23 = vmul.f32 %v6063_v12, %v6026_v45  ;;  %v6078_v2 = vmul.f32 %v15845_v42, %v6012_v16  ;;  %v6085_v31 = vmul.f32 %v15725_v26, %v6026_v45  ;;  %8723 = vmatpush3.msra.mxu1 %v16102_v11  ;;  %v16108_v41 = vld [vmem:[%s17095_s12 + $0x388] sm:$0xff] }
0x2968   :  { %v6056_v3 = vadd.f32 %v6054_v10, %v6050_v14  ;;  %v6074_v15 = vadd.f32 %v6072_v32, %v6068_v56  ;;  %v6086_v49 = vmul.f32 %v6084_v51, %v6026_v45  ;;  %8724 = vmatprep.subr.mxu1 %v16108_v41  ;;  %v6071_v26 = vmul.f32 %v15975_v50, %v6019_v52  ;;  %v16116_v46 = vld [vmem:[%s17095_s12 + $0x308] sm:$0xff]  ;;  %v16123_v32 = vld [vmem:[%s17095_s12 + $0x380] sm:$0xff]  ;;  %v16210_v14 = vld [vmem:[%s17095_s12 + $0x438] sm:$0xff] }
0x2969   :  { %v6055_v42 = vadd.f32 %v6053_v62, %v6049_v54  ;;  %v6067_v21 = vadd.f32 %v6065_v23, %v6059_v35  ;;  %v6077_v12 = vmul.f32 %v15689_v57, %v6012_v16  ;;  %8725 = vmatpush3.msra.mxu1 %v16116_v46  ;;  %v6092_v51 = vmul.f32 %v15993_v1, %v6019_v52  ;;  %v16130_v56 = vld [vmem:[%s17095_s12 + $0x300] sm:$0xff]  ;;  %v16216_v35 = vld [vmem:[%s17095_s12 + $0x4b0] sm:$0xff]  ;;  %v16228_v62 = vld [vmem:[%s17095_s12 + $0x4a8] sm:$0xff] }
0x296a   :  { %6299 = vmatprep.mubr.f32.mxu0 %v6056_v3  ;;  %v6088_v45 = vadd.f32 %v6086_v49, %v6078_v2  ;;  %8726 = vmatprep.subr.mxu1 %v16123_v32  ;;  %v6091_v16 = vmul.f32 %v15719_v43, %v6019_v52  ;;  %v9753_v43 = vld [vmem:[%s17090_s7 + $0x8] sm:$0xff]   ;;  %v16192_v52 = vld [vmem:[%s17095_s12 + $0x4c0] sm:$0xff]  ;;  %18414 = vst [vmem:[#allocation57_spill] sm:$0xff] %v16216_v35  ;;  %v16222_v54 = vld [vmem:[%s17095_s12 + $0x430] sm:$0xff] }
0x296b   :  { %6369 = vmatprep.mubr.f32.mxu1 %v6074_v15  ;;  %v6073_v57 = vadd.f32 %v6071_v26, %v6067_v21  ;;  %v6087_v50 = vadd.f32 %v6085_v31, %v6077_v12  ;;  %8727 = vmatpush3.msra.mxu1 %v16130_v56  ;;  %v16198_v10 = vld [vmem:[%s17095_s12 + $0x440] sm:$0xff]  ;;  %v16204_v15 = vld [vmem:[%s17095_s12 + $0x4b8] sm:$0xff]  ;;  %18415 = vst [vmem:[#allocation58_spill] sm:$0xff] %v16222_v54  ;;  %18416 = vst [vmem:[#allocation62_spill] sm:$0xff] %v16228_v62 }
0x296c   :  { %6300 = vmatmul.mubr.f32.vlgmr.msra.gmra.mxu0 %v6055_v42  ;;  %v6094_v1 = vadd.f32 %v6092_v51, %v6088_v45  ;;  %9149 = vmatprep.subr.bf16.mxu1 %v17613_v58  ;;  %v16234_v23 = vld [vmem:[%s17095_s12 + $0x428] sm:$0xff]  ;;  %v16240_v2 = vld [vmem:[%s17095_s12 + $0x4a0] sm:$0xff]  ;;  %v16252_v3 = vld [vmem:[%s17095_s12 + $0x498] sm:$0xff] }
0x296d   :  { %6370 = vmatmul.mubr.f32.vlgmr.msra.gmra.mxu1 %v6073_v57  ;;  %8732 = vmatpush3.msra.mxu0 %v15408_v60  ;;  %v16134_v49 = vadd.f32 %v6091_v16, %v6087_v50  ;;  %v16152_v60 = vld [vmem:[%s17095_s12 + $0x4d8] sm:$0xff]  ;;  %18417 = vst [vmem:[#allocation63_spill] sm:$0xff] %v16234_v23  ;;  %18418 = vst [vmem:[#allocation64_spill] sm:$0xff] %v16240_v2  ;;  %v16246_v31 = vld [vmem:[%s17095_s12 + $0x420] sm:$0xff] }
0x296e   :  { %8733 = vmatprep.subr.mxu0 %v15414_v36  ;;  %6439 = vmatprep.mubr.f32.mxu0 %v6094_v1  ;;  %v9755_v36 = vld [vmem:[%s17090_s7] sm:$0xff]   ;;  %18419 = vst [vmem:[#allocation65_spill] sm:$0xff] %v16246_v31  ;;  %18420 = vst [vmem:[#allocation66_spill] sm:$0xff] %v16252_v3  ;;  %v16258_v42 = vld [vmem:[%s17095_s12 + $0x418] sm:$0xff] }
0x296f   :  { %8734 = vmatpush3.msra.mxu0 %v15420_v0  ;;  %9150 = vmatpush3.bf16.msra.mxu1 %v9753_v43  ;;  %v16161_v0 = vld [vmem:[%s17095_s12 + $0x458] sm:$0xff]  ;;  %18421 = vst [vmem:[#allocation67_spill] sm:$0xff] %v16258_v42  ;;  %v16264_v21 = vld [vmem:[%s17095_s12 + $0x490] sm:$0xff]  ;;  %v16276_v12 = vld [vmem:[%s17095_s12 + $0x488] sm:$0xff] }
0x2970   :  { %8735 = vmatprep.subr.mxu0 %v15427_v61  ;;  %9151 = vmatprep.subr.bf16.mxu1 %v17613_v58  ;;  %v16168_v61 = vld [vmem:[%s17095_s12 + $0x4d0] sm:$0xff]  ;;  %18422 = vst [vmem:[#allocation71_spill] sm:$0xff] %v16264_v21  ;;  %18424 = vst [vmem:[#allocation73_spill] sm:$0xff] %v16276_v12  ;;  %v16282_v45 = vld [vmem:[%s17095_s12 + $0x408] sm:$0xff] }
0x2971   :  { %8736 = vmatpush3.msra.mxu0 %v15434_v6  ;;  %9153 = vmatprep.mubr.msk.bf16.mxu1 %vm9898_vm2, %v17613_v58  ;;  %v16174_v6 = vld [vmem:[%s17095_s12 + $0x450] sm:$0xff]  ;;  %18425 = vst [vmem:[#allocation8_spill] sm:$0xff] %v16282_v45  ;;  %v16288_v51 = vld [vmem:[%s17095_s12 + $0x480] sm:$0xff] }
0x2972   :  { %8737 = vmatprep.subr.mxu0 %v15441_v63  ;;  %v16180_v63 = vld [vmem:[%s17095_s12 + $0x4c8] sm:$0xff]  ;;  %v16270_v26 = vld [vmem:[%s17095_s12 + $0x410] sm:$0xff]  ;;  %18426 = vst [vmem:[#allocation9_spill] sm:$0xff] %v16288_v51  ;;  %v16294_v57 = vld [vmem:[%s17095_s12 + $0x400] sm:$0xff] }
0x2973   :  { %8738 = vmatpush3.msra.mxu0 %v15449_v48  ;;  %9152 = vmatpush3.bf16.msra.mxu1 %v9755_v36  ;;  %v16186_v48 = vld [vmem:[%s17095_s12 + $0x448] sm:$0xff]  ;;  %18423 = vst [vmem:[#allocation72_spill] sm:$0xff] %v16270_v26  ;;  %18427 = vst [vmem:[#allocation10_spill] sm:$0xff] %v16294_v57 }
0x2974   :  { %8739 = vmatprep.subr.mxu0 %v16152_v60  ;;  %9157 = vmatprep.subr.bf16.mxu1 %v17613_v58 }
0x2975   :  { %8740 = vmatpush3.msra.mxu0 %v16161_v0 }
0x2976   :  { %8741 = vmatprep.subr.mxu0 %v16168_v61 }
0x2977   :  { %8742 = vmatpush3.msra.mxu0 %v16174_v6 }
0x2978   :  { %8743 = vmatprep.subr.mxu0 %v16180_v63 }
0x2979   :  { %8744 = vmatpush3.msra.mxu0 %v16186_v48 }
0x297a   :  { %8745 = vmatprep.subr.mxu0 %v16192_v52 }
0x297b   :  { %8746 = vmatpush3.msra.mxu0 %v16198_v10 }
0x297c   :  { %8747 = vmatprep.subr.mxu0 %v16204_v15 }
0x297d   :  { %8748 = vmatpush3.msra.mxu0 %v16210_v14 }
0x297e   :  { %8749 = vmatprep.subr.mxu0 %v16216_v35 }
0x297f   :  { %8750 = vmatpush3.msra.mxu0 %v16222_v54 }
0x2980   :  { %8751 = vmatprep.subr.mxu0 %v16228_v62  ;;  %v6490_v62 = vpop.permute.xlu1 %6489 }
0x2981   :  { %8752 = vmatpush3.msra.mxu0 %v16234_v23  ;;  %v6454_v23 = vpop.permute.xlu0 %6453 }
0x2982   :  { %8753 = vmatprep.subr.mxu0 %v16240_v2 }
0x2983   :  { %8754 = vmatpush3.msra.mxu0 %v16246_v31 }
0x2984   :  { %8755 = vmatprep.subr.mxu0 %v16252_v3 }
0x2985   :  { %8756 = vmatpush3.msra.mxu0 %v16258_v42 }
0x2986   :  { %8757 = vmatprep.subr.mxu0 %v16264_v21 }
0x2987   :  { %8758 = vmatpush3.msra.mxu0 %v16270_v26 }
0x2988   :  { %8759 = vmatprep.subr.mxu0 %v16276_v12 }
0x2989   :  { %8760 = vmatpush3.msra.mxu0 %v16282_v45 }
0x298a   :  { %8761 = vmatprep.subr.mxu0 %v16288_v51 }
0x298b   :  { %8762 = vmatpush3.msra.mxu0 %v16294_v57 }
0x298c   :  { %6440 = vmatmul.mubr.f32.vlgmr.msra.gmra.mxu0 %v16134_v49  ;;  %6676 = vmatprep.subr.bf16.mxu0 %v18287_v59 }
0x298d   :  { %6677 = vmatpush1.bf16.msra.mxu0 %v18288_v8  ;;  %6694 = vmatprep.mubr.bf16.mxu0 %v17628_v5 }
0x298e   :  { %6717 = vmatprep.subr.bf16.mxu0 %v18289_v28 }
0x2a02   :  { %v8623_v50 = vpop.f32.mrf.mxu0 }
0x2a04   :  { %v8624_v16 = vpop.f32.mrf.mxu0 }
0x2a05   :  { %v8625_v26 = vadd.f32 %v8624_v16, %v8623_v50 }
0x2a0a   :  { %v8658_v1 = vpop.f32.mrf.mxu1 }
0x2a0c   :  { %v8659_v36 = vpop.f32.mrf.mxu1 }
0x2a0d   :  { %v8660_v45 = vadd.f32 %v8659_v36, %v8658_v1 }
0x2a0f   :  { %v6232_v21 = vadd.f32 %v8660_v45, %v8625_v26 }
0x2a2c   :  { %v8693_v43 = vpop.f32.mrf.mxu0 }
0x2a2d   :  { %v8728_v12 = vpop.f32.mrf.mxu1 }
0x2a2e   :  { %v8694_v51 = vpop.f32.mrf.mxu0 }
0x2a2f   :  { %v8695_v57 = vadd.f32 %v8694_v51, %v8693_v43  ;;  %v8729_v49 = vpop.f32.mrf.mxu1 }
0x2a30   :  { %v8730_v3 = vadd.f32 %v8729_v49, %v8728_v12 }
0x2a31   :  { %v6302_v42 = vadd.f32 %v8695_v57, %v6232_v21  ;;  %v16329_v57 = vld [vmem:[%s17085_s2] sm:$0x3] }
0x2a33   :  { %v6372_v31 = vadd.f32 %v8730_v3, %v6302_v42  ;;  %v6484_v3 = vld [vmem:[%s17083_s0] sm:$0x3] }
0x2a4c   :  { %v8763_v59 = vpop.f32.mrf.mxu0 }
0x2a4e   :  { %v8764_v8 = vpop.f32.mrf.mxu0 }
0x2a4f   :  { %v8765_v2 = vadd.f32 %v8764_v8, %v8763_v59 }
0x2a51   :  { %v6442_v28 = vadd.f32 %v8765_v2, %v6372_v31 }
0x2a53   :  { %v16302_v54 = vadd.f32 %v6454_v23, %v6442_v28  ;;  %v16305_v35 = vadd.f32 %v6442_v28, %v11077_v25 }
0x2a55   :  { %v6492_v1 = vadd.f32 %v6490_v62, %v16305_v35  ;;  %6500 = vrot.lane.b32.xlu0 %v16302_v54, %s9899_s21 }
0x2a57   :  { %9256 = vrcp.f32 %v6492_v1 }
0x2a64   :  { %v9257_v21 = vpop.eup %9256 }
0x2a65   :  { %6496 = vrot.lane.b32.xlu1 %v9257_v21, %s9896_s4  ;;  %v16320_v42 = vmul.f32 %v9257_v21, %v16305_v35  ;;  %v9779_v21 = vld [vmem:[%s17092_s9 + $0x30] sm:$0xff]  }
0x2ac7   :  { %v6501_v2 = vpop.permute.xlu0 %6500 }
0x2ac8   :  { %v6503_v31 = vsub.f32 %v6484_v3, %v6501_v2  ;;  %v9780_v3 = vld [vmem:[%s17092_s9 + $0x28] sm:$0xff]   ;;  %v9782_v2 = vld [vmem:[%s17092_s9 + $0x18] sm:$0xff]  }
0x2aca   :  { %6509 = vrot.lane.b32.xlu1 %v6503_v31, %s9906_s20  ;;  %6505 = vrot.lane.b32.xlu0 %v6503_v31, %s9905_s19  ;;  %v9783_v31 = vld [vmem:[%s17092_s9 + $0x10] sm:$0xff]  }
0x2ad7   :  { %v6497_v23 = vpop.permute.xlu1 %6496 }
0x2ad8   :  { %v16317_v62 = vmul.f32 %v6497_v23, %v16305_v35  ;;  %v9784_v23 = vld [vmem:[%s17092_s9 + $0x8] sm:$0xff]  }
0x2b3c   :  { %v6510_v26 = vpop.permute.xlu1 %6509  ;;  %v6506_v12 = vpop.permute.xlu0 %6505 }
0x2b3d   :  { %v6512_v45 = vmul.f32 %v6510_v26, %v16317_v62  ;;  %v6508_v51 = vmul.f32 %v6506_v12, %v16320_v42  ;;  %v9785_v26 = vld [vmem:[%s17092_s9] sm:$0xff]  }
0x2b3f   :  { %6518 = vrot.lane.b32.xlu1 %v6512_v45, %s9906_s20  ;;  %6514 = vrot.lane.b32.xlu0 %v6508_v51, %s9901_s27  ;;  %v9786_v45 = vld [vmem:[%s17091_s8] ss:$0 sm:$0xff] }
0x2b43   :  { %6542 = vrot.lane.b32.xlu1 %v16329_v57, %s9896_s4  ;;  %6539 = vrot.lane.b32.xlu0 %v16329_v57, %s9900_s26 }
0x2bb1   :  { %v6519_v50 = vpop.permute.xlu1 %6518  ;;  %v6515_v16 = vpop.permute.xlu0 %6514 }
0x2bb2   :  { %v6521_v49 = vsel %vm271_vm4, %v6515_v16, %v6519_v50 }
0x2bb5   :  { %v6543_v43 = vpop.permute.xlu1 %6542  ;;  %v6540_v36 = vpop.permute.xlu0 %6539 }
0x2bb6   :  { %v16337_v59 = vsel %vm271_vm4, %v6540_v36, %v6543_v43 }
0x2bb7   :  { %v6546_v8 = vmul.f32 %v16337_v59, %v6521_v49 }
0x2bb9   :  { %v16341_v28 = vadd.f32 %v6546_v8, %v16302_v54 }
0x2bbb   :  { %v6558_v1 = vpack.c.bf16 %v16341_v28, %v16341_v28 }
0x2bbd   :  { %9154 = vmatmul.mubr.msk.bf16.vlgmr.msra.gmra.mxu1 %vm289_vm5, %v6558_v1 }
0x2bbe   :  { %9158 = vmatpush3.bf16.msra.mxu1 %v10019_v17  ;;  %9173 = vmatprep.mubr.msk.bf16.mxu1 %vm9898_vm2, %v17613_v58  ;;  %v9781_v17 = vld [vmem:[%s17092_s9 + $0x20] sm:$0xff]   ;;  %vm1237_vm2 = vcmask 1041408  }
0x2bbf   :  { %9159 = vmatprep.subr.bf16.mxu1 %v17613_v58 }
0x2bc2   :  { %9160 = vmatpush3.bf16.msra.mxu1 %v9779_v21 }
0x2bc3   :  { %9161 = vmatprep.subr.bf16.mxu1 %v17613_v58 }
0x2bc6   :  { %9162 = vmatpush3.bf16.msra.mxu1 %v9780_v3 }
0x2bc7   :  { %9163 = vmatprep.subr.bf16.mxu1 %v17613_v58 }
0x2bca   :  { %9164 = vmatpush3.bf16.msra.mxu1 %v9781_v17 }
0x2bcb   :  { %9165 = vmatprep.subr.bf16.mxu1 %v17613_v58 }
0x2bce   :  { %9166 = vmatpush3.bf16.msra.mxu1 %v9782_v2 }
0x2bcf   :  { %9167 = vmatprep.subr.bf16.mxu1 %v17613_v58 }
0x2bd2   :  { %9168 = vmatpush3.bf16.msra.mxu1 %v9783_v31 }
0x2bd3   :  { %9169 = vmatprep.subr.bf16.mxu1 %v17613_v58 }
0x2bd6   :  { %9170 = vmatpush3.bf16.msra.mxu1 %v9784_v23 }
0x2bd7   :  { %9171 = vmatprep.subr.bf16.mxu1 %v17613_v58 }
0x2bda   :  { %9172 = vmatpush3.bf16.msra.mxu1 %v9785_v26 }
0x2bdb   :  { %6758 = vmatprep.subr.bf16.mxu1 %v18296_v47  ;;  %v9787_v47 = vld [vmem:[%s17093_s10] ss:$0 sm:$0xff] }
0x2c7d   :  { %v6596_v12 = vpop.f32.mrf.mxu1 }
0x2c7e   :  { %v6597_v51 = vadd.f32 %v9786_v45, %v6596_v12  ;;  %v6522_v12 = vmul.f32 %v16320_v42, %v16305_v35 }
0x2c7f   :  { %v9155_v50 = vpop.f32.mrf.mxu1 }
0x2c80   :  { %9258 = vtanh.f32 %v6597_v51 }
0x2c81   :  { %v6599_v16 = vpop.f32.mrf.mxu1 }
0x2c83   :  { %v9156_v43 = vpop.f32.mrf.mxu1 }
0x2c8d   :  { %v9259_v36 = vpop.eup %9258 }
0x2c8e   :  { %v6603_v49 = vpack.c.bf16 %v9259_v36, %v9259_v36 }
0x2c90   :  { %9174 = vmatmul.mubr.msk.bf16.vlgmr.msra.gmra.mxu1 %vm419_vm6, %v6603_v49  ;;  %vm2115_vm6 = vcmask 1041664  }
0x2c91   :  { %6759 = vmatpush1.bf16.msra.mxu1 %v18298_v13  ;;  %6776 = vmatprep.mubr.bf16.mxu1 %v17628_v5  ;;  %v6523_v13 = vmul.f32 %v16317_v62, %v16305_v35 }
0x2c92   :  { %8778 = vmatprep.subr.mxu1 %v15544_v7 }
0x2d50   :  { %v6641_v58 = vpop.f32.mrf.mxu1 }
0x2d51   :  { %v6642_v8 = vadd.f32 %v9787_v47, %v6641_v58 }
0x2d52   :  { %v9175_v1 = vpop.f32.mrf.mxu1 }
0x2d53   :  { %v6647_v21 = vsel %vm467_vm7, %v6642_v8, -inf }
0x2d54   :  { %6648 = vmax.xlane.f32.xlu0 %v6647_v21  ;;  %v6644_v3 = vpop.f32.mrf.mxu1  ;;  %v9792_v21 = vld [vmem:[%s17095_s12 + $0x68] sm:$0xff] }
0x2d55   :  { %v9793_v3 = vld [vmem:[%s17095_s12 + $0xe0] sm:$0xff] }
0x2d56   :  { %v9176_v17 = vpop.f32.mrf.mxu1 }
0x2d57   :  { %v9794_v17 = vld [vmem:[%s17095_s12 + $0x60] sm:$0xff] }
0x2d6a   :  { %6524 = vrot.lane.b32.xlu0 %v16305_v35, %s9901_s27 }
0x2d6e   :  { %6533 = vrot.lane.b32.xlu0 %v6523_v13, %s9906_s20  ;;  %v9795_v13 = vld [vmem:[%s17095_s12 + $0x1f8] sm:$0xff] }
0x2ddd   :  { %v6649_v7 = vpop.xlane.xlu0 %6648 }
0x2dde   :  { %v6650_v2 = vsub.f32 %v6642_v8, %v6649_v7  ;;  %v9796_v7 = vld [vmem:[%s17095_s12 + $0xd8] sm:$0xff] }
0x2de0   :  { %v6651_v31 = vmul.f32 1.442695, %v6650_v2  ;;  %v9799_v2 = vld [vmem:[%s17095_s12 + $0x50] sm:$0xff] }
0x2de1   :  { %v6525_v62 = vpop.permute.xlu0 %6524 }
0x2de2   :  { %9260 = vpow2.f32 %v6651_v31  ;;  %v9800_v31 = vld [vmem:[%s17095_s12 + $0xc8] sm:$0xff] }
0x2de5   :  { %v6534_v50 = vpop.permute.xlu0 %6533 }
0x2def   :  { %v9261_v23 = vpop.eup %9260 }
0x2df0   :  { %v6653_v26 = vsel %vm467_vm7, %v9261_v23, 0.0  ;;  %vm2116_vm7 = vcmask 519170  }
0x2df1   :  { %6654 = vadd.xlane.f32.xlu1 %v6653_v26  ;;  %v9802_v26 = vld [vmem:[%s17095_s12 + $0x178] sm:$0xff]  ;;  %vm17014_vm8 = vmor %vm2116_vm7, %vm2115_vm6 }
0x2e02   :  { %6529 = vrot.lane.b32.xlu1 %v6522_v12, %s9901_s27  ;;  %v9803_v12 = vld [vmem:[%s17095_s12 + $0xc0] sm:$0xff] }
0x2e06   :  { %6548 = vrot.lane.b32.xlu1 %v16329_v57, %s9905_s19  ;;  %v6527_v57 = vmul.f32 %v6525_v62, %v16320_v42  ;;  %v9788_v42 = vld [vmem:[%s17095_s12 + $0x78] sm:$0xff]  ;;  %v9804_v62 = vld [vmem:[%s17095_s12 + $0x1f0] sm:$0xff] }
0x2e0a   :  { %6827 = vrot.lane.b32.xlu1 %v16341_v28, %s9900_s26 }
0x2e0e   :  { %6830 = vrot.lane.b32.xlu1 %v16341_v28, %s9896_s4 }
0x2e12   :  { %6836 = vrot.lane.b32.xlu1 %v16341_v28, %s9902_s28 }
0x2e16   :  { %6842 = vrot.lane.b32.xlu1 %v16341_v28, %s9901_s27 }
0x2e7a   :  { %v6655_v45 = vpop.xlane.xlu1 %6654 }
0x2e7b   :  { %9262 = vrcp.f32 %v6655_v45  ;;  %v9805_v45 = vld [vmem:[%s17095_s12 + $0x40] sm:$0xff] }
0x2e7e   :  { %v6530_v51 = vpop.permute.xlu1 %6529 }
0x2e7f   :  { %v6536_v16 = vsel %vm271_vm4, %v6530_v51, %v6534_v50  ;;  %v9806_v51 = vld [vmem:[%s17095_s12 + $0x170] sm:$0xff]  ;;  %v9807_v50 = vld [vmem:[%s17095_s12 + $0xb8] sm:$0xff] }
0x2e80   :  { %v6537_v36 = vsel %vm289_vm5, %v6536_v16, %v6527_v57  ;;  %v9808_v16 = vld [vmem:[%s17095_s12 + $0x1e8] sm:$0xff]  ;;  %v9809_v57 = vld [vmem:[%s17095_s12 + $0x38] sm:$0xff] }
0x2e82   :  { %v6549_v43 = vpop.permute.xlu1 %6548 }
0x2e83   :  { %v6551_v49 = vsel %vm289_vm5, %v16337_v59, %v6549_v43  ;;  %v9789_v59 = vld [vmem:[%s17095_s12 + $0xf0] sm:$0xff]  ;;  %v9810_v43 = vld [vmem:[%s17095_s12 + $0x168] sm:$0xff] }
0x2e84   :  { %v6552_v58 = vmul.f32 %v6551_v49, %v6537_v36  ;;  %v9811_v36 = vld [vmem:[%s17095_s12 + $0xb0] sm:$0xff]  ;;  %v9812_v49 = vld [vmem:[%s17095_s12 + $0x1e0] sm:$0xff] }
0x2e86   :  { %6554 = vrot.lane.b32.xlu0 %v6552_v58, %s9896_s4  ;;  %v9813_v58 = vld [vmem:[%s17095_s12 + $0x30] sm:$0xff] }
0x2e88   :  { %v9263_v47 = vpop.eup %9262 }
0x2e89   :  { %v6657_v8 = vmul.f32 %v9263_v47, %v9261_v23  ;;  %v9801_v23 = vld [vmem:[%s17095_s12 + $0x48] sm:$0xff]  ;;  %v9814_v47 = vld [vmem:[%s17095_s12 + $0x160] sm:$0xff] }
0x2e8a   :  { %6845 = vrot.lane.b32.xlu0 %v16341_v28, %s9899_s21 }
0x2e8b   :  { %v6658_v1 = vpack.c.bf16 %v6657_v8, %v6657_v8  ;;  %v9815_v8 = vld [vmem:[%s17095_s12 + $0xa8] sm:$0xff] }
0x2e8d   :  { %7452 = vmatmul.mubr.msk.bf16.vlgmr.msra.gmra.mxu0 %vm512_vm10, %v6658_v1  ;;  %7454 = vmatmul.mubr.msk.bf16.vlgmr.msra.gmra.mxu1 %vm512_vm10, %v6658_v1 }
0x2e8e   :  { %6833 = vrot.lane.b32.xlu0 %v16341_v28, %s9905_s19  ;;  %6718 = vmatpush1.bf16.msra.mxu0 %v18300_v20  ;;  %v9790_v20 = vld [vmem:[%s17095_s12 + $0x70] sm:$0xff] }
0x2e8f   :  { %6735 = vmatprep.mubr.bf16.mxu0 %v17628_v5  ;;  %6799 = vmatprep.subr.bf16.mxu0 %v18301_v29  ;;  %v9791_v29 = vld [vmem:[%s17095_s12 + $0xe8] sm:$0xff] }
0x2e90   :  { %8779 = vmatpush3.msra.mxu1 %v9788_v42  ;;  %v9817_v42 = vld [vmem:[%s17095_s12 + $0x28] sm:$0xff] }
0x2e91   :  { %8780 = vmatprep.subr.mxu1 %v9789_v59  ;;  %v9818_v59 = vld [vmem:[%s17095_s12 + $0x158] sm:$0xff] }
0x2e92   :  { %6839 = vrot.lane.b32.xlu0 %v16341_v28, %s9906_s20  ;;  %8781 = vmatpush3.msra.mxu1 %v9790_v20  ;;  %v9819_v20 = vld [vmem:[%s17095_s12 + $0xa0] sm:$0xff] }
0x2e93   :  { %8782 = vmatprep.subr.mxu1 %v9791_v29  ;;  %v9820_v29 = vld [vmem:[%s17095_s12 + $0x1d0] sm:$0xff] }
0x2e94   :  { %8783 = vmatpush3.msra.mxu1 %v9792_v21  ;;  %v9821_v21 = vld [vmem:[%s17095_s12 + $0x20] sm:$0xff] }
0x2e95   :  { %7453 = vmatmul.mubr.msk.bf16.vlgmr.msra.gmra.mxu0 %vm512_vm10, %v6658_v1  ;;  %8784 = vmatprep.subr.mxu1 %v9793_v3  ;;  %v9822_v3 = vld [vmem:[%s17095_s12 + $0x150] sm:$0xff] }
0x2e96   :  { %6800 = vmatpush1.bf16.msra.mxu0 %v18308_v39  ;;  %6817 = vmatprep.mubr.bf16.mxu0 %v17628_v5  ;;  %v9797_v39 = vld [vmem:[%s17095_s12 + $0x58] sm:$0xff]  ;;  %v9798_v5 = vld [vmem:[%s17095_s12 + $0xd0] sm:$0xff] }
0x2e97   :  { %8785 = vmatpush3.msra.mxu1 %v9794_v17  ;;  %8813 = vmatprep.subr.mxu0 %v9795_v13  ;;  %v9823_v17 = vld [vmem:[%s17095_s12 + $0x98] sm:$0xff]  ;;  %v9824_v13 = vld [vmem:[%s17095_s12 + $0x1c8] sm:$0xff] }
0x2e98   :  { %8786 = vmatprep.subr.mxu1 %v9796_v7  ;;  %v9825_v7 = vld [vmem:[%s17095_s12 + $0x18] sm:$0xff] }
0x2e99   :  { %8787 = vmatpush3.msra.mxu1 %v9797_v39  ;;  %v9826_v39 = vld [vmem:[%s17095_s12 + $0x148] sm:$0xff] }
0x2e9a   :  { %8788 = vmatprep.subr.mxu1 %v9798_v5  ;;  %v9827_v5 = vld [vmem:[%s17095_s12 + $0x90] sm:$0xff] }
0x2e9b   :  { %8789 = vmatpush3.msra.mxu1 %v9799_v2  ;;  %v9828_v2 = vld [vmem:[%s17095_s12 + $0x1c0] sm:$0xff] }
0x2e9c   :  { %8790 = vmatprep.subr.mxu1 %v9800_v31  ;;  %v9829_v31 = vld [vmem:[%s17095_s12 + $0x10] sm:$0xff] }
0x2e9d   :  { %7455 = vmatmul.mubr.msk.bf16.vlgmr.msra.gmra.mxu0 %vm512_vm10, %v6658_v1  ;;  %8791 = vmatpush3.msra.mxu1 %v9801_v23  ;;  %v9816_v1 = vld [vmem:[%s17095_s12 + $0x1d8] sm:$0xff]  ;;  %v9830_v23 = vld [vmem:[%s17095_s12 + $0x140] sm:$0xff]  ;;  %vm2987_vm10 = vcmask 781314  }
0x2e9e   :  { %8814 = vmatpush3.msra.mxu0 %v9802_v26  ;;  %8792 = vmatprep.subr.mxu1 %v9803_v12  ;;  %v9831_v26 = vld [vmem:[%s17095_s12 + $0x88] sm:$0xff]  ;;  %v9832_v12 = vld [vmem:[%s17095_s12 + $0x1b8] sm:$0xff] }
0x2e9f   :  { %8815 = vmatprep.subr.mxu0 %v9804_v62  ;;  %8793 = vmatpush3.msra.mxu1 %v9805_v45  ;;  %v9833_v62 = vld [vmem:[%s17095_s12 + $0x8] sm:$0xff]  ;;  %v9834_v45 = vld [vmem:[%s17095_s12 + $0x138] sm:$0xff] }
0x2ea0   :  { %8816 = vmatpush3.msra.mxu0 %v9806_v51  ;;  %8794 = vmatprep.subr.mxu1 %v9807_v50  ;;  %v9835_v51 = vld [vmem:[%s17095_s12 + $0x80] sm:$0xff]  ;;  %v9836_v50 = vld [vmem:[%s17095_s12 + $0x1b0] sm:$0xff] }
0x2ea1   :  { %8817 = vmatprep.subr.mxu0 %v9808_v16  ;;  %8795 = vmatpush3.msra.mxu1 %v9809_v57  ;;  %v9837_v16 = vld [vmem:[%s17095_s12] sm:$0xff]  ;;  %v9838_v57 = vld [vmem:[%s17095_s12 + $0x130] sm:$0xff] }
0x2ea2   :  { %8818 = vmatpush3.msra.mxu0 %v9810_v43  ;;  %8796 = vmatprep.subr.mxu1 %v9811_v36  ;;  %v9839_v43 = vld [vmem:[%s17095_s12 + $0x2f8] sm:$0xff]  ;;  %v9840_v36 = vld [vmem:[%s17095_s12 + $0x1a8] sm:$0xff] }
0x2ea3   :  { %8819 = vmatprep.subr.mxu0 %v9812_v49  ;;  %8797 = vmatpush3.msra.mxu1 %v9813_v58  ;;  %v9841_v49 = vld [vmem:[%s17095_s12 + $0x128] sm:$0xff]  ;;  %v9842_v58 = vld [vmem:[%s17095_s12 + $0x1a0] sm:$0xff] }
0x2ea4   :  { %8820 = vmatpush3.msra.mxu0 %v9814_v47  ;;  %8798 = vmatprep.subr.mxu1 %v9815_v8  ;;  %v9843_v47 = vld [vmem:[%s17095_s12 + $0x120] sm:$0xff]  ;;  %v9844_v8 = vld [vmem:[%s17095_s12 + $0x198] sm:$0xff] }
0x2ea5   :  { %8821 = vmatprep.subr.mxu0 %v9816_v1  ;;  %8799 = vmatpush3.msra.mxu1 %v9817_v42  ;;  %v9845_v1 = vld [vmem:[%s17095_s12 + $0x118] sm:$0xff]  ;;  %v9846_v42 = vld [vmem:[%s17095_s12 + $0x190] sm:$0xff] }
0x2ea6   :  { %8822 = vmatpush3.msra.mxu0 %v9818_v59  ;;  %8800 = vmatprep.subr.mxu1 %v9819_v20  ;;  %v9847_v59 = vld [vmem:[%s17095_s12 + $0x110] sm:$0xff]  ;;  %v9848_v20 = vld [vmem:[%s17095_s12 + $0x188] sm:$0xff] }
0x2ea7   :  { %8823 = vmatprep.subr.mxu0 %v9820_v29  ;;  %8801 = vmatpush3.msra.mxu1 %v9821_v21  ;;  %v9849_v29 = vld [vmem:[%s17095_s12 + $0x108] sm:$0xff]  ;;  %v9850_v21 = vld [vmem:[%s17095_s12 + $0x180] sm:$0xff] }
0x2ea8   :  { %8824 = vmatpush3.msra.mxu0 %v9822_v3  ;;  %8802 = vmatprep.subr.mxu1 %v9823_v17  ;;  %v9851_v3 = vld [vmem:[%s17095_s12 + $0x100] sm:$0xff]  ;;  %v9852_v17 = vld [vmem:[%s17095_s12 + $0x3f8] sm:$0xff] }
0x2ea9   :  { %8825 = vmatprep.subr.mxu0 %v9824_v13  ;;  %8803 = vmatpush3.msra.mxu1 %v9825_v7 }
0x2eaa   :  { %8826 = vmatpush3.msra.mxu0 %v9826_v39  ;;  %8804 = vmatprep.subr.mxu1 %v9827_v5  ;;  %v7456_v39 = vld.sshfl [vmem:[%s17086_s3 + $0x2] sm:$0x3 pattern:$0x76325410]  ;;  %v18428_v5 = vld [vmem:[#allocation17_spill] sm:$0xff] }
0x2eab   :  { %8827 = vmatprep.subr.mxu0 %v9828_v2  ;;  %8805 = vmatpush3.msra.mxu1 %v9829_v31  ;;  %v18429_v2 = vld [vmem:[#allocation69_spill] sm:$0xff] }
0x2eac   :  { %8828 = vmatpush3.msra.mxu0 %v9830_v23  ;;  %8806 = vmatprep.subr.mxu1 %v9831_v26  ;;  %v18430_v31 = vld [vmem:[#allocation21_spill] sm:$0xff]  ;;  %v18431_v23 = vld [vmem:[#allocation19_spill] sm:$0xff] }
0x2ead   :  { %8829 = vmatprep.subr.mxu0 %v9832_v12  ;;  %8807 = vmatpush3.msra.mxu1 %v9833_v62  ;;  %v18433_v26 = vld [vmem:[#allocation23_spill] sm:$0xff]  ;;  %v18434_v12 = vld [vmem:[#allocation60_spill] sm:$0xff]  ;;  %v6828_v62 = vpop.permute.xlu1 %6827 }
0x2eae   :  { %8830 = vmatpush3.msra.mxu0 %v9834_v45  ;;  %8808 = vmatprep.subr.mxu1 %v9835_v51 }
0x2eaf   :  { %8831 = vmatprep.subr.mxu0 %v9836_v50  ;;  %8809 = vmatpush3.msra.mxu1 %v9837_v16 }
0x2eb0   :  { %8832 = vmatpush3.msra.mxu0 %v9838_v57  ;;  %8848 = vmatprep.subr.mxu1 %v9839_v43 }
0x2eb1   :  { %8833 = vmatprep.subr.mxu0 %v9840_v36  ;;  %v6831_v51 = vpop.permute.xlu1 %6830 }
0x2eb2   :  { %8834 = vmatpush3.msra.mxu0 %v9841_v49 }
0x2eb3   :  { %8835 = vmatprep.subr.mxu0 %v9842_v58 }
0x2eb4   :  { %8836 = vmatpush3.msra.mxu0 %v9843_v47 }
0x2eb5   :  { %8837 = vmatprep.subr.mxu0 %v9844_v8  ;;  %v6837_v58 = vpop.permute.xlu1 %6836 }
0x2eb6   :  { %8838 = vmatpush3.msra.mxu0 %v9845_v1 }
0x2eb7   :  { %8839 = vmatprep.subr.mxu0 %v9846_v42 }
0x2eb8   :  { %8840 = vmatpush3.msra.mxu0 %v9847_v59 }
0x2eb9   :  { %8841 = vmatprep.subr.mxu0 %v9848_v20 }
0x2eba   :  { %8842 = vmatpush3.msra.mxu0 %v9849_v29 }
0x2ebb   :  { %8843 = vmatprep.subr.mxu0 %v9850_v21 }
0x2ebc   :  { %8844 = vmatpush3.msra.mxu0 %v9851_v3 }
0x2ebd   :  { %8883 = vmatprep.subr.mxu0 %v9852_v17 }
0x2ef8   :  { %v6555_v13 = vpop.permute.xlu0 %6554 }
0x2ef9   :  { %v16625_v7 = vsub.f32 %v16305_v35, %v6555_v13 }
0x2efb   :  { %6866 = vrot.lane.b32.xlu1 %v16625_v7, %s9899_s21  ;;  %6863 = vrot.lane.b32.xlu0 %v16625_v7, %s9901_s27 }
0x2eff   :  { %6881 = vrot.lane.b32.xlu1 %v16625_v7, %s9906_s20  ;;  %6878 = vrot.lane.b32.xlu0 %v16625_v7, %s9902_s28 }
0x2f03   :  { %6872 = vrot.lane.b32.xlu1 %v16625_v7, %s9896_s4  ;;  %6869 = vrot.lane.b32.xlu0 %v16625_v7, %s9900_s26 }
0x2f07   :  { %7331 = vrot.lane.b32.xlu1 %v7456_v39, %s9896_s4  ;;  %6875 = vrot.lane.b32.xlu0 %v16625_v7, %s9905_s19 }
0x2f0b   :  { %5581 = vrot.lane.b32.xlu1 %v15482_v27, %s9906_s20  ;;  %2091 = vrot.lane.b32.xlu0 %v18428_v5, %s9906_s20  ;;  %v18432_v27 = vld [vmem:[#allocation68_spill] sm:$0xff] }
0x2f0f   :  { %2962 = vrot.lane.b32.xlu1 %v18429_v2, %s9906_s20  ;;  %2095 = vrot.lane.b32.xlu0 %v18430_v31, %s9906_s20  ;;  %v6843_v2 = vpop.permute.xlu1 %6842 }
0x2f13   :  { %6459 = vrot.lane.b32.xlu1 %v16302_v54, %s9906_s20  ;;  %5585 = vrot.lane.b32.xlu0 %v15485_v55, %s9906_s20  ;;  %v18435_v54 = vld [vmem:[#allocation74_spill] sm:$0xff]  ;;  %v6846_v55 = vpop.permute.xlu0 %6845 }
0x2f14   :  { %v6855_v45 = vsel %vm271_vm4, %v6846_v55, %v16341_v28 }
0x2f15   :  { %v6856_v16 = vsel %vm289_vm5, %v6855_v45, %v6828_v62 }
0x2f16   :  { %v6857_v43 = vsel %vm732_vm11, %v6856_v16, %v6831_v51 }
0x2f17   :  { %3843 = vrot.lane.b32.xlu1 %v18431_v23, %s9906_s20  ;;  %2966 = vrot.lane.b32.xlu0 %v18432_v27, %s9906_s20  ;;  %v6834_v50 = vpop.permute.xlu0 %6833 }
0x2f18   :  { %v6858_v20 = vsel %vm734_vm12, %v6857_v43, %v6834_v50 }
0x2f19   :  { %v6859_v13 = vsel %vm736_vm13, %v6858_v20, %v6837_v58 }
0x2f1b   :  { %6463 = vrot.lane.b32.xlu0 %v16305_v35, %s9906_s20  ;;  %v6848_v35 = vsel %vm271_vm4, %v16341_v28, %v6828_v62  ;;  %v6840_v8 = vpop.permute.xlu0 %6839 }
0x2f1c   :  { %v6849_v57 = vsel %vm289_vm5, %v6848_v35, %v6831_v51  ;;  %v6860_v31 = vsel %vm738_vm14, %v6859_v13, %v6840_v8 }
0x2f1d   :  { %v6850_v47 = vsel %vm732_vm11, %v6849_v57, %v6834_v50 }
0x2f1e   :  { %v6851_v29 = vsel %vm734_vm12, %v6850_v47, %v6837_v58 }
0x2f1f   :  { %3847 = vrot.lane.b32.xlu0 %v18433_v26, %s9906_s20  ;;  %v6852_v17 = vsel %vm736_vm13, %v6851_v29, %v6840_v8  ;;  %v9853_v29 = vld [vmem:[%s17095_s12 + $0x278] sm:$0xff] }
0x2f20   :  { %v6853_v23 = vsel %vm738_vm14, %v6852_v17, %v6843_v2  ;;  %v9854_v17 = vld [vmem:[%s17095_s12 + $0x2f0] sm:$0xff] }
0x2f21   :  { %v6854_v62 = vsel %vm740_vm15, %v6853_v23, %v6846_v55  ;;  %v9856_v23 = vld [vmem:[%s17095_s12 + $0x2e8] sm:$0xff] }
0x2f23   :  { %1217 = vrot.lane.b32.xlu0 %v18434_v12, %s9906_s20  ;;  %v6861_v12 = vsel %vm740_vm15, %v6860_v31, %v6843_v2  ;;  %v9855_v2 = vld [vmem:[%s17095_s12 + $0x270] sm:$0xff] }
0x2f27   :  { %4714 = vrot.lane.b32.xlu0 %v18435_v54, %s9906_s20 }
0x2f4d   :  { %v16676_v36 = vpop.f32.mrf.mxu0  ;;  %v16678_v49 = vpop.f32.mrf.mxu1 }
0x2f4e   :  { %v16683_v1 = vmul.f32 %v16678_v49, %v16676_v36  ;;  %v6905_v35 = vmul.f32 %v6854_v62, %v16676_v36  ;;  %v6911_v31 = vmul.f32 %v6854_v62, %v16678_v49 }
0x2f4f   :  { %v16685_v42 = vpop.f32.mrf.mxu0  ;;  %v16687_v59 = vpop.f32.mrf.mxu1 }
0x2f50   :  { %v6906_v50 = vmul.f32 %v6854_v62, %v16685_v42 }
0x2f51   :  { %v6700_v21 = vpop.f32.mrf.mxu0  ;;  %v6782_v3 = vpop.f32.mrf.mxu1 }
0x2f53   :  { %v6701_v39 = vpop.f32.mrf.mxu0  ;;  %v6783_v5 = vpop.f32.mrf.mxu1 }
0x2f54   :  { %v6912_v39 = vmul.f32 %v6854_v62, %v16687_v59  ;;  %v9859_v62 = vld [vmem:[%s17095_s12 + $0x260] sm:$0xff] }
0x2f55   :  { %v16695_v27 = vpop.f32.mrf.mxu0 }
0x2f56   :  { %v6959_v26 = vmul.f32 %v16678_v49, %v16695_v27  ;;  %v6907_v45 = vmul.f32 %v6861_v12, %v16695_v27 }
0x2f57   :  { %v16700_v54 = vpop.f32.mrf.mxu0 }
0x2f58   :  { %v6908_v16 = vmul.f32 %v6861_v12, %v16700_v54  ;;  %v6909_v58 = vadd.f32 %v6907_v45, %v6905_v35  ;;  %v9861_v35 = vld [vmem:[%s17095_s12 + $0x258] sm:$0xff] }
0x2f59   :  { %v6741_v51 = vpop.f32.mrf.mxu0 }
0x2f5a   :  { %v6910_v43 = vadd.f32 %v6908_v16, %v6906_v50  ;;  %v9857_v51 = vld [vmem:[%s17095_s12 + $0x268] sm:$0xff]  ;;  %v9858_v50 = vld [vmem:[%s17095_s12 + $0x2e0] sm:$0xff]  ;;  %v9860_v16 = vld [vmem:[%s17095_s12 + $0x2d8] sm:$0xff] }
0x2f5b   :  { %v6742_v57 = vpop.f32.mrf.mxu0 }
0x2f5c   :  { %7037 = vmatprep.mubr.f32.mxu1 %v6910_v43  ;;  %v9862_v57 = vld [vmem:[%s17095_s12 + $0x2d0] sm:$0xff] }
0x2f5d   :  { %v16707_v47 = vpop.f32.mrf.mxu0  ;;  %7038 = vmatmul.mubr.f32.vlgmr.msra.gmra.mxu1 %v6909_v58  ;;  %v9863_v43 = vld [vmem:[%s17095_s12 + $0x250] sm:$0xff] }
0x2f5e   :  { %v6957_v8 = vmul.f32 %v16707_v47, %v16676_v36  ;;  %v16713_v55 = vmul.f32 %v16707_v47, %v16695_v27  ;;  %8849 = vmatpush3.msra.mxu1 %v9853_v29  ;;  %v6913_v21 = vmul.f32 %v6861_v12, %v16707_v47  ;;  %v18438_v29 = vld [vmem:[#allocation33_spill] sm:$0xff] }
0x2f5f   :  { %v16715_v20 = vpop.f32.mrf.mxu0  ;;  %8850 = vmatprep.subr.mxu1 %v9854_v17 }
0x2f60   :  { %v16721_v3 = vadd.f32 %v6959_v26, %v6957_v8  ;;  %v6914_v5 = vmul.f32 %v6861_v12, %v16715_v20  ;;  %8851 = vmatpush3.msra.mxu1 %v9855_v2  ;;  %v6915_v12 = vadd.f32 %v6913_v21, %v6911_v31  ;;  %v18437_v8 = vld [vmem:[#allocation31_spill] sm:$0xff]  ;;  %v18440_v21 = vld [vmem:[#allocation61_spill] sm:$0xff]  ;;  %v16799_v31 = vmul.f32 %v16685_v42, %v16685_v42 }
0x2f61   :  { %v6823_v13 = vpop.f32.mrf.mxu0  ;;  %8852 = vmatprep.subr.mxu1 %v9856_v23  ;;  %v16803_v23 = vmul.f32 %v16687_v59, %v16687_v59 }
0x2f62   :  { %v6916_v45 = vadd.f32 %v6914_v5, %v6912_v39  ;;  %8853 = vmatpush3.msra.mxu1 %v9857_v51  ;;  %v18442_v13 = vld [vmem:[#allocation37_spill] sm:$0xff]  ;;  %v18443_v39 = vld [vmem:[#allocation151_spill] sm:$0xff]  ;;  %v18444_v5 = vld [vmem:[#allocation76_spill] sm:$0xff] }
0x2f63   :  { %v6824_v26 = vpop.f32.mrf.mxu0  ;;  %8854 = vmatprep.subr.mxu1 %v9858_v50  ;;  %v16795_v2 = vsel %vm289_vm5, %v18444_v5, %v18443_v39  ;;  %v18446_v50 = vld [vmem:[#allocation46_spill] sm:$0xff] }
0x2f64   :  { %7107 = vmatprep.mubr.f32.mxu0 %v6916_v45  ;;  %8855 = vmatpush3.msra.mxu1 %v9859_v62  ;;  %v16807_v26 = vmul.f32 %v16687_v59, %v16685_v42  ;;  %v18445_v45 = vld [vmem:[#allocation39_spill] sm:$0xff] }
0x2f65   :  { %7108 = vmatmul.mubr.f32.vlgmr.msra.gmra.mxu0 %v6915_v12  ;;  %8856 = vmatprep.subr.mxu1 %v9860_v16  ;;  %v18447_v16 = vld [vmem:[#allocation26_spill] sm:$0xff] }
0x2f66   :  { %8884 = vmatpush3.msra.mxu0 %v15740_v22  ;;  %8857 = vmatpush3.msra.mxu1 %v9861_v35  ;;  %v9864_v22 = vld [vmem:[%s17095_s12 + $0x2c8] sm:$0xff] }
0x2f67   :  { %8885 = vmatprep.subr.mxu0 %v15747_v53  ;;  %8858 = vmatprep.subr.mxu1 %v9862_v57  ;;  %v9865_v53 = vld [vmem:[%s17095_s12 + $0x248] sm:$0xff] }
0x2f68   :  { %8886 = vmatpush3.msra.mxu0 %v15754_v40  ;;  %8859 = vmatpush3.msra.mxu1 %v9863_v43  ;;  %v9866_v40 = vld [vmem:[%s17095_s12 + $0x2c0] sm:$0xff]  ;;  %v18448_v43 = vld [vmem:[#allocation51_spill] sm:$0xff] }
0x2f69   :  { %8887 = vmatprep.subr.mxu0 %v15761_v44  ;;  %8860 = vmatprep.subr.mxu1 %v9864_v22  ;;  %v6921_v22 = vmul.f32 %v16695_v27, %v16676_v36 }
0x2f6a   :  { %8888 = vmatpush3.msra.mxu0 %v15768_v18  ;;  %8861 = vmatpush3.msra.mxu1 %v9865_v53  ;;  %v18436_v18 = vld [vmem:[#allocation29_spill] sm:$0xff] }
0x2f6b   :  { %8889 = vmatprep.subr.mxu0 %v15775_v37  ;;  %8862 = vmatprep.subr.mxu1 %v9866_v40  ;;  %v18439_v37 = vld [vmem:[#allocation135_spill] sm:$0xff] }
0x2f6c   :  { %8890 = vmatpush3.msra.mxu0 %v15782_v19  ;;  %8863 = vmatpush3.msra.mxu1 %v15788_v33  ;;  %v16780_v17 = vsel %vm289_vm5, %v18440_v21, %v18439_v37  ;;  %v16784_v19 = vmul.f32 %v16676_v36, %v16676_v36  ;;  %v16788_v33 = vmul.f32 %v16678_v49, %v16678_v49  ;;  %v18451_v37 = vld [vmem:[#allocation32_spill] sm:$0xff] }
0x2f6d   :  { %v6867_v44 = vpop.permute.xlu1 %6866  ;;  %v6864_v58 = vpop.permute.xlu0 %6863  ;;  %8891 = vmatprep.subr.mxu0 %v15794_v24  ;;  %8864 = vmatprep.subr.mxu1 %v18436_v18  ;;  %v18441_v24 = vld [vmem:[#allocation35_spill] sm:$0xff]  ;;  %v18449_v18 = vld [vmem:[#allocation28_spill] sm:$0xff]  ;;  %v6939_v36 = vmul.f32 %v16707_v47, %v16678_v49 }
0x2f6e   :  { %8892 = vmatpush3.msra.mxu0 %v18437_v8  ;;  %8865 = vmatpush3.msra.mxu1 %v18438_v29  ;;  %v6884_v62 = vsel %vm271_vm4, %v6864_v58, %v6867_v44  ;;  %v18450_v8 = vld [vmem:[#allocation30_spill] sm:$0xff]  ;;  %v6922_v29 = vmul.f32 %v16700_v54, %v16685_v42 }
0x2f6f   :  { %8893 = vmatprep.subr.mxu0 %v18441_v24  ;;  %8866 = vmatprep.subr.mxu1 %v18442_v13  ;;  %v18452_v13 = vld [vmem:[#allocation34_spill] sm:$0xff]  ;;  %v6885_v5 = vsel %vm289_vm5, %v6884_v62, %v16625_v7  ;;  %v6960_v62 = vmul.f32 %v16687_v59, %v16700_v54 }
0x2f70   :  { %8894 = vmatpush3.msra.mxu0 %v18445_v45  ;;  %8867 = vmatpush3.msra.mxu1 %v18446_v50 }
0x2f71   :  { %v16810_v51 = vpop.permute.xlu1 %6881  ;;  %v6879_v12 = vpop.permute.xlu0 %6878  ;;  %8895 = vmatprep.subr.mxu0 %v18447_v16  ;;  %8868 = vmatprep.subr.mxu1 %v18448_v43  ;;  %v18454_v16 = vld [vmem:[#allocation38_spill] sm:$0xff]  ;;  %v18456_v43 = vld [vmem:[#allocation41_spill] sm:$0xff] }
0x2f72   :  { %v6891_v35 = vsel %vm271_vm4, %v16810_v51, %v6864_v58  ;;  %v6898_v57 = vsel %vm271_vm4, %v6879_v12, %v16810_v51  ;;  %8896 = vmatpush3.msra.mxu0 %v18449_v18  ;;  %8869 = vmatpush3.msra.mxu1 %v18450_v8  ;;  %v18458_v18 = vld [vmem:[#allocation43_spill] sm:$0xff]  ;;  %v1232_v8 = vlaneseq  ;;  %vm16998_vm4 = vmor %vm1238_vm3, %vm1237_vm2 }
0x2f73   :  { %v6892_v53 = vsel %vm289_vm5, %v6891_v35, %v6867_v44  ;;  %v6899_v40 = vsel %vm289_vm5, %v6898_v57, %v6864_v58  ;;  %8897 = vmatprep.subr.mxu0 %v18451_v37  ;;  %8870 = vmatprep.subr.mxu1 %v18452_v13  ;;  %v18453_v58 = vld [vmem:[#allocation36_spill] sm:$0xff]  ;;  %v6930_v37 = vmul.f32 %v16700_v54, %v16700_v54 }
0x2f74   :  { %v6893_v21 = vsel %vm732_vm11, %v6892_v53, %v16625_v7  ;;  %v6900_v24 = vsel %vm732_vm11, %v6899_v40, %v6867_v44  ;;  %8898 = vmatpush3.msra.mxu0 %v18453_v58  ;;  %8871 = vmatpush3.msra.mxu1 %v18454_v16  ;;  %v18455_v35 = vld [vmem:[#allocation40_spill] sm:$0xff]  ;;  %v6929_v53 = vmul.f32 %v16695_v27, %v16695_v27  ;;  %v18457_v40 = vld [vmem:[#allocation42_spill] sm:$0xff] }
0x2f75   :  { %v6873_v39 = vpop.permute.xlu1 %6872  ;;  %v6901_v45 = vsel %vm734_vm12, %v6900_v24, %v16625_v7  ;;  %v6870_v50 = vpop.permute.xlu0 %6869  ;;  %8899 = vmatprep.subr.mxu0 %v18455_v35  ;;  %8872 = vmatprep.subr.mxu1 %v18456_v43  ;;  %v6923_v24 = vmul.f32 2.0, %v6921_v22  ;;  %v6940_v13 = vmul.f32 %v16715_v20, %v16687_v59  ;;  %v6958_v27 = vmul.f32 %v16715_v20, %v16685_v42  ;;  %v18459_v58 = vld [vmem:[#allocation44_spill] sm:$0xff]  ;;  %v18461_v59 = vld [vmem:[#allocation47_spill] sm:$0xff] }
0x2f76   :  { %v6886_v44 = vsel %vm732_vm11, %v6885_v5, %v6870_v50  ;;  %v6894_v57 = vsel %vm734_vm12, %v6893_v21, %v6870_v50  ;;  %v6902_v49 = vsel %vm736_vm13, %v6901_v45, %v6870_v50  ;;  %8900 = vmatpush3.msra.mxu0 %v18457_v40  ;;  %8873 = vmatpush3.msra.mxu1 %v18458_v18  ;;  %v18460_v5 = vld [vmem:[#allocation45_spill] sm:$0xff]  ;;  %v6924_v45 = vmul.f32 2.0, %v6922_v29  ;;  %v18462_v42 = vld [vmem:[#allocation48_spill] sm:$0xff]  ;;  %vm17021_vm11 = vmor %vm2987_vm10, %vm2986_vm9 }
0x2f77   :  { %v16856_v21 = vmul.f32 %v16707_v47, %v16707_v47  ;;  %8901 = vmatprep.subr.mxu0 %v18459_v58  ;;  %8874 = vmatprep.subr.mxu1 %v18460_v5  ;;  %v6887_v22 = vsel %vm734_vm12, %v6886_v44, %v6873_v39  ;;  %v6895_v47 = vsel %vm736_vm13, %v6894_v57, %v6873_v39  ;;  %v6941_v43 = vmul.f32 2.0, %v6939_v36 }
0x2f78   :  { %8902 = vmatpush3.msra.mxu0 %v15998_v30  ;;  %v6903_v16 = vsel %vm738_vm14, %v6902_v49, %v6873_v39  ;;  %8875 = vmatpush3.msra.mxu1 %v18461_v59  ;;  %v6948_v36 = vmul.f32 %v16715_v20, %v16715_v20  ;;  %v6968_v39 = vmul.f32 %v16715_v20, %v16700_v54  ;;  %v6942_v49 = vmul.f32 2.0, %v6940_v13  ;;  %v18466_v13 = vld [vmem:[#allocation52_spill] sm:$0xff] }
0x2f79   :  { %v16865_v50 = vpop.permute.xlu1 %7331  ;;  %v6876_v35 = vpop.permute.xlu0 %6875  ;;  %8903 = vmatprep.subr.mxu0 %v18462_v42  ;;  %8876 = vmatprep.subr.mxu1 %v16022_v34  ;;  %v18463_v34 = vld [vmem:[#allocation49_spill] sm:$0xff]  ;;  %v6962_v5 = vadd.f32 %v6960_v62, %v6958_v27  ;;  %v18468_v42 = vld [vmem:[#allocation55_spill] sm:$0xff] }
0x2f7a   :  { %v6888_v40 = vsel %vm736_vm13, %v6887_v22, %v6876_v35  ;;  %v6896_v29 = vsel %vm738_vm14, %v6895_v47, %v6876_v35  ;;  %v6904_v30 = vsel %vm740_vm15, %v6903_v16, %v6876_v35  ;;  %8904 = vmatpush3.msra.mxu0 %v16032_v38  ;;  %8877 = vmatpush3.msra.mxu1 %v18463_v34  ;;  %v18465_v38 = vld [vmem:[#allocation53_spill] sm:$0xff] }
0x2f7b   :  { %v6889_v44 = vsel %vm738_vm14, %v6888_v40, %v6879_v12  ;;  %v16878_v57 = vsel %vm740_vm15, %v6896_v29, %v6879_v12  ;;  %v6925_v58 = vmul.f32 %v6923_v24, %v6904_v30  ;;  %8905 = vmatprep.subr.mxu0 %v16040_v4  ;;  %v18464_v12 = vld [vmem:[#allocation50_spill] sm:$0xff]  ;;  %8878 = vmatprep.subr.mxu1 %v18465_v38  ;;  %v9907_v24 = vmov 1983009808   ;;  %v18469_v40 = vld [vmem:[#allocation56_spill] sm:$0xff] }
0x2f7c   :  { %v6890_v18 = vsel %vm740_vm15, %v6889_v44, %v16810_v51  ;;  %8906 = vmatpush3.msra.mxu0 %v18464_v12  ;;  %v6926_v16 = vmul.f32 %v6924_v45, %v6904_v30  ;;  %v6943_v20 = vmul.f32 %v6941_v43, %v6904_v30  ;;  %v1230_v35 = vunpack.c.l.s4 %v9907_v24  ;;  %v18467_v4 = vld [vmem:[#allocation54_spill] sm:$0xff] }
0x2f7d   :  { %v2092_v22 = vpop.permute.xlu0 %2091  ;;  %v6920_v47 = vmul.f32 %v16799_v31, %v6890_v18  ;;  %v6938_v54 = vmul.f32 %v16803_v23, %v6890_v18  ;;  %8907 = vmatprep.subr.mxu0 %v18466_v13  ;;  %v5582_v51 = vpop.permute.xlu1 %5581  ;;  %8879 = vmatpush3.msra.mxu1 %v18467_v4  ;;  %v6932_v62 = vmul.f32 %v6930_v37, %v16878_v57  ;;  %v1233_v31 = vshrl.u32 %v1232_v8, 7  ;;  %v9869_v13 = vld [vmem:[%s17095_s12 + $0x470] sm:$0xff] }
0x2f7e   :  { %v6944_v27 = vmul.f32 %v6942_v49, %v6904_v30  ;;  %v2099_v59 = vsel %vm736_vm13, %v16780_v17, %v2092_v22  ;;  %8908 = vmatpush3.msra.mxu0 %v18468_v42  ;;  %8918 = vmatprep.subr.mxu1 %v18469_v40  ;;  %v6919_v23 = vmul.f32 %v16784_v19, %v6890_v18 }
0x2f7f   :  { %v6928_v45 = vadd.f32 %v6926_v16, %v6920_v47  ;;  %8909 = vmatprep.subr.mxu0 %v16093_v9  ;;  %v6950_v29 = vmul.f32 %v6948_v36, %v16878_v57  ;;  %v6931_v44 = vmul.f32 %v6929_v53, %v16878_v57  ;;  %v6937_v37 = vmul.f32 %v16788_v33, %v6890_v18 }
0x2f80   :  { %v6946_v43 = vadd.f32 %v6944_v27, %v6938_v54  ;;  %8910 = vmatpush3.msra.mxu0 %v16102_v11  ;;  %v6927_v8 = vadd.f32 %v6925_v58, %v6919_v23  ;;  %v6956_v34 = vmul.f32 %v16807_v26, %v6890_v18  ;;  %v6964_v12 = vmul.f32 %v6962_v5, %v6904_v30  ;;  %v9873_v23 = vld [vmem:[%s17095_s12 + $0x460] sm:$0xff] }
0x2f81   :  { %v16906_v17 = vpop.permute.xlu0 %2095  ;;  %v6934_v49 = vadd.f32 %v6932_v62, %v6928_v45  ;;  %8911 = vmatprep.subr.mxu0 %v16108_v41  ;;  %v6945_v36 = vadd.f32 %v6943_v20, %v6937_v37  ;;  %v6949_v33 = vmul.f32 %v16856_v21, %v16878_v57  ;;  %v1231_v53 = vunpack.c.0.s8 %v1230_v35  ;;  %v2963_v5 = vpop.permute.xlu1 %2962  ;;  %v9870_v35 = vld [vmem:[%s17095_s12 + $0x4e8] sm:$0xff] }
0x2f82   :  { %v16912_v9 = vsel %vm740_vm15, %v2099_v59, %v16906_v17  ;;  %v6952_v19 = vadd.f32 %v6950_v29, %v6946_v43  ;;  %8912 = vmatpush3.msra.mxu0 %v16116_v46  ;;  %v6933_v26 = vadd.f32 %v6931_v44, %v6927_v8  ;;  %v6966_v58 = vadd.f32 %v6964_v12, %v6956_v34  ;;  %v9871_v62 = vld [vmem:[%s17095_s12 + $0x468] sm:$0xff]  ;;  %v9872_v59 = vld [vmem:[%s17095_s12 + $0x4e0] sm:$0xff]  ;;  %v18477_v34 = vld [vmem:[#allocation58_spill] sm:$0xff] }
0x2f83   :  { %v2102_v11 = vcombine.low %v16912_v9, %v16906_v17  ;;  %7177 = vmatprep.mubr.f32.mxu1 %v6934_v49  ;;  %8913 = vmatprep.subr.mxu0 %v16123_v32  ;;  %v6951_v41 = vadd.f32 %v6949_v33, %v6945_v36  ;;  %v6970_v22 = vmul.f32 %v6968_v39, %v16878_v57  ;;  %v9867_v32 = vld [vmem:[%s17095_s12 + $0x478] sm:$0xff]  ;;  %v18473_v45 = vld [vmem:[#allocation25_spill] sm:$0xff]  ;;  %v18479_v12 = vld [vmem:[#allocation62_spill] sm:$0xff] }
0x2f84   :  { %7247 = vmatprep.mubr.f32.mxu0 %v6952_v19  ;;  %v6955_v38 = vmul.f32 %v16683_v1, %v6890_v18  ;;  %v6963_v21 = vmul.f32 %v16721_v3, %v6904_v30  ;;  %v5589_v47 = vsel %vm736_vm13, %v16795_v2, %v5582_v51  ;;  %8914 = vmatpush3.msra.mxu0 %v16130_v56  ;;  %v9868_v1 = vld [vmem:[%s17095_s12 + $0x4f0] sm:$0xff]  ;;  %v18481_v19 = vld [vmem:[#allocation64_spill] sm:$0xff]  ;;  %s9908_s12 = smov [#allocation4]  }
0x2f85   :  { %7178 = vmatmul.mubr.f32.vlgmr.msra.gmra.mxu1 %v6933_v26  ;;  %v5586_v46 = vpop.permute.xlu0 %5585  ;;  %7248 = vmatmul.mubr.f32.vlgmr.msra.gmra.mxu0 %v6951_v41  ;;  %v6972_v39 = vadd.f32 %v6970_v22, %v6966_v58  ;;  %v16930_v54 = vsub.s32 %v1231_v53, %v1233_v31  ;;  %v6969_v2 = vmul.f32 %v16713_v55, %v16878_v57  ;;  %v18470_v30 = vld [vmem:[#allocation18_spill] sm:$0xff]  ;;  %v6460_v4 = vpop.permute.xlu1 %6459  ;;  %v18472_v31 = vld [vmem:[#allocation27_spill] sm:$0xff]  ;;  %v18484_v53 = vld [vmem:[#allocation65_spill] sm:$0xff] }
0x2f86   :  { %8919 = vmatpush3.msra.mxu1 %v9867_v32  ;;  %v5590_v16 = vsel %vm740_vm15, %v5589_v47, %v5586_v46  ;;  %v6965_v56 = vadd.f32 %v6963_v21, %v6955_v38  ;;  %v18471_v18 = vld [vmem:[#allocation22_spill] sm:$0xff]  ;;  %v6466_v40 = vsel %vm289_vm5, %v18473_v45, %v18472_v31  ;;  %v18487_v41 = vld [vmem:[#allocation71_spill] sm:$0xff]  ;;  %v18488_v22 = vld [vmem:[#allocation72_spill] sm:$0xff]  ;;  %v7344_v9 = vsel %vm289_vm5, %v16341_v28, %v16625_v7 }
0x2f87   :  { %8920 = vmatprep.subr.mxu1 %v9868_v1  ;;  %v5592_v3 = vcombine.low %v5590_v16, %v5586_v46  ;;  %v2969_v20 = vsel %vm289_vm5, %v18471_v18, %v18470_v30  ;;  %7317 = vmatprep.mubr.f32.mxu1 %v6972_v39  ;;  %v6467_v43 = vsel %vm736_vm13, %v6466_v40, %v6460_v4  ;;  %v18485_v58 = vld [vmem:[#allocation66_spill] sm:$0xff]  ;;  %v18489_v38 = vld [vmem:[#allocation73_spill] sm:$0xff]  ;;  %v18490_v21 = vld [vmem:[#allocation8_spill] sm:$0xff] }
0x2f88   :  { %8921 = vmatpush3.msra.mxu1 %v9869_v13  ;;  %v2970_v51 = vsel %vm736_vm13, %v2969_v20, %v2963_v5  ;;  %v6971_v57 = vadd.f32 %v6969_v2, %v6965_v56  ;;  %v18486_v5 = vld [vmem:[#allocation67_spill] sm:$0xff]  ;;  %v18491_v47 = vld [vmem:[#allocation9_spill] sm:$0xff]  ;;  %v18492_v46 = vld [vmem:[#allocation10_spill] sm:$0xff] }
0x2f89   :  { %v5599_v24 = vrot.slane %v5592_v3, %v16930_v54  ;;  %8922 = vmatprep.subr.mxu1 %v9870_v35  ;;  %v16948_v55 = vpop.permute.xlu0 %2966 }
0x2f8a   :  { %8923 = vmatpush3.msra.mxu1 %v9871_v62  ;;  %v16955_v27 = vsel %vm740_vm15, %v2970_v51, %v16948_v55 }
0x2f8b   :  { %8924 = vmatprep.subr.mxu1 %v9872_v59  ;;  %v2973_v42 = vcombine.low %v16955_v27, %v16948_v55  ;;  %5600 = vrot.lane.b32.xlu0 %v5599_v24, %s9896_s4 }
0x2f8c   :  { %8925 = vmatpush3.msra.mxu1 %v9873_v23 }
0x2f8d   :  { %8926 = vmatprep.subr.mxu1 %v16152_v60  ;;  %v6464_v29 = vpop.permute.xlu0 %6463 }
0x2f8e   :  { %8927 = vmatpush3.msra.mxu1 %v16161_v0  ;;  %v6468_v44 = vsel %vm740_vm15, %v6467_v43, %v6464_v29  ;;  %v18474_v0 = vld [vmem:[#allocation57_spill] sm:$0xff] }
0x2f8f   :  { %8928 = vmatprep.subr.mxu1 %v16168_v61  ;;  %v6470_v37 = vcombine.low %v6468_v44, %v6464_v29  ;;  %v18475_v61 = vld [vmem:[#allocation20_spill] sm:$0xff] }
0x2f90   :  { %8929 = vmatpush3.msra.mxu1 %v16174_v6  ;;  %v18476_v6 = vld [vmem:[#allocation24_spill] sm:$0xff] }
0x2f91   :  { %v6477_v49 = vrot.slane %v6470_v37, %v16930_v54  ;;  %8930 = vmatprep.subr.mxu1 %v16180_v63  ;;  %v16977_v8 = vpop.permute.xlu0 %3847  ;;  %v4717_v63 = vsel %vm289_vm5, %v18476_v6, %v18475_v61  ;;  %v3844_v6 = vpop.permute.xlu1 %3843 }
0x2f92   :  { %8931 = vmatpush3.msra.mxu1 %v16186_v48  ;;  %v18478_v48 = vld [vmem:[#allocation75_spill] sm:$0xff] }
0x2f93   :  { %8932 = vmatprep.subr.mxu1 %v16192_v52  ;;  %6478 = vrot.lane.b32.xlu0 %v6477_v49, %s9902_s28  ;;  %v4718_v52 = vsel %vm736_vm13, %v4717_v63, %v18478_v48  ;;  %v18497_v63 = vld [vmem:[#allocation59_spill] sm:$0xff]  ;;  %v18499_v48 = vld [vmem:[#allocation70_spill] sm:$0xff] }
0x2f94   :  { %8933 = vmatpush3.msra.mxu1 %v16198_v10 }
0x2f95   :  { %8934 = vmatprep.subr.mxu1 %v16204_v15  ;;  %v16984_v60 = vpop.permute.xlu0 %1217  ;;  %v18480_v15 = vld [vmem:[#allocation63_spill] sm:$0xff] }
0x2f96   :  { %8935 = vmatpush3.msra.mxu1 %v16210_v14 }
0x2f97   :  { %8936 = vmatprep.subr.mxu1 %v18474_v0 }
0x2f98   :  { %8937 = vmatpush3.msra.mxu1 %v18477_v34  ;;  %v18498_v34 = vld [vmem:[#allocation142_spill] sm:$0xff] }
0x2f99   :  { %8938 = vmatprep.subr.mxu1 %v18479_v12  ;;  %v4715_v10 = vpop.permute.xlu0 %4714 }
0x2f9a   :  { %8939 = vmatpush3.msra.mxu1 %v18480_v15  ;;  %v4719_v14 = vsel %vm740_vm15, %v4718_v52, %v4715_v10  ;;  %v3850_v52 = vsel %vm289_vm5, %v18499_v48, %v18498_v34 }
0x2f9b   :  { %8940 = vmatprep.subr.mxu1 %v18481_v19  ;;  %v4721_v36 = vcombine.low %v4719_v14, %v4715_v10  ;;  %v3851_v12 = vsel %vm736_vm13, %v3850_v52, %v3844_v6  ;;  %v2980_v10 = vrot.slane %v2973_v42, %v16930_v54  ;;  %v18500_v42 = vld [vmem:[#allocation16_spill] sm:$0xff] }
0x2f9c   :  { %8941 = vmatpush3.msra.mxu1 %v18484_v53 }
0x2f9d   :  { %v4728_v26 = vrot.slane %v4721_v36, %v16930_v54  ;;  %8942 = vmatprep.subr.mxu1 %v18485_v58 }
0x2f9e   :  { %8943 = vmatpush3.msra.mxu1 %v18486_v5 }
0x2f9f   :  { %4730 = vst.msk [vmem:[#allocation4 + $0xa] sm:$0xf] %vm16998_vm4, %v4728_v26  ;;  %8944 = vmatprep.subr.mxu1 %v18487_v41 }
0x2fa0   :  { %8945 = vmatpush3.msra.mxu1 %v18488_v22 }
0x2fa1   :  { %8946 = vmatprep.subr.mxu1 %v18489_v38 }
0x2fa2   :  { %8947 = vmatpush3.msra.mxu1 %v18490_v21 }
0x2fa3   :  { %8948 = vmatprep.subr.mxu1 %v18491_v47 }
0x2fa4   :  { %8949 = vmatpush3.msra.mxu1 %v18492_v46 }
0x2fa5   :  { %7318 = vmatmul.mubr.f32.vlgmr.msra.gmra.mxu1 %v6971_v57 }
0x2ffd   :  { %v5601_v32 = vpop.permute.xlu0 %5600 }
0x2ffe   :  { %v5602_v39 = vrot.slane %v5601_v32, 6 }
0x3000   :  { %v5603_v1 = vsel %vm289_vm5, %v5602_v39, %v5601_v32 }
0x3001   :  { %5605 = vst.msk [vmem:[#allocation4 + $0xc] sm:$0xf] %vm17014_vm8, %v5603_v1 }
0x3005   :  { %v6479_v3 = vpop.permute.xlu0 %6478 }
0x3006   :  { %v6480_v2 = vrot.slane %v6479_v3, 6 }
0x3008   :  { %v6481_v30 = vsel %vm734_vm12, %v6480_v2, %v6479_v3 }
0x3009   :  { %6483 = vst.msk [vmem:[#allocation4 + $0xe] sm:$0xf] %vm17021_vm11, %v6481_v30 }
0x301d   :  { %v8810_v18 = vpop.f32.mrf.mxu1 }
0x301f   :  { %v8811_v20 = vpop.f32.mrf.mxu1 }
0x3020   :  { %v8812_v62 = vadd.f32 %v8811_v20, %v8810_v18 }
0x3025   :  { %v8845_v13 = vpop.f32.mrf.mxu0 }
0x3027   :  { %v8846_v24 = vpop.f32.mrf.mxu0 }
0x3028   :  { %v8847_v57 = vadd.f32 %v8846_v24, %v8845_v13 }
0x302a   :  { %v7110_v31 = vadd.f32 %v8847_v57, %v8812_v62 }
0x3045   :  { %v8880_v51 = vpop.f32.mrf.mxu1  ;;  %v8915_v4 = vpop.f32.mrf.mxu0 }
0x3047   :  { %v8881_v35 = vpop.f32.mrf.mxu1  ;;  %v8916_v45 = vpop.f32.mrf.mxu0 }
0x3048   :  { %v8882_v59 = vadd.f32 %v8881_v35, %v8880_v51  ;;  %v8917_v43 = vadd.f32 %v8916_v45, %v8915_v4 }
0x304a   :  { %v7180_v40 = vadd.f32 %v8882_v59, %v7110_v31 }
0x304c   :  { %v7250_v44 = vadd.f32 %v8917_v43, %v7180_v40 }
0x3065   :  { %v8950_v23 = vpop.f32.mrf.mxu1 }
0x3067   :  { %v8951_v29 = vpop.f32.mrf.mxu1 }
0x3068   :  { %v8952_v37 = vadd.f32 %v8951_v29, %v8950_v23 }
0x306a   :  { %v7320_v49 = vadd.f32 %v8952_v37, %v7250_v44 }
0x306c   :  { %v7334_v0 = vadd.f32 %v16865_v50, %v7320_v49  ;;  %v7335_v61 = vadd.f32 %v7320_v49, %v11077_v25  ;;  %v2109_v50 = vrot.slane %v2102_v11, %v16930_v54  ;;  %v3852_v25 = vsel %vm740_vm15, %v3851_v12, %v16977_v8 }
0x306d   :  { %v3854_v15 = vcombine.low %v3852_v25, %v16977_v8  ;;  %v18501_v8 = vld [vmem:[#allocation7_spill] sm:$0xff] }
0x306e   :  { %7363 = vst.msk [vmem:[#allocation2] sm:$0x3] %vm51_vm1, %v7334_v0  ;;  %7337 = vrot.lane.b32.xlu1 %v7334_v0, %s9906_s20  ;;  %v1224_v36 = vsel %vm289_vm5, %v18501_v8, %v18500_v42  ;;  %vm3867_vm1 = vcmask 1042176  }
0x306f   :  { %v3861_v14 = vrot.slane %v3854_v15, %v16930_v54  ;;  %v1225_v53 = vsel %vm736_vm13, %v1224_v36, %v16984_v60 }
0x3072   :  { %7341 = vrot.lane.b32.xlu1 %v7335_v61, %s9906_s20 }
0x3076   :  { %1221 = vrot.lane.b32.xlu1 %v18497_v63, %s9906_s20 }
0x307a   :  { %2110 = vrot.lane.b32.xlu1 %v2109_v50, %s9896_s4  ;;  %s7375_s4 = sshll.u32 %s9908_s12, 4  ;;  %s7376_s4 = int_to_ptr.vmem [resolvable:$true] %s7375_s4 }
0x307b   :  { %p9879_p1 = scmp.lt.s32.totalorder %s7376_s4, %s7376_s4 }
0x307e   :  { %2981 = vrot.lane.b32.xlu1 %v2980_v10, %s9902_s28 }
0x3082   :  { %3862 = vrot.lane.b32.xlu1 %v3861_v14, %s9901_s27 }
0x3086   :  { %7364 = vrot.lane.b32.xlu1 %v7335_v61, %s9901_s27 }
0x30e0   :  { %v7338_v17 = vpop.permute.xlu1 %7337 }
0x30e1   :  { %v7345_v11 = vsel %vm736_vm13, %v7344_v9, %v7338_v17  ;;  %vm3868_vm13 = vcmask 1043458  }
0x30e4   :  { %v7342_v19 = vpop.permute.xlu1 %7341 }
0x30e5   :  { %v7346_v55 = vsel %vm740_vm15, %v7345_v11, %v7342_v19 }
0x30e6   :  { %v7348_v27 = vcombine.low %v7346_v55, %v7342_v19 }
0x30e8   :  { %v7355_v26 = vrot.slane %v7348_v27, %v16930_v54  ;;  %v1222_v58 = vpop.permute.xlu1 %1221 }
0x30e9   :  { %v1226_v5 = vsel %vm740_vm15, %v1225_v53, %v1222_v58  ;;  %vm3869_vm15 = vmor %vm3868_vm13, %vm3867_vm1 }
0x30ea   :  { %v1228_v41 = vcombine.low %v1226_v5, %v1222_v58  ;;  %7356 = vrot.lane.b32.xlu0 %v7355_v26, %s9901_s27  ;;  %s9874_s27 = scalar_lea.vmem %s7376_s4, 320 }
0x30eb   :  { %p9875_p0 = scmp.ne.s32.totalorder %s7376_s4, %s9874_s27  ;;  %p9880_p2 = scmp.lt.s32.totalorder %s9874_s27, %s9874_s27 }
0x30ec   :  { %v1235_v28 = vrot.slane %v1228_v41, %v16930_v54  ;;  %v2111_v7 = vpop.permute.xlu1 %2110 }
0x30ed   :  { %v2112_v22 = vrot.slane %v2111_v7, 6  ;;  %p9881_p3 = por %p9880_p2, %p9879_p1 }
0x30ee   :  { %1240 = vst.msk [vmem:[#allocation4] sm:$0xf] %vm16998_vm4, %v1235_v28 }
0x30ef   :  { %v2113_v38 = vsel %vm289_vm5, %v2112_v22, %v2111_v7  ;;  %p9882_p4 = pnand %p9881_p3, %p9875_p0 }
0x30f0   :  { %2118 = vst.msk [vmem:[#allocation4 + $0x2] sm:$0xf] %vm17014_vm8, %v2113_v38  ;;  %v2982_v60 = vpop.permute.xlu1 %2981 }
0x30f1   :  { %v2983_v21 = vrot.slane %v2982_v60, 6 }
0x30f3   :  { %v2984_v47 = vsel %vm734_vm12, %v2983_v21, %v2982_v60 }
0x30f4   :  { %2989 = vst.msk [vmem:[#allocation4 + $0x4] sm:$0xf] %vm17021_vm11, %v2984_v47  ;;  %v3863_v54 = vpop.permute.xlu1 %3862 }
0x30f5   :  { %v3864_v46 = vrot.slane %v3863_v54, 6 }
0x30f7   :  { %v3865_v33 = vsel %vm738_vm14, %v3864_v46, %v3863_v54 }
0x30f8   :  { %3870 = vst.msk [vmem:[#allocation4 + $0x6] sm:$0xf] %vm3869_vm15, %v3865_v33  ;;  %v7365_v32 = vpop.permute.xlu1 %7364 }
0x30f9   :  { %7368 = vst.msk [vmem:[#allocation3] sm:$0x3] %vm54_vm0, %v7365_v32 }
0x315c   :  { %v7357_v16 = vpop.permute.xlu0 %7356 }
0x315d   :  { %v7358_v39 = vrot.slane %v7357_v16, 6 }
0x315f   :  { %v7359_v1 = vsel %vm738_vm14, %v7358_v39, %v7357_v16 }
0x3160   :  { %7361 = vst.msk [vmem:[#allocation4 + $0x10] sm:$0xf] %vm3869_vm15, %v7359_v1 }
0x3161   :  { %9885 = shalt.err (!%p9882_p4)
}
0x3162   :  { %7378 = dma.vmem_to_hbm [thread:$0]  %s7376_s4, 320, %s17096_s13, [#allocation5]  }
0x3163   :  { %9894 = dma.done.wait [#allocation5], 320  }
0x3164   :  { %9895 = vsyncadd [#allocation5], 4294966976 }
0x3165   :  { %7382 = vsyncpa [#allocation5], 1 }

</bundles_post_ra>
